<compile_context>
chip_gen: v7x
topology: tpu7x:2x2x1
jax: 0.10.0
libtpu: 0.0.40
codegen_flags: <defaults>
</compile_context>

<pallas_src>
import math

import jax
import jax.numpy as jnp
from jax.experimental import pallas as pl
from jax.experimental.pallas import tpu as pltpu


# ---------------------------------------------------------------------------
# Fused Pallas kernel: conv1 -> bn1 -> relu -> conv2 -> bn2 -> relu -> avgpool
# ---------------------------------------------------------------------------

def _convblock_kernel(x_ref, w1_ref, b1_ref, w2_ref, b2_ref, o_ref,
                      xpad_ref, col1_ref, y1pad_ref, col2_ref, vp_ref):
    # x_ref:    (H, W, Cin)      bf16 unpadded NHWC input (one batch element)
    # w1_ref:   (9*Cin, C)       bf16 conv1 weights, BN1 scale folded in
    # b1_ref:   (1, C)           f32 folded BN1 bias
    # w2_ref:   (9*C, C)         bf16 conv2 weights, BN2 scale folded in
    # b2_ref:   (1, C)           f32 folded BN2 bias
    # o_ref:    (Ho*Wo, C)       f32 pooled output
    # scratch:
    #   xpad_ref:  (H+2, W+2, Cin) bf16   zero-padded input halo buffer
    #   col1_ref:  (H*W, 9*Cin)    bf16   conv1 im2col tile
    #   y1pad_ref: (H+2, W+2, C)   bf16   zero-padded conv1 activation
    #   col2_ref:  (H*W, 9*C)      bf16   conv2 im2col tile
    #   vp_ref:    (Ho*W, C)       f32    row-pair sums for pooling
    H, W, Cin = x_ref.shape
    C = w1_ref.shape[1]
    Ho, Wo = H // 2, W // 2

    # ---- stage input into a zero-padded bf16 halo buffer -------------------
    # Only the 1-pixel border is zeroed each step; the interior is overwritten.
    xpad_ref[0:1, :, :] = jnp.zeros((1, W + 2, Cin), jnp.bfloat16)
    xpad_ref[H + 1:H + 2, :, :] = jnp.zeros((1, W + 2, Cin), jnp.bfloat16)
    xpad_ref[1:H + 1, 0:1, :] = jnp.zeros((H, 1, Cin), jnp.bfloat16)
    xpad_ref[1:H + 1, W + 1:W + 2, :] = jnp.zeros((H, 1, Cin), jnp.bfloat16)
    xpad_ref[1:H + 1, 1:W + 1, :] = x_ref[...]

    # ---- conv1: im2col (K = 9*Cin) + single MXU matmul + bias + ReLU --------
    for kh in range(3):
        for kw in range(3):
            t = kh * 3 + kw
            col1_ref[:, t * Cin:(t + 1) * Cin] = (
                xpad_ref[kh:kh + H, kw:kw + W, :].reshape(H * W, Cin))
    acc1 = jnp.dot(col1_ref[...], w1_ref[...],
                   preferred_element_type=jnp.float32)               # (H*W, C)
    y1 = jnp.maximum(acc1 + b1_ref[...], 0.0).astype(jnp.bfloat16)   # bf16 once

    # ---- stage y1 into a zero-padded bf16 halo buffer for conv2 -------------
    y1pad_ref[0:1, :, :] = jnp.zeros((1, W + 2, C), jnp.bfloat16)
    y1pad_ref[H + 1:H + 2, :, :] = jnp.zeros((1, W + 2, C), jnp.bfloat16)
    y1pad_ref[1:H + 1, 0:1, :] = jnp.zeros((H, 1, C), jnp.bfloat16)
    y1pad_ref[1:H + 1, W + 1:W + 2, :] = jnp.zeros((H, 1, C), jnp.bfloat16)
    y1pad_ref[1:H + 1, 1:W + 1, :] = y1.reshape(H, W, C)

    # ---- conv2: im2col (K = 9*C) + single MXU matmul + bias + ReLU ----------
    for kh in range(3):
        for kw in range(3):
            t = kh * 3 + kw
            col2_ref[:, t * C:(t + 1) * C] = (
                y1pad_ref[kh:kh + H, kw:kw + W, :].reshape(H * W, C))
    acc2 = jnp.dot(col2_ref[...], w2_ref[...],
                   preferred_element_type=jnp.float32)               # (H*W, C)
    y2 = jnp.maximum(acc2 + b2_ref[...], 0.0)                        # f32

    # ---- 2x2 average pooling on the VPU (no pooling matmul) -----------------
    # Vertical pairs: expose image rows (2ho, 2ho+1) as two contiguous
    # sublane slabs and add them.
    y2r = y2.reshape(Ho, 2 * W, C)                    # [ho, (i%2)*W + j, c]
    vsum = y2r[:, 0:W, :] + y2r[:, W:2 * W, :]        # (Ho, W, C)
    vp_ref[...] = vsum.reshape(Ho * W, C)
    # Horizontal pairs: stride-2 sublane reads pick columns 2wo and 2wo+1.
    o_ref[...] = (vp_ref[pl.ds(0, Ho * Wo, stride=2), :] +
                  vp_ref[pl.ds(1, Ho * Wo, stride=2), :]) * 0.25


def convblock_mix_forward(x, params, pool_size=(2, 2), pool_type="avg"):
    """x: (B, Cin, H, W) NCHW (PyTorch layout). Returns (B, Cout, H//2, W//2)."""
    if pool_type != "avg":
        # TODO(synk): 'max' pooling path not implemented (module default is 'avg').
        raise NotImplementedError("only pool_type='avg' is implemented")
    if tuple(pool_size) != (2, 2):
        # TODO(synk): general pool sizes not implemented (module default is (2, 2)).
        raise NotImplementedError("only pool_size=(2, 2) is implemented")

    B, Cin, H, W = x.shape
    C = params["w1_mat"].shape[-1]
    Ho, Wo = H // 2, W // 2

    # NHWC + bf16 cast (single fused XLA transpose+convert; no padded f32 copy).
    x_nhwc = jnp.transpose(x, (0, 2, 3, 1)).astype(jnp.bfloat16)

    flops = 2 * B * H * W * C * 9 * (Cin + C)
    bytes_accessed = (B * H * W * Cin * 2            # bf16 input
                      + (9 * Cin * C + 9 * C * C) * 2  # bf16 weights
                      + 2 * C * 4                    # biases
                      + B * Ho * Wo * C * 4)         # f32 output

    out_flat = pl.pallas_call(
        _convblock_kernel,
        out_shape=jax.ShapeDtypeStruct((B, Ho * Wo, C), jnp.float32),
        grid=(B,),
        in_specs=[
            pl.BlockSpec((None, H, W, Cin), lambda b: (b, 0, 0, 0)),
            pl.BlockSpec((9 * Cin, C), lambda b: (0, 0)),
            pl.BlockSpec((1, C), lambda b: (0, 0)),
            pl.BlockSpec((9 * C, C), lambda b: (0, 0)),
            pl.BlockSpec((1, C), lambda b: (0, 0)),
        ],
        out_specs=pl.BlockSpec((None, Ho * Wo, C), lambda b: (b, 0, 0)),
        scratch_shapes=[
            pltpu.VMEM((H + 2, W + 2, Cin), jnp.bfloat16),   # padded input
            pltpu.VMEM((H * W, 9 * Cin), jnp.bfloat16),      # conv1 im2col
            pltpu.VMEM((H + 2, W + 2, C), jnp.bfloat16),     # padded y1
            pltpu.VMEM((H * W, 9 * C), jnp.bfloat16),        # conv2 im2col
            pltpu.VMEM((Ho * W, C), jnp.float32),            # pooling rows
        ],
        compiler_params=pltpu.CompilerParams(
            dimension_semantics=("parallel",)),
        cost_estimate=pl.CostEstimate(flops=flops, transcendentals=0,
                                      bytes_accessed=bytes_accessed),
    )(x_nhwc, params["w1_mat"], params["b1"], params["w2_mat"], params["b2"])

    out = out_flat.reshape(B, Ho, Wo, C)
    return jnp.transpose(out, (0, 3, 1, 2))                   # back to NCHW


# ---------------------------------------------------------------------------
# Parameter construction (mirrors ConvBlock_mix.init_weights) + packing
# ---------------------------------------------------------------------------

def init_module_weights(key, in_channels, out_channels):
    """Raw weights matching init_layer (kaiming_uniform) + init_bn."""
    k1, k2 = jax.random.split(key)
    fan1 = in_channels * 9
    b1 = math.sqrt(2.0) * math.sqrt(3.0 / fan1)      # gain(leaky_relu,a=0)=sqrt(2)
    w1 = jax.random.uniform(k1, (out_channels, in_channels, 3, 3),
                            jnp.float32, -b1, b1)
    fan2 = out_channels * 9
    b2 = math.sqrt(2.0) * math.sqrt(3.0 / fan2)
    w2 = jax.random.uniform(k2, (out_channels, out_channels, 3, 3),
                            jnp.float32, -b2, b2)
    ones = jnp.ones((out_channels,), jnp.float32)
    zeros = jnp.zeros((out_channels,), jnp.float32)
    return dict(w1=w1, w2=w2,
                g1=ones, be1=zeros, m1=zeros, v1=ones,    # init_bn(bn1)
                g2=ones, be2=zeros, m2=zeros, v2=ones)    # init_bn(bn2)


def fold_and_pack(raw, eps=1e-5):
    """Fold eval-mode BN scale into bf16 (9*Cin, Cout) weight matrices + f32 bias."""
    def fold(g, be, m, v):
        scale = g / jnp.sqrt(v + eps)
        bias = be - m * scale
        return scale, bias

    def to_mat(w, scale):   # (Cout, Cin, 3, 3) -> (9*Cin, Cout), row = t*Cin + ci
        co, ci, kh, kw = w.shape
        w = w * scale[:, None, None, None]
        w = jnp.transpose(w, (2, 3, 1, 0)).reshape(kh * kw * ci, co)
        return w.astype(jnp.bfloat16)

    s1, b1 = fold(raw["g1"], raw["be1"], raw["m1"], raw["v1"])
    s2, b2 = fold(raw["g2"], raw["be2"], raw["m2"], raw["v2"])
    return dict(w1_mat=to_mat(raw["w1"], s1), b1=b1.reshape(1, -1),
                w2_mat=to_mat(raw["w2"], s2), b2=b2.reshape(1, -1))


# ---------------------------------------------------------------------------
# Pure-JAX reference (for a tolerance check against the Pallas kernel)
# ---------------------------------------------------------------------------

def reference_forward(x, raw, pool_size=(2, 2), eps=1e-5):
    def conv(a, w):
        return jax.lax.conv_general_dilated(
            a, w, (1, 1), ((1, 1), (1, 1)),
            dimension_numbers=("NCHW", "OIHW", "NCHW"),
            precision=jax.lax.Precision.HIGHEST)

    def bn(a, g, be, m, v):
        sc = (g / jnp.sqrt(v + eps))[None, :, None, None]
        return (a - m[None, :, None, None]) * sc + be[None, :, None, None]

    h = jax.nn.relu(bn(conv(x, raw["w1"]), raw["g1"], raw["be1"], raw["m1"], raw["v1"]))
    h = jax.nn.relu(bn(conv(h, raw["w2"]), raw["g2"], raw["be2"], raw["m2"], raw["v2"]))
    B, C, H, W = h.shape
    ph, pw = pool_size
    h = h[:, :, :H // ph * ph, :W // pw * pw]
    return h.reshape(B, C, H // ph, ph, W // pw, pw).mean(axis=(3, 5))


# ---------------------------------------------------------------------------

if __name__ == "__main__":
    key = jax.random.PRNGKey(0)
    kp, kx, kb = jax.random.split(key, 3)

    B, Cin, Cout, H, W = 2, 4, 64, 16, 16
    raw = init_module_weights(kp, Cin, Cout)

    # Use mildly perturbed eval-mode BN statistics so the folded-BN path is
    # actually exercised (module init would make BN the identity).
    kb1, kb2, kb3, kb4, kb5, kb6, kb7, kb8 = jax.random.split(kb, 8)
    raw.update(
        g1=1.0 + 0.1 * jax.random.normal(kb1, (Cout,), jnp.float32),
        be1=0.1 * jax.random.normal(kb2, (Cout,), jnp.float32),
        m1=0.1 * jax.random.normal(kb3, (Cout,), jnp.float32),
        v1=1.0 + 0.2 * jax.random.uniform(kb4, (Cout,), jnp.float32),
        g2=1.0 + 0.1 * jax.random.normal(kb5, (Cout,), jnp.float32),
        be2=0.1 * jax.random.normal(kb6, (Cout,), jnp.float32),
        m2=0.1 * jax.random.normal(kb7, (Cout,), jnp.float32),
        v2=1.0 + 0.2 * jax.random.uniform(kb8, (Cout,), jnp.float32),
    )
    params = fold_and_pack(raw)
    x = jax.random.normal(kx, (B, Cin, H, W), jnp.float32)

    y = jax.block_until_ready(convblock_mix_forward(x, params))
    assert y.shape == (B, Cout, H // 2, W // 2), y.shape
    assert bool(jnp.all(jnp.isfinite(y)))

    # Tolerance check vs. pure-JAX f32 reference (kernel matmuls use bf16 operands).
    y_ref = jax.block_until_ready(reference_forward(x, raw))
    max_err = float(jnp.max(jnp.abs(y - y_ref)))
    assert max_err < 6e-2, f"max abs err vs reference: {max_err}"

    print("KERNEL_OK")
</pallas_src>

<mosaic_0001>
module attributes {stable_mosaic.version = 11 : i64} {
  func.func @_convblock_kernel(%arg0: i32, %arg1: memref<1x16x16x4xbf16, #tpu.memory_space<vmem>>, %arg2: memref<36x64xbf16, #tpu.memory_space<vmem>>, %arg3: memref<1x64xf32, #tpu.memory_space<vmem>>, %arg4: memref<576x64xbf16, #tpu.memory_space<vmem>>, %arg5: memref<1x64xf32, #tpu.memory_space<vmem>>, %arg6: memref<1x64x64xf32, #tpu.memory_space<vmem>>, %arg7: memref<18x18x4xbf16, #tpu.memory_space<vmem>>, %arg8: memref<256x36xbf16, #tpu.memory_space<vmem>>, %arg9: memref<18x18x64xbf16, #tpu.memory_space<vmem>>, %arg10: memref<256x576xbf16, #tpu.memory_space<vmem>>, %arg11: memref<128x64xf32, #tpu.memory_space<vmem>>) attributes {dimension_semantics = [#tpu.dimension_semantics<parallel>], iteration_bounds = array<i64: 2>, scalar_prefetch = 0 : i64, scratch_operands = 5 : i64, tpu.core_type = #tpu.core_type<tc>, window_params = [{transform_indices = @transform_0, window_bounds = array<i64: 1, 16, 16, 4>}, {pipeline_mode = #tpu.pipeline_mode<synchronous>, transform_indices = @transform_1, window_bounds = array<i64: 36, 64>}, {pipeline_mode = #tpu.pipeline_mode<synchronous>, transform_indices = @transform_2, window_bounds = array<i64: 1, 64>}, {pipeline_mode = #tpu.pipeline_mode<synchronous>, transform_indices = @transform_3, window_bounds = array<i64: 576, 64>}, {pipeline_mode = #tpu.pipeline_mode<synchronous>, transform_indices = @transform_4, window_bounds = array<i64: 1, 64>}, {transform_indices = @transform_5, window_bounds = array<i64: 1, 64, 64>}]} {
    %cst = arith.constant 0.000000e+00 : bf16
    %0 = vector.broadcast %cst : bf16 to vector<1x18x4xbf16>
    %c0 = arith.constant 0 : index
    %c0_0 = arith.constant 0 : index
    %c0_1 = arith.constant 0 : index
    %1 = vector.load %arg7[%c0, %c0_0, %c0_1] : memref<18x18x4xbf16, #tpu.memory_space<vmem>>, vector<1x18x4xbf16>
    tpu.vector_store %arg7[%c0, %c0_0, %c0_1], %0 {strides = array<i32>} : memref<18x18x4xbf16, #tpu.memory_space<vmem>>, vector<1x18x4xbf16>,
    %cst_2 = arith.constant 0.000000e+00 : bf16
    %2 = vector.broadcast %cst_2 : bf16 to vector<1x18x4xbf16>
    %c17 = arith.constant 17 : index
    %c0_3 = arith.constant 0 : index
    %c0_4 = arith.constant 0 : index
    %3 = vector.load %arg7[%c17, %c0_3, %c0_4] : memref<18x18x4xbf16, #tpu.memory_space<vmem>>, vector<1x18x4xbf16>
    tpu.vector_store %arg7[%c17, %c0_3, %c0_4], %2 {strides = array<i32>} : memref<18x18x4xbf16, #tpu.memory_space<vmem>>, vector<1x18x4xbf16>,
    %cst_5 = arith.constant 0.000000e+00 : bf16
    %4 = vector.broadcast %cst_5 : bf16 to vector<16x1x4xbf16>
    %c1 = arith.constant 1 : index
    %c0_6 = arith.constant 0 : index
    %c0_7 = arith.constant 0 : index
    %5 = vector.load %arg7[%c1, %c0_6, %c0_7] : memref<18x18x4xbf16, #tpu.memory_space<vmem>>, vector<16x1x4xbf16>
    tpu.vector_store %arg7[%c1, %c0_6, %c0_7], %4 {strides = array<i32>} : memref<18x18x4xbf16, #tpu.memory_space<vmem>>, vector<16x1x4xbf16>,
    %cst_8 = arith.constant 0.000000e+00 : bf16
    %6 = vector.broadcast %cst_8 : bf16 to vector<16x1x4xbf16>
    %c1_9 = arith.constant 1 : index
    %c17_10 = arith.constant 17 : index
    %c0_11 = arith.constant 0 : index
    %7 = vector.load %arg7[%c1_9, %c17_10, %c0_11] : memref<18x18x4xbf16, #tpu.memory_space<vmem>>, vector<16x1x4xbf16>
    tpu.vector_store %arg7[%c1_9, %c17_10, %c0_11], %6 {strides = array<i32>} : memref<18x18x4xbf16, #tpu.memory_space<vmem>>, vector<16x1x4xbf16>,
    %c0_12 = arith.constant 0 : index
    %c0_13 = arith.constant 0 : index
    %c0_14 = arith.constant 0 : index
    %c0_15 = arith.constant 0 : index
    %8 = vector.load %arg1[%c0_12, %c0_13, %c0_14, %c0_15] : memref<1x16x16x4xbf16, #tpu.memory_space<vmem>>, vector<1x16x16x4xbf16>
    %9 = vector.shape_cast %8 : vector<1x16x16x4xbf16> to vector<16x16x4xbf16>
    %c1_16 = arith.constant 1 : index
    %c1_17 = arith.constant 1 : index
    %c0_18 = arith.constant 0 : index
    %10 = vector.load %arg7[%c1_16, %c1_17, %c0_18] : memref<18x18x4xbf16, #tpu.memory_space<vmem>>, vector<16x16x4xbf16>
    tpu.vector_store %arg7[%c1_16, %c1_17, %c0_18], %9 {strides = array<i32>} : memref<18x18x4xbf16, #tpu.memory_space<vmem>>, vector<16x16x4xbf16>,
    %c0_19 = arith.constant 0 : index
    %c0_20 = arith.constant 0 : index
    %c0_21 = arith.constant 0 : index
    %11 = vector.load %arg7[%c0_19, %c0_20, %c0_21] : memref<18x18x4xbf16, #tpu.memory_space<vmem>>, vector<16x16x4xbf16>
    %12 = vector.shape_cast %11 : vector<16x16x4xbf16> to vector<256x4xbf16>
    %c0_22 = arith.constant 0 : index
    %c0_23 = arith.constant 0 : index
    %13 = vector.load %arg8[%c0_22, %c0_23] : memref<256x36xbf16, #tpu.memory_space<vmem>>, vector<256x4xbf16>
    tpu.vector_store %arg8[%c0_22, %c0_23], %12 {strides = array<i32>} : memref<256x36xbf16, #tpu.memory_space<vmem>>, vector<256x4xbf16>,
    %c0_24 = arith.constant 0 : index
    %c1_25 = arith.constant 1 : index
    %c0_26 = arith.constant 0 : index
    %14 = vector.load %arg7[%c0_24, %c1_25, %c0_26] : memref<18x18x4xbf16, #tpu.memory_space<vmem>>, vector<16x16x4xbf16>
    %15 = vector.shape_cast %14 : vector<16x16x4xbf16> to vector<256x4xbf16>
    %c0_27 = arith.constant 0 : index
    %c4 = arith.constant 4 : index
    %16 = vector.load %arg8[%c0_27, %c4] : memref<256x36xbf16, #tpu.memory_space<vmem>>, vector<256x4xbf16>
    tpu.vector_store %arg8[%c0_27, %c4], %15 {strides = array<i32>} : memref<256x36xbf16, #tpu.memory_space<vmem>>, vector<256x4xbf16>,
    %c0_28 = arith.constant 0 : index
    %c2 = arith.constant 2 : index
    %c0_29 = arith.constant 0 : index
    %17 = vector.load %arg7[%c0_28, %c2, %c0_29] : memref<18x18x4xbf16, #tpu.memory_space<vmem>>, vector<16x16x4xbf16>
    %18 = vector.shape_cast %17 : vector<16x16x4xbf16> to vector<256x4xbf16>
    %c0_30 = arith.constant 0 : index
    %c8 = arith.constant 8 : index
    %19 = vector.load %arg8[%c0_30, %c8] : memref<256x36xbf16, #tpu.memory_space<vmem>>, vector<256x4xbf16>
    tpu.vector_store %arg8[%c0_30, %c8], %18 {strides = array<i32>} : memref<256x36xbf16, #tpu.memory_space<vmem>>, vector<256x4xbf16>,
    %c1_31 = arith.constant 1 : index
    %c0_32 = arith.constant 0 : index
    %c0_33 = arith.constant 0 : index
    %20 = vector.load %arg7[%c1_31, %c0_32, %c0_33] : memref<18x18x4xbf16, #tpu.memory_space<vmem>>, vector<16x16x4xbf16>
    %21 = vector.shape_cast %20 : vector<16x16x4xbf16> to vector<256x4xbf16>
    %c0_34 = arith.constant 0 : index
    %c12 = arith.constant 12 : index
    %22 = vector.load %arg8[%c0_34, %c12] : memref<256x36xbf16, #tpu.memory_space<vmem>>, vector<256x4xbf16>
    tpu.vector_store %arg8[%c0_34, %c12], %21 {strides = array<i32>} : memref<256x36xbf16, #tpu.memory_space<vmem>>, vector<256x4xbf16>,
    %c1_35 = arith.constant 1 : index
    %c1_36 = arith.constant 1 : index
    %c0_37 = arith.constant 0 : index
    %23 = vector.load %arg7[%c1_35, %c1_36, %c0_37] : memref<18x18x4xbf16, #tpu.memory_space<vmem>>, vector<16x16x4xbf16>
    %24 = vector.shape_cast %23 : vector<16x16x4xbf16> to vector<256x4xbf16>
    %c0_38 = arith.constant 0 : index
    %c16 = arith.constant 16 : index
    %25 = vector.load %arg8[%c0_38, %c16] : memref<256x36xbf16, #tpu.memory_space<vmem>>, vector<256x4xbf16>
    tpu.vector_store %arg8[%c0_38, %c16], %24 {strides = array<i32>} : memref<256x36xbf16, #tpu.memory_space<vmem>>, vector<256x4xbf16>,
    %c1_39 = arith.constant 1 : index
    %c2_40 = arith.constant 2 : index
    %c0_41 = arith.constant 0 : index
    %26 = vector.load %arg7[%c1_39, %c2_40, %c0_41] : memref<18x18x4xbf16, #tpu.memory_space<vmem>>, vector<16x16x4xbf16>
    %27 = vector.shape_cast %26 : vector<16x16x4xbf16> to vector<256x4xbf16>
    %c0_42 = arith.constant 0 : index
    %c20 = arith.constant 20 : index
    %28 = vector.load %arg8[%c0_42, %c20] : memref<256x36xbf16, #tpu.memory_space<vmem>>, vector<256x4xbf16>
    tpu.vector_store %arg8[%c0_42, %c20], %27 {strides = array<i32>} : memref<256x36xbf16, #tpu.memory_space<vmem>>, vector<256x4xbf16>,
    %c2_43 = arith.constant 2 : index
    %c0_44 = arith.constant 0 : index
    %c0_45 = arith.constant 0 : index
    %29 = vector.load %arg7[%c2_43, %c0_44, %c0_45] : memref<18x18x4xbf16, #tpu.memory_space<vmem>>, vector<16x16x4xbf16>
    %30 = vector.shape_cast %29 : vector<16x16x4xbf16> to vector<256x4xbf16>
    %c0_46 = arith.constant 0 : index
    %c24 = arith.constant 24 : index
    %31 = vector.load %arg8[%c0_46, %c24] : memref<256x36xbf16, #tpu.memory_space<vmem>>, vector<256x4xbf16>
    tpu.vector_store %arg8[%c0_46, %c24], %30 {strides = array<i32>} : memref<256x36xbf16, #tpu.memory_space<vmem>>, vector<256x4xbf16>,
    %c2_47 = arith.constant 2 : index
    %c1_48 = arith.constant 1 : index
    %c0_49 = arith.constant 0 : index
    %32 = vector.load %arg7[%c2_47, %c1_48, %c0_49] : memref<18x18x4xbf16, #tpu.memory_space<vmem>>, vector<16x16x4xbf16>
    %33 = vector.shape_cast %32 : vector<16x16x4xbf16> to vector<256x4xbf16>
    %c0_50 = arith.constant 0 : index
    %c28 = arith.constant 28 : index
    %34 = vector.load %arg8[%c0_50, %c28] : memref<256x36xbf16, #tpu.memory_space<vmem>>, vector<256x4xbf16>
    tpu.vector_store %arg8[%c0_50, %c28], %33 {strides = array<i32>} : memref<256x36xbf16, #tpu.memory_space<vmem>>, vector<256x4xbf16>,
    %c2_51 = arith.constant 2 : index
    %c2_52 = arith.constant 2 : index
    %c0_53 = arith.constant 0 : index
    %35 = vector.load %arg7[%c2_51, %c2_52, %c0_53] : memref<18x18x4xbf16, #tpu.memory_space<vmem>>, vector<16x16x4xbf16>
    %36 = vector.shape_cast %35 : vector<16x16x4xbf16> to vector<256x4xbf16>
    %c0_54 = arith.constant 0 : index
    %c32 = arith.constant 32 : index
    %37 = vector.load %arg8[%c0_54, %c32] : memref<256x36xbf16, #tpu.memory_space<vmem>>, vector<256x4xbf16>
    tpu.vector_store %arg8[%c0_54, %c32], %36 {strides = array<i32>} : memref<256x36xbf16, #tpu.memory_space<vmem>>, vector<256x4xbf16>,
    %c0_55 = arith.constant 0 : index
    %c0_56 = arith.constant 0 : index
    %38 = vector.load %arg8[%c0_55, %c0_56] : memref<256x36xbf16, #tpu.memory_space<vmem>>, vector<256x36xbf16>
    %c0_57 = arith.constant 0 : index
    %c0_58 = arith.constant 0 : index
    %39 = vector.load %arg2[%c0_57, %c0_58] : memref<36x64xbf16, #tpu.memory_space<vmem>>, vector<36x64xbf16>
    %cst_59 = arith.constant dense<0.000000e+00> : vector<256x64xf32>
    %40 = tpu.matmul %38, %39, %cst_59 {dimension_numbers = #tpu.dot_dimension_numbers<[1], [0], [0], [1], [0, 0, 1, 1], [], []>} : vector<256x36xbf16>, vector<36x64xbf16>, vector<256x64xf32> -> vector<256x64xf32>
    %c0_60 = arith.constant 0 : index
    %c0_61 = arith.constant 0 : index
    %41 = vector.load %arg3[%c0_60, %c0_61] : memref<1x64xf32, #tpu.memory_space<vmem>>, vector<1x64xf32>
    %42 = vector.broadcast %41 : vector<1x64xf32> to vector<256x64xf32>
    %43 = arith.addf %40, %42 : vector<256x64xf32>
    %cst_62 = arith.constant 0.000000e+00 : f32
    %44 = vector.broadcast %cst_62 : f32 to vector<256x64xf32>
    %45 = arith.maximumf %43, %44 : vector<256x64xf32>
    %46 = arith.truncf %45 : vector<256x64xf32> to vector<256x64xbf16>
    %cst_63 = arith.constant 0.000000e+00 : bf16
    %47 = vector.broadcast %cst_63 : bf16 to vector<1x18x64xbf16>
    %c0_64 = arith.constant 0 : index
    %c0_65 = arith.constant 0 : index
    %c0_66 = arith.constant 0 : index
    %48 = vector.load %arg9[%c0_64, %c0_65, %c0_66] : memref<18x18x64xbf16, #tpu.memory_space<vmem>>, vector<1x18x64xbf16>
    tpu.vector_store %arg9[%c0_64, %c0_65, %c0_66], %47 {strides = array<i32>} : memref<18x18x64xbf16, #tpu.memory_space<vmem>>, vector<1x18x64xbf16>,
    %cst_67 = arith.constant 0.000000e+00 : bf16
    %49 = vector.broadcast %cst_67 : bf16 to vector<1x18x64xbf16>
    %c17_68 = arith.constant 17 : index
    %c0_69 = arith.constant 0 : index
    %c0_70 = arith.constant 0 : index
    %50 = vector.load %arg9[%c17_68, %c0_69, %c0_70] : memref<18x18x64xbf16, #tpu.memory_space<vmem>>, vector<1x18x64xbf16>
    tpu.vector_store %arg9[%c17_68, %c0_69, %c0_70], %49 {strides = array<i32>} : memref<18x18x64xbf16, #tpu.memory_space<vmem>>, vector<1x18x64xbf16>,
    %cst_71 = arith.constant 0.000000e+00 : bf16
    %51 = vector.broadcast %cst_71 : bf16 to vector<16x1x64xbf16>
    %c1_72 = arith.constant 1 : index
    %c0_73 = arith.constant 0 : index
    %c0_74 = arith.constant 0 : index
    %52 = vector.load %arg9[%c1_72, %c0_73, %c0_74] : memref<18x18x64xbf16, #tpu.memory_space<vmem>>, vector<16x1x64xbf16>
    tpu.vector_store %arg9[%c1_72, %c0_73, %c0_74], %51 {strides = array<i32>} : memref<18x18x64xbf16, #tpu.memory_space<vmem>>, vector<16x1x64xbf16>,
    %cst_75 = arith.constant 0.000000e+00 : bf16
    %53 = vector.broadcast %cst_75 : bf16 to vector<16x1x64xbf16>
    %c1_76 = arith.constant 1 : index
    %c17_77 = arith.constant 17 : index
    %c0_78 = arith.constant 0 : index
    %54 = vector.load %arg9[%c1_76, %c17_77, %c0_78] : memref<18x18x64xbf16, #tpu.memory_space<vmem>>, vector<16x1x64xbf16>
    tpu.vector_store %arg9[%c1_76, %c17_77, %c0_78], %53 {strides = array<i32>} : memref<18x18x64xbf16, #tpu.memory_space<vmem>>, vector<16x1x64xbf16>,
    %55 = vector.shape_cast %46 : vector<256x64xbf16> to vector<16x16x64xbf16>
    %c1_79 = arith.constant 1 : index
    %c1_80 = arith.constant 1 : index
    %c0_81 = arith.constant 0 : index
    %56 = vector.load %arg9[%c1_79, %c1_80, %c0_81] : memref<18x18x64xbf16, #tpu.memory_space<vmem>>, vector<16x16x64xbf16>
    tpu.vector_store %arg9[%c1_79, %c1_80, %c0_81], %55 {strides = array<i32>} : memref<18x18x64xbf16, #tpu.memory_space<vmem>>, vector<16x16x64xbf16>,
    %c0_82 = arith.constant 0 : index
    %c0_83 = arith.constant 0 : index
    %c0_84 = arith.constant 0 : index
    %57 = vector.load %arg9[%c0_82, %c0_83, %c0_84] : memref<18x18x64xbf16, #tpu.memory_space<vmem>>, vector<16x16x64xbf16>
    %58 = vector.shape_cast %57 : vector<16x16x64xbf16> to vector<256x64xbf16>
    %c0_85 = arith.constant 0 : index
    %c0_86 = arith.constant 0 : index
    %59 = vector.load %arg10[%c0_85, %c0_86] : memref<256x576xbf16, #tpu.memory_space<vmem>>, vector<256x64xbf16>
    tpu.vector_store %arg10[%c0_85, %c0_86], %58 {strides = array<i32>} : memref<256x576xbf16, #tpu.memory_space<vmem>>, vector<256x64xbf16>,
    %c0_87 = arith.constant 0 : index
    %c1_88 = arith.constant 1 : index
    %c0_89 = arith.constant 0 : index
    %60 = vector.load %arg9[%c0_87, %c1_88, %c0_89] : memref<18x18x64xbf16, #tpu.memory_space<vmem>>, vector<16x16x64xbf16>
    %61 = vector.shape_cast %60 : vector<16x16x64xbf16> to vector<256x64xbf16>
    %c0_90 = arith.constant 0 : index
    %c64 = arith.constant 64 : index
    %62 = vector.load %arg10[%c0_90, %c64] : memref<256x576xbf16, #tpu.memory_space<vmem>>, vector<256x64xbf16>
    tpu.vector_store %arg10[%c0_90, %c64], %61 {strides = array<i32>} : memref<256x576xbf16, #tpu.memory_space<vmem>>, vector<256x64xbf16>,
    %c0_91 = arith.constant 0 : index
    %c2_92 = arith.constant 2 : index
    %c0_93 = arith.constant 0 : index
    %63 = vector.load %arg9[%c0_91, %c2_92, %c0_93] : memref<18x18x64xbf16, #tpu.memory_space<vmem>>, vector<16x16x64xbf16>
    %64 = vector.shape_cast %63 : vector<16x16x64xbf16> to vector<256x64xbf16>
    %c0_94 = arith.constant 0 : index
    %c128 = arith.constant 128 : index
    %65 = vector.load %arg10[%c0_94, %c128] : memref<256x576xbf16, #tpu.memory_space<vmem>>, vector<256x64xbf16>
    tpu.vector_store %arg10[%c0_94, %c128], %64 {strides = array<i32>} : memref<256x576xbf16, #tpu.memory_space<vmem>>, vector<256x64xbf16>,
    %c1_95 = arith.constant 1 : index
    %c0_96 = arith.constant 0 : index
    %c0_97 = arith.constant 0 : index
    %66 = vector.load %arg9[%c1_95, %c0_96, %c0_97] : memref<18x18x64xbf16, #tpu.memory_space<vmem>>, vector<16x16x64xbf16>
    %67 = vector.shape_cast %66 : vector<16x16x64xbf16> to vector<256x64xbf16>
    %c0_98 = arith.constant 0 : index
    %c192 = arith.constant 192 : index
    %68 = vector.load %arg10[%c0_98, %c192] : memref<256x576xbf16, #tpu.memory_space<vmem>>, vector<256x64xbf16>
    tpu.vector_store %arg10[%c0_98, %c192], %67 {strides = array<i32>} : memref<256x576xbf16, #tpu.memory_space<vmem>>, vector<256x64xbf16>,
    %c1_99 = arith.constant 1 : index
    %c1_100 = arith.constant 1 : index
    %c0_101 = arith.constant 0 : index
    %69 = vector.load %arg9[%c1_99, %c1_100, %c0_101] : memref<18x18x64xbf16, #tpu.memory_space<vmem>>, vector<16x16x64xbf16>
    %70 = vector.shape_cast %69 : vector<16x16x64xbf16> to vector<256x64xbf16>
    %c0_102 = arith.constant 0 : index
    %c256 = arith.constant 256 : index
    %71 = vector.load %arg10[%c0_102, %c256] : memref<256x576xbf16, #tpu.memory_space<vmem>>, vector<256x64xbf16>
    tpu.vector_store %arg10[%c0_102, %c256], %70 {strides = array<i32>} : memref<256x576xbf16, #tpu.memory_space<vmem>>, vector<256x64xbf16>,
    %c1_103 = arith.constant 1 : index
    %c2_104 = arith.constant 2 : index
    %c0_105 = arith.constant 0 : index
    %72 = vector.load %arg9[%c1_103, %c2_104, %c0_105] : memref<18x18x64xbf16, #tpu.memory_space<vmem>>, vector<16x16x64xbf16>
    %73 = vector.shape_cast %72 : vector<16x16x64xbf16> to vector<256x64xbf16>
    %c0_106 = arith.constant 0 : index
    %c320 = arith.constant 320 : index
    %74 = vector.load %arg10[%c0_106, %c320] : memref<256x576xbf16, #tpu.memory_space<vmem>>, vector<256x64xbf16>
    tpu.vector_store %arg10[%c0_106, %c320], %73 {strides = array<i32>} : memref<256x576xbf16, #tpu.memory_space<vmem>>, vector<256x64xbf16>,
    %c2_107 = arith.constant 2 : index
    %c0_108 = arith.constant 0 : index
    %c0_109 = arith.constant 0 : index
    %75 = vector.load %arg9[%c2_107, %c0_108, %c0_109] : memref<18x18x64xbf16, #tpu.memory_space<vmem>>, vector<16x16x64xbf16>
    %76 = vector.shape_cast %75 : vector<16x16x64xbf16> to vector<256x64xbf16>
    %c0_110 = arith.constant 0 : index
    %c384 = arith.constant 384 : index
    %77 = vector.load %arg10[%c0_110, %c384] : memref<256x576xbf16, #tpu.memory_space<vmem>>, vector<256x64xbf16>
    tpu.vector_store %arg10[%c0_110, %c384], %76 {strides = array<i32>} : memref<256x576xbf16, #tpu.memory_space<vmem>>, vector<256x64xbf16>,
    %c2_111 = arith.constant 2 : index
    %c1_112 = arith.constant 1 : index
    %c0_113 = arith.constant 0 : index
    %78 = vector.load %arg9[%c2_111, %c1_112, %c0_113] : memref<18x18x64xbf16, #tpu.memory_space<vmem>>, vector<16x16x64xbf16>
    %79 = vector.shape_cast %78 : vector<16x16x64xbf16> to vector<256x64xbf16>
    %c0_114 = arith.constant 0 : index
    %c448 = arith.constant 448 : index
    %80 = vector.load %arg10[%c0_114, %c448] : memref<256x576xbf16, #tpu.memory_space<vmem>>, vector<256x64xbf16>
    tpu.vector_store %arg10[%c0_114, %c448], %79 {strides = array<i32>} : memref<256x576xbf16, #tpu.memory_space<vmem>>, vector<256x64xbf16>,
    %c2_115 = arith.constant 2 : index
    %c2_116 = arith.constant 2 : index
    %c0_117 = arith.constant 0 : index
    %81 = vector.load %arg9[%c2_115, %c2_116, %c0_117] : memref<18x18x64xbf16, #tpu.memory_space<vmem>>, vector<16x16x64xbf16>
    %82 = vector.shape_cast %81 : vector<16x16x64xbf16> to vector<256x64xbf16>
    %c0_118 = arith.constant 0 : index
    %c512 = arith.constant 512 : index
    %83 = vector.load %arg10[%c0_118, %c512] : memref<256x576xbf16, #tpu.memory_space<vmem>>, vector<256x64xbf16>
    tpu.vector_store %arg10[%c0_118, %c512], %82 {strides = array<i32>} : memref<256x576xbf16, #tpu.memory_space<vmem>>, vector<256x64xbf16>,
    %c0_119 = arith.constant 0 : index
    %c0_120 = arith.constant 0 : index
    %84 = vector.load %arg10[%c0_119, %c0_120] : memref<256x576xbf16, #tpu.memory_space<vmem>>, vector<256x576xbf16>
    %c0_121 = arith.constant 0 : index
    %c0_122 = arith.constant 0 : index
    %85 = vector.load %arg4[%c0_121, %c0_122] : memref<576x64xbf16, #tpu.memory_space<vmem>>, vector<576x64xbf16>
    %cst_123 = arith.constant dense<0.000000e+00> : vector<256x64xf32>
    %86 = tpu.matmul %84, %85, %cst_123 {dimension_numbers = #tpu.dot_dimension_numbers<[1], [0], [0], [1], [0, 0, 1, 1], [], []>} : vector<256x576xbf16>, vector<576x64xbf16>, vector<256x64xf32> -> vector<256x64xf32>
    %c0_124 = arith.constant 0 : index
    %c0_125 = arith.constant 0 : index
    %87 = vector.load %arg5[%c0_124, %c0_125] : memref<1x64xf32, #tpu.memory_space<vmem>>, vector<1x64xf32>
    %88 = vector.broadcast %87 : vector<1x64xf32> to vector<256x64xf32>
    %89 = arith.addf %86, %88 : vector<256x64xf32>
    %cst_126 = arith.constant 0.000000e+00 : f32
    %90 = vector.broadcast %cst_126 : f32 to vector<256x64xf32>
    %91 = arith.maximumf %89, %90 : vector<256x64xf32>
    %92 = vector.shape_cast %91 : vector<256x64xf32> to vector<8x32x64xf32>
    %93 = vector.extract_strided_slice %92 {offsets = [0, 0, 0], sizes = [8, 16, 64], strides = [1, 1, 1]} : vector<8x32x64xf32> to vector<8x16x64xf32>
    %94 = vector.extract_strided_slice %92 {offsets = [0, 16, 0], sizes = [8, 16, 64], strides = [1, 1, 1]} : vector<8x32x64xf32> to vector<8x16x64xf32>
    %95 = arith.addf %93, %94 : vector<8x16x64xf32>
    %96 = vector.shape_cast %95 : vector<8x16x64xf32> to vector<128x64xf32>
    %c0_127 = arith.constant 0 : index
    %c0_128 = arith.constant 0 : index
    %97 = vector.load %arg11[%c0_127, %c0_128] : memref<128x64xf32, #tpu.memory_space<vmem>>, vector<128x64xf32>
    tpu.vector_store %arg11[%c0_127, %c0_128], %96 {strides = array<i32>} : memref<128x64xf32, #tpu.memory_space<vmem>>, vector<128x64xf32>,
    %c0_129 = arith.constant 0 : index
    %c0_130 = arith.constant 0 : index
    %98 = tpu.strided_load %arg11[%c0_129, %c0_130] {strides = array<i32: 2, 1>} : memref<128x64xf32, #tpu.memory_space<vmem>>, vector<64x64xf32>
    %c1_131 = arith.constant 1 : index
    %c0_132 = arith.constant 0 : index
    %99 = tpu.strided_load %arg11[%c1_131, %c0_132] {strides = array<i32: 2, 1>} : memref<128x64xf32, #tpu.memory_space<vmem>>, vector<64x64xf32>
    %100 = arith.addf %98, %99 : vector<64x64xf32>
    %cst_133 = arith.constant 2.500000e-01 : f32
    %101 = vector.broadcast %cst_133 : f32 to vector<64x64xf32>
    %102 = arith.mulf %100, %101 : vector<64x64xf32>
    %c0_134 = arith.constant 0 : index
    %c0_135 = arith.constant 0 : index
    %c0_136 = arith.constant 0 : index
    %103 = vector.load %arg6[%c0_134, %c0_135, %c0_136] : memref<1x64x64xf32, #tpu.memory_space<vmem>>, vector<1x64x64xf32>
    %104 = vector.shape_cast %103 : vector<1x64x64xf32> to vector<64x64xf32>
    %105 = vector.shape_cast %102 : vector<64x64xf32> to vector<1x64x64xf32>
    tpu.vector_store %arg6[%c0_134, %c0_135, %c0_136], %105 {strides = array<i32>} : memref<1x64x64xf32, #tpu.memory_space<vmem>>, vector<1x64x64xf32>,
    return
  }
  func.func @transform_0(%arg0: i32) -> (i32, i32, i32, i32) {
    %c0_i32 = arith.constant 0 : i32
    %c0_i32_0 = arith.constant 0 : i32
    %c0_i32_1 = arith.constant 0 : i32
    %c0_i32_2 = arith.constant 0 : i32
    return %arg0, %c0_i32, %c0_i32_0, %c0_i32_1 : i32, i32, i32, i32
  }
  func.func @transform_1(%arg0: i32) -> (i32, i32) {
    %c0_i32 = arith.constant 0 : i32
    %c0_i32_0 = arith.constant 0 : i32
    %c0_i32_1 = arith.constant 0 : i32
    return %c0_i32, %c0_i32_0 : i32, i32
  }
  func.func @transform_2(%arg0: i32) -> (i32, i32) {
    %c0_i32 = arith.constant 0 : i32
    %c0_i32_0 = arith.constant 0 : i32
    %c0_i32_1 = arith.constant 0 : i32
    return %c0_i32, %c0_i32_0 : i32, i32
  }
  func.func @transform_3(%arg0: i32) -> (i32, i32) {
    %c0_i32 = arith.constant 0 : i32
    %c0_i32_0 = arith.constant 0 : i32
    %c0_i32_1 = arith.constant 0 : i32
    return %c0_i32, %c0_i32_0 : i32, i32
  }
  func.func @transform_4(%arg0: i32) -> (i32, i32) {
    %c0_i32 = arith.constant 0 : i32
    %c0_i32_0 = arith.constant 0 : i32
    %c0_i32_1 = arith.constant 0 : i32
    return %c0_i32, %c0_i32_0 : i32, i32
  }
  func.func @transform_5(%arg0: i32) -> (i32, i32, i32) {
    %c0_i32 = arith.constant 0 : i32
    %c0_i32_0 = arith.constant 0 : i32
    %c0_i32_1 = arith.constant 0 : i32
    return %arg0, %c0_i32, %c0_i32_0 : i32, i32, i32
  }
}

</mosaic_0001>

<bundles_post_ra>
// kernel: tpu_custom_call.1
= control target key start
LH: loop header
LB: loop body
LE: loop exit
PB: predicated region body
PF: predicated region fallthrough
CT: control target
= control target key end

     0   :  { %10 = vsyncpa [#allocation8], 0  ;;  %s13370_s0 = inlined_call_operand.vmem [shape: bf16[2,16,16,4], index: 0, kind: input, shape index: {}]   ;;  %s13371_s1 = inlined_call_operand.vmem [shape: bf16[36,64], index: 1, kind: input, shape index: {}]   ;;  %s13372_s2 = inlined_call_operand.vmem [shape: f32[1,64], index: 2, kind: input, shape index: {}]   ;;  %s13373_s3 = inlined_call_operand.vmem [shape: bf16[576,64], index: 3, kind: input, shape index: {}]   ;;  %s13374_s4 = inlined_call_operand.vmem [shape: f32[1,64], index: 4, kind: input, shape index: {}]   ;;  %s13375_s5 = inlined_call_operand.hbm [shape: f32[2,64,64], index: 5, kind: output, shape index: {}]  }
   0x1   :  { %12 = vsyncpa [#allocation8 + $0x1], 0  ;;  %s10078_s18 = smov 0   ;;  %s10080_s19 = smov 0  }
   0x2   :  { %s10082_s20 = smov 0   ;;  %s10084_s21 = smov 0  }
   0x3 LB: > { %s10099_s22 = sadd.s32 4294967295, %s10034_s21   ;;  %s8899_s23 = sadd.s32 4294967294, %s10034_s21   ;;  %s10034_s21 = sphi %s10084_s21, %s13461_s21   ;;  %s10030_s20 = sphi %s10082_s20, %s13460_s20   ;;  %s10026_s19 = sphi %s10080_s19, %s13459_s19   ;;  %s10022_s18 = sphi %s10078_s18, %s13458_s18  }
   0x4   : > { %s10103_s24 = sadd.s32 1, %s10034_s21   ;;  %s135_s25 = sadd.s32 1, %s10030_s20 }
   0x5   : > { %s132_s26 = ssub.s32 %s10034_s21, %s10103_s24  ;;  %p145_p0 = scmp.ne.s32.totalorder %s10030_s20, %s10026_s19 }
   0x6   : > { %p133_p1 = scmp.eq.s32.totalorder %s132_s26, 0  ;;  %p146_p2 = scmp.eq.s32.totalorder %s10099_s22, 1 }
   0x7   : > { %p151_p3 = scmp.ne.s32.totalorder %s10026_s19, %s10022_s18  ;;  %p152_p4 = scmp.eq.s32.totalorder %s8899_s23, 1 }
   0x8   : > { %s10114_s27 = scalar_select %p133_p1, %s10030_s20, %s135_s25  }
   0x9   : > { %p10116_p5 = por %p146_p2, %p145_p0  ;;  %p10120_p6 = por %p152_p4, %p151_p3 }
   0xa   : > { %p8902_p7 = scmp.ge.s32.totalorder %s10034_s21, 1  ;;  %p190_p8 = scmp.lt.s32.totalorder %s10034_s21, 3 }
   0xc   : > { %p191_p9 = pnand %p8902_p7, %p190_p8 }
   0xd   : > { %vm224_vm0 = vcmask (!%p191_p9), 27648   ;;  %vm227_vm1 = vcmask (!%p191_p9), 24576   ;;  %vm13377_vm2 = vsmask.f32 (!%p191_p9), 256  ;;  %v10036_v0 = vmov (!%p191_p9), 0   ;;  %p218_p10 = scmp.lt.s32.totalorder (!%p191_p9), %s10099_s22, 1 }
   0xe   : > { %194 = sbr.rel (%p191_p9) target bundleno = 1219 (0x4c3), region = 40  ;;  %225 = vst.msk [vmem:[#allocation2] sm:$0xf] (!%p191_p9), %vm224_vm0, %v10036_v0  ;;  %226 = vst.msk [vmem:[#allocation2 + $0x4] sm:$0xf] (!%p191_p9), %vm224_vm0, %v10036_v0  ;;  %vm13376_vm5 = vcmask (!%p191_p9), 519168  }
   0xf   : > { %228 = vst.msk [vmem:[#allocation2 + $0x8] sm:$0x1] (!%p191_p9), %vm227_vm1, %v10036_v0  ;;  %vm10131_vm3 = vmand (!%p191_p9), %vm227_vm1, %vm13377_vm2  ;;  %vm13379_vm4 = vsmask.f32 (!%p191_p9), 7938  ;;  %vm13378_vm6 = vcmask (!%p191_p9), 516096   ;;  %vm1592_vm8 = vcmask (!%p191_p9), 1042432  }
  0x10   : > { %230 = vst.msk [vmem:[#allocation2 + $0xcc] sm:$0xf] (!%p191_p9), %vm224_vm0, %v10036_v0  ;;  %231 = vst.msk [vmem:[#allocation2 + $0xd0] sm:$0xf] (!%p191_p9), %vm224_vm0, %v10036_v0  ;;  %vm1593_vm9 = vcmask (!%p191_p9), 1046532   ;;  %s10037_s10 = smov (!%p191_p9), 8  }
  0x11   : > { %232 = vst.msk [vmem:[#allocation2 + $0xd4] sm:$0x1] (!%p191_p9), %vm227_vm1, %v10036_v0  ;;  %vm10145_vm7 = vmand (!%p191_p9), %vm227_vm1, %vm13379_vm4  ;;  %v240_v3 = vld [vmem:[#allocation2 + $0x18] sm:$0x1] (!%p191_p9)  ;;  %v237_v5 = vld [vmem:[#allocation2 + $0xc] sm:$0x1] (!%p191_p9) }
  0x12   : > { %4213 = vst.msk [vmem:[#allocation4] sm:$0xf] (!%p191_p9), %vm13376_vm5, %v10036_v0  ;;  %4214 = vst.msk [vmem:[#allocation4 + $0x4] sm:$0xf] (!%p191_p9), %vm13376_vm5, %v10036_v0  ;;  %v241_v4 = vsel (!%p191_p9), %vm10131_vm3, 0, %v240_v3  ;;  %v238_v7 = vsel (!%p191_p9), %vm10131_vm3, 0, %v237_v5 }
  0x13   : > { %4218 = vst.msk [vmem:[#allocation4 + $0xcc] sm:$0xf] (!%p191_p9), %vm13376_vm5, %v10036_v0  ;;  %4219 = vst.msk [vmem:[#allocation4 + $0xd0] sm:$0xf] (!%p191_p9), %vm13376_vm5, %v10036_v0  ;;  %v243_v6 = vld [vmem:[#allocation2 + $0x24] sm:$0x1] (!%p191_p9) }
  0x14   : > { %4216 = vst.msk [vmem:[#allocation4 + $0x8] sm:$0x1] (!%p191_p9), %vm13378_vm6, %v10036_v0  ;;  %4220 = vst.msk [vmem:[#allocation4 + $0xd4] sm:$0x1] (!%p191_p9), %vm13378_vm6, %v10036_v0  ;;  %vm996_vm10 = vsmask.f32 (!%p191_p9), 3328 }
  0x15   : > { %s219_s30 = scalar_select %p218_p10, %s10099_s22, 1  ;;  %242 = vst [vmem:[#allocation2 + $0x18] sm:$0x1] %v241_v4  ;;  %v244_v8 = vsel %vm10131_vm3, 0, %v243_v6  ;;  %v287_v9 = vld [vmem:[#allocation2 + $0x14] sm:$0x1]  ;;  %vm10162_vm11 = vmor %vm1592_vm8, %vm1593_vm9 }
  0x16   : > { %239 = vst [vmem:[#allocation2 + $0xc] sm:$0x1] %v238_v7  ;;  %245 = vst [vmem:[#allocation2 + $0x24] sm:$0x1] %v244_v8  ;;  %v288_v10 = vsel %vm10145_vm7, 0, %v287_v9  ;;  %s10038_s11 = smov 4  }
  0x17   : > { %s9400_s6 = sshll.u32 %s219_s30, 7  ;;  %v290_v11 = vld [vmem:[#allocation2 + $0x20] sm:$0x1]  ;;  %v293_v12 = vld [vmem:[#allocation2 + $0x2c] sm:$0x1]  ;;  %vm10183_vm14 = vmand %vm224_vm0, %vm13379_vm4  ;;  %s10039_s12 = smov 12  }
  0x18   : > { %vm997_vm12 = vsmask.f32 7440  ;;  %vm367_vm13 = vsmask.f32 4368  ;;  %289 = vst [vmem:[#allocation2 + $0x14] sm:$0x1] %v288_v10  ;;  %s10173_s9 = scalar_lea.vmem %s13370_s0, %s9400_s6 }
  0x19   : > { %v291_v14 = vsel %vm10145_vm7, 0, %v290_v11  ;;  %v294_v15 = vsel %vm10145_vm7, 0, %v293_v12  ;;  %v1496_v16 = vld [vmem:[#allocation2] sm:$0xe]  ;;  %v1497_v17 = vld [vmem:[#allocation2 + $0x4] sm:$0xf]  ;;  %vm10191_vm15 = vmor %vm996_vm10, %vm997_vm12 }
  0x1a   : > { %v1498_v18 = vld [vmem:[#allocation2 + $0x8] sm:$0x1]  ;;  %292 = vst [vmem:[#allocation2 + $0x20] sm:$0x1] %v291_v14  ;;  %295 = vst [vmem:[#allocation2 + $0x2c] sm:$0x1] %v294_v15 }
  0x1b   : > { %v8938_v19 = vrot.slane %v1496_v16, 9  ;;  %v1597_v20 = vrot.slane %v1497_v17, 5  ;;  %v1600_v21 = vrot.slane %v1498_v18, 5  ;;  %v948_v22 = vld [vmem:[#allocation2] sm:$0xf]  ;;  %vm10201_vm1 = vmor %vm13377_vm2, %vm367_vm13  ;;  %s10040_s13 = smov 24  }
  0x1c   : > { %v949_v23 = vld [vmem:[#allocation2 + $0x4] sm:$0xf]  ;;  %v950_v24 = vld [vmem:[#allocation2 + $0x8] sm:$0x1]  ;;  %v1000_v25 = vshrl.u32 %v948_v22, 16  ;;  %v1003_v26 = vshll.u32 %v948_v22, 16 }
  0x1d   : > { %v1598_v27 = vsel %vm10162_vm11, %v8938_v19, %v1597_v20  ;;  %v1599_v28 = vrot.slane %v1597_v20, 4  ;;  %v1009_v29 = vshll.u32 %v949_v23, 16  ;;  %v1013_v30 = vshrl.u32 %v949_v23, 16  ;;  %v337_v31 = vld [vmem:[%s10173_s9 + $0x8] sm:$0xf]  ;;  %s10041_s14 = smov 20  }
  0x1e   : > { %v1002_v32 = vrot.slane %v1000_v25, 4  ;;  %v1005_v33 = vrot.slane %v1003_v26, 5  ;;  %v1019_v34 = vshll.u32 %v950_v24, 16  ;;  %v338_v35 = vld [vmem:[%s10173_s9 + $0xc] sm:$0xf]  ;;  %v387_v36 = vshrl.u32 %v337_v31, 16 }
  0x1f   : > { %v1601_v37 = vsel %vm10162_vm11, %v1599_v28, %v1600_v21  ;;  %v1011_v38 = vrot.slane %v1009_v29, 5  ;;  %v1015_v39 = vrot.slane %v1013_v30, 4  ;;  %v390_v40 = vshll.u32 %v337_v31, 16  ;;  %v335_v46 = vld [vmem:[%s10173_s9] sm:$0xf]  ;;  %s10042_s15 = smov 32  }
  0x20   : > { %v8954_v42 = vcombine.low %v1598_v27, %v1601_v37  ;;  %v1006_v43 = vor.u32 %v1005_v33, %v1002_v32  ;;  %v1021_v44 = vrot.slane %v1019_v34, 5  ;;  %v389_v45 = vrot.slane %v387_v36, 7  ;;  %v336_v47 = vld [vmem:[%s10173_s9 + $0x4] sm:$0xf]  ;;  %v698_v52 = vld [vmem:[#allocation2 + $0x18] sm:$0xf] }
  0x21   : > { %v1016_v49 = vor.u32 %v1015_v39, %v1011_v38  ;;  %v395_v50 = vshrl.u32 %v338_v35, 16  ;;  %v398_v51 = vshll.u32 %v338_v35, 16  ;;  %v370_v53 = vshrl.u32 %v335_v46, 16  ;;  %v339_v58 = vld [vmem:[%s10173_s9 + $0x10] sm:$0xf]  ;;  %s10043_s16 = smov 16  }
  0x22   : > { %1755 = vrot.lane.b32.xlu1 %v8954_v42, %s10037_s10  ;;  %v1007_v54 = vrot.slane %v1006_v43, 4  ;;  %v392_v55 = vor.u32 %v390_v40, %v389_v45  ;;  %v393_v56 = vrot.slane %v389_v45, 4  ;;  %v373_v57 = vshll.u32 %v335_v46, 16  ;;  %v691_v5 = vld [vmem:[#allocation2 + $0xc] sm:$0xf]  ;;  %s10044_s17 = smov 28  }
  0x23   : > { %v1017_v59 = vrot.slane %v1016_v49, 4  ;;  %v397_v60 = vrot.slane %v395_v50, 7  ;;  %v372_v61 = vrot.slane %v370_v53, 7  ;;  %v378_v62 = vshrl.u32 %v336_v47, 16  ;;  %v340_v6 = vld [vmem:[%s10173_s9 + $0x14] sm:$0xf] }
  0x24   : > { %v1012_v63 = vsel %vm10191_vm15, %v1007_v54, %v1011_v38  ;;  %v699_v3 = vsel %vm10183_vm14, %v392_v55, %v698_v52  ;;  %v381_v4 = vshll.u32 %v336_v47, 16  ;;  %v404_v7 = vshrl.u32 %v339_v58, 16  ;;  %v246_v12 = vld [vmem:[#allocation2 + $0x30] sm:$0x1]  ;;  %v705_v18 = vld [vmem:[#allocation2 + $0x24] sm:$0xf] }
  0x25   : > { %v1022_v8 = vsel %vm10191_vm15, %v1017_v59, %v1021_v44  ;;  %v400_v9 = vor.u32 %v398_v51, %v397_v60  ;;  %v402_v10 = vrot.slane %v397_v60, 4  ;;  %700 = vst [vmem:[#allocation2 + $0x18] sm:$0xf] %v699_v3  ;;  %v375_v11 = vor.u32 %v373_v57, %v372_v61  ;;  %v702_v19 = vld [vmem:[#allocation2 + $0x20] sm:$0x1]  ;;  %s10045_s8 = smov 64  }
  0x26   : > { %v8922_v14 = vcombine.low %v1012_v63, %v1022_v8  ;;  %v376_v15 = vrot.slane %v372_v61, 4  ;;  %v380_v16 = vrot.slane %v378_v62, 7  ;;  %v406_v17 = vrot.slane %v404_v7, 7  ;;  %v695_v24 = vld [vmem:[#allocation2 + $0x14] sm:$0x1]  ;;  %s215_s30 = sand.u32 1, %s10026_s19  }
  0x27   : > { %v401_v20 = vsel %vm10201_vm1, %v393_v56, %v400_v9  ;;  %v692_v21 = vsel %vm10183_vm14, %v375_v11, %v691_v5  ;;  %v407_v22 = vshll.u32 %v339_v58, 16  ;;  %v412_v23 = vshrl.u32 %v340_v6, 16  ;;  %v10215_v25 = vld [vmem:[%s10173_s9 + $0x18] sm:$0xf]  ;;  %v10220_v30 = vld [vmem:[%s10173_s9 + $0x1c] sm:$0xf] }
  0x28   : > { %1431 = vrot.lane.b32.xlu0 %v8922_v14, %s10038_s11  ;;  %701 = vst.msk [vmem:[#allocation2 + $0x1c] sm:$0xf] %vm224_vm0, %v401_v20  ;;  %v383_v26 = vor.u32 %v381_v4, %v380_v16  ;;  %v385_v27 = vrot.slane %v380_v16, 4  ;;  %693 = vst [vmem:[#allocation2 + $0xc] sm:$0xf] %v692_v21  ;;  %v410_v28 = vrot.slane %v406_v17, 4  ;;  %v703_v33 = vsel %vm10131_vm3, %v402_v10, %v702_v19 }
  0x29   : > { %v415_v29 = vshll.u32 %v340_v6, 16  ;;  %v409_v31 = vor.u32 %v407_v22, %v406_v17  ;;  %v414_v32 = vrot.slane %v412_v23, 7  ;;  %v247_v34 = vsel %vm10131_vm3, 0, %v246_v12  ;;  %704 = vst [vmem:[#allocation2 + $0x20] sm:$0x1] %v703_v33  ;;  %s8903_s6 = sshll.u32 %s215_s30, 6 }
  0x2a   : > { %v384_v35 = vsel %vm10201_vm1, %v376_v15, %v383_v26  ;;  %v696_v36 = vsel %vm10131_vm3, %v385_v27, %v695_v24  ;;  %v709_v37 = vld [vmem:[#allocation2 + $0x2c] sm:$0x1]  ;;  %248 = vst [vmem:[#allocation2 + $0x30] sm:$0x1] %v247_v34  ;;  %v421_v38 = vshrl.u32 %v10215_v25, 16  ;;  %v429_v43 = vshrl.u32 %v10220_v30, 16 }
  0x2b   : > { %694 = vst.msk [vmem:[#allocation2 + $0x10] sm:$0xf] %vm224_vm0, %v384_v35  ;;  %v417_v39 = vor.u32 %v415_v29, %v414_v32  ;;  %v419_v40 = vrot.slane %v414_v32, 4  ;;  %v706_v42 = vsel %vm10183_vm14, %v409_v31, %v705_v18  ;;  %697 = vst [vmem:[#allocation2 + $0x14] sm:$0x1] %v696_v36  ;;  %v424_v51 = vshll.u32 %v10215_v25, 16 }
  0x2c   : > { %707 = vst [vmem:[#allocation2 + $0x24] sm:$0xf] %v706_v42  ;;  %v3586_v44 = vld [vmem:[#allocation2 + $0x18] sm:$0xe]  ;;  %v10246_v56 = vrot.slane %v421_v38, 7  ;;  %v10248_v58 = vrot.slane %v429_v43, 7 }
  0x2d   : > { %v418_v45 = vsel %vm10201_vm1, %v410_v28, %v417_v39  ;;  %v9066_v46 = vrot.slane %v3586_v44, 9  ;;  %v10237_v47 = vld [vmem:[#allocation2 + $0x18] sm:$0xe]  ;;  %v710_v49 = vsel %vm10131_vm3, %v419_v40, %v709_v37  ;;  %vm13380_vm8 = vcmask 31744   ;;  %s13255_s7 = scalar_lea.vmem [#allocation7], %s8903_s6 }
  0x2e   : > { %v2000_v50 = vld [vmem:[#allocation2 + $0x18] sm:$0xf]  ;;  %708 = vst.msk [vmem:[#allocation2 + $0x28] sm:$0xf] %vm224_vm0, %v418_v45  ;;  %v9003_v52 = vrot.slane %v10237_v47, 9  ;;  %v10268_v40 = vor.u32 %v424_v51, %v10246_v56  ;;  %vm1479_vm9 = vcmask 64544  }
  0x2f   : > { %711 = vst [vmem:[#allocation2 + $0x2c] sm:$0x1] %v710_v49  ;;  %v2070_v53 = vshrl.u32 %v2000_v50, 16  ;;  %v2073_v54 = vshll.u32 %v2000_v50, 16  ;;  %v10244_v55 = vld [vmem:[#allocation2 + $0x18] sm:$0xf] }
  0x30   : > { %v9834_v57 = vld [vmem:[#allocation2 + $0x18] sm:$0xff]   ;;  %v2542_v59 = vld [vmem:[#allocation2 + $0xc] sm:$0xe]  ;;  %v3090_v61 = vshrl.u32 %v10244_v55, 16  ;;  %v3588_v23 = vld [vmem:[#allocation2 + $0x20] sm:$0x1] }
  0x31   : > { %v2072_v60 = vrot.slane %v2070_v53, 4  ;;  %1934 = vrot.lane.b32.xlu1 %v9834_v57, %s10039_s12  ;;  %v9002_v62 = vrot.slane %v2542_v59, 9  ;;  %v1499_v63 = vld [vmem:[#allocation2 + $0xc] sm:$0xe]  ;;  %v3587_v3 = vld [vmem:[#allocation2 + $0x1c] sm:$0xf] }
  0x32   : > { %v2075_v4 = vrot.slane %v2073_v54, 5  ;;  %v9835_v5 = vld [vmem:[#allocation2 + $0xc] sm:$0xff]   ;;  %v9837_v6 = vld [vmem:[#allocation2 + $0x18] sm:$0xff]   ;;  %v8939_v8 = vrot.slane %v1499_v63, 9  ;;  %v2544_v9 = vld [vmem:[#allocation2 + $0x14] sm:$0x1] }
  0x33   : > { %v2543_v7 = vld [vmem:[#allocation2 + $0x10] sm:$0xf]  ;;  %v3684_v11 = vrot.slane %v3587_v3, 5  ;;  %1932 = vrot.lane.b32.xlu0 %v9835_v5, %s10039_s12  ;;  %v2643_v14 = vrot.slane %v2544_v9, 5  ;;  %v1501_v16 = vld [vmem:[#allocation2 + $0x14] sm:$0x1] }
  0x34   : > { %v2640_v10 = vrot.slane %v2543_v7, 5  ;;  %v2076_v12 = vor.u32 %v2075_v4, %v2072_v60  ;;  %v1500_v15 = vld [vmem:[#allocation2 + $0x10] sm:$0xf]  ;;  %v10253_v17 = vrot.slane %v3090_v61, 4  ;;  %v1607_v22 = vrot.slane %v1501_v16, 5 }
  0x35   : > { %v9836_v18 = vld [vmem:[#allocation2 + $0x24] sm:$0xff]   ;;  %v1604_v21 = vrot.slane %v1500_v15, 5  ;;  %v3685_v24 = vsel %vm10162_vm11, %v9066_v46, %v3684_v11  ;;  %v3686_v25 = vrot.slane %v3684_v11, 4  ;;  %v2546_v26 = vld [vmem:[#allocation2 + $0x1c] sm:$0xf]  ;;  %v3687_v32 = vrot.slane %v3588_v23, 5 }
  0x36   : > { %v2641_v19 = vsel %vm10162_vm11, %v9002_v62, %v2640_v10  ;;  %v2642_v20 = vrot.slane %v2640_v10, 4  ;;  %v10259_v27 = vrot.slane %v2076_v12, 4  ;;  %2978 = vrot.lane.b32.xlu1 %v9836_v18, %s10040_s13  ;;  %v2547_v33 = vld [vmem:[#allocation2 + $0x20] sm:$0x1]  ;;  %v3589_v34 = vld [vmem:[#allocation2 + $0x24] sm:$0xe] }
  0x37   : > { %v1605_v29 = vsel %vm10162_vm11, %v8939_v8, %v1604_v21  ;;  %v1606_v31 = vrot.slane %v1604_v21, 4  ;;  %2976 = vrot.lane.b32.xlu0 %v9837_v6, %s10040_s13  ;;  %v2647_v36 = vrot.slane %v2546_v26, 5  ;;  %v2650_v37 = vrot.slane %v2547_v33, 5  ;;  %v3590_v38 = vld [vmem:[#allocation2 + $0x28] sm:$0xf] }
  0x38   : > { %v2644_v28 = vsel %vm10162_vm11, %v2642_v20, %v2643_v14  ;;  %v3591_v39 = vld [vmem:[#allocation2 + $0x2c] sm:$0x1]  ;;  %v3688_v43 = vsel %vm10162_vm11, %v3686_v25, %v3687_v32  ;;  %v9067_v44 = vrot.slane %v3589_v34, 9  ;;  %v3691_v45 = vrot.slane %v3590_v38, 5  ;;  %v952_v49 = vld [vmem:[#allocation2 + $0x10] sm:$0xf] }
  0x39   : > { %v9018_v35 = vcombine.low %v2641_v19, %v2644_v28  ;;  %v1608_v42 = vsel %vm10162_vm11, %v1606_v31, %v1607_v22  ;;  %v951_v46 = vld [vmem:[#allocation2 + $0xc] sm:$0xf]  ;;  %v9082_v53 = vcombine.low %v3685_v24, %v3688_v43  ;;  %v2648_v54 = vsel %vm10162_vm11, %v9003_v52, %v2647_v36  ;;  %v953_v51 = vld [vmem:[#allocation2 + $0x14] sm:$0x1]  ;;  %v2001_v63 = vld [vmem:[#allocation2 + $0x1c] sm:$0xf] }
  0x3a   : > { %v8955_v50 = vcombine.low %v1605_v29, %v1608_v42  ;;  %v2649_v57 = vrot.slane %v2647_v36, 4  ;;  %v3692_v59 = vsel %vm10162_vm11, %v9067_v44, %v3691_v45  ;;  %v3693_v60 = vrot.slane %v3691_v45, 4  ;;  %v2002_v5 = vld [vmem:[#allocation2 + $0x20] sm:$0x1]  ;;  %v1997_v10 = vld [vmem:[#allocation2 + $0xc] sm:$0xf] }
  0x3b   : > { %v3694_v61 = vrot.slane %v3591_v39, 5  ;;  %v1024_v62 = vshrl.u32 %v951_v46, 16  ;;  %2798 = vrot.lane.b32.xlu0 %v9018_v35, %s10041_s14  ;;  %v1027_v3 = vshll.u32 %v951_v46, 16  ;;  %v1033_v4 = vshll.u32 %v952_v49, 16  ;;  %v1998_v16 = vld [vmem:[#allocation2 + $0x10] sm:$0xf] }
  0x3c   : > { %1757 = vrot.lane.b32.xlu1 %v8955_v50, %s10037_s10  ;;  %v2651_v47 = vsel %vm10162_vm11, %v2649_v57, %v2650_v37  ;;  %v1037_v52 = vshrl.u32 %v952_v49, 16  ;;  %v1043_v9 = vshll.u32 %v953_v51, 16  ;;  %v2079_v19 = vshll.u32 %v2001_v63, 16  ;;  %v1999_v31 = vld [vmem:[#allocation2 + $0x14] sm:$0x1] }
  0x3d   : > { %v9019_v6 = vcombine.low %v2648_v54, %v2651_v47  ;;  %v3695_v7 = vsel %vm10162_vm11, %v3693_v60, %v3694_v61  ;;  %v1026_v8 = vrot.slane %v1024_v62, 4  ;;  %v1029_v12 = vrot.slane %v1027_v3, 5  ;;  %v3044_v37 = vld [vmem:[#allocation2 + $0x24] sm:$0xf]  ;;  %v3045_v44 = vld [vmem:[#allocation2 + $0x28] sm:$0xf] }
  0x3e   : > { %v9083_v11 = vcombine.low %v3692_v59, %v3695_v7  ;;  %v1035_v14 = vrot.slane %v1033_v4, 5  ;;  %v1039_v15 = vrot.slane %v1037_v52, 4  ;;  %v1045_v18 = vrot.slane %v1043_v9, 5  ;;  %v3046_v60 = vld [vmem:[#allocation2 + $0x2c] sm:$0x1] }
  0x3f   : > { %v2083_v20 = vshrl.u32 %v2001_v63, 16  ;;  %v2089_v21 = vshll.u32 %v2002_v5, 16  ;;  %3842 = vrot.lane.b32.xlu0 %v9082_v53, %s10042_s15  ;;  %v1030_v22 = vor.u32 %v1029_v12, %v1026_v8  ;;  %v2046_v24 = vshrl.u32 %v1997_v10, 16  ;;  %v3042_v52 = vld [vmem:[#allocation2 + $0x1c] sm:$0xf] }
  0x40   : > { %2800 = vrot.lane.b32.xlu1 %v9019_v6, %s10041_s14  ;;  %v1040_v23 = vor.u32 %v1039_v15, %v1035_v14  ;;  %v2049_v25 = vshll.u32 %v1997_v10, 16  ;;  %v2081_v26 = vrot.slane %v2079_v19, 5  ;;  %v2055_v32 = vshll.u32 %v1998_v16, 16  ;;  %v3043_v5 = vld [vmem:[#allocation2 + $0x20] sm:$0x1] }
  0x41   : > { %v2085_v28 = vrot.slane %v2083_v20, 4  ;;  %v2091_v29 = vrot.slane %v2089_v21, 5  ;;  %v1031_v33 = vrot.slane %v1030_v22, 4  ;;  %v2048_v35 = vrot.slane %v2046_v24, 4  ;;  %v954_v15 = vld [vmem:[#allocation2 + $0x18] sm:$0xf] }
  0x42   : > { %v1041_v34 = vrot.slane %v1040_v23, 4  ;;  %v2051_v36 = vrot.slane %v2049_v25, 5  ;;  %v2082_v38 = vsel %vm10191_vm15, %v10259_v27, %v2081_v26  ;;  %v2057_v42 = vrot.slane %v2055_v32, 5  ;;  %v955_v25 = vld [vmem:[#allocation2 + $0x1c] sm:$0xf] }
  0x43   : > { %v2086_v39 = vor.u32 %v2085_v28, %v2081_v26  ;;  %v2059_v43 = vshrl.u32 %v1998_v16, 16  ;;  %v1036_v45 = vsel %vm10191_vm15, %v1031_v33, %v1035_v14  ;;  %v2065_v50 = vshll.u32 %v1999_v31, 16 }
  0x44   : > { %3844 = vrot.lane.b32.xlu1 %v9083_v11, %s10042_s15  ;;  %v1046_v46 = vsel %vm10191_vm15, %v1041_v34, %v1045_v18  ;;  %v2052_v49 = vor.u32 %v2051_v36, %v2048_v35  ;;  %v3114_v51 = vshrl.u32 %v3044_v37, 16  ;;  %v3117_v61 = vshll.u32 %v3044_v37, 16  ;;  %v956_v37 = vld [vmem:[#allocation2 + $0x20] sm:$0x1] }
  0x45   : > { %v8923_v53 = vcombine.low %v1036_v45, %v1046_v46  ;;  %v2087_v54 = vrot.slane %v2086_v39, 4  ;;  %v2061_v57 = vrot.slane %v2059_v43, 4  ;;  %v2067_v27 = vrot.slane %v2065_v50, 5 }
  0x46   : > { %v2053_v59 = vrot.slane %v2052_v49, 4  ;;  %v3123_v62 = vshll.u32 %v3045_v44, 16  ;;  %v3116_v3 = vrot.slane %v3114_v51, 4  ;;  %v3127_v4 = vshrl.u32 %v3045_v44, 16  ;;  %v958_v49 = vld [vmem:[#allocation2 + $0x28] sm:$0xf] }
  0x47   : > { %1433 = vrot.lane.b32.xlu0 %v8923_v53, %s10038_s11  ;;  %v2092_v63 = vsel %vm10191_vm15, %v2087_v54, %v2091_v29  ;;  %v2062_v47 = vor.u32 %v2061_v57, %v2057_v42  ;;  %v3119_v8 = vrot.slane %v3117_v61, 5  ;;  %v3133_v12 = vshll.u32 %v3046_v60, 16 }
  0x48   : > { %v8987_v6 = vcombine.low %v2082_v38, %v2092_v63  ;;  %v2058_v7 = vsel %vm10191_vm15, %v2053_v59, %v2057_v42  ;;  %v3125_v9 = vrot.slane %v3123_v62, 5  ;;  %v3129_v11 = vrot.slane %v3127_v4, 4  ;;  %v957_v42 = vld [vmem:[#allocation2 + $0x24] sm:$0xf]  ;;  %v1503_v4 = vld [vmem:[#allocation2 + $0x1c] sm:$0xf] }
  0x49   : > { %v2063_v10 = vrot.slane %v2062_v47, 4  ;;  %v3093_v14 = vshll.u32 %v10244_v55, 16  ;;  %v3120_v16 = vor.u32 %v3119_v8, %v3116_v3  ;;  %v3099_v18 = vshll.u32 %v3042_v52, 16  ;;  %v1502_v3 = vld [vmem:[#allocation2 + $0x18] sm:$0xe] }
  0x4a   : > { %2479 = vrot.lane.b32.xlu1 %v8987_v6, %s10043_s16  ;;  %v3103_v19 = vshrl.u32 %v3042_v52, 16  ;;  %v3109_v20 = vshll.u32 %v3043_v5, 16  ;;  %v3130_v22 = vor.u32 %v3129_v11, %v3125_v9  ;;  %v3135_v23 = vrot.slane %v3133_v12, 5  ;;  %v1504_v8 = vld [vmem:[#allocation2 + $0x20] sm:$0x1] }
  0x4b   : > { %v2068_v21 = vsel %vm10191_vm15, %v2063_v10, %v2067_v27  ;;  %v3095_v24 = vrot.slane %v3093_v14, 5  ;;  %v3121_v28 = vrot.slane %v3120_v16, 4  ;;  %v3101_v29 = vrot.slane %v3099_v18, 5  ;;  %v959_v27 = vld [vmem:[#allocation2 + $0x2c] sm:$0x1] }
  0x4c   : > { %v8986_v26 = vcombine.low %v2058_v7, %v2068_v21  ;;  %v3105_v31 = vrot.slane %v3103_v19, 4  ;;  %v3131_v55 = vrot.slane %v3130_v22, 4  ;;  %v3111_v33 = vrot.slane %v3109_v20, 5  ;;  %v1505_v19 = vld [vmem:[#allocation2 + $0x24] sm:$0xe] }
  0x4d   : > { %v3096_v32 = vor.u32 %v3095_v24, %v10253_v17  ;;  %v1048_v34 = vshrl.u32 %v954_v15, 16  ;;  %v3126_v35 = vsel %vm10191_vm15, %v3121_v28, %v3125_v9  ;;  %v1051_v38 = vshll.u32 %v954_v15, 16  ;;  %v1506_v24 = vld [vmem:[#allocation2 + $0x28] sm:$0xf] }
  0x4e   : > { %2477 = vrot.lane.b32.xlu0 %v8986_v26, %s10043_s16  ;;  %v3106_v36 = vor.u32 %v3105_v31, %v3101_v29  ;;  %v1057_v39 = vshll.u32 %v955_v25, 16  ;;  %v3136_v43 = vsel %vm10191_vm15, %v3131_v55, %v3135_v23  ;;  %v1061_v46 = vshrl.u32 %v955_v25, 16  ;;  %v1507_v25 = vld [vmem:[#allocation2 + $0x2c] sm:$0x1] }
  0x4f   : > { %v3097_v44 = vrot.slane %v3096_v32, 4  ;;  %v1050_v45 = vrot.slane %v1048_v34, 4  ;;  %v9051_v17 = vcombine.low %v3126_v35, %v3136_v43  ;;  %v1053_v53 = vrot.slane %v1051_v38, 5  ;;  %v712_v35 = vld [vmem:[#allocation2 + $0x30] sm:$0xf] }
  0x50   : > { %v3107_v50 = vrot.slane %v3106_v36, 4  ;;  %v1059_v54 = vrot.slane %v1057_v39, 5  ;;  %v1063_v51 = vrot.slane %v1061_v46, 4  ;;  %v1067_v59 = vshll.u32 %v956_v37, 16 }
  0x51   : > { %v3102_v57 = vsel %vm10191_vm15, %v3097_v44, %v3101_v29  ;;  %v1072_v60 = vshrl.u32 %v957_v42, 16  ;;  %3523 = vrot.lane.b32.xlu1 %v9051_v17, %s10044_s17  ;;  %v1054_v62 = vor.u32 %v1053_v53, %v1050_v45  ;;  %v1075_v63 = vshll.u32 %v957_v42, 16  ;;  %v2003_v42 = vld [vmem:[#allocation2 + $0x24] sm:$0xf]  ;;  %v2005_v17 = vld [vmem:[#allocation2 + $0x2c] sm:$0x1] }
  0x52   : > { %v3112_v61 = vsel %vm10191_vm15, %v3107_v50, %v3111_v33  ;;  %v1081_v47 = vshll.u32 %v958_v49, 16  ;;  %v1064_v5 = vor.u32 %v1063_v51, %v1059_v54  ;;  %v1069_v6 = vrot.slane %v1067_v59, 5  ;;  %v296_v50 = vld [vmem:[#allocation2 + $0x38] sm:$0x1]  ;;  %v2549_v51 = vld [vmem:[#allocation2 + $0x28] sm:$0xf] }
  0x53   : > { %v9050_v52 = vcombine.low %v3102_v57, %v3112_v61  ;;  %v1074_v7 = vrot.slane %v1072_v60, 4  ;;  %v1055_v9 = vrot.slane %v1054_v62, 4  ;;  %v1077_v10 = vrot.slane %v1075_v63, 5  ;;  %v2548_v57 = vld [vmem:[#allocation2 + $0x24] sm:$0xe] }
  0x54   : > { %v1083_v11 = vrot.slane %v1081_v47, 5  ;;  %v1085_v12 = vshrl.u32 %v958_v49, 16  ;;  %v1065_v14 = vrot.slane %v1064_v5, 4  ;;  %v1091_v15 = vshll.u32 %v959_v27, 16  ;;  %v2004_v49 = vld [vmem:[#allocation2 + $0x28] sm:$0xf] }
  0x55   : > { %3521 = vrot.lane.b32.xlu0 %v9050_v52, %s10044_s17  ;;  %v8940_v16 = vrot.slane %v1502_v3, 9  ;;  %v1611_v18 = vrot.slane %v1503_v4, 5  ;;  %v1060_v20 = vsel %vm10191_vm15, %v1055_v9, %v1059_v54  ;;  %v1078_v21 = vor.u32 %v1077_v10, %v1074_v7  ;;  %v2550_v59 = vld [vmem:[#allocation2 + $0x2c] sm:$0x1]  ;;  %v249_v62 = vld [vmem:[#allocation2 + $0x3c] sm:$0x1] }
  0x56   : > { %v1087_v22 = vrot.slane %v1085_v12, 4  ;;  %v1614_v23 = vrot.slane %v1504_v8, 5  ;;  %v1070_v26 = vsel %vm10191_vm15, %v1065_v14, %v1069_v6  ;;  %v1093_v28 = vrot.slane %v1091_v15, 5  ;;  %v343_v63 = vld [vmem:[%s10173_s9 + $0x20] sm:$0xf]  ;;  %v9838_v5 = vld [vmem:[#allocation2 + $0x24] sm:$0xff]  }
  0x57   : > { %v1612_v29 = vsel %vm10162_vm11, %v8940_v16, %v1611_v18  ;;  %v1613_v31 = vrot.slane %v1611_v18, 4  ;;  %v8924_v55 = vcombine.low %v1060_v20, %v1070_v26  ;;  %v1079_v32 = vrot.slane %v1078_v21, 4 }
  0x58   : > { %v1088_v33 = vor.u32 %v1087_v22, %v1083_v11  ;;  %v8941_v34 = vrot.slane %v1505_v19, 9  ;;  %v1618_v37 = vrot.slane %v1506_v24, 5  ;;  %v1621_v38 = vrot.slane %v1507_v25, 5 }
  0x59   : > { %v1615_v36 = vsel %vm10162_vm11, %v1613_v31, %v1614_v23  ;;  %v427_v39 = vrot.slane %v10246_v56, 4  ;;  %1435 = vrot.lane.b32.xlu0 %v8924_v55, %s10038_s11  ;;  %v1084_v43 = vsel %vm10191_vm15, %v1079_v32, %v1083_v11  ;;  %v432_v46 = vshll.u32 %v10220_v30, 16 }
  0x5a   : > { %v1089_v44 = vrot.slane %v1088_v33, 4  ;;  %v8956_v45 = vcombine.low %v1612_v29, %v1615_v36  ;;  %v1619_v53 = vsel %vm10162_vm11, %v8941_v34, %v1618_v37  ;;  %v1620_v54 = vrot.slane %v1618_v37, 4  ;;  %v344_v37 = vld [vmem:[%s10173_s9 + $0x24] sm:$0xf] }
  0x5b   : > { %v713_v56 = vsel %vm10183_vm14, %v10268_v40, %v712_v35  ;;  %v434_v30 = vor.u32 %v432_v46, %v10248_v58  ;;  %v2094_v60 = vshrl.u32 %v2003_v42, 16  ;;  %v2097_v61 = vshll.u32 %v2003_v42, 16 }
  0x5c   : > { %v1094_v27 = vsel %vm10191_vm15, %v1089_v44, %v1093_v28  ;;  %714 = vst [vmem:[#allocation2 + $0x30] sm:$0xf] %v713_v56  ;;  %v1622_v3 = vsel %vm10162_vm11, %v1620_v54, %v1621_v38  ;;  %v2103_v4 = vshll.u32 %v2004_v49, 16  ;;  %v2107_v52 = vshrl.u32 %v2004_v49, 16 }
  0x5d   : > { %v8925_v47 = vcombine.low %v1084_v43, %v1094_v27  ;;  %1759 = vrot.lane.b32.xlu0 %v8956_v45, %s10037_s10  ;;  %v8957_v40 = vcombine.low %v1619_v53, %v1622_v3  ;;  %v435_v6 = vsel %vm10201_vm1, %v427_v39, %v434_v30  ;;  %v2096_v7 = vrot.slane %v2094_v60, 4 }
  0x5e   : > { %v2099_v8 = vrot.slane %v2097_v61, 5  ;;  %715 = vst.msk [vmem:[#allocation2 + $0x34] sm:$0xf] %vm224_vm0, %v435_v6  ;;  %v2105_v9 = vrot.slane %v2103_v4, 5  ;;  %v2109_v10 = vrot.slane %v2107_v52, 4  ;;  %v2113_v11 = vshll.u32 %v2005_v17, 16 }
  0x5f   : > { %1437 = vrot.lane.b32.xlu1 %v8925_v47, %s10038_s11  ;;  %v297_v12 = vsel %vm10145_vm7, 0, %v296_v50  ;;  %v9004_v15 = vrot.slane %v2548_v57, 9  ;;  %v2654_v16 = vrot.slane %v2549_v51, 5  ;;  %v2657_v18 = vrot.slane %v2550_v59, 5 }
  0x60   : > { %v2100_v14 = vor.u32 %v2099_v8, %v2096_v7  ;;  %298 = vst [vmem:[#allocation2 + $0x38] sm:$0x1] %v297_v12  ;;  %v2110_v19 = vor.u32 %v2109_v10, %v2105_v9  ;;  %v2115_v20 = vrot.slane %v2113_v11, 5  ;;  %v250_v21 = vsel %vm10131_vm3, 0, %v249_v62  ;;  %v299_v62 = vld [vmem:[#allocation2 + $0x44] sm:$0x1] }
  0x61   : > { %v438_v22 = vshrl.u32 %v343_v63, 16  ;;  %1936 = vrot.lane.b32.xlu0 %v9838_v5, %s10039_s12  ;;  %v2656_v24 = vrot.slane %v2654_v16, 4  ;;  %251 = vst [vmem:[#allocation2 + $0x3c] sm:$0x1] %v250_v21  ;;  %v441_v25 = vshll.u32 %v343_v63, 16  ;;  %v436_v31 = vrot.slane %v10248_v58, 4 }
  0x62   : > { %v2101_v23 = vrot.slane %v2100_v14, 4  ;;  %v2111_v26 = vrot.slane %v2110_v19, 4  ;;  %v2655_v35 = vsel %vm10162_vm11, %v9004_v15, %v2654_v16  ;;  %v446_v51 = vshrl.u32 %v344_v37, 16 }
  0x63   : > { %1761 = vrot.lane.b32.xlu1 %v8957_v40, %s10037_s10  ;;  %v2006_v28 = vld [vmem:[#allocation2 + $0x30] sm:$0xf]  ;;  %v440_v29 = vrot.slane %v438_v22, 7  ;;  %v2658_v36 = vsel %vm10162_vm11, %v2656_v24, %v2657_v18  ;;  %v449_v47 = vshll.u32 %v344_v37, 16  ;;  %vm13383_vm10 = vcmask 97344  }
  0x64   : > { %v2106_v55 = vsel %vm10191_vm15, %v2101_v23, %v2105_v9  ;;  %v2118_v32 = vshrl.u32 %v2006_v28, 16  ;;  %v2121_v33 = vshll.u32 %v2006_v28, 16  ;;  %v2116_v34 = vsel %vm10191_vm15, %v2111_v26, %v2115_v20  ;;  %v3047_v38 = vld [vmem:[#allocation2 + $0x30] sm:$0xf] }
  0x65   : > { %v9839_v39 = vld [vmem:[#allocation2 + $0x30] sm:$0xff]   ;;  %v8988_v42 = vcombine.low %v2106_v55, %v2116_v34  ;;  %v443_v45 = vor.u32 %v441_v25, %v440_v29  ;;  %v9020_v54 = vcombine.low %v2655_v35, %v2658_v36  ;;  %v444_v57 = vrot.slane %v440_v29, 4 }
  0x66   : > { %v2007_v43 = vld [vmem:[#allocation2 + $0x34] sm:$0xf]  ;;  %v2120_v58 = vrot.slane %v2118_v32, 4  ;;  %v10362_v44 = vld [vmem:[#allocation2 + $0x30] sm:$0xe]  ;;  %v2123_v49 = vrot.slane %v2121_v33, 5 }
  0x67   : > { %v716_v46 = vld [vmem:[#allocation2 + $0x38] sm:$0x1]  ;;  %v2127_v17 = vshll.u32 %v2007_v43, 16  ;;  %v2131_v50 = vshrl.u32 %v2007_v43, 16  ;;  %1938 = vrot.lane.b32.xlu1 %v9839_v39, %s10039_s12  ;;  %2481 = vrot.lane.b32.xlu0 %v8988_v42, %s10043_s16  ;;  %v2552_v56 = vld [vmem:[#allocation2 + $0x34] sm:$0xf] }
  0x68   : > { %v717_v53 = vsel %vm10131_vm3, %v436_v31, %v716_v46  ;;  %v2124_v59 = vor.u32 %v2123_v49, %v2120_v58  ;;  %v2661_v60 = vrot.slane %v2552_v56, 5  ;;  %v719_v61 = vld [vmem:[#allocation2 + $0x3c] sm:$0xf]  ;;  %v10370_v63 = vrot.slane %v446_v51, 7  ;;  %v3048_v4 = vld [vmem:[#allocation2 + $0x34] sm:$0xf] }
  0x69   : > { %718 = vst [vmem:[#allocation2 + $0x38] sm:$0x1] %v717_v53  ;;  %v10368_v27 = vrot.slane %v2127_v17, 5  ;;  %v2133_v30 = vrot.slane %v2131_v50, 4  ;;  %v720_v3 = vsel %vm10183_vm14, %v443_v45, %v719_v61  ;;  %v3138_v52 = vshrl.u32 %v3047_v38, 16  ;;  %v9840_v8 = vld [vmem:[#allocation2 + $0x30] sm:$0xff]  }
  0x6a   : > { %v2125_v40 = vrot.slane %v2124_v59, 4  ;;  %v9005_v6 = vrot.slane %v10362_v44, 9  ;;  %v2663_v7 = vrot.slane %v2661_v60, 4  ;;  %721 = vst [vmem:[#allocation2 + $0x3c] sm:$0xf] %v720_v3  ;;  %v451_v10 = vor.u32 %v449_v47, %v10370_v63 }
  0x6b   : > { %v2134_v5 = vor.u32 %v2133_v30, %v10368_v27  ;;  %v3592_v9 = vld [vmem:[#allocation2 + $0x30] sm:$0xe]  ;;  %2802 = vrot.lane.b32.xlu0 %v9020_v54, %s10041_s14  ;;  %v3140_v11 = vrot.slane %v3138_v52, 4  ;;  %v3141_v12 = vshll.u32 %v3047_v38, 16  ;;  %v3593_v14 = vld [vmem:[#allocation2 + $0x34] sm:$0xf] }
  0x6c   : > { %v10378_v15 = vld [vmem:[#allocation2 + $0x30] sm:$0xf]  ;;  %v453_v18 = vrot.slane %v10370_v63, 4  ;;  %v3147_v19 = vshll.u32 %v3048_v4, 16  ;;  %v3151_v20 = vshrl.u32 %v3048_v4, 16  ;;  %v452_v21 = vsel %vm10201_vm1, %v444_v57, %v451_v10 }
  0x6d   : > { %v2135_v16 = vrot.slane %v2134_v5, 4  ;;  %v3143_v22 = vrot.slane %v3141_v12, 5  ;;  %v300_v23 = vsel %vm10145_vm7, 0, %v299_v62  ;;  %v9068_v24 = vrot.slane %v3592_v9, 9  ;;  %722 = vst.msk [vmem:[#allocation2 + $0x40] sm:$0xf] %vm224_vm0, %v452_v21 }
  0x6e   : > { %v3149_v25 = vrot.slane %v3147_v19, 5  ;;  %v3153_v26 = vrot.slane %v3151_v20, 4  ;;  %301 = vst [vmem:[#allocation2 + $0x44] sm:$0x1] %v300_v23  ;;  %v3698_v28 = vrot.slane %v3593_v14, 5  ;;  %v1096_v29 = vshrl.u32 %v10378_v15, 16 }
  0x6f   : > { %2980 = vrot.lane.b32.xlu0 %v9840_v8, %s10040_s13  ;;  %v3144_v33 = vor.u32 %v3143_v22, %v3140_v11  ;;  %v2130_v39 = vsel %vm10191_vm15, %v2125_v40, %v10368_v27  ;;  %v2662_v42 = vsel %vm10162_vm11, %v9005_v6, %v2661_v60  ;;  %v961_v60 = vld [vmem:[#allocation2 + $0x34] sm:$0xf]  ;;  %v9854_v21 = vld [vmem:[%s13371_s1] sm:$0xff]   ;;  %vm13382_vm12 = vcmask 130144  }
  0x70   : > { %v2008_v31 = vld [vmem:[#allocation2 + $0x38] sm:$0x1]  ;;  %v3154_v36 = vor.u32 %v3153_v26, %v3149_v25  ;;  %v3700_v44 = vrot.slane %v3698_v28, 4  ;;  %v3699_v57 = vsel %vm10162_vm11, %v9068_v24, %v3698_v28  ;;  %v1109_v19 = vshrl.u32 %v961_v60, 16  ;;  %9697 = vmatprep.subr.bf16.mxu0 %v9854_v21 }
  0x71   : > { %v2553_v55 = vld [vmem:[#allocation2 + $0x38] sm:$0x1]  ;;  %v2137_v34 = vshll.u32 %v2008_v31, 16  ;;  %v3145_v43 = vrot.slane %v3144_v33, 4  ;;  %v3050_v58 = vld [vmem:[#allocation2 + $0x3c] sm:$0xf]  ;;  %9698 = vmatpush3.bf16.msra.mxu0 %v9854_v21 }
  0x72   : > { %v3049_v32 = vld [vmem:[#allocation2 + $0x38] sm:$0x1]  ;;  %v2664_v35 = vrot.slane %v2553_v55, 5  ;;  %v3155_v49 = vrot.slane %v3154_v36, 4  ;;  %v10395_v50 = vld [vmem:[#allocation2 + $0x3c] sm:$0xe] }
  0x73   : > { %v3157_v37 = vshll.u32 %v3049_v32, 16  ;;  %v3594_v38 = vld [vmem:[#allocation2 + $0x38] sm:$0x1]  ;;  %v2139_v45 = vrot.slane %v2137_v34, 5  ;;  %v3150_v53 = vsel %vm10191_vm15, %v3145_v43, %v3149_v25  ;;  %v3162_v54 = vshrl.u32 %v3050_v58, 16 }
  0x74   : > { %v2665_v46 = vsel %vm10162_vm11, %v2663_v7, %v2664_v35  ;;  %v3165_v56 = vshll.u32 %v3050_v58, 16  ;;  %v3701_v30 = vrot.slane %v3594_v38, 5  ;;  %v9069_v3 = vrot.slane %v10395_v50, 9  ;;  %v3051_v52 = vld [vmem:[#allocation2 + $0x40] sm:$0xf] }
  0x75   : > { %v3159_v17 = vrot.slane %v3157_v37, 5  ;;  %v2140_v51 = vsel %vm10191_vm15, %v2135_v16, %v2139_v45  ;;  %v9021_v59 = vcombine.low %v2662_v42, %v2665_v46  ;;  %v723_v63 = vld [vmem:[#allocation2 + $0x44] sm:$0x1]  ;;  %v3164_v47 = vrot.slane %v3162_v54, 4  ;;  %v3596_v6 = vld [vmem:[#allocation2 + $0x40] sm:$0xf] }
  0x76   : > { %v8989_v61 = vcombine.low %v2130_v39, %v2140_v51  ;;  %v724_v4 = vsel %vm10131_vm3, %v453_v18, %v723_v63  ;;  %v3167_v40 = vrot.slane %v3165_v56, 5  ;;  %v3702_v5 = vsel %vm10162_vm11, %v3700_v44, %v3701_v30  ;;  %v962_v12 = vld [vmem:[#allocation2 + $0x38] sm:$0x1]  ;;  %v963_v20 = vld [vmem:[#allocation2 + $0x3c] sm:$0xf] }
  0x77   : > { %v3160_v27 = vsel %vm10191_vm15, %v3155_v49, %v3159_v17  ;;  %v1098_v7 = vrot.slane %v1096_v29, 4  ;;  %725 = vst [vmem:[#allocation2 + $0x44] sm:$0x1] %v724_v4  ;;  %v3171_v8 = vshll.u32 %v3051_v52, 16  ;;  %v3175_v9 = vshrl.u32 %v3051_v52, 16  ;;  %v9841_v31 = vld [vmem:[#allocation2 + $0x3c] sm:$0xff]  }
  0x78   : > { %v9052_v62 = vcombine.low %v3150_v53, %v3160_v27  ;;  %2483 = vrot.lane.b32.xlu1 %v8989_v61, %s10043_s16  ;;  %v9084_v10 = vcombine.low %v3699_v57, %v3702_v5  ;;  %v3705_v11 = vrot.slane %v3596_v6, 5  ;;  %v3168_v14 = vor.u32 %v3167_v40, %v3164_v47  ;;  %v964_v24 = vld [vmem:[#allocation2 + $0x40] sm:$0xf]  ;;  %v1508_v58 = vld [vmem:[#allocation2 + $0x30] sm:$0xe] }
  0x79   : > { %v1099_v16 = vshll.u32 %v10378_v15, 16  ;;  %v1105_v18 = vshll.u32 %v961_v60, 16  ;;  %v10416_v22 = vrot.slane %v3171_v8, 5  ;;  %v3177_v23 = vrot.slane %v3175_v9, 4  ;;  %v1509_v61 = vld [vmem:[#allocation2 + $0x34] sm:$0xf] }
  0x7a   : > { %3525 = vrot.lane.b32.xlu0 %v9052_v62, %s10044_s17  ;;  %v3169_v25 = vrot.slane %v3168_v14, 4  ;;  %v1111_v29 = vrot.slane %v1109_v19, 4  ;;  %v1115_v55 = vshll.u32 %v962_v12, 16  ;;  %v1120_v32 = vshrl.u32 %v963_v20, 16  ;;  %v1510_v62 = vld [vmem:[#allocation2 + $0x38] sm:$0x1] }
  0x7b   : > { %v1101_v26 = vrot.slane %v1099_v16, 5  ;;  %v1107_v28 = vrot.slane %v1105_v18, 5  ;;  %v3178_v15 = vor.u32 %v3177_v23, %v10416_v22  ;;  %v1123_v33 = vshll.u32 %v963_v20, 16  ;;  %v252_v63 = vld [vmem:[#allocation2 + $0x48] sm:$0x1] }
  0x7c   : > { %2804 = vrot.lane.b32.xlu1 %v9021_v59, %s10041_s14  ;;  %v3707_v34 = vrot.slane %v3705_v11, 4  ;;  %v1129_v37 = vshll.u32 %v964_v24, 16  ;;  %v1117_v39 = vrot.slane %v1115_v55, 5  ;;  %v1122_v42 = vrot.slane %v1120_v32, 4  ;;  %v1511_v40 = vld [vmem:[#allocation2 + $0x3c] sm:$0xe] }
  0x7d   : > { %v1102_v35 = vor.u32 %v1101_v26, %v1098_v7  ;;  %v1112_v36 = vor.u32 %v1111_v29, %v1107_v28  ;;  %v3179_v38 = vrot.slane %v3178_v15, 4  ;;  %v1125_v43 = vrot.slane %v1123_v33, 5  ;;  %v1512_v5 = vld [vmem:[#allocation2 + $0x40] sm:$0xf]  ;;  %v345_v18 = vld [vmem:[%s10173_s9 + $0x28] sm:$0xf] }
  0x7e   : > { %3846 = vrot.lane.b32.xlu0 %v9084_v10, %s10042_s15  ;;  %v3052_v44 = vld [vmem:[#allocation2 + $0x44] sm:$0x1]  ;;  %v3174_v45 = vsel %vm10191_vm15, %v3169_v25, %v10416_v22  ;;  %v10426_v49 = vsel %vm10162_vm11, %v9069_v3, %v3705_v11  ;;  %v1131_v51 = vrot.slane %v1129_v37, 5  ;;  %v1133_v30 = vshrl.u32 %v964_v24, 16  ;;  %v346_v19 = vld [vmem:[%s10173_s9 + $0x2c] sm:$0xf] }
  0x7f   : > { %v3597_v46 = vld [vmem:[#allocation2 + $0x44] sm:$0x1]  ;;  %v1103_v17 = vrot.slane %v1102_v35, 4  ;;  %v1113_v50 = vrot.slane %v1112_v36, 4  ;;  %v3181_v53 = vshll.u32 %v3052_v44, 16  ;;  %v1126_v57 = vor.u32 %v1125_v43, %v1122_v42  ;;  %v9855_v25 = vld [vmem:[%s13371_s1 + $0x8] sm:$0xff]  }
  0x80   : > { %2982 = vrot.lane.b32.xlu1 %v9841_v31, %s10040_s13  ;;  %v3708_v54 = vrot.slane %v3597_v46, 5  ;;  %v965_v56 = vld [vmem:[#allocation2 + $0x44] sm:$0x1]  ;;  %v1135_v7 = vrot.slane %v1133_v30, 4  ;;  %v8942_v9 = vrot.slane %v1508_v58, 9  ;;  %v1625_v14 = vrot.slane %v1509_v61, 5  ;;  %9699 = vmatprep.subr.bf16.mxu0 %v9855_v25 }
  0x81   : > { %v1108_v59 = vsel %vm10191_vm15, %v1103_v17, %v1107_v28  ;;  %v1118_v27 = vsel %vm10191_vm15, %v1113_v50, %v1117_v39  ;;  %v1139_v60 = vshll.u32 %v965_v56, 16  ;;  %v3183_v47 = vrot.slane %v3181_v53, 5  ;;  %v1513_v10 = vld [vmem:[#allocation2 + $0x44] sm:$0x1]  ;;  %v2009_v24 = vld [vmem:[#allocation2 + $0x3c] sm:$0xf]  ;;  %9700 = vmatpush3.bf16.msra.mxu0 %v9855_v25 }
  0x82   : > { %v3709_v3 = vsel %vm10162_vm11, %v3707_v34, %v3708_v54  ;;  %v8926_v4 = vcombine.low %v1108_v59, %v1118_v27  ;;  %v1127_v52 = vrot.slane %v1126_v57, 4  ;;  %v1628_v16 = vrot.slane %v1510_v62, 5  ;;  %v2010_v15 = vld [vmem:[#allocation2 + $0x40] sm:$0xf]  ;;  %v302_v39 = vld [vmem:[#allocation2 + $0x50] sm:$0x1] }
  0x83   : > { %v9085_v6 = vcombine.low %v10426_v49, %v3709_v3  ;;  %v1141_v8 = vrot.slane %v1139_v60, 5  ;;  %v3184_v11 = vsel %vm10191_vm15, %v3179_v38, %v3183_v47  ;;  %v1136_v21 = vor.u32 %v1135_v7, %v1131_v51  ;;  %v2554_v46 = vld [vmem:[#allocation2 + $0x3c] sm:$0xe]  ;;  %v2555_v49 = vld [vmem:[#allocation2 + $0x40] sm:$0xf] }
  0x84   : > { %1439 = vrot.lane.b32.xlu0 %v8926_v4, %s10038_s11  ;;  %v1132_v12 = vsel %vm10191_vm15, %v1127_v52, %v1131_v51  ;;  %v9053_v20 = vcombine.low %v3174_v45, %v3184_v11  ;;  %v8943_v22 = vrot.slane %v1511_v40, 9  ;;  %v1632_v23 = vrot.slane %v1512_v5, 5  ;;  %v2011_v45 = vld [vmem:[#allocation2 + $0x44] sm:$0x1]  ;;  %v9842_v54 = vld [vmem:[#allocation2 + $0x3c] sm:$0xff]  }
  0x85   : > { %v1626_v26 = vsel %vm10162_vm11, %v8942_v9, %v1625_v14  ;;  %v1627_v28 = vrot.slane %v1625_v14, 4  ;;  %v1635_v29 = vrot.slane %v1513_v10, 5  ;;  %v253_v31 = vsel %vm10131_vm3, 0, %v252_v63  ;;  %v255_v27 = vld [vmem:[#allocation2 + $0x54] sm:$0x1] }
  0x86   : > { %3527 = vrot.lane.b32.xlu1 %v9053_v20, %s10044_s17  ;;  %v1137_v55 = vrot.slane %v1136_v21, 4  ;;  %v10453_v32 = vsel %vm10162_vm11, %v8943_v22, %v1632_v23  ;;  %v1634_v33 = vrot.slane %v1632_v23, 4  ;;  %254 = vst [vmem:[#allocation2 + $0x48] sm:$0x1] %v253_v31  ;;  %v455_v34 = vshrl.u32 %v345_v18, 16 }
  0x87   : > { %v1629_v35 = vsel %vm10162_vm11, %v1627_v28, %v1628_v16  ;;  %v458_v36 = vshll.u32 %v345_v18, 16  ;;  %v463_v37 = vshrl.u32 %v346_v19, 16  ;;  %v466_v38 = vshll.u32 %v346_v19, 16  ;;  %v2556_v63 = vld [vmem:[#allocation2 + $0x44] sm:$0x1] }
  0x88   : > { %v1142_v42 = vsel %vm10191_vm15, %v1137_v55, %v1141_v8  ;;  %v8958_v43 = vcombine.low %v1626_v26, %v1629_v35  ;;  %v1636_v58 = vsel %vm10162_vm11, %v1634_v33, %v1635_v29  ;;  %v457_v44 = vrot.slane %v455_v34, 7  ;;  %v347_v47 = vld [vmem:[%s10173_s9 + $0x30] sm:$0xf]  ;;  %v348_v3 = vld [vmem:[%s10173_s9 + $0x34] sm:$0xf] }
  0x89   : > { %v8927_v17 = vcombine.low %v1132_v12, %v1142_v42  ;;  %v10461_v50 = vrot.slane %v463_v37, 7  ;;  %v2142_v53 = vshrl.u32 %v2009_v24, 16  ;;  %v2145_v51 = vshll.u32 %v2009_v24, 16  ;;  %v258_v19 = vld [vmem:[#allocation2 + $0x60] sm:$0x1] }
  0x8a   : > { %3848 = vrot.lane.b32.xlu1 %v9085_v6, %s10042_s15  ;;  %1763 = vrot.lane.b32.xlu0 %v8958_v43, %s10037_s10  ;;  %v460_v56 = vor.u32 %v458_v36, %v457_v44  ;;  %v461_v57 = vrot.slane %v457_v44, 4  ;;  %v2151_v59 = vshll.u32 %v2010_v15, 16  ;;  %v8959_v30 = vcombine.low %v10453_v32, %v1636_v58  ;;  %v305_v6 = vld [vmem:[#allocation2 + $0x5c] sm:$0x1]  ;;  %v10479_v20 = vld [vmem:[%s10173_s9 + $0x38] sm:$0xf] }
  0x8b   : > { %v468_v60 = vor.u32 %v466_v38, %v10461_v50  ;;  %v2144_v61 = vrot.slane %v2142_v53, 4  ;;  %v2155_v62 = vshrl.u32 %v2010_v15, 16  ;;  %v2147_v4 = vrot.slane %v2145_v51, 5 }
  0x8c   : > { %v2153_v52 = vrot.slane %v2151_v59, 5  ;;  %v2161_v40 = vshll.u32 %v2011_v45, 16  ;;  %v303_v5 = vsel %vm10145_vm7, 0, %v302_v39  ;;  %v9006_v10 = vrot.slane %v2554_v46, 9 }
  0x8d   : > { %v469_v7 = vsel %vm10201_vm1, %v461_v57, %v468_v60  ;;  %v726_v8 = vld [vmem:[#allocation2 + $0x48] sm:$0xf]  ;;  %v2157_v9 = vrot.slane %v2155_v62, 4  ;;  %304 = vst [vmem:[#allocation2 + $0x50] sm:$0x1] %v303_v5  ;;  %v2668_v11 = vrot.slane %v2555_v49, 5  ;;  %v2148_v14 = vor.u32 %v2147_v4, %v2144_v61 }
  0x8e   : > { %1441 = vrot.lane.b32.xlu1 %v8927_v17, %s10038_s11  ;;  %1940 = vrot.lane.b32.xlu0 %v9842_v54, %s10039_s12  ;;  %v727_v12 = vsel %vm10183_vm14, %v460_v56, %v726_v8  ;;  %729 = vst.msk [vmem:[#allocation2 + $0x4c] sm:$0xf] %vm224_vm0, %v469_v7  ;;  %v2163_v16 = vrot.slane %v2161_v40, 5  ;;  %v2671_v18 = vrot.slane %v2556_v63, 5  ;;  %v256_v23 = vsel %vm10131_vm3, 0, %v255_v27 }
  0x8f   : > { %728 = vst [vmem:[#allocation2 + $0x48] sm:$0xf] %v727_v12  ;;  %v2158_v21 = vor.u32 %v2157_v9, %v2153_v52  ;;  %v2670_v22 = vrot.slane %v2668_v11, 4  ;;  %v470_v24 = vrot.slane %v10461_v50, 4  ;;  %v2149_v25 = vrot.slane %v2148_v14, 4 }
  0x90   : > { %257 = vst [vmem:[#allocation2 + $0x54] sm:$0x1] %v256_v23  ;;  %v472_v26 = vshrl.u32 %v347_v47, 16  ;;  %v480_v28 = vshrl.u32 %v348_v3, 16  ;;  %v475_v31 = vshll.u32 %v347_v47, 16  ;;  %v483_v15 = vshll.u32 %v348_v3, 16 }
  0x91   : > { %v2159_v29 = vrot.slane %v2158_v21, 4  ;;  %v306_v55 = vsel %vm10145_vm7, 0, %v305_v6  ;;  %v2154_v32 = vsel %vm10191_vm15, %v2149_v25, %v2153_v52  ;;  %v2669_v33 = vsel %vm10162_vm11, %v9006_v10, %v2668_v11 }
  0x92   : > { %1765 = vrot.lane.b32.xlu1 %v8959_v30, %s10037_s10  ;;  %v474_v34 = vrot.slane %v472_v26, 7  ;;  %v482_v35 = vrot.slane %v480_v28, 7  ;;  %307 = vst [vmem:[#allocation2 + $0x5c] sm:$0x1] %v306_v55  ;;  %v2672_v37 = vsel %vm10162_vm11, %v2670_v22, %v2671_v18  ;;  %v259_v38 = vsel %vm10131_vm3, 0, %v258_v19 }
  0x93   : > { %v2164_v36 = vsel %vm10191_vm15, %v2159_v29, %v2163_v16  ;;  %v489_v39 = vshrl.u32 %v10479_v20, 16  ;;  %260 = vst [vmem:[#allocation2 + $0x60] sm:$0x1] %v259_v38  ;;  %v492_v45 = vshll.u32 %v10479_v20, 16  ;;  %v9022_v56 = vcombine.low %v2669_v33, %v2672_v37 }
  0x94   : > { %v8990_v42 = vcombine.low %v2154_v32, %v2164_v36  ;;  %v730_v43 = vld [vmem:[#allocation2 + $0x50] sm:$0x1]  ;;  %v478_v58 = vrot.slane %v474_v34, 4  ;;  %v485_v44 = vor.u32 %v483_v15, %v482_v35  ;;  %v477_v57 = vor.u32 %v475_v31, %v474_v34 }
  0x95   : > { %v731_v46 = vsel %vm10131_vm3, %v470_v24, %v730_v43  ;;  %v2013_v49 = vld [vmem:[#allocation2 + $0x4c] sm:$0xf]  ;;  %v487_v5 = vrot.slane %v482_v35, 4  ;;  %v10507_v8 = vrot.slane %v489_v39, 7  ;;  %vm2525_vm13 = vcmask 162944  }
  0x96   : > { %v2558_v17 = vld [vmem:[#allocation2 + $0x4c] sm:$0xf]  ;;  %2485 = vrot.lane.b32.xlu0 %v8990_v42, %s10043_s16  ;;  %732 = vst [vmem:[#allocation2 + $0x50] sm:$0x1] %v731_v46  ;;  %v2012_v53 = vld [vmem:[#allocation2 + $0x48] sm:$0xf]  ;;  %v486_v51 = vsel %vm10201_vm1, %v478_v58, %v485_v44 }
  0x97   : > { %v9843_v50 = vld [vmem:[#allocation2 + $0x48] sm:$0xff]   ;;  %v2175_v54 = vshll.u32 %v2013_v49, 16  ;;  %v2166_v59 = vshrl.u32 %v2012_v53, 16  ;;  %v2169_v27 = vshll.u32 %v2012_v53, 16  ;;  %v2179_v30 = vshrl.u32 %v2013_v49, 16 }
  0x98   : > { %v2557_v60 = vld [vmem:[#allocation2 + $0x48] sm:$0xe]  ;;  %v2675_v61 = vrot.slane %v2558_v17, 5  ;;  %736 = vst.msk [vmem:[#allocation2 + $0x58] sm:$0xf] %vm224_vm0, %v486_v51  ;;  %1942 = vrot.lane.b32.xlu1 %v9843_v50, %s10039_s12  ;;  %vm13381_vm5 = vcmask 195744  }
  0x99   : > { %v2177_v62 = vrot.slane %v2175_v54, 5  ;;  %v9007_v63 = vrot.slane %v2557_v60, 9  ;;  %v2168_v47 = vrot.slane %v2166_v59, 4  ;;  %v2171_v3 = vrot.slane %v2169_v27, 5  ;;  %v9844_v40 = vld [vmem:[#allocation2 + $0x48] sm:$0xff]  }
  0x9a   : > { %v2181_v4 = vrot.slane %v2179_v30, 4  ;;  %v2677_v52 = vrot.slane %v2675_v61, 4  ;;  %2806 = vrot.lane.b32.xlu0 %v9022_v56, %s10041_s14  ;;  %v733_v6 = vld [vmem:[#allocation2 + $0x54] sm:$0xf]  ;;  %v3053_v7 = vld [vmem:[#allocation2 + $0x48] sm:$0xf]  ;;  %v10518_v36 = vpop.permute.xlu0 %1431  ;;  %v10527_v56 = vor.u32 %v492_v45, %v10507_v8 }
  0x9b   : > { %v2172_v9 = vor.u32 %v2171_v3, %v2168_v47  ;;  %v734_v11 = vsel %vm10183_vm14, %v477_v57, %v733_v6  ;;  %v3054_v12 = vld [vmem:[#allocation2 + $0x4c] sm:$0xf]  ;;  %v3186_v14 = vshrl.u32 %v3053_v7, 16  ;;  %v737_v16 = vld [vmem:[#allocation2 + $0x5c] sm:$0x1]  ;;  %v3189_v18 = vshll.u32 %v3053_v7, 16  ;;  %v10529_v57 = vpop.permute.xlu1 %1755 }
  0x9c   : > { %v2182_v10 = vor.u32 %v2181_v4, %v2177_v62  ;;  %735 = vst [vmem:[#allocation2 + $0x54] sm:$0xf] %v734_v11  ;;  %v3195_v19 = vshll.u32 %v3054_v12, 16  ;;  %v3199_v21 = vshrl.u32 %v3054_v12, 16  ;;  %v738_v22 = vsel %vm10131_vm3, %v487_v5, %v737_v16  ;;  %v3598_v43 = vld [vmem:[#allocation2 + $0x48] sm:$0xe] }
  0x9d   : > { %v2014_v23 = vld [vmem:[#allocation2 + $0x50] sm:$0x1]  ;;  %v2173_v24 = vrot.slane %v2172_v9, 4  ;;  %739 = vst [vmem:[#allocation2 + $0x5c] sm:$0x1] %v738_v22  ;;  %v2676_v29 = vsel %vm10162_vm11, %v9007_v63, %v2675_v61  ;;  %v3188_v32 = vrot.slane %v3186_v14, 4 }
  0x9e   : > { %v2183_v25 = vrot.slane %v2182_v10, 4  ;;  %v2559_v26 = vld [vmem:[#allocation2 + $0x50] sm:$0x1]  ;;  %v2185_v28 = vshll.u32 %v2014_v23, 16  ;;  %2984 = vrot.lane.b32.xlu0 %v9844_v40, %s10040_s13  ;;  %v3191_v33 = vrot.slane %v3189_v18, 5  ;;  %v3197_v34 = vrot.slane %v3195_v19, 5 }
  0x9f   : > { %v2678_v31 = vrot.slane %v2559_v26, 5  ;;  %v3055_v15 = vld [vmem:[#allocation2 + $0x50] sm:$0x1]  ;;  %v2178_v55 = vsel %vm10191_vm15, %v2173_v24, %v2177_v62  ;;  %v3057_v35 = vld [vmem:[#allocation2 + $0x58] sm:$0xf]  ;;  %v3201_v39 = vrot.slane %v3199_v21, 4 }
  0xa0   : > { %v2187_v37 = vrot.slane %v2185_v28, 5  ;;  %v3205_v42 = vshll.u32 %v3055_v15, 16  ;;  %v3192_v58 = vor.u32 %v3191_v33, %v3188_v32  ;;  %v3219_v44 = vshll.u32 %v3057_v35, 16  ;;  %v3599_v53 = vld [vmem:[#allocation2 + $0x4c] sm:$0xf] }
  0xa1   : > { %v2679_v38 = vsel %vm10162_vm11, %v2677_v52, %v2678_v31  ;;  %v3223_v46 = vshrl.u32 %v3057_v35, 16  ;;  %v3202_v17 = vor.u32 %v3201_v39, %v3197_v34  ;;  %v3600_v54 = vld [vmem:[#allocation2 + $0x50] sm:$0x1]  ;;  %v9070_v60 = vrot.slane %v3598_v43, 9  ;;  %v3602_v61 = vld [vmem:[#allocation2 + $0x58] sm:$0xf] }
  0xa2   : > { %v2188_v49 = vsel %vm10191_vm15, %v2183_v25, %v2187_v37  ;;  %v3207_v50 = vrot.slane %v3205_v42, 5  ;;  %v9023_v59 = vcombine.low %v2676_v29, %v2679_v38  ;;  %v3193_v27 = vrot.slane %v3192_v58, 4  ;;  %v966_v52 = vld [vmem:[#allocation2 + $0x48] sm:$0xf]  ;;  %v967_v26 = vld [vmem:[#allocation2 + $0x4c] sm:$0xf] }
  0xa3   : > { %v8991_v51 = vcombine.low %v2178_v55, %v2188_v49  ;;  %v3056_v30 = vld [vmem:[#allocation2 + $0x54] sm:$0xf]  ;;  %v3203_v62 = vrot.slane %v3202_v17, 4  ;;  %v3221_v4 = vrot.slane %v3219_v44, 5  ;;  %v3225_v45 = vrot.slane %v3223_v46, 4  ;;  %v10540_v28 = vpop.permute.xlu1 %1934 }
  0xa4   : > { %v3058_v63 = vld [vmem:[#allocation2 + $0x5c] sm:$0x1]  ;;  %v3210_v47 = vshrl.u32 %v3056_v30, 16  ;;  %v3213_v3 = vshll.u32 %v3056_v30, 16  ;;  %v3198_v20 = vsel %vm10191_vm15, %v3193_v27, %v3197_v34  ;;  %v3712_v5 = vrot.slane %v3599_v53, 5  ;;  %v9845_v29 = vld [vmem:[#allocation2 + $0x54] sm:$0xff]  }
  0xa5   : > { %2487 = vrot.lane.b32.xlu1 %v8991_v51, %s10043_s16  ;;  %v3229_v40 = vshll.u32 %v3058_v63, 16  ;;  %v3601_v6 = vld [vmem:[#allocation2 + $0x54] sm:$0xe]  ;;  %v10534_v7 = vpop.permute.xlu0 %1932  ;;  %v3208_v9 = vsel %vm10191_vm15, %v3203_v62, %v3207_v50  ;;  %v3715_v12 = vrot.slane %v3600_v54, 5  ;;  %v3603_v14 = vld [vmem:[#allocation2 + $0x5c] sm:$0x1]  ;;  %v3226_v18 = vor.u32 %v3225_v45, %v3221_v4 }
  0xa6   : > { %v3212_v10 = vrot.slane %v3210_v47, 4  ;;  %v3215_v11 = vrot.slane %v3213_v3, 5  ;;  %v9054_v16 = vcombine.low %v3198_v20, %v3208_v9  ;;  %v3713_v21 = vsel %vm10162_vm11, %v9070_v60, %v3712_v5  ;;  %v968_v39 = vld [vmem:[#allocation2 + $0x50] sm:$0x1]  ;;  %v969_v46 = vld [vmem:[#allocation2 + $0x54] sm:$0xf] }
  0xa7   : > { %v3231_v19 = vrot.slane %v3229_v40, 5  ;;  %v3714_v23 = vrot.slane %v3712_v5, 4  ;;  %v9071_v24 = vrot.slane %v3601_v6, 9  ;;  %v3719_v25 = vrot.slane %v3602_v61, 5  ;;  %v970_v49 = vld [vmem:[#allocation2 + $0x58] sm:$0xf] }
  0xa8   : > { %v3216_v22 = vor.u32 %v3215_v11, %v3212_v10  ;;  %3529 = vrot.lane.b32.xlu0 %v9054_v16, %s10044_s17  ;;  %v3227_v31 = vrot.slane %v3226_v18, 4  ;;  %v3722_v15 = vrot.slane %v3603_v14, 5  ;;  %v1144_v55 = vshrl.u32 %v966_v52, 16  ;;  %v971_v51 = vld [vmem:[#allocation2 + $0x5c] sm:$0x1]  ;;  %v10558_v20 = vpop.permute.xlu1 %2978 }
  0xa9   : > { %2808 = vrot.lane.b32.xlu1 %v9023_v59, %s10041_s14  ;;  %v1147_v32 = vshll.u32 %v966_v52, 16  ;;  %v10544_v33 = vpop.permute.xlu0 %2976  ;;  %v3716_v35 = vsel %vm10162_vm11, %v3714_v23, %v3715_v12  ;;  %v3720_v37 = vsel %vm10162_vm11, %v9071_v24, %v3719_v25  ;;  %v3721_v38 = vrot.slane %v3719_v25, 4  ;;  %v1514_v59 = vld [vmem:[#allocation2 + $0x48] sm:$0xe]  ;;  %v1515_v62 = vld [vmem:[#allocation2 + $0x4c] sm:$0xf] }
  0xaa   : > { %v3217_v34 = vrot.slane %v3216_v22, 4  ;;  %v3232_v42 = vsel %vm10191_vm15, %v3227_v31, %v3231_v19  ;;  %v9086_v43 = vcombine.low %v3713_v21, %v3716_v35  ;;  %v1146_v58 = vrot.slane %v1144_v55, 4  ;;  %v1516_v52 = vld [vmem:[#allocation2 + $0x50] sm:$0x1]  ;;  %v1517_v10 = vld [vmem:[#allocation2 + $0x54] sm:$0xe] }
  0xab   : > { %v1149_v44 = vrot.slane %v1147_v32, 5  ;;  %v3723_v50 = vsel %vm10162_vm11, %v3721_v38, %v3722_v15  ;;  %v1153_v53 = vshll.u32 %v967_v26, 16  ;;  %v1157_v54 = vshrl.u32 %v967_v26, 16  ;;  %v1518_v18 = vld [vmem:[#allocation2 + $0x58] sm:$0xf] }
  0xac   : > { %v3222_v17 = vsel %vm10191_vm15, %v3217_v34, %v3221_v4  ;;  %3850 = vrot.lane.b32.xlu0 %v9086_v43, %s10042_s15  ;;  %v9087_v30 = vcombine.low %v3720_v37, %v3723_v50  ;;  %v1163_v61 = vshll.u32 %v968_v39, 16  ;;  %v1168_v3 = vshrl.u32 %v969_v46, 16  ;;  %v1519_v55 = vld [vmem:[#allocation2 + $0x5c] sm:$0x1]  ;;  %v740_v50 = vld [vmem:[#allocation2 + $0x60] sm:$0xf] }
  0xad   : > { %2986 = vrot.lane.b32.xlu1 %v9845_v29, %s10040_s13  ;;  %v9055_v27 = vcombine.low %v3222_v17, %v3232_v42  ;;  %v1150_v60 = vor.u32 %v1149_v44, %v1146_v58  ;;  %v1155_v63 = vrot.slane %v1153_v53, 5  ;;  %v1159_v47 = vrot.slane %v1157_v54, 4  ;;  %v10560_v45 = vpop.permute.xlu0 %2798  ;;  %v350_v42 = vld [vmem:[%s10173_s9 + $0x3c] sm:$0xf]  ;;  %v2015_v53 = vld [vmem:[#allocation2 + $0x54] sm:$0xf] }
  0xae   : > { %v1171_v4 = vshll.u32 %v969_v46, 16  ;;  %v1165_v5 = vrot.slane %v1163_v61, 5  ;;  %v1177_v6 = vshll.u32 %v970_v49, 16  ;;  %v1181_v9 = vshrl.u32 %v970_v49, 16  ;;  %v10570_v43 = vpop.permute.xlu1 %1757  ;;  %v308_v54 = vld [vmem:[#allocation2 + $0x68] sm:$0x1] }
  0xaf   : > { %v1151_v40 = vrot.slane %v1150_v60, 4  ;;  %v1160_v11 = vor.u32 %v1159_v47, %v1155_v63  ;;  %v1170_v12 = vrot.slane %v1168_v3, 4  ;;  %v1187_v16 = vshll.u32 %v971_v51, 16  ;;  %v2016_v61 = vld [vmem:[#allocation2 + $0x58] sm:$0xf] }
  0xb0   : > { %v1173_v14 = vrot.slane %v1171_v4, 5  ;;  %v1179_v21 = vrot.slane %v1177_v6, 5  ;;  %v1183_v22 = vrot.slane %v1181_v9, 4  ;;  %v8944_v23 = vrot.slane %v1514_v59, 9  ;;  %v10585_v4 = vld [vmem:[#allocation2 + $0x54] sm:$0xe] }
  0xb1   : > { %3531 = vrot.lane.b32.xlu1 %v9055_v27, %s10044_s17  ;;  %v1156_v19 = vsel %vm10191_vm15, %v1151_v40, %v1155_v63  ;;  %v1161_v24 = vrot.slane %v1160_v11, 4  ;;  %v1189_v26 = vrot.slane %v1187_v16, 5  ;;  %v1639_v29 = vrot.slane %v1515_v62, 5  ;;  %v10572_v58 = vpop.permute.xlu0 %3842  ;;  %v10594_v9 = vld [vmem:[#allocation2 + $0x5c] sm:$0x1]  ;;  %v9851_v11 = vld [vmem:[#allocation2 + $0xc] sm:$0xff]  }
  0xb2   : > { %v1174_v25 = vor.u32 %v1173_v14, %v1170_v12  ;;  %v1184_v31 = vor.u32 %v1183_v22, %v1179_v21  ;;  %v1642_v15 = vrot.slane %v1516_v52, 5  ;;  %v8945_v32 = vrot.slane %v1517_v10, 9  ;;  %v10587_v52 = vld [vmem:[#allocation2 + $0x58] sm:$0xf]  ;;  %v9848_v10 = vld [vmem:[#allocation2] sm:$0xff]   ;;  %933 = vst.msk [vmem:[#allocation3 + $0x8] sm:$0xff] %vm13380_vm8, %v9851_v11 }
  0xb3   : > { %v1646_v34 = vrot.slane %v1518_v18, 5  ;;  %v1166_v35 = vsel %vm10191_vm15, %v1161_v24, %v1165_v5  ;;  %v1640_v38 = vsel %vm10162_vm11, %v8944_v23, %v1639_v29  ;;  %v1641_v39 = vrot.slane %v1639_v29, 4  ;;  %v9856_v12 = vld [vmem:[#allocation2 + $0x18] sm:$0xff]   ;;  %932 = vst.msk [vmem:[#allocation3] sm:$0xff] %vm13380_vm8, %v9848_v10 }
  0xb4   : > { %v1175_v37 = vrot.slane %v1174_v25, 4  ;;  %v8928_v44 = vcombine.low %v1156_v19, %v1166_v35  ;;  %v1185_v46 = vrot.slane %v1184_v31, 4  ;;  %v1649_v27 = vrot.slane %v1519_v55, 5  ;;  %v261_v25 = vld [vmem:[#allocation2 + $0x6c] sm:$0x1]  ;;  %v9863_v31 = vld [vmem:[#allocation2 + $0x30] sm:$0xff]  }
  0xb5   : > { %3852 = vrot.lane.b32.xlu1 %v9087_v30, %s10042_s15  ;;  %v1647_v49 = vsel %vm10162_vm11, %v8945_v32, %v1646_v34  ;;  %v1648_v17 = vrot.slane %v1646_v34, 4  ;;  %v1643_v59 = vsel %vm10162_vm11, %v1641_v39, %v1642_v15  ;;  %v495_v60 = vrot.slane %v10507_v8, 4  ;;  %v2017_v30 = vld [vmem:[#allocation2 + $0x5c] sm:$0x1]  ;;  %v9846_v55 = vld [vmem:[#allocation2 + $0x54] sm:$0xff]   ;;  %934 = vst.msk [vmem:[#allocation3 + $0x10] sm:$0xff] %vm13380_vm8, %v9856_v12 }
  0xb6   : > { %v1180_v51 = vsel %vm10191_vm15, %v1175_v37, %v1179_v21  ;;  %1443 = vrot.lane.b32.xlu0 %v8928_v44, %s10038_s11  ;;  %v1190_v62 = vsel %vm10191_vm15, %v1185_v46, %v1189_v26  ;;  %v8960_v63 = vcombine.low %v1640_v38, %v1643_v59  ;;  %v497_v47 = vshrl.u32 %v350_v42, 16  ;;  %v9857_v21 = vld [vmem:[#allocation2 + $0x24] sm:$0xff]   ;;  %v10601_v26 = vpop.permute.xlu1 %2800  ;;  %v9864_v15 = vld [vmem:[#allocation2 + $0x3c] sm:$0xff]   ;;  %936 = vst.msk [vmem:[#allocation3 + $0x20] sm:$0xff] %vm13380_vm8, %v9863_v31 }
  0xb7   : > { %v500_v3 = vshll.u32 %v350_v42, 16  ;;  %v8929_v40 = vcombine.low %v1180_v51, %v1190_v62  ;;  %v1650_v5 = vsel %vm10162_vm11, %v1648_v17, %v1649_v27  ;;  %v741_v8 = vsel %vm10183_vm14, %v10527_v56, %v740_v50  ;;  %v351_v38 = vld [vmem:[%s10173_s9 + $0x40] sm:$0xf]  ;;  %935 = vst.msk [vmem:[#allocation3 + $0x18] sm:$0xff] %vm13380_vm8, %v9857_v21  ;;  %937 = vst.msk [vmem:[#allocation3 + $0x28] sm:$0xff] %vm13380_vm8, %v9864_v15 }
  0xb8   : > { %v2190_v6 = vshrl.u32 %v2015_v53, 16  ;;  %v8961_v14 = vcombine.low %v1647_v49, %v1650_v5  ;;  %v10596_v16 = vrot.slane %v497_v47, 7  ;;  %742 = vst [vmem:[#allocation2 + $0x60] sm:$0xf] %v741_v8  ;;  %v2193_v18 = vshll.u32 %v2015_v53, 16  ;;  %1480 = vst.msk [vmem:[#allocation3] sm:$0xff] %vm1479_vm9, %v10518_v36 }
  0xb9   : > { %v2199_v19 = vshll.u32 %v2016_v61, 16  ;;  %1445 = vrot.lane.b32.xlu1 %v8929_v40, %s10038_s11  ;;  %v2203_v23 = vshrl.u32 %v2016_v61, 16  ;;  %v2209_v24 = vshll.u32 %v2017_v30, 16  ;;  %v309_v56 = vsel %vm10145_vm7, 0, %v308_v54  ;;  %v1434_v29 = vpop.permute.xlu0 %1433  ;;  %v352_v49 = vld [vmem:[%s10173_s9 + $0x44] sm:$0xf] }
  0xba   : > { %v2192_v22 = vrot.slane %v2190_v6, 4  ;;  %1767 = vrot.lane.b32.xlu0 %v8960_v63, %s10037_s10  ;;  %v502_v32 = vor.u32 %v500_v3, %v10596_v16  ;;  %v504_v34 = vrot.slane %v10596_v16, 4  ;;  %v2195_v35 = vrot.slane %v2193_v18, 5  ;;  %310 = vst [vmem:[#allocation2 + $0x68] sm:$0x1] %v309_v56  ;;  %1481 = vst.msk [vmem:[#allocation3 + $0x8] sm:$0xff] %vm1479_vm9, %v1434_v29  ;;  %v10627_v47 = vpop.permute.xlu1 %3844 }
  0xbb   : > { %v2201_v37 = vrot.slane %v2199_v19, 5  ;;  %v2205_v39 = vrot.slane %v2203_v23, 4  ;;  %v2211_v42 = vrot.slane %v2209_v24, 5  ;;  %v9008_v44 = vrot.slane %v10585_v4, 9  ;;  %1804 = vst.msk [vmem:[#allocation3] sm:$0xff] %vm13383_vm10, %v10529_v57  ;;  %1805 = vst.msk [vmem:[#allocation3 + $0x8] sm:$0xff] %vm13383_vm10, %v10570_v43 }
  0xbc   : > { %v2682_v46 = vrot.slane %v10587_v52, 5  ;;  %v503_v17 = vsel %vm10201_vm1, %v495_v60, %v502_v32  ;;  %v2196_v50 = vor.u32 %v2195_v35, %v2192_v22  ;;  %v2685_v53 = vrot.slane %v10594_v9, 5  ;;  %1981 = vst.msk [vmem:[#allocation3] sm:$0xff] %vm13382_vm12, %v10534_v7  ;;  %1982 = vst.msk [vmem:[#allocation3 + $0x8] sm:$0xff] %vm13382_vm12, %v10540_v28 }
  0xbd   : > { %1769 = vrot.lane.b32.xlu1 %v8961_v14, %s10037_s10  ;;  %743 = vst.msk [vmem:[#allocation2 + $0x64] sm:$0xf] %vm224_vm0, %v503_v17  ;;  %v2206_v54 = vor.u32 %v2205_v39, %v2201_v37  ;;  %v262_v27 = vsel %vm10131_vm3, 0, %v261_v25  ;;  %v506_v60 = vshrl.u32 %v351_v38, 16  ;;  %v509_v61 = vshll.u32 %v351_v38, 16 }
  0xbe   : > { %v2684_v51 = vrot.slane %v2682_v46, 4  ;;  %1944 = vrot.lane.b32.xlu0 %v9846_v55, %s10039_s12  ;;  %v2197_v59 = vrot.slane %v2196_v50, 4  ;;  %263 = vst [vmem:[#allocation2 + $0x6c] sm:$0x1] %v262_v27  ;;  %v514_v63 = vshrl.u32 %v352_v49, 16  ;;  %v2683_v40 = vsel %vm10162_vm11, %v9008_v44, %v2682_v46 }
  0xbf   : > { %v2207_v30 = vrot.slane %v2206_v54, 4  ;;  %v2018_v62 = vld [vmem:[#allocation2 + $0x60] sm:$0xf]  ;;  %v508_v9 = vrot.slane %v506_v60, 7  ;;  %v517_v22 = vshll.u32 %v352_v49, 16  ;;  %vm3024_vm2 = vcmask 228544  }
  0xc0   : > { %v10629_v3 = vpop.permute.xlu0 %2477  ;;  %v2202_v4 = vsel %vm10191_vm15, %v2197_v59, %v2201_v37  ;;  %v2214_v52 = vshrl.u32 %v2018_v62, 16  ;;  %v2217_v36 = vshll.u32 %v2018_v62, 16  ;;  %v2686_v6 = vsel %vm10162_vm11, %v2684_v51, %v2685_v53  ;;  %v2563_v18 = vld [vmem:[#allocation2 + $0x60] sm:$0xe]  ;;  %v311_v60 = vld [vmem:[#allocation2 + $0x74] sm:$0x1] }
  0xc1   : > { %v2212_v5 = vsel %vm10191_vm15, %v2207_v30, %v2211_v42  ;;  %v744_v8 = vld [vmem:[#allocation2 + $0x68] sm:$0x1]  ;;  %v10639_v10 = vrot.slane %v514_v63, 7  ;;  %v511_v19 = vor.u32 %v509_v61, %v508_v9  ;;  %v512_v21 = vrot.slane %v508_v9, 4  ;;  %v3059_v23 = vld [vmem:[#allocation2 + $0x60] sm:$0xf] }
  0xc2   : > { %v8992_v11 = vcombine.low %v2202_v4, %v2212_v5  ;;  %v745_v12 = vsel %vm10131_vm3, %v504_v34, %v744_v8  ;;  %v2216_v14 = vrot.slane %v2214_v52, 4  ;;  %v2219_v16 = vrot.slane %v2217_v36, 5  ;;  %v10649_v34 = vpop.permute.xlu1 %2479  ;;  %2526 = vst.msk [vmem:[#allocation3] sm:$0xff] %vm2525_vm13, %v10629_v3 }
  0xc3   : > { %746 = vst [vmem:[#allocation2 + $0x68] sm:$0x1] %v745_v12  ;;  %v9024_v29 = vcombine.low %v2683_v40, %v2686_v6  ;;  %v519_v32 = vor.u32 %v517_v22, %v10639_v10  ;;  %v9009_v37 = vrot.slane %v2563_v18, 9  ;;  %v3234_v50 = vshrl.u32 %v3059_v23, 16  ;;  %v3604_v40 = vld [vmem:[#allocation2 + $0x60] sm:$0xe] }
  0xc4   : > { %v9847_v24 = vld [vmem:[#allocation2 + $0x60] sm:$0xff]   ;;  %2489 = vrot.lane.b32.xlu0 %v8992_v11, %s10043_s16  ;;  %v2220_v25 = vor.u32 %v2219_v16, %v2216_v14  ;;  %v3237_v53 = vshll.u32 %v3059_v23, 16  ;;  %2527 = vst.msk [vmem:[#allocation3 + $0x8] sm:$0xff] %vm2525_vm13, %v10649_v34  ;;  %vm3569_vm6 = vcmask 261344   ;;  %vm3890_vm4 = vcmask 294144  }
  0xc5   : > { %v2019_v56 = vld [vmem:[#allocation2 + $0x64] sm:$0xf]  ;;  %1946 = vrot.lane.b32.xlu1 %v9847_v24, %s10039_s12  ;;  %v747_v39 = vld [vmem:[#allocation2 + $0x6c] sm:$0xf]  ;;  %v520_v46 = vsel %vm10201_vm1, %v512_v21, %v519_v32  ;;  %v3236_v36 = vrot.slane %v3234_v50, 4  ;;  %v9072_v24 = vrot.slane %v3604_v40, 9 }
  0xc6   : > { %v2223_v31 = vshll.u32 %v2019_v56, 16  ;;  %v2227_v15 = vshrl.u32 %v2019_v56, 16  ;;  %v2564_v55 = vld [vmem:[#allocation2 + $0x64] sm:$0xf]  ;;  %v748_v57 = vsel %vm10183_vm14, %v511_v19, %v747_v39  ;;  %v2221_v49 = vrot.slane %v2220_v25, 4  ;;  %v10668_v5 = vpop.permute.xlu1 %3523  ;;  %2848 = vst.msk [vmem:[#allocation3 + $0x8] sm:$0xff] %vm13381_vm5, %v10601_v26 }
  0xc7   : > { %v10651_v35 = vpop.permute.xlu0 %3521  ;;  %v2689_v38 = vrot.slane %v2564_v55, 5  ;;  %v3060_v43 = vld [vmem:[#allocation2 + $0x64] sm:$0xf]  ;;  %749 = vst [vmem:[#allocation2 + $0x6c] sm:$0xf] %v748_v57  ;;  %v3239_v8 = vrot.slane %v3237_v53, 5 }
  0xc8   : > { %v2225_v42 = vrot.slane %v2223_v31, 5  ;;  %v2229_v44 = vrot.slane %v2227_v15, 4  ;;  %2810 = vrot.lane.b32.xlu0 %v9024_v29, %s10041_s14  ;;  %v9849_v17 = vld [vmem:[#allocation2 + $0x60] sm:$0xff]   ;;  %750 = vst.msk [vmem:[#allocation2 + $0x70] sm:$0xf] %vm224_vm0, %v520_v46  ;;  %v3243_v59 = vshll.u32 %v3060_v43, 16 }
  0xc9   : > { %v2691_v51 = vrot.slane %v2689_v38, 4  ;;  %v3247_v27 = vshrl.u32 %v3060_v43, 16  ;;  %v10666_v30 = vsel %vm10162_vm11, %v9009_v37, %v2689_v38  ;;  %v3605_v12 = vld [vmem:[#allocation2 + $0x64] sm:$0xf]  ;;  %v312_v19 = vsel %vm10145_vm7, 0, %v311_v60  ;;  %2847 = vst.msk [vmem:[#allocation3] sm:$0xff] %vm13381_vm5, %v10560_v45 }
  0xca   : > { %v2230_v54 = vor.u32 %v2229_v44, %v2225_v42  ;;  %v2020_v61 = vld [vmem:[#allocation2 + $0x68] sm:$0x1]  ;;  %v3245_v6 = vrot.slane %v3243_v59, 5  ;;  %v2226_v14 = vsel %vm10191_vm15, %v2221_v49, %v2225_v42  ;;  %v3240_v21 = vor.u32 %v3239_v8, %v3236_v36  ;;  %313 = vst [vmem:[#allocation2 + $0x74] sm:$0x1] %v312_v19  ;;  %3026 = vst.msk [vmem:[#allocation3 + $0x8] sm:$0xff] %vm3024_vm2, %v10558_v20 }
  0xcb   : > { %v2565_v7 = vld [vmem:[#allocation2 + $0x68] sm:$0x1]  ;;  %v1436_v62 = vpop.permute.xlu0 %1435  ;;  %v2233_v4 = vshll.u32 %v2020_v61, 16  ;;  %v3249_v9 = vrot.slane %v3247_v27, 4  ;;  %v521_v29 = vrot.slane %v10639_v10, 4  ;;  %v3726_v15 = vrot.slane %v3605_v12, 5 }
  0xcc   : > { %v3061_v28 = vld [vmem:[#allocation2 + $0x68] sm:$0x1]  ;;  %v2231_v63 = vrot.slane %v2230_v54, 4  ;;  %v2692_v52 = vrot.slane %v2565_v7, 5  ;;  %1482 = vst.msk [vmem:[#allocation3 + $0x10] sm:$0xff] %vm1479_vm9, %v1436_v62  ;;  %2988 = vrot.lane.b32.xlu0 %v9849_v17, %s10040_s13  ;;  %v3241_v38 = vrot.slane %v3240_v21, 4 }
  0xcd   : > { %v3253_v11 = vshll.u32 %v3061_v28, 16  ;;  %v2235_v16 = vrot.slane %v2233_v4, 5  ;;  %v3250_v22 = vor.u32 %v3249_v9, %v3245_v6  ;;  %v3606_v31 = vld [vmem:[#allocation2 + $0x68] sm:$0x1]  ;;  %v972_v46 = vld [vmem:[#allocation2 + $0x60] sm:$0xf]  ;;  %v3727_v54 = vsel %vm10162_vm11, %v9072_v24, %v3726_v15 }
  0xce   : > { %v2693_v18 = vsel %vm10162_vm11, %v2691_v51, %v2692_v52  ;;  %v3062_v42 = vld [vmem:[#allocation2 + $0x6c] sm:$0xf]  ;;  %v3246_v50 = vsel %vm10191_vm15, %v3241_v38, %v3245_v6  ;;  %v3728_v51 = vrot.slane %v3726_v15, 4  ;;  %v973_v27 = vld [vmem:[#allocation2 + $0x64] sm:$0xf]  ;;  %v3729_v4 = vrot.slane %v3606_v31, 5 }
  0xcf   : > { %v3255_v23 = vrot.slane %v3253_v11, 5  ;;  %v1760_v56 = vpop.permute.xlu0 %1759  ;;  %v2236_v25 = vsel %vm10191_vm15, %v2231_v63, %v2235_v16  ;;  %v9025_v37 = vcombine.low %v10666_v30, %v2693_v18  ;;  %v3251_v39 = vrot.slane %v3250_v22, 4  ;;  %v3063_v44 = vld [vmem:[#allocation2 + $0x70] sm:$0xf]  ;;  %v3607_v10 = vld [vmem:[#allocation2 + $0x6c] sm:$0xe] }
  0xd0   : > { %1806 = vst.msk [vmem:[#allocation3 + $0x10] sm:$0xff] %vm13383_vm10, %v1760_v56  ;;  %v8993_v32 = vcombine.low %v2226_v14, %v2236_v25  ;;  %v3258_v57 = vshrl.u32 %v3062_v42, 16  ;;  %v3261_v43 = vshll.u32 %v3062_v42, 16  ;;  %v3267_v49 = vshll.u32 %v3063_v44, 16  ;;  %v3608_v59 = vld [vmem:[#allocation2 + $0x70] sm:$0xf] }
  0xd1   : > { %v1438_v55 = vpop.permute.xlu1 %1437  ;;  %v3271_v17 = vshrl.u32 %v3063_v44, 16  ;;  %v3256_v53 = vsel %vm10191_vm15, %v3251_v39, %v3255_v23  ;;  %v9073_v52 = vrot.slane %v3607_v10, 9  ;;  %v3733_v36 = vrot.slane %v3608_v59, 5  ;;  %v974_v40 = vld [vmem:[#allocation2 + $0x68] sm:$0x1]  ;;  %v9850_v8 = vld [vmem:[#allocation2 + $0x6c] sm:$0xff]  }
  0xd2   : > { %1483 = vst.msk [vmem:[#allocation3 + $0x18] sm:$0xff] %vm1479_vm9, %v1438_v55  ;;  %2491 = vrot.lane.b32.xlu1 %v8993_v32, %s10043_s16  ;;  %v9056_v61 = vcombine.low %v3246_v50, %v3256_v53  ;;  %v3260_v7 = vrot.slane %v3258_v57, 4  ;;  %v3263_v30 = vrot.slane %v3261_v43, 5  ;;  %v10691_v28 = vrot.slane %v3267_v49, 5  ;;  %v751_v6 = vld [vmem:[#allocation2 + $0x74] sm:$0x1] }
  0xd3   : > { %v1937_v60 = vpop.permute.xlu0 %1936  ;;  %v3273_v63 = vrot.slane %v3271_v17, 4  ;;  %v1192_v11 = vshrl.u32 %v972_v46, 16  ;;  %v1195_v12 = vshll.u32 %v972_v46, 16  ;;  %v1201_v14 = vshll.u32 %v973_v27, 16  ;;  %v975_v22 = vld [vmem:[#allocation2 + $0x6c] sm:$0xf] }
  0xd4   : > { %1983 = vst.msk [vmem:[#allocation3 + $0x10] sm:$0xff] %vm13382_vm12, %v1937_v60  ;;  %3533 = vrot.lane.b32.xlu0 %v9056_v61, %s10044_s17  ;;  %v3264_v9 = vor.u32 %v3263_v30, %v3260_v7  ;;  %v752_v16 = vsel %vm10131_vm3, %v521_v29, %v751_v6  ;;  %v3730_v19 = vsel %vm10162_vm11, %v3728_v51, %v3729_v4  ;;  %v1520_v23 = vld [vmem:[#allocation2 + $0x60] sm:$0xe]  ;;  %v3735_v25 = vrot.slane %v3733_v36, 4  ;;  %v976_v15 = vld [vmem:[#allocation2 + $0x70] sm:$0xf] }
  0xd5   : > { %v1762_v62 = vpop.permute.xlu1 %1761  ;;  %v3274_v18 = vor.u32 %v3273_v63, %v10691_v28  ;;  %v10704_v21 = vsel %vm10162_vm11, %v9073_v52, %v3733_v36  ;;  %753 = vst [vmem:[#allocation2 + $0x74] sm:$0x1] %v752_v16  ;;  %v9088_v56 = vcombine.low %v3727_v54, %v3730_v19  ;;  %v1194_v31 = vrot.slane %v1192_v11, 4  ;;  %v1521_v38 = vld [vmem:[#allocation2 + $0x64] sm:$0xf]  ;;  %3025 = vst.msk [vmem:[#allocation3] sm:$0xff] %vm3024_vm2, %v10544_v33 }
  0xd6   : > { %1807 = vst.msk [vmem:[#allocation3 + $0x18] sm:$0xff] %vm13383_vm10, %v1762_v62  ;;  %2812 = vrot.lane.b32.xlu1 %v9025_v37, %s10041_s14  ;;  %v10706_v24 = vrot.slane %v3264_v9, 4  ;;  %v1197_v29 = vrot.slane %v1195_v12, 5  ;;  %v1203_v32 = vrot.slane %v1201_v14, 5  ;;  %v1205_v37 = vshrl.u32 %v973_v27, 16 }
  0xd7   : > { %v10708_v55 = vrot.slane %v3274_v18, 4  ;;  %v1211_v46 = vshll.u32 %v974_v40, 16  ;;  %v1216_v57 = vshrl.u32 %v975_v22, 16  ;;  %v1219_v43 = vshll.u32 %v975_v22, 16  ;;  %v1522_v49 = vld [vmem:[#allocation2 + $0x68] sm:$0x1] }
  0xd8   : > { %v3270_v44 = vsel %vm10191_vm15, %v10706_v24, %v10691_v28  ;;  %3854 = vrot.lane.b32.xlu0 %v9088_v56, %s10042_s15  ;;  %v1198_v17 = vor.u32 %v1197_v29, %v1194_v31  ;;  %v1207_v10 = vrot.slane %v1205_v37, 4  ;;  %v1225_v50 = vshll.u32 %v976_v15, 16  ;;  %v1523_v54 = vld [vmem:[#allocation2 + $0x6c] sm:$0xe]  ;;  %v1524_v61 = vld [vmem:[#allocation2 + $0x70] sm:$0xf] }
  0xd9   : > { %v1939_v39 = vpop.permute.xlu1 %1938  ;;  %v10710_v42 = vpop.permute.xlu0 %2481  ;;  %v1229_v53 = vshrl.u32 %v976_v15, 16  ;;  %v1213_v51 = vrot.slane %v1211_v46, 5  ;;  %v1218_v59 = vrot.slane %v1216_v57, 4  ;;  %v1221_v27 = vrot.slane %v1219_v43, 5  ;;  %v264_v24 = vld [vmem:[#allocation2 + $0x78] sm:$0x1] }
  0xda   : > { %1984 = vst.msk [vmem:[#allocation3 + $0x18] sm:$0xff] %vm13382_vm12, %v1939_v39  ;;  %2990 = vrot.lane.b32.xlu1 %v9850_v8, %s10040_s13  ;;  %v8946_v60 = vrot.slane %v1520_v23, 9  ;;  %v1199_v7 = vrot.slane %v1198_v17, 4  ;;  %v1208_v30 = vor.u32 %v1207_v10, %v1203_v32  ;;  %v1227_v28 = vrot.slane %v1225_v50, 5  ;;  %v353_v57 = vld [vmem:[%s10173_s9 + $0x48] sm:$0xf] }
  0xdb   : > { %v1231_v62 = vrot.slane %v1229_v53, 4  ;;  %v1222_v4 = vor.u32 %v1221_v27, %v1218_v59  ;;  %v1653_v52 = vrot.slane %v1521_v38, 5  ;;  %v1656_v36 = vrot.slane %v1522_v49, 5  ;;  %v354_v43 = vld [vmem:[%s10173_s9 + $0x4c] sm:$0xf]  ;;  %2528 = vst.msk [vmem:[#allocation3 + $0x10] sm:$0xff] %vm2525_vm13, %v10710_v42 }
  0xdc   : > { %v8947_v40 = vrot.slane %v1523_v54, 9  ;;  %v3064_v8 = vld [vmem:[#allocation2 + $0x74] sm:$0x1]  ;;  %v1204_v9 = vsel %vm10191_vm15, %v1199_v7, %v1203_v32  ;;  %v1209_v11 = vrot.slane %v1208_v30, 4  ;;  %v1660_v14 = vrot.slane %v1524_v61, 5  ;;  %3571 = vst.msk [vmem:[#allocation3 + $0x8] sm:$0xff] %vm3569_vm6, %v10668_v5 }
  0xdd   : > { %v10719_v63 = vpop.permute.xlu0 %2802  ;;  %v3609_v6 = vld [vmem:[#allocation2 + $0x74] sm:$0x1]  ;;  %v1232_v12 = vor.u32 %v1231_v62, %v1227_v28  ;;  %v3277_v16 = vshll.u32 %v3064_v8, 16  ;;  %v1223_v22 = vrot.slane %v1222_v4, 4  ;;  %v1654_v23 = vsel %vm10162_vm11, %v8946_v60, %v1653_v52  ;;  %v2021_v53 = vld [vmem:[#allocation2 + $0x6c] sm:$0xf] }
  0xde   : > { %v3736_v18 = vrot.slane %v3609_v6, 5  ;;  %v977_v19 = vld [vmem:[#allocation2 + $0x74] sm:$0x1]  ;;  %v1214_v56 = vsel %vm10191_vm15, %v1209_v11, %v1213_v51  ;;  %v1655_v29 = vrot.slane %v1653_v52, 4  ;;  %v10741_v50 = vsel %vm10162_vm11, %v8947_v40, %v1660_v14  ;;  %v2022_v30 = vld [vmem:[#allocation2 + $0x70] sm:$0xf] }
  0xdf   : > { %v1233_v31 = vrot.slane %v1232_v12, 4  ;;  %v1235_v15 = vshll.u32 %v977_v19, 16  ;;  %v1525_v32 = vld [vmem:[#allocation2 + $0x74] sm:$0x1]  ;;  %v3279_v37 = vrot.slane %v3277_v16, 5  ;;  %v8930_v39 = vcombine.low %v1204_v9, %v1214_v56  ;;  %v9869_v40 = vld [vmem:[#allocation2 + $0x48] sm:$0xff]  }
  0xe0   : > { %v10729_v38 = vsel %vm10162_vm11, %v3735_v25, %v3736_v18  ;;  %v1228_v46 = vsel %vm10191_vm15, %v1223_v22, %v1227_v28  ;;  %v1657_v10 = vsel %vm10162_vm11, %v1655_v29, %v1656_v36  ;;  %v1662_v59 = vrot.slane %v1660_v14, 4  ;;  %v2023_v36 = vld [vmem:[#allocation2 + $0x74] sm:$0x1]  ;;  %v10769_v18 = vld [vmem:[#allocation2 + $0x6c] sm:$0xe]  ;;  %938 = vst.msk [vmem:[#allocation3 + $0x30] sm:$0xff] %vm13380_vm8, %v9869_v40 }
  0xe1   : > { %v9089_v49 = vcombine.low %v10704_v21, %v10729_v38  ;;  %v1237_v17 = vrot.slane %v1235_v15, 5  ;;  %v10743_v25 = vpop.permute.xlu0 %2980  ;;  %v3280_v54 = vsel %vm10191_vm15, %v10708_v55, %v3279_v37  ;;  %1447 = vrot.lane.b32.xlu0 %v8930_v39, %s10038_s11  ;;  %v8962_v51 = vcombine.low %v1654_v23, %v1657_v10  ;;  %v9852_v55 = vld [vmem:[#allocation2 + $0x6c] sm:$0xff]   ;;  %v9870_v11 = vld [vmem:[#allocation2 + $0x54] sm:$0xff]   ;;  %2849 = vst.msk [vmem:[#allocation3 + $0x10] sm:$0xff] %vm13381_vm5, %v10719_v63 }
  0xe2   : > { %v1663_v21 = vrot.slane %v1525_v32, 5  ;;  %v9057_v27 = vcombine.low %v3270_v44, %v3280_v54  ;;  %v265_v61 = vsel %vm10131_vm3, 0, %v264_v24  ;;  %v523_v7 = vshrl.u32 %v353_v57, 16  ;;  %v314_v44 = vld [vmem:[#allocation2 + $0x80] sm:$0x1]  ;;  %939 = vst.msk [vmem:[#allocation3 + $0x38] sm:$0xff] %vm13380_vm8, %v9870_v11 }
  0xe3   : > { %v1238_v60 = vsel %vm10191_vm15, %v1233_v31, %v1237_v17  ;;  %266 = vst [vmem:[#allocation2 + $0x78] sm:$0x1] %v265_v61  ;;  %v526_v4 = vshll.u32 %v353_v57, 16  ;;  %v531_v52 = vshrl.u32 %v354_v43, 16  ;;  %v534_v9 = vshll.u32 %v354_v43, 16  ;;  %3027 = vst.msk [vmem:[#allocation3 + $0x10] sm:$0xff] %vm3024_vm2, %v10743_v25 }
  0xe4   : > { %v10753_v28 = vcombine.low %v1228_v46, %v1238_v60  ;;  %v10757_v62 = vsel %vm10162_vm11, %v1662_v59, %v1663_v21  ;;  %3535 = vrot.lane.b32.xlu1 %v9057_v27, %s10044_s17  ;;  %v525_v6 = vrot.slane %v523_v7, 7  ;;  %v2238_v14 = vshrl.u32 %v2021_v53, 16  ;;  %v2567_v23 = vld [vmem:[#allocation2 + $0x70] sm:$0xf]  ;;  %v10778_v24 = vld [vmem:[#allocation2 + $0x74] sm:$0x1] }
  0xe5   : > { %v8963_v8 = vcombine.low %v10741_v50, %v10757_v62  ;;  %1771 = vrot.lane.b32.xlu0 %v8962_v51, %s10037_s10  ;;  %v10763_v12 = vrot.slane %v531_v52, 7  ;;  %v2241_v16 = vshll.u32 %v2021_v53, 16  ;;  %v2247_v34 = vshll.u32 %v2022_v30, 16  ;;  %v9859_v45 = vld [vmem:[%s13371_s1 + $0x10] ss:$0 sps:$4 sm:$0x33]  }
  0xe6   : > { %v528_v19 = vor.u32 %v526_v4, %v525_v6  ;;  %v529_v22 = vrot.slane %v525_v6, 4  ;;  %v2251_v3 = vshrl.u32 %v2022_v30, 16  ;;  %v2240_v15 = vrot.slane %v2238_v14, 4  ;;  %v267_v32 = vld [vmem:[#allocation2 + $0x84] sm:$0x1]  ;;  %3570 = vst.msk [vmem:[#allocation3] sm:$0xff] %vm3569_vm6, %v10651_v35 }
  0xe7   : > { %v536_v31 = vor.u32 %v534_v9, %v10763_v12  ;;  %v538_v26 = vrot.slane %v10763_v12, 4  ;;  %v2243_v29 = vrot.slane %v2241_v16, 5  ;;  %v10789_v37 = vld [vmem:[%s10173_s9 + $0x50] sm:$0xf]  ;;  %v2249_v63 = vrot.slane %v2247_v34, 5  ;;  %3892 = vst.msk [vmem:[#allocation3 + $0x8] sm:$0xff] %vm3890_vm4, %v10627_v47 }
  0xe8   : > { %3856 = vrot.lane.b32.xlu1 %v9089_v49, %s10042_s15  ;;  %v2253_v38 = vrot.slane %v2251_v3, 4  ;;  %v2257_v39 = vshll.u32 %v2023_v36, 16  ;;  %v315_v46 = vsel %vm10145_vm7, 0, %v314_v44  ;;  %v356_v17 = vld [vmem:[%s10173_s9 + $0x54] sm:$0xf]  ;;  %v9010_v54 = vrot.slane %v10769_v18, 9 }
  0xe9   : > { %1948 = vrot.lane.b32.xlu0 %v9852_v55, %s10039_s12  ;;  %v537_v57 = vsel %vm10201_vm1, %v529_v22, %v536_v31  ;;  %v2244_v43 = vor.u32 %v2243_v29, %v2240_v15  ;;  %316 = vst [vmem:[#allocation2 + $0x80] sm:$0x1] %v315_v46  ;;  %v2696_v20 = vrot.slane %v2567_v23, 5  ;;  %v2699_v33 = vrot.slane %v10778_v24, 5  ;;  %3891 = vst.msk [vmem:[#allocation3] sm:$0xff] %vm3890_vm4, %v10572_v58 }
  0xea   : > { %v2484_v56 = vpop.permute.xlu1 %2483  ;;  %v754_v10 = vld [vmem:[#allocation2 + $0x78] sm:$0xf]  ;;  %757 = vst.msk [vmem:[#allocation2 + $0x7c] sm:$0xf] %vm224_vm0, %v537_v57  ;;  %v2254_v49 = vor.u32 %v2253_v38, %v2249_v63  ;;  %v2259_v53 = vrot.slane %v2257_v39, 5  ;;  %vm3999_vm8 = vcmask 1041408  }
  0xeb   : > { %2529 = vst.msk [vmem:[#allocation3 + $0x18] sm:$0xff] %vm2525_vm13, %v2484_v56  ;;  %v755_v21 = vsel %vm10183_vm14, %v528_v19, %v754_v10  ;;  %v2245_v27 = vrot.slane %v2244_v43, 4  ;;  %v268_v35 = vsel %vm10131_vm3, 0, %v267_v32  ;;  %v540_v5 = vshrl.u32 %v10789_v37, 16  ;;  %9783 = vmatprep.subr.msk.bf16.mxu0 %vm3999_vm8, %v9859_v45 }
  0xec   : > { %v3526_v42 = vpop.permute.xlu0 %3525  ;;  %1449 = vrot.lane.b32.xlu1 %v10753_v28, %s10038_s11  ;;  %756 = vst [vmem:[#allocation2 + $0x78] sm:$0xf] %v755_v21  ;;  %v2255_v25 = vrot.slane %v2254_v49, 4  ;;  %v2697_v61 = vsel %vm10162_vm11, %v9010_v54, %v2696_v20  ;;  %v2698_v7 = vrot.slane %v2696_v20, 4  ;;  %269 = vst [vmem:[#allocation2 + $0x84] sm:$0x1] %v268_v35 }
  0xed   : > { %3572 = vst.msk [vmem:[#allocation3 + $0x10] sm:$0xff] %vm3569_vm6, %v3526_v42  ;;  %v2250_v60 = vsel %vm10191_vm15, %v2245_v27, %v2249_v63  ;;  %v543_v58 = vshll.u32 %v10789_v37, 16  ;;  %v542_v30 = vrot.slane %v540_v5, 7  ;;  %v548_v28 = vshrl.u32 %v356_v17, 16 }
  0xee   : > { %v2805_v51 = vpop.permute.xlu1 %2804  ;;  %v2260_v47 = vsel %vm10191_vm15, %v2255_v25, %v2259_v53  ;;  %v551_v55 = vshll.u32 %v356_v17, 16  ;;  %v2700_v36 = vsel %vm10162_vm11, %v2698_v7, %v2699_v33  ;;  %v4001_v44 = vsel %vm3999_vm8, %v9859_v45, 0  ;;  %v3908_v54 = vld [vmem:[#allocation3 + $0x8] sm:$0xff]  ;;  %v317_v33 = vld [vmem:[#allocation2 + $0x8c] sm:$0x1] }
  0xef   : > { %2850 = vst.msk [vmem:[#allocation3 + $0x18] sm:$0xff] %vm13381_vm5, %v2805_v51  ;;  %v8994_v52 = vcombine.low %v2250_v60, %v2260_v47  ;;  %vm3950_vm5 = vcmask 293888   ;;  %v546_v6 = vrot.slane %v542_v30, 4  ;;  %v10842_v9 = vrot.slane %v548_v28, 7  ;;  %9702 = vmatpush3.bf16.msra.mxu0 %v4001_v44 }
  0xf0   : > { %v3847_v59 = vpop.permute.xlu0 %3846  ;;  %1773 = vrot.lane.b32.xlu1 %v8963_v8, %s10037_s10  ;;  %v758_v40 = vld [vmem:[#allocation2 + $0x80] sm:$0x1]  ;;  %v9026_v16 = vcombine.low %v2697_v61, %v2700_v36  ;;  %v545_v23 = vor.u32 %v543_v58, %v542_v30  ;;  %v3907_v37 = vld [vmem:[#allocation3] sm:$0xff]  ;;  %vm13398_vm8 = vcmask 195744  }
  0xf1   : > { %3893 = vst.msk [vmem:[#allocation3 + $0x10] sm:$0xff] %vm3890_vm4, %v3847_v59  ;;  %2493 = vrot.lane.b32.xlu0 %v8994_v52, %s10043_s16  ;;  %v759_v11 = vsel %vm10131_vm3, %v538_v26, %v758_v40  ;;  %v2025_v14 = vld [vmem:[#allocation2 + $0x7c] sm:$0xf]  ;;  %v553_v8 = vor.u32 %v551_v55, %v10842_v9  ;;  %v555_v12 = vrot.slane %v10842_v9, 4  ;;  %9703 = vmatprep.mubr.msk.bf16.mxu0 %vm3950_vm5, %v3907_v37 }
  0xf2   : > { %v2983_v4 = vpop.permute.xlu1 %2982  ;;  %v10849_v18 = vld [vmem:[#allocation2 + $0x7c] sm:$0xf]  ;;  %760 = vst [vmem:[#allocation2 + $0x80] sm:$0x1] %v759_v11  ;;  %v2271_v19 = vshll.u32 %v2025_v14, 16  ;;  %v2275_v50 = vshrl.u32 %v2025_v14, 16  ;;  %9704 = vmatmul.mubr.msk.bf16.vlgmr.msra.gmra.mrb[0].mxu0 %vm3950_vm5, %v3908_v54 }
  0xf3   : > { %3028 = vst.msk [vmem:[#allocation3 + $0x18] sm:$0xff] %vm3024_vm2, %v2983_v4  ;;  %v2703_v62 = vrot.slane %v10849_v18, 5  ;;  %v9853_v34 = vld [vmem:[#allocation2 + $0x78] sm:$0xff]   ;;  %v554_v32 = vsel %vm10201_vm1, %v546_v6, %v553_v8  ;;  %v761_v57 = vld [vmem:[#allocation2 + $0x84] sm:$0xf]  ;;  %v318_v11 = vsel %vm10145_vm7, 0, %v317_v33 }
  0xf4   : > { %v2024_v3 = vld [vmem:[#allocation2 + $0x78] sm:$0xf]  ;;  %v10855_v42 = vrot.slane %v2271_v19, 5  ;;  %v2277_v31 = vrot.slane %v2275_v50, 4  ;;  %1950 = vrot.lane.b32.xlu1 %v9853_v34, %s10039_s12  ;;  %764 = vst.msk [vmem:[#allocation2 + $0x88] sm:$0xf] %vm224_vm0, %v554_v32  ;;  %v762_v17 = vsel %vm10183_vm14, %v545_v23, %v761_v57 }
  0xf5   : > { %v2262_v24 = vshrl.u32 %v2024_v3, 16  ;;  %v2265_v56 = vshll.u32 %v2024_v3, 16  ;;  %v2569_v26 = vld [vmem:[#allocation2 + $0x78] sm:$0xe]  ;;  %2814 = vrot.lane.b32.xlu0 %v9026_v16, %s10041_s14  ;;  %v2705_v29 = vrot.slane %v2703_v62, 4 }
  0xf6   : > { %v1440_v22 = vpop.permute.xlu0 %1439  ;;  %v9011_v15 = vrot.slane %v2569_v26, 9  ;;  %v9858_v45 = vld [vmem:[#allocation2 + $0x78] sm:$0xff]   ;;  %v2278_v46 = vor.u32 %v2277_v31, %v10855_v42  ;;  %763 = vst [vmem:[#allocation2 + $0x84] sm:$0xf] %v762_v17  ;;  %319 = vst [vmem:[#allocation2 + $0x8c] sm:$0x1] %v318_v11 }
  0xf7   : > { %1484 = vst.msk [vmem:[#allocation3 + $0x20] sm:$0xff] %vm1479_vm9, %v1440_v22  ;;  %v2264_v38 = vrot.slane %v2262_v24, 4  ;;  %v2267_v39 = vrot.slane %v2265_v56, 5  ;;  %v3065_v43 = vld [vmem:[#allocation2 + $0x78] sm:$0xf] }
  0xf8   : > { %v3528_v63 = vpop.permute.xlu1 %3527  ;;  %v3066_v10 = vld [vmem:[#allocation2 + $0x7c] sm:$0xf]  ;;  %v3282_v49 = vshrl.u32 %v3065_v43, 16  ;;  %v3285_v53 = vshll.u32 %v3065_v43, 16  ;;  %v3909_v51 = vld [vmem:[#allocation3 + $0x10] sm:$0xff]  ;;  %v2279_v21 = vrot.slane %v2278_v46, 4  ;;  %v2704_v6 = vsel %vm10162_vm11, %v9011_v15, %v2703_v62 }
  0xf9   : > { %3573 = vst.msk [vmem:[#allocation3 + $0x18] sm:$0xff] %vm3569_vm6, %v3528_v63  ;;  %v2268_v59 = vor.u32 %v2267_v39, %v2264_v38  ;;  %v3291_v27 = vshll.u32 %v3066_v10, 16  ;;  %v3295_v20 = vshrl.u32 %v3066_v10, 16  ;;  %v2026_v25 = vld [vmem:[#allocation2 + $0x80] sm:$0x1]  ;;  %2992 = vrot.lane.b32.xlu0 %v9858_v45, %s10040_s13  ;;  %9707 = vmatprep.mubr.msk.bf16.mxu0 %vm3950_vm5, %v3909_v51 }
  0xfa   : > { %v2571_v35 = vld [vmem:[#allocation2 + $0x80] sm:$0x1]  ;;  %v2281_v58 = vshll.u32 %v2026_v25, 16  ;;  %v3284_v30 = vrot.slane %v3282_v49, 4  ;;  %v3287_v28 = vrot.slane %v3285_v53, 5 }
  0xfb   : > { %v3067_v5 = vld [vmem:[#allocation2 + $0x80] sm:$0x1]  ;;  %v2269_v7 = vrot.slane %v2268_v59, 4  ;;  %v2706_v47 = vrot.slane %v2571_v35, 5  ;;  %v3293_v55 = vrot.slane %v3291_v27, 5  ;;  %v3297_v4 = vrot.slane %v3295_v20, 4 }
  0xfc   : > { %v3849_v60 = vpop.permute.xlu1 %3848  ;;  %v1764_v61 = vpop.permute.xlu0 %1763  ;;  %v3301_v52 = vshll.u32 %v3067_v5, 16  ;;  %v3610_v36 = vld [vmem:[#allocation2 + $0x78] sm:$0xe]  ;;  %v2283_v40 = vrot.slane %v2281_v58, 5  ;;  %v3611_v14 = vld [vmem:[#allocation2 + $0x7c] sm:$0xf]  ;;  %v3288_v50 = vor.u32 %v3287_v28, %v3284_v30 }
  0xfd   : > { %3894 = vst.msk [vmem:[#allocation3 + $0x18] sm:$0xff] %vm3890_vm4, %v3849_v60  ;;  %v2274_v44 = vsel %vm10191_vm15, %v2269_v7, %v10855_v42  ;;  %v3612_v16 = vld [vmem:[#allocation2 + $0x80] sm:$0x1]  ;;  %v2707_v19 = vsel %vm10162_vm11, %v2705_v29, %v2706_v47  ;;  %v3298_v8 = vor.u32 %v3297_v4, %v3293_v55  ;;  %v3069_v34 = vld [vmem:[#allocation2 + $0x88] sm:$0xf]  ;;  %v9074_v56 = vrot.slane %v3610_v36, 9 }
  0xfe   : > { %1808 = vst.msk [vmem:[#allocation3 + $0x20] sm:$0xff] %vm13383_vm10, %v1764_v61  ;;  %v3303_v22 = vrot.slane %v3301_v52, 5  ;;  %v2284_v18 = vsel %vm10191_vm15, %v2279_v21, %v2283_v40  ;;  %v3315_v24 = vshll.u32 %v3069_v34, 16  ;;  %v3319_v62 = vshrl.u32 %v3069_v34, 16  ;;  %v10887_v42 = vld [vmem:[#allocation2 + $0x88] sm:$0xf] }
  0xff   : > { %v8995_v31 = vcombine.low %v2274_v44, %v2284_v18  ;;  %v3289_v26 = vrot.slane %v3288_v50, 4  ;;  %v3299_v15 = vrot.slane %v3298_v8, 4  ;;  %v3740_v29 = vrot.slane %v3611_v14, 5  ;;  %v3068_v32 = vld [vmem:[#allocation2 + $0x84] sm:$0xf] }
 0x100   : > { %v1442_v3 = vpop.permute.xlu1 %1441  ;;  %v1941_v23 = vpop.permute.xlu0 %1940  ;;  %v9027_v45 = vcombine.low %v2704_v6, %v2707_v19  ;;  %v10891_v37 = vrot.slane %v3315_v24, 5  ;;  %v3321_v63 = vrot.slane %v3319_v62, 4  ;;  %v3743_v38 = vrot.slane %v3612_v16, 5  ;;  %v978_v17 = vld [vmem:[#allocation2 + $0x78] sm:$0xf]  ;;  %v9860_v47 = vld [vmem:[#allocation2 + $0x84] sm:$0xff]  }
 0x101   : > { %1485 = vst.msk [vmem:[#allocation3 + $0x28] sm:$0xff] %vm1479_vm9, %v1442_v3  ;;  %2495 = vrot.lane.b32.xlu1 %v8995_v31, %s10043_s16  ;;  %v3294_v39 = vsel %vm10191_vm15, %v3289_v26, %v3293_v55  ;;  %v3304_v46 = vsel %vm10191_vm15, %v3299_v15, %v3303_v22  ;;  %v3306_v57 = vshrl.u32 %v3068_v32, 16  ;;  %v3309_v43 = vshll.u32 %v3068_v32, 16  ;;  %v10900_v51 = vld [vmem:[#allocation2 + $0x84] sm:$0xe] }
 0x102   : > { %1985 = vst.msk [vmem:[#allocation3 + $0x20] sm:$0xff] %vm13382_vm12, %v1941_v23  ;;  %v9058_v49 = vcombine.low %v3294_v39, %v3304_v46  ;;  %v3741_v53 = vsel %vm10162_vm11, %v9074_v56, %v3740_v29  ;;  %v3742_v54 = vrot.slane %v3740_v29, 4  ;;  %v3747_v59 = vrot.slane %v10887_v42, 5  ;;  %v979_v21 = vld [vmem:[#allocation2 + $0x7c] sm:$0xf] }
 0x103   : > { %v3308_v27 = vrot.slane %v3306_v57, 4  ;;  %v3311_v20 = vrot.slane %v3309_v43, 5  ;;  %v980_v33 = vld [vmem:[#allocation2 + $0x80] sm:$0x1]  ;;  %v981_v25 = vld [vmem:[#allocation2 + $0x84] sm:$0xf]  ;;  %v3322_v5 = vor.u32 %v3321_v63, %v10891_v37 }
 0x104   : > { %v1766_v10 = vpop.permute.xlu1 %1765  ;;  %3537 = vrot.lane.b32.xlu0 %v9058_v49, %s10044_s17  ;;  %v765_v35 = vld [vmem:[#allocation2 + $0x8c] sm:$0x1]  ;;  %v3744_v60 = vsel %vm10162_vm11, %v3742_v54, %v3743_v38  ;;  %v1240_v61 = vshrl.u32 %v978_v17, 16  ;;  %v1243_v7 = vshll.u32 %v978_v17, 16  ;;  %v3910_v58 = vld [vmem:[#allocation3 + $0x18] sm:$0xff]  ;;  %v9075_v4 = vrot.slane %v10900_v51, 9 }
 0x105   : > { %1809 = vst.msk [vmem:[#allocation3 + $0x28] sm:$0xff] %vm13383_vm10, %v1766_v10  ;;  %2816 = vrot.lane.b32.xlu1 %v9027_v45, %s10041_s14  ;;  %v766_v30 = vsel %vm10131_vm3, %v555_v12, %v765_v35  ;;  %v3312_v28 = vor.u32 %v3311_v20, %v3308_v27  ;;  %v9090_v55 = vcombine.low %v3741_v53, %v3744_v60  ;;  %v982_v52 = vld [vmem:[#allocation2 + $0x88] sm:$0xf]  ;;  %v1249_v6 = vshll.u32 %v979_v21, 16  ;;  %v1526_v14 = vld [vmem:[#allocation2 + $0x78] sm:$0xe] }
 0x106   : > { %767 = vst [vmem:[#allocation2 + $0x8c] sm:$0x1] %v766_v30  ;;  %v1242_v44 = vrot.slane %v1240_v61, 4  ;;  %v1245_v40 = vrot.slane %v1243_v7, 5  ;;  %v1253_v11 = vshrl.u32 %v979_v21, 16  ;;  %9708 = vmatmul.mubr.msk.bf16.gmra.mrb[4].mxu0 %vm3950_vm5, %v3910_v58  ;;  %v3749_v9 = vrot.slane %v3747_v59, 4 }
 0x107   : > { %v1527_v16 = vld [vmem:[#allocation2 + $0x7c] sm:$0xf]  ;;  %v1259_v12 = vshll.u32 %v980_v33, 16  ;;  %v1264_v19 = vshrl.u32 %v981_v25, 16  ;;  %v1267_v50 = vshll.u32 %v981_v25, 16  ;;  %v1251_v34 = vrot.slane %v1249_v6, 5 }
 0x108   : > { %v2486_v36 = vpop.permute.xlu0 %2485  ;;  %3858 = vrot.lane.b32.xlu0 %v9090_v55, %s10042_s15  ;;  %v1246_v22 = vor.u32 %v1245_v40, %v1242_v44  ;;  %v1255_v3 = vrot.slane %v1253_v11, 4  ;;  %v1273_v23 = vshll.u32 %v982_v52, 16  ;;  %v3313_v18 = vrot.slane %v3312_v28, 4  ;;  %v1528_v31 = vld [vmem:[#allocation2 + $0x80] sm:$0x1] }
 0x109   : > { %2530 = vst.msk [vmem:[#allocation3 + $0x20] sm:$0xff] %vm2525_vm13, %v2486_v36  ;;  %2994 = vrot.lane.b32.xlu1 %v9860_v47, %s10040_s13  ;;  %v3323_v24 = vrot.slane %v3322_v5, 4  ;;  %v1266_v62 = vrot.slane %v1264_v19, 4  ;;  %v1269_v56 = vrot.slane %v1267_v50, 5  ;;  %v1261_v45 = vrot.slane %v1259_v12, 5  ;;  %v9876_v50 = vld [vmem:[#allocation2 + $0x6c] sm:$0xff]  }
 0x10a   : > { %v1943_v8 = vpop.permute.xlu1 %1942  ;;  %v1247_v15 = vrot.slane %v1246_v22, 4  ;;  %v1256_v29 = vor.u32 %v1255_v3, %v1251_v34  ;;  %v1277_v32 = vshrl.u32 %v982_v52, 16  ;;  %v10922_v38 = vrot.slane %v1273_v23, 5  ;;  %v1530_v49 = vld [vmem:[#allocation2 + $0x88] sm:$0xf] }
 0x10b   : > { %1986 = vst.msk [vmem:[#allocation3 + $0x28] sm:$0xff] %vm13382_vm12, %v1943_v8  ;;  %v1270_v63 = vor.u32 %v1269_v56, %v1266_v62  ;;  %v8948_v39 = vrot.slane %v1526_v14, 9  ;;  %v1667_v46 = vrot.slane %v1527_v16, 5  ;;  %v1670_v10 = vrot.slane %v1528_v31, 5  ;;  %v1529_v60 = vld [vmem:[#allocation2 + $0x84] sm:$0xe] }
 0x10c   : > { %v2807_v26 = vpop.permute.xlu0 %2806  ;;  %v1252_v57 = vsel %vm10191_vm15, %v1247_v15, %v1251_v34  ;;  %v1257_v43 = vrot.slane %v1256_v29, 4  ;;  %v1279_v17 = vrot.slane %v1277_v32, 4  ;;  %v10930_v51 = vsel %vm10162_vm11, %v9075_v4, %v3747_v59  ;;  %v270_v58 = vld [vmem:[#allocation2 + $0x90] sm:$0x1]  ;;  %v357_v4 = vld [vmem:[%s10173_s9 + $0x58] sm:$0xf] }
 0x10d   : > { %2851 = vst.msk [vmem:[#allocation3 + $0x20] sm:$0xff] %vm13398_vm8, %v2807_v26  ;;  %v3070_v53 = vld [vmem:[#allocation2 + $0x8c] sm:$0x1]  ;;  %v1668_v27 = vsel %vm10162_vm11, %v8948_v39, %v1667_v46  ;;  %v1271_v5 = vrot.slane %v1270_v63, 4  ;;  %v1669_v7 = vrot.slane %v1667_v46, 4  ;;  %v3318_v47 = vsel %vm10191_vm15, %v3313_v18, %v10891_v37  ;;  %v9875_v14 = vld [vmem:[#allocation2 + $0x60] sm:$0xff]  }
 0x10e   : > { %v3615_v54 = vld [vmem:[#allocation2 + $0x8c] sm:$0x1]  ;;  %v3325_v33 = vshll.u32 %v3070_v53, 16  ;;  %v1262_v35 = vsel %vm10191_vm15, %v1257_v43, %v1261_v45  ;;  %v1280_v59 = vor.u32 %v1279_v17, %v10922_v38  ;;  %v1674_v55 = vrot.slane %v1530_v49, 5  ;;  %v358_v52 = vld [vmem:[%s10173_s9 + $0x5c] sm:$0xf] }
 0x10f   : > { %v983_v21 = vld [vmem:[#allocation2 + $0x8c] sm:$0x1]  ;;  %v3750_v25 = vrot.slane %v3615_v54, 5  ;;  %v8932_v42 = vcombine.low %v1252_v57, %v1262_v35  ;;  %v1671_v40 = vsel %vm10162_vm11, %v1669_v7, %v1670_v10  ;;  %v8949_v11 = vrot.slane %v1529_v60, 9  ;;  %v2027_v19 = vld [vmem:[#allocation2 + $0x84] sm:$0xf] }
 0x110   : > { %v2985_v20 = vpop.permute.xlu0 %2984  ;;  %v1283_v61 = vshll.u32 %v983_v21, 16  ;;  %v3327_v30 = vrot.slane %v3325_v33, 5  ;;  %v1281_v36 = vrot.slane %v1280_v59, 4  ;;  %v1531_v6 = vld [vmem:[#allocation2 + $0x8c] sm:$0x1]  ;;  %v8964_v12 = vcombine.low %v1668_v27, %v1671_v40  ;;  %v9861_v29 = vld [vmem:[#allocation2 + $0x84] sm:$0xff]  }
 0x111   : > { %3029 = vst.msk [vmem:[#allocation3 + $0x20] sm:$0xff] %vm3024_vm2, %v2985_v20  ;;  %v3751_v28 = vsel %vm10162_vm11, %v3749_v9, %v3750_v25  ;;  %1451 = vrot.lane.b32.xlu0 %v8932_v42, %s10038_s11  ;;  %v1276_v9 = vsel %vm10191_vm15, %v1271_v5, %v10922_v38  ;;  %v1676_v34 = vrot.slane %v1674_v55, 4  ;;  %v271_v3 = vsel %vm10131_vm3, 0, %v270_v58  ;;  %v2028_v23 = vld [vmem:[#allocation2 + $0x88] sm:$0xf] }
 0x112   : > { %v1285_v44 = vrot.slane %v1283_v61, 5  ;;  %v3328_v37 = vsel %vm10191_vm15, %v3323_v24, %v3327_v30  ;;  %v9091_v16 = vcombine.low %v10930_v51, %v3751_v28  ;;  %v2029_v18 = vld [vmem:[#allocation2 + $0x8c] sm:$0x1]  ;;  %vm13399_vm8 = vcmask 31744   ;;  %272 = vst [vmem:[#allocation2 + $0x90] sm:$0x1] %v271_v3 }
 0x113   : > { %v9059_v8 = vcombine.low %v3318_v47, %v3328_v37  ;;  %940 = vst.msk [vmem:[#allocation3 + $0x40] sm:$0xff] %vm13399_vm8, %v9875_v14  ;;  %v1677_v24 = vrot.slane %v1531_v6, 5  ;;  %v557_v62 = vshrl.u32 %v357_v4, 16  ;;  %v560_v56 = vshll.u32 %v357_v4, 16  ;;  %vm13400_vm12 = vmmov %vm13399_vm8  ;;  %v320_v38 = vld [vmem:[#allocation2 + $0x98] sm:$0x1] }
 0x114   : > { %v1286_v22 = vsel %vm10191_vm15, %v1281_v36, %v1285_v44  ;;  %v565_v31 = vshrl.u32 %v358_v52, 16  ;;  %941 = vst.msk [vmem:[#allocation3 + $0x48] sm:$0xff] %vm13400_vm12, %v9876_v50  ;;  %v10964_v15 = vsel %vm10162_vm11, %v8949_v11, %v1674_v55  ;;  %v568_v45 = vshll.u32 %v358_v52, 16  ;;  %v2572_v39 = vld [vmem:[#allocation2 + $0x84] sm:$0xe] }
 0x115   : > { %3539 = vrot.lane.b32.xlu1 %v9059_v8, %s10044_s17  ;;  %1775 = vrot.lane.b32.xlu0 %v8964_v12, %s10037_s10  ;;  %v2286_v32 = vshrl.u32 %v2027_v19, 16  ;;  %v2289_v63 = vshll.u32 %v2027_v19, 16  ;;  %v8933_v46 = vcombine.low %v1276_v9, %v1286_v22  ;;  %v559_v57 = vrot.slane %v557_v62, 7  ;;  %v2573_v10 = vld [vmem:[#allocation2 + $0x88] sm:$0xf] }
 0x116   : > { %v10967_v43 = vrot.slane %v565_v31, 7  ;;  %v2295_v17 = vshll.u32 %v2028_v23, 16  ;;  %v273_v49 = vld [vmem:[#allocation2 + $0x9c] sm:$0x1]  ;;  %v2299_v51 = vshrl.u32 %v2028_v23, 16  ;;  %v2305_v21 = vshll.u32 %v2029_v18, 16 }
 0x117   : > { %v2488_v26 = vpop.permute.xlu1 %2487  ;;  %v2288_v53 = vrot.slane %v2286_v32, 4  ;;  %v2291_v54 = vrot.slane %v2289_v63, 5  ;;  %v10970_v27 = vld [vmem:[%s10173_s9 + $0x60] sm:$0xf]  ;;  %v10974_v20 = vsel %vm10162_vm11, %v1676_v34, %v1677_v24  ;;  %v562_v33 = vor.u32 %v560_v56, %v559_v57  ;;  %v2574_v5 = vld [vmem:[#allocation2 + $0x8c] sm:$0x1] }
 0x118   : > { %2531 = vst.msk [vmem:[#allocation3 + $0x28] sm:$0xff] %vm2525_vm13, %v2488_v26  ;;  %v563_v25 = vrot.slane %v559_v57, 4  ;;  %v570_v35 = vor.u32 %v568_v45, %v10967_v43  ;;  %v360_v60 = vld [vmem:[%s10173_s9 + $0x64] sm:$0xf]  ;;  %v2297_v7 = vrot.slane %v2295_v17, 5  ;;  %v2301_v58 = vrot.slane %v2299_v51, 4 }
 0x119   : > { %3860 = vrot.lane.b32.xlu1 %v9091_v16, %s10042_s15  ;;  %1952 = vrot.lane.b32.xlu0 %v9861_v29, %s10039_s12  ;;  %v2292_v61 = vor.u32 %v2291_v54, %v2288_v53  ;;  %v2307_v47 = vrot.slane %v2305_v21, 5  ;;  %v323_v30 = vld [vmem:[#allocation2 + $0xa4] sm:$0x1]  ;;  %vm13401_vm12 = vcmask 195744   ;;  %v321_v55 = vsel %vm10145_vm7, 0, %v320_v38  ;;  %v9879_v31 = vld [vmem:[#allocation2 + $0x78] sm:$0xff]  }
 0x11a   : > { %v3530_v59 = vpop.permute.xlu0 %3529  ;;  %v571_v28 = vsel %vm10201_vm1, %v563_v25, %v570_v35  ;;  %v9012_v4 = vrot.slane %v2572_v39, 9  ;;  %v2710_v52 = vrot.slane %v2573_v10, 5  ;;  %v276_v36 = vld [vmem:[#allocation2 + $0xa8] sm:$0x1]  ;;  %v768_v44 = vld [vmem:[#allocation2 + $0x90] sm:$0xf]  ;;  %v2302_v6 = vor.u32 %v2301_v58, %v2297_v7 }
 0x11b   : > { %v2809_v42 = vpop.permute.xlu1 %2808  ;;  %3574 = vst.msk [vmem:[#allocation3 + $0x20] sm:$0xff] %vm3569_vm6, %v3530_v59  ;;  %v2293_v40 = vrot.slane %v2292_v61, 4  ;;  %322 = vst [vmem:[#allocation2 + $0x98] sm:$0x1] %v321_v55  ;;  %v2713_v11 = vrot.slane %v2574_v5, 5  ;;  %v274_v14 = vsel %vm10131_vm3, 0, %v273_v49  ;;  %v8965_v37 = vcombine.low %v10964_v15, %v10974_v20 }
 0x11c   : > { %2852 = vst.msk [vmem:[#allocation3 + $0x28] sm:$0xff] %vm13401_vm12, %v2809_v42  ;;  %v769_v16 = vsel %vm10183_vm14, %v562_v33, %v768_v44  ;;  %v2712_v9 = vrot.slane %v2710_v52, 4  ;;  %275 = vst [vmem:[#allocation2 + $0x9c] sm:$0x1] %v274_v14  ;;  %v574_v12 = vshrl.u32 %v10970_v27, 16  ;;  %v572_v22 = vrot.slane %v10967_v43, 4 }
 0x11d   : > { %771 = vst.msk [vmem:[#allocation2 + $0x94] sm:$0xf] %vm224_vm0, %v571_v28  ;;  %v10995_v50 = vld [vmem:[%s10173_s9 + $0x68] sm:$0xf]  ;;  %1453 = vrot.lane.b32.xlu1 %v8933_v46, %s10038_s11  ;;  %770 = vst [vmem:[#allocation2 + $0x90] sm:$0xf] %v769_v16  ;;  %v2298_v34 = vsel %vm10191_vm15, %v2293_v40, %v2297_v7  ;;  %v2711_v18 = vsel %vm10162_vm11, %v9012_v4, %v2710_v52 }
 0x11e   : > { %v3851_v8 = vpop.permute.xlu0 %3850  ;;  %v2303_v3 = vrot.slane %v2302_v6, 4  ;;  %v582_v23 = vshrl.u32 %v360_v60, 16  ;;  %v576_v24 = vrot.slane %v574_v12, 7  ;;  %v585_v62 = vshll.u32 %v360_v60, 16  ;;  %v9880_v26 = vld [vmem:[#allocation2 + $0x84] sm:$0xff]   ;;  %942 = vst.msk [vmem:[#allocation3 + $0x50] sm:$0xff] %vm13399_vm8, %v9879_v31  ;;  %vm13402_vm12 = vmmov %vm13399_vm8 }
 0x11f   : > { %v2987_v19 = vpop.permute.xlu1 %2986  ;;  %3895 = vst.msk [vmem:[#allocation3 + $0x20] sm:$0xff] %vm3890_vm4, %v3851_v8  ;;  %v324_v56 = vsel %vm10145_vm7, 0, %v323_v30  ;;  %v2714_v29 = vsel %vm10162_vm11, %v2712_v9, %v2713_v11  ;;  %v277_v32 = vsel %vm10131_vm3, 0, %v276_v36  ;;  %v577_v38 = vshll.u32 %v10970_v27, 16  ;;  %v11022_v17 = vld [vmem:[%s10173_s9 + $0x6c] sm:$0xf] }
 0x120   : > { %3030 = vst.msk [vmem:[#allocation3 + $0x28] sm:$0xff] %vm3024_vm2, %v2987_v19  ;;  %v2308_v15 = vsel %vm10191_vm15, %v2303_v3, %v2307_v47  ;;  %v11011_v45 = vrot.slane %v582_v23, 7  ;;  %325 = vst [vmem:[#allocation2 + $0xa4] sm:$0x1] %v324_v56  ;;  %v580_v39 = vrot.slane %v576_v24, 4  ;;  %v591_v10 = vshrl.u32 %v10995_v50, 16 }
 0x121   : > { %v8996_v63 = vcombine.low %v2298_v34, %v2308_v15  ;;  %278 = vst [vmem:[#allocation2 + $0xa8] sm:$0x1] %v277_v32  ;;  %943 = vst.msk [vmem:[#allocation3 + $0x58] sm:$0xff] %vm13402_vm12, %v9880_v26  ;;  %1777 = vrot.lane.b32.xlu1 %v8965_v37, %s10037_s10  ;;  %v594_v49 = vshll.u32 %v10995_v50, 16  ;;  %v9028_v51 = vcombine.low %v2711_v18, %v2714_v29  ;;  %v599_v52 = vshrl.u32 %v11022_v17, 16 }
 0x122   : > { %v587_v57 = vor.u32 %v585_v62, %v11011_v45  ;;  %v589_v43 = vrot.slane %v11011_v45, 4  ;;  %v772_v53 = vld [vmem:[#allocation2 + $0x98] sm:$0x1]  ;;  %v579_v42 = vor.u32 %v577_v38, %v576_v24  ;;  %v11043_v3 = vrot.slane %v591_v10, 7 }
 0x123   : > { %v3532_v46 = vpop.permute.xlu1 %3531  ;;  %2497 = vrot.lane.b32.xlu0 %v8996_v63, %s10043_s16  ;;  %v773_v21 = vsel %vm10131_vm3, %v572_v22, %v772_v53  ;;  %v775_v11 = vld [vmem:[#allocation2 + $0x9c] sm:$0xf]  ;;  %vm13403_vm8 = vcmask 130144  }
 0x124   : > { %3575 = vst.msk [vmem:[#allocation3 + $0x28] sm:$0xff] %vm3569_vm6, %v3532_v46  ;;  %v2031_v54 = vld [vmem:[#allocation2 + $0x94] sm:$0xf]  ;;  %v588_v25 = vsel %vm10201_vm1, %v580_v39, %v587_v57  ;;  %774 = vst [vmem:[#allocation2 + $0x98] sm:$0x1] %v773_v21  ;;  %v776_v37 = vsel %vm10183_vm14, %v579_v42, %v775_v11 }
 0x125   : > { %v2319_v27 = vshll.u32 %v2031_v54, 16  ;;  %v2323_v20 = vshrl.u32 %v2031_v54, 16  ;;  %v2576_v33 = vld [vmem:[#allocation2 + $0x94] sm:$0xf]  ;;  %v2030_v5 = vld [vmem:[#allocation2 + $0x90] sm:$0xf]  ;;  %vm13404_vm12 = vmmov %vm13403_vm8 }
 0x126   : > { %v9862_v35 = vld [vmem:[#allocation2 + $0x90] sm:$0xff]   ;;  %v2717_v60 = vrot.slane %v2576_v33, 5  ;;  %778 = vst.msk [vmem:[#allocation2 + $0xa0] sm:$0xf] %vm224_vm0, %v588_v25  ;;  %v2310_v61 = vshrl.u32 %v2030_v5, 16  ;;  %v2313_v7 = vshll.u32 %v2030_v5, 16 }
 0x127   : > { %v3853_v59 = vpop.permute.xlu1 %3852  ;;  %v11033_v58 = vrot.slane %v2319_v27, 5  ;;  %v2325_v47 = vrot.slane %v2323_v20, 4  ;;  %v2575_v30 = vld [vmem:[#allocation2 + $0x90] sm:$0xe]  ;;  %1954 = vrot.lane.b32.xlu1 %v9862_v35, %s10039_s12  ;;  %2818 = vrot.lane.b32.xlu0 %v9028_v51, %s10041_s14  ;;  %v3072_v16 = vld [vmem:[#allocation2 + $0x94] sm:$0xf] }
 0x128   : > { %3896 = vst.msk [vmem:[#allocation3 + $0x28] sm:$0xff] %vm3890_vm4, %v3853_v59  ;;  %v9013_v28 = vrot.slane %v2575_v30, 9  ;;  %v2719_v55 = vrot.slane %v2717_v60, 4  ;;  %v9865_v4 = vld [vmem:[#allocation2 + $0x90] sm:$0xff]   ;;  %v1444_v36 = vpop.permute.xlu0 %1443  ;;  %v2312_v44 = vrot.slane %v2310_v61, 4  ;;  %v2315_v40 = vrot.slane %v2313_v7, 5 }
 0x129   : > { %v2326_v6 = vor.u32 %v2325_v47, %v11033_v58  ;;  %v3071_v14 = vld [vmem:[#allocation2 + $0x90] sm:$0xf]  ;;  %1486 = vst.msk [vmem:[#allocation3 + $0x30] sm:$0xff] %vm1479_vm9, %v1444_v36  ;;  %v779_v19 = vld [vmem:[#allocation2 + $0xa4] sm:$0x1]  ;;  %v3339_v22 = vshll.u32 %v3072_v16, 16  ;;  %v11067_v47 = vor.u32 %v594_v49, %v11043_v3 }
 0x12a   : > { %v3330_v9 = vshrl.u32 %v3071_v14, 16  ;;  %v3333_v12 = vshll.u32 %v3071_v14, 16  ;;  %v2316_v8 = vor.u32 %v2315_v40, %v2312_v44  ;;  %777 = vst [vmem:[#allocation2 + $0x9c] sm:$0xf] %v776_v37  ;;  %v3343_v34 = vshrl.u32 %v3072_v16, 16  ;;  %v3911_v18 = vld [vmem:[#allocation3 + $0x20] sm:$0xff] }
 0x12b   : > { %v1446_v23 = vpop.permute.xlu1 %1445  ;;  %v2327_v24 = vrot.slane %v2326_v6, 4  ;;  %2996 = vrot.lane.b32.xlu0 %v9865_v4, %s10040_s13  ;;  %v780_v31 = vsel %vm10131_vm3, %v589_v43, %v779_v19  ;;  %v11048_v26 = vld [vmem:[#allocation2 + $0x90] sm:$0xe]  ;;  %9711 = vmatprep.mubr.msk.bf16.mxu0 %vm3950_vm5, %v3911_v18  ;;  %v2032_v29 = vld [vmem:[#allocation2 + $0x98] sm:$0x1]  ;;  %v3341_v63 = vrot.slane %v3339_v22, 5  ;;  %v11055_v39 = vsel %vm10162_vm11, %v9013_v28, %v2717_v60 }
 0x12c   : > { %v3332_v62 = vrot.slane %v3330_v9, 4  ;;  %v3335_v56 = vrot.slane %v3333_v12, 5  ;;  %1487 = vst.msk [vmem:[#allocation3 + $0x38] sm:$0xff] %vm1479_vm9, %v1446_v23  ;;  %v1768_v15 = vpop.permute.xlu0 %1767  ;;  %v2317_v45 = vrot.slane %v2316_v8, 4  ;;  %v2577_v32 = vld [vmem:[#allocation2 + $0x98] sm:$0x1] }
 0x12d   : > { %781 = vst [vmem:[#allocation2 + $0xa4] sm:$0x1] %v780_v31  ;;  %1810 = vst.msk [vmem:[#allocation3 + $0x30] sm:$0xff] %vm13383_vm10, %v1768_v15  ;;  %v2329_v38 = vshll.u32 %v2032_v29, 16  ;;  %v2720_v46 = vrot.slane %v2577_v32, 5  ;;  %v3345_v53 = vrot.slane %v3343_v34, 4 }
 0x12e   : > { %v3073_v57 = vld [vmem:[#allocation2 + $0x98] sm:$0x1]  ;;  %v3336_v43 = vor.u32 %v3335_v56, %v3332_v62  ;;  %v2322_v10 = vsel %vm10191_vm15, %v2317_v45, %v11033_v58  ;;  %v3075_v51 = vld [vmem:[#allocation2 + $0xa0] sm:$0xf]  ;;  %v9076_v21 = vrot.slane %v11048_v26, 9 }
 0x12f   : > { %v3349_v54 = vshll.u32 %v3073_v57, 16  ;;  %v1770_v27 = vpop.permute.xlu1 %1769  ;;  %v2331_v20 = vrot.slane %v2329_v38, 5  ;;  %v2721_v33 = vsel %vm10162_vm11, %v2719_v55, %v2720_v46  ;;  %v3363_v35 = vshll.u32 %v3075_v51, 16  ;;  %v3912_v5 = vld [vmem:[#allocation3 + $0x28] sm:$0xff]  ;;  %v3617_v7 = vld [vmem:[#allocation2 + $0x94] sm:$0xf] }
 0x130   : > { %v3337_v25 = vrot.slane %v3336_v43, 4  ;;  %1811 = vst.msk [vmem:[#allocation3 + $0x38] sm:$0xff] %vm13383_vm10, %v1770_v27  ;;  %v1945_v60 = vpop.permute.xlu0 %1944  ;;  %v3346_v42 = vor.u32 %v3345_v53, %v3341_v63  ;;  %v3367_v61 = vshrl.u32 %v3075_v51, 16  ;;  %v3618_v58 = vld [vmem:[#allocation2 + $0x98] sm:$0x1]  ;;  %9712 = vmatmul.mubr.msk.bf16.gmra.mrb[8].mxu0 %vm3950_vm5, %v3912_v5  ;;  %v9029_v28 = vcombine.low %v11055_v39, %v2721_v33  ;;  %v9881_v53 = vld [vmem:[#allocation2 + $0x90] sm:$0xff]  }
 0x131   : > { %v3351_v59 = vrot.slane %v3349_v54, 5  ;;  %1987 = vst.msk [vmem:[#allocation3 + $0x30] sm:$0xff] %vm13403_vm8, %v1945_v60  ;;  %v2332_v30 = vsel %vm10191_vm15, %v2327_v24, %v2331_v20  ;;  %v3074_v4 = vld [vmem:[#allocation2 + $0x9c] sm:$0xf]  ;;  %v3365_v36 = vrot.slane %v3363_v35, 5  ;;  %v3754_v9 = vrot.slane %v3617_v7, 5 }
 0x132   : > { %v3342_v55 = vsel %vm10191_vm15, %v3337_v25, %v3341_v63  ;;  %v3620_v44 = vld [vmem:[#allocation2 + $0xa0] sm:$0xf]  ;;  %v8997_v40 = vcombine.low %v2322_v10, %v2332_v30  ;;  %v3347_v6 = vrot.slane %v3346_v42, 4  ;;  %v3354_v50 = vshrl.u32 %v3074_v4, 16  ;;  %v3619_v11 = vld [vmem:[#allocation2 + $0x9c] sm:$0xe] }
 0x133   : > { %v3357_v49 = vshll.u32 %v3074_v4, 16  ;;  %v984_v14 = vld [vmem:[#allocation2 + $0x90] sm:$0xf]  ;;  %v3369_v16 = vrot.slane %v3367_v61, 4  ;;  %v3757_v12 = vrot.slane %v3618_v58, 5  ;;  %v9077_v19 = vrot.slane %v3619_v11, 9 }
 0x134   : > { %v3076_v37 = vld [vmem:[#allocation2 + $0xa4] sm:$0x1]  ;;  %2499 = vrot.lane.b32.xlu1 %v8997_v40, %s10043_s16  ;;  %v3352_v8 = vsel %vm10191_vm15, %v3347_v6, %v3351_v59  ;;  %v3356_v22 = vrot.slane %v3354_v50, 4  ;;  %v3755_v56 = vsel %vm10162_vm11, %v9076_v21, %v3754_v9  ;;  %v3756_v31 = vrot.slane %v3754_v9, 4  ;;  %v985_v63 = vld [vmem:[#allocation2 + $0x94] sm:$0xf] }
 0x135   : > { %v3359_v34 = vrot.slane %v3357_v49, 5  ;;  %v3373_v23 = vshll.u32 %v3076_v37, 16  ;;  %v3621_v18 = vld [vmem:[#allocation2 + $0xa4] sm:$0x1]  ;;  %v9060_v24 = vcombine.low %v3342_v55, %v3352_v8  ;;  %v3370_v62 = vor.u32 %v3369_v16, %v3365_v36  ;;  %v986_v46 = vld [vmem:[#allocation2 + $0x98] sm:$0x1] }
 0x136   : > { %v2490_v26 = vpop.permute.xlu0 %2489  ;;  %v3761_v45 = vrot.slane %v3620_v44, 5  ;;  %v3764_v32 = vrot.slane %v3621_v18, 5  ;;  %v3758_v39 = vsel %vm10162_vm11, %v3756_v31, %v3757_v12  ;;  %v1288_v57 = vshrl.u32 %v984_v14, 16  ;;  %v9866_v54 = vld [vmem:[#allocation2 + $0x9c] sm:$0xff]   ;;  %v989_v55 = vld [vmem:[#allocation2 + $0xa4] sm:$0x1] }
 0x137   : > { %v3360_v15 = vor.u32 %v3359_v34, %v3356_v22  ;;  %v3375_v29 = vrot.slane %v3373_v23, 5  ;;  %2532 = vst.msk [vmem:[#allocation3 + $0x30] sm:$0xff] %vm2525_vm13, %v2490_v26  ;;  %3541 = vrot.lane.b32.xlu0 %v9060_v24, %s10044_s17  ;;  %v3371_v38 = vrot.slane %v3370_v62, 4  ;;  %v1291_v43 = vshll.u32 %v984_v14, 16  ;;  %v1947_v10 = vpop.permute.xlu1 %1946  ;;  %v987_v33 = vld [vmem:[#allocation2 + $0x9c] sm:$0xf] }
 0x138   : > { %2820 = vrot.lane.b32.xlu1 %v9029_v28, %s10041_s14  ;;  %v9092_v21 = vcombine.low %v3755_v56, %v3758_v39  ;;  %v11088_v27 = vsel %vm10162_vm11, %v9077_v19, %v3761_v45  ;;  %v3763_v20 = vrot.slane %v3761_v45, 4  ;;  %1988 = vst.msk [vmem:[#allocation3 + $0x38] sm:$0xff] %vm13404_vm12, %v1947_v10  ;;  %v1290_v35 = vrot.slane %v1288_v57, 4  ;;  %v988_v42 = vld [vmem:[#allocation2 + $0xa0] sm:$0xf] }
 0x139   : > { %v3361_v51 = vrot.slane %v3360_v15, 4  ;;  %v3376_v25 = vsel %vm10191_vm15, %v3371_v38, %v3375_v29  ;;  %v1293_v5 = vrot.slane %v1291_v43, 5  ;;  %v1297_v60 = vshll.u32 %v985_v63, 16  ;;  %v9882_v61 = vld [vmem:[#allocation2 + $0x9c] sm:$0xff]   ;;  %v1532_v4 = vld [vmem:[#allocation2 + $0x90] sm:$0xe] }
 0x13a   : > { %v2811_v59 = vpop.permute.xlu0 %2810  ;;  %vm13405_vm8 = vcmask 31744   ;;  %v3765_v58 = vsel %vm10162_vm11, %v3763_v20, %v3764_v32  ;;  %v1301_v30 = vshrl.u32 %v985_v63, 16  ;;  %v1307_v28 = vshll.u32 %v986_v46, 16  ;;  %v1533_v49 = vld [vmem:[#allocation2 + $0x94] sm:$0xf] }
 0x13b   : > { %944 = vst.msk [vmem:[#allocation3 + $0x60] sm:$0xff] %vm13405_vm8, %v9881_v53  ;;  %v3366_v7 = vsel %vm10191_vm15, %v3361_v51, %v3365_v36  ;;  %vm13406_vm12 = vcmask 195744   ;;  %3862 = vrot.lane.b32.xlu0 %v9092_v21, %s10042_s15  ;;  %v9093_v40 = vcombine.low %v11088_v27, %v3765_v58  ;;  %v1294_v6 = vor.u32 %v1293_v5, %v1290_v35  ;;  %v1534_v11 = vld [vmem:[#allocation2 + $0x98] sm:$0x1]  ;;  %945 = vst.msk [vmem:[#allocation3 + $0x68] sm:$0xff] %vm13405_vm8, %v9882_v61 }
 0x13c   : > { %2853 = vst.msk [vmem:[#allocation3 + $0x30] sm:$0xff] %vm13406_vm12, %v2811_v59  ;;  %v9061_v44 = vcombine.low %v3366_v7, %v3376_v25  ;;  %v1299_v50 = vrot.slane %v1297_v60, 5  ;;  %2998 = vrot.lane.b32.xlu1 %v9866_v54, %s10040_s13  ;;  %v1303_v36 = vrot.slane %v1301_v30, 4  ;;  %v1309_v14 = vrot.slane %v1307_v28, 5  ;;  %v1535_v9 = vld [vmem:[#allocation2 + $0x9c] sm:$0xe] }
 0x13d   : > { %v1312_v37 = vshrl.u32 %v987_v33, 16  ;;  %v1315_v16 = vshll.u32 %v987_v33, 16  ;;  %v1295_v12 = vrot.slane %v1294_v6, 4  ;;  %v1321_v19 = vshll.u32 %v988_v42, 16  ;;  %v1536_v34 = vld [vmem:[#allocation2 + $0xa0] sm:$0xf] }
 0x13e   : > { %v1325_v8 = vshrl.u32 %v988_v42, 16  ;;  %v1331_v22 = vshll.u32 %v989_v55, 16  ;;  %v2989_v23 = vpop.permute.xlu0 %2988  ;;  %v1304_v18 = vor.u32 %v1303_v36, %v1299_v50  ;;  %v8950_v56 = vrot.slane %v1532_v4, 9  ;;  %v1537_v31 = vld [vmem:[#allocation2 + $0xa4] sm:$0x1] }
 0x13f   : > { %v1314_v24 = vrot.slane %v1312_v37, 4  ;;  %v1317_v62 = vrot.slane %v1315_v16, 5  ;;  %3031 = vst.msk [vmem:[#allocation3 + $0x30] sm:$0xff] %vm3024_vm2, %v2989_v23  ;;  %v1300_v26 = vsel %vm10191_vm15, %v1295_v12, %v1299_v50  ;;  %v1323_v15 = vrot.slane %v1321_v19, 5  ;;  %v782_v53 = vld [vmem:[#allocation2 + $0xa8] sm:$0xf] }
 0x140   : > { %v1327_v29 = vrot.slane %v1325_v8, 4  ;;  %v1333_v45 = vrot.slane %v1331_v22, 5  ;;  %3543 = vrot.lane.b32.xlu1 %v9061_v44, %s10044_s17  ;;  %v1305_v32 = vrot.slane %v1304_v18, 4  ;;  %v1681_v38 = vrot.slane %v1533_v49, 5  ;;  %v2033_v20 = vld [vmem:[#allocation2 + $0x9c] sm:$0xf] }
 0x141   : > { %v1318_v63 = vor.u32 %v1317_v62, %v1314_v24  ;;  %v1684_v39 = vrot.slane %v1534_v11, 5  ;;  %v8951_v57 = vrot.slane %v1535_v9, 9  ;;  %v1688_v43 = vrot.slane %v1536_v34, 5  ;;  %v2034_v33 = vld [vmem:[#allocation2 + $0xa0] sm:$0xf] }
 0x142   : > { %v1328_v46 = vor.u32 %v1327_v29, %v1323_v15  ;;  %v1691_v10 = vrot.slane %v1537_v31, 5  ;;  %v1310_v54 = vsel %vm10191_vm15, %v1305_v32, %v1309_v14  ;;  %v1682_v21 = vsel %vm10162_vm11, %v8950_v56, %v1681_v38  ;;  %v2035_v42 = vld [vmem:[#allocation2 + $0xa4] sm:$0x1]  ;;  %v326_v59 = vld [vmem:[#allocation2 + $0xb0] sm:$0x1]  ;;  %v9867_v62 = vld [vmem:[#allocation2 + $0x9c] sm:$0xff]  }
 0x143   : > { %v1319_v51 = vrot.slane %v1318_v63, 4  ;;  %v1683_v27 = vrot.slane %v1681_v38, 4  ;;  %v8934_v25 = vcombine.low %v1300_v26, %v1310_v54  ;;  %v1689_v5 = vsel %vm10162_vm11, %v8951_v57, %v1688_v43  ;;  %v11113_v61 = vld [vmem:[#allocation2 + $0x9c] sm:$0xe]  ;;  %v11132_v50 = vld [vmem:[#allocation2 + $0xa0] sm:$0xf] }
 0x144   : > { %v1329_v35 = vrot.slane %v1328_v46, 4  ;;  %v1690_v60 = vrot.slane %v1688_v43, 4  ;;  %v2492_v7 = vpop.permute.xlu1 %2491  ;;  %3864 = vrot.lane.b32.xlu1 %v9093_v40, %s10042_s15  ;;  %v597_v28 = vrot.slane %v11043_v3, 4  ;;  %v11123_v55 = vrot.slane %v599_v52, 7  ;;  %v11134_v3 = vld [vmem:[#allocation2 + $0xa4] sm:$0x1] }
 0x145   : > { %v1324_v58 = vsel %vm10191_vm15, %v1319_v51, %v1323_v15  ;;  %v1685_v30 = vsel %vm10162_vm11, %v1683_v27, %v1684_v39  ;;  %2533 = vst.msk [vmem:[#allocation3 + $0x38] sm:$0xff] %vm2525_vm13, %v2492_v7  ;;  %1455 = vrot.lane.b32.xlu0 %v8934_v25, %s10038_s11  ;;  %v602_v6 = vshll.u32 %v11022_v17, 16  ;;  %v783_v36 = vsel %vm10183_vm14, %v11067_v47, %v782_v53  ;;  %v279_v14 = vld [vmem:[#allocation2 + $0xb4] sm:$0x1]  ;;  %v363_v37 = vld [vmem:[%s10173_s9 + $0x70] sm:$0xf] }
 0x146   : > { %v1334_v4 = vsel %vm10191_vm15, %v1329_v35, %v1333_v45  ;;  %v8966_v44 = vcombine.low %v1682_v21, %v1685_v30  ;;  %v1692_v40 = vsel %vm10162_vm11, %v1690_v60, %v1691_v10  ;;  %v606_v11 = vrot.slane %v11123_v55, 4  ;;  %v3534_v16 = vpop.permute.xlu0 %3533  ;;  %784 = vst [vmem:[#allocation2 + $0xa8] sm:$0xf] %v783_v36  ;;  %v364_v8 = vld [vmem:[%s10173_s9 + $0x74] sm:$0xf] }
 0x147   : > { %v8935_v52 = vcombine.low %v1324_v58, %v1334_v4  ;;  %v8967_v49 = vcombine.low %v1689_v5, %v1692_v40  ;;  %v604_v9 = vor.u32 %v602_v6, %v11123_v55  ;;  %v2334_v12 = vshrl.u32 %v2033_v20, 16  ;;  %3576 = vst.msk [vmem:[#allocation3 + $0x30] sm:$0xff] %vm3569_vm6, %v3534_v16  ;;  %v329_v24 = vld [vmem:[#allocation2 + $0xbc] sm:$0x1] }
 0x148   : > { %v2337_v17 = vshll.u32 %v2033_v20, 16  ;;  %v2343_v19 = vshll.u32 %v2034_v33, 16  ;;  %v2813_v22 = vpop.permute.xlu1 %2812  ;;  %v2347_v34 = vshrl.u32 %v2034_v33, 16  ;;  %v2353_v23 = vshll.u32 %v2035_v42, 16 }
 0x149   : > { %1457 = vrot.lane.b32.xlu1 %v8935_v52, %s10038_s11  ;;  %v327_v47 = vsel %vm10145_vm7, 0, %v326_v59  ;;  %v9014_v18 = vrot.slane %v11113_v61, 9  ;;  %2854 = vst.msk [vmem:[#allocation3 + $0x38] sm:$0xff] %vm13406_vm12, %v2813_v22  ;;  %1779 = vrot.lane.b32.xlu0 %v8966_v44, %s10037_s10  ;;  %v605_v56 = vsel %vm10201_vm1, %v597_v28, %v604_v9  ;;  %v2336_v31 = vrot.slane %v2334_v12, 4 }
 0x14a   : > { %v2339_v26 = vrot.slane %v2337_v17, 5  ;;  %v2345_v15 = vrot.slane %v2343_v19, 5  ;;  %328 = vst [vmem:[#allocation2 + $0xb0] sm:$0x1] %v327_v47  ;;  %785 = vst.msk [vmem:[#allocation2 + $0xac] sm:$0xf] %vm224_vm0, %v605_v56  ;;  %v3855_v38 = vpop.permute.xlu0 %3854 }
 0x14b   : > { %v2349_v29 = vrot.slane %v2347_v34, 4  ;;  %v2355_v45 = vrot.slane %v2353_v23, 5  ;;  %v2724_v32 = vrot.slane %v11132_v50, 5  ;;  %v2727_v63 = vrot.slane %v11134_v3, 5  ;;  %3897 = vst.msk [vmem:[#allocation3 + $0x30] sm:$0xff] %vm3890_vm4, %v3855_v38 }
 0x14c   : > { %v2340_v39 = vor.u32 %v2339_v26, %v2336_v31  ;;  %v280_v46 = vsel %vm10131_vm3, 0, %v279_v14  ;;  %v608_v57 = vshrl.u32 %v363_v37, 16  ;;  %v611_v43 = vshll.u32 %v363_v37, 16  ;;  %v2991_v10 = vpop.permute.xlu1 %2990 }
 0x14d   : > { %1781 = vrot.lane.b32.xlu1 %v8967_v49, %s10037_s10  ;;  %v2350_v53 = vor.u32 %v2349_v29, %v2345_v15  ;;  %v2726_v54 = vrot.slane %v2724_v32, 4  ;;  %281 = vst [vmem:[#allocation2 + $0xb4] sm:$0x1] %v280_v46  ;;  %v616_v51 = vshrl.u32 %v364_v8, 16  ;;  %3032 = vst.msk [vmem:[#allocation3 + $0x38] sm:$0xff] %vm3024_vm2, %v2991_v10  ;;  %1956 = vrot.lane.b32.xlu0 %v9867_v62, %s10039_s12  ;;  %v619_v20 = vshll.u32 %v364_v8, 16 }
 0x14e   : > { %v2341_v21 = vrot.slane %v2340_v39, 4  ;;  %v610_v27 = vrot.slane %v608_v57, 7  ;;  %v330_v33 = vsel %vm10145_vm7, 0, %v329_v24  ;;  %v2036_v35 = vld [vmem:[#allocation2 + $0xa8] sm:$0xf]  ;;  %v2725_v61 = vsel %vm10162_vm11, %v9014_v18, %v2724_v32 }
 0x14f   : > { %v2351_v25 = vrot.slane %v2350_v53, 4  ;;  %v618_v5 = vrot.slane %v616_v51, 7  ;;  %331 = vst [vmem:[#allocation2 + $0xbc] sm:$0x1] %v330_v33  ;;  %v2358_v42 = vshrl.u32 %v2036_v35, 16  ;;  %v2361_v59 = vshll.u32 %v2036_v35, 16 }
 0x150   : > { %v2346_v60 = vsel %vm10191_vm15, %v2341_v21, %v2345_v15  ;;  %v2728_v30 = vsel %vm10162_vm11, %v2726_v54, %v2727_v63  ;;  %v2581_v28 = vld [vmem:[#allocation2 + $0xa8] sm:$0xe]  ;;  %v613_v4 = vor.u32 %v611_v43, %v610_v27  ;;  %v614_v44 = vrot.slane %v610_v27, 4 }
 0x151   : > { %v2356_v7 = vsel %vm10191_vm15, %v2351_v25, %v2355_v45  ;;  %v786_v58 = vld [vmem:[#allocation2 + $0xb0] sm:$0x1]  ;;  %v3077_v40 = vld [vmem:[#allocation2 + $0xa8] sm:$0xf]  ;;  %v2037_v52 = vld [vmem:[#allocation2 + $0xac] sm:$0xf]  ;;  %v621_v36 = vor.u32 %v619_v20, %v618_v5  ;;  %v9030_v12 = vcombine.low %v2725_v61, %v2728_v30 }
 0x152   : > { %v9868_v6 = vld [vmem:[#allocation2 + $0xa8] sm:$0xff]   ;;  %v8998_v50 = vcombine.low %v2346_v60, %v2356_v7  ;;  %v787_v3 = vsel %vm10131_vm3, %v606_v11, %v786_v58  ;;  %v2360_v49 = vrot.slane %v2358_v42, 4  ;;  %v2363_v14 = vrot.slane %v2361_v59, 5 }
 0x153   : > { %788 = vst [vmem:[#allocation2 + $0xb0] sm:$0x1] %v787_v3  ;;  %v2367_v37 = vshll.u32 %v2037_v52, 16  ;;  %v2371_v16 = vshrl.u32 %v2037_v52, 16  ;;  %v2582_v9 = vld [vmem:[#allocation2 + $0xac] sm:$0xf]  ;;  %1958 = vrot.lane.b32.xlu1 %v9868_v6, %s10039_s12  ;;  %v622_v55 = vsel %vm10201_vm1, %v614_v44, %v621_v36  ;;  %v1448_v24 = vpop.permute.xlu0 %1447 }
 0x154   : > { %2501 = vrot.lane.b32.xlu0 %v8998_v50, %s10043_s16  ;;  %v2731_v17 = vrot.slane %v2582_v9, 5  ;;  %v623_v19 = vrot.slane %v618_v5, 4  ;;  %v789_v8 = vld [vmem:[#allocation2 + $0xb4] sm:$0xf]  ;;  %v2364_v11 = vor.u32 %v2363_v14, %v2360_v49  ;;  %792 = vst.msk [vmem:[#allocation2 + $0xb8] sm:$0xf] %vm224_vm0, %v622_v55 }
 0x155   : > { %v11179_v22 = vrot.slane %v2367_v37, 5  ;;  %v2373_v34 = vrot.slane %v2371_v16, 4  ;;  %v790_v23 = vsel %vm10183_vm14, %v613_v4, %v789_v8  ;;  %v3078_v47 = vld [vmem:[#allocation2 + $0xac] sm:$0xf]  ;;  %v11184_v18 = vld [vmem:[#allocation2 + $0xa8] sm:$0xe] }
 0x156   : > { %v9015_v62 = vrot.slane %v2581_v28, 9  ;;  %791 = vst [vmem:[#allocation2 + $0xb4] sm:$0xf] %v790_v23  ;;  %v3378_v56 = vshrl.u32 %v3077_v40, 16  ;;  %v3381_v31 = vshll.u32 %v3077_v40, 16  ;;  %1488 = vst.msk [vmem:[#allocation3 + $0x40] sm:$0xff] %vm1479_vm9, %v1448_v24  ;;  %v3536_v10 = vpop.permute.xlu1 %3535 }
 0x157   : > { %v793_v26 = vld [vmem:[#allocation2 + $0xbc] sm:$0x1]  ;;  %v3913_v15 = vld [vmem:[#allocation3 + $0x30] sm:$0xff]  ;;  %v2374_v29 = vor.u32 %v2373_v34, %v11179_v22  ;;  %v2733_v45 = vrot.slane %v2731_v17, 4  ;;  %v3387_v32 = vshll.u32 %v3078_v47, 16  ;;  %v3391_v63 = vshrl.u32 %v3078_v47, 16  ;;  %v1772_v20 = vpop.permute.xlu0 %1771 }
 0x158   : > { %9715 = vmatprep.mubr.msk.bf16.mxu0 %vm3950_vm5, %v3913_v15  ;;  %v2365_v38 = vrot.slane %v2364_v11, 4  ;;  %2822 = vrot.lane.b32.xlu0 %v9030_v12, %s10041_s14  ;;  %v9871_v39 = vld [vmem:[#allocation2 + $0xa8] sm:$0xff]   ;;  %v3380_v46 = vrot.slane %v3378_v56, 4  ;;  %v3383_v57 = vrot.slane %v3381_v31, 5  ;;  %v794_v43 = vsel %vm10131_vm3, %v623_v19, %v793_v26  ;;  %3577 = vst.msk [vmem:[#allocation3 + $0x38] sm:$0xff] %vm3569_vm6, %v3536_v10 }
 0x159   : > { %v2375_v53 = vrot.slane %v2374_v29, 4  ;;  %v3389_v54 = vrot.slane %v3387_v32, 5  ;;  %v3393_v51 = vrot.slane %v3391_v63, 4  ;;  %795 = vst [vmem:[#allocation2 + $0xbc] sm:$0x1] %v794_v43  ;;  %v9078_v27 = vrot.slane %v11184_v18, 9 }
 0x15a   : > { %v3623_v21 = vld [vmem:[#allocation2 + $0xac] sm:$0xf]  ;;  %v2038_v33 = vld [vmem:[#allocation2 + $0xb0] sm:$0x1]  ;;  %v11196_v35 = vsel %vm10162_vm11, %v9015_v62, %v2731_v17  ;;  %v3384_v60 = vor.u32 %v3383_v57, %v3380_v46  ;;  %1812 = vst.msk [vmem:[#allocation3 + $0x40] sm:$0xff] %vm13383_vm10, %v1772_v20  ;;  %v2370_v58 = vsel %vm10191_vm15, %v2365_v38, %v11179_v22  ;;  %v3857_v44 = vpop.permute.xlu1 %3856  ;;  %vm13407_vm8 = vcmask 130144  }
 0x15b   : > { %v2583_v25 = vld [vmem:[#allocation2 + $0xb0] sm:$0x1]  ;;  %v2377_v42 = vshll.u32 %v2038_v33, 16  ;;  %v3394_v61 = vor.u32 %v3393_v51, %v3389_v54  ;;  %v3081_v28 = vld [vmem:[#allocation2 + $0xb8] sm:$0xf]  ;;  %v3768_v4 = vrot.slane %v3623_v21, 5  ;;  %v1949_v52 = vpop.permute.xlu0 %1948 }
 0x15c   : > { %v3079_v5 = vld [vmem:[#allocation2 + $0xb0] sm:$0x1]  ;;  %v2734_v59 = vrot.slane %v2583_v25, 5  ;;  %3000 = vrot.lane.b32.xlu0 %v9871_v39, %s10040_s13  ;;  %v3385_v30 = vrot.slane %v3384_v60, 4  ;;  %3898 = vst.msk [vmem:[#allocation3 + $0x38] sm:$0xff] %vm3890_vm4, %v3857_v44  ;;  %v3411_v37 = vshll.u32 %v3081_v28, 16 }
 0x15d   : > { %v3397_v7 = vshll.u32 %v3079_v5, 16  ;;  %v2379_v40 = vrot.slane %v2377_v42, 5  ;;  %v3395_v50 = vrot.slane %v3394_v61, 4  ;;  %v3080_v14 = vld [vmem:[#allocation2 + $0xb4] sm:$0xf]  ;;  %v3415_v16 = vshrl.u32 %v3081_v28, 16 }
 0x15e   : > { %v2735_v6 = vsel %vm10162_vm11, %v2733_v45, %v2734_v59  ;;  %v3390_v36 = vsel %vm10191_vm15, %v3385_v30, %v3389_v54  ;;  %v3624_v9 = vld [vmem:[#allocation2 + $0xb0] sm:$0x1]  ;;  %1989 = vst.msk [vmem:[#allocation3 + $0x40] sm:$0xff] %vm13407_vm8, %v1949_v52  ;;  %v3402_v55 = vshrl.u32 %v3080_v14, 16  ;;  %v3405_v19 = vshll.u32 %v3080_v14, 16  ;;  %v1450_v62 = vpop.permute.xlu1 %1449  ;;  %v9872_v25 = vld [vmem:[#allocation2 + $0xb4] sm:$0xff]  }
 0x15f   : > { %v3399_v3 = vrot.slane %v3397_v7, 5  ;;  %v9031_v49 = vcombine.low %v11196_v35, %v2735_v6  ;;  %v2380_v12 = vsel %vm10191_vm15, %v2375_v53, %v2379_v40  ;;  %v3625_v8 = vld [vmem:[#allocation2 + $0xb4] sm:$0xe]  ;;  %v3626_v11 = vld [vmem:[#allocation2 + $0xb8] sm:$0xf]  ;;  %v3413_v47 = vrot.slane %v3411_v37, 5 }
 0x160   : > { %v8999_v22 = vcombine.low %v2370_v58, %v2380_v12  ;;  %v3082_v23 = vld [vmem:[#allocation2 + $0xbc] sm:$0x1]  ;;  %v3417_v18 = vrot.slane %v3415_v16, 4  ;;  %v3404_v56 = vrot.slane %v3402_v55, 4  ;;  %v3407_v31 = vrot.slane %v3405_v19, 5  ;;  %1489 = vst.msk [vmem:[#allocation3 + $0x48] sm:$0xff] %vm1479_vm9, %v1450_v62 }
 0x161   : > { %v3400_v17 = vsel %vm10191_vm15, %v3395_v50, %v3399_v3  ;;  %v3627_v24 = vld [vmem:[#allocation2 + $0xbc] sm:$0x1]  ;;  %v3421_v26 = vshll.u32 %v3082_v23, 16  ;;  %v3769_v15 = vsel %vm10162_vm11, %v9078_v27, %v3768_v4  ;;  %v990_v29 = vld [vmem:[#allocation2 + $0xa8] sm:$0xf]  ;;  %v3770_v32 = vrot.slane %v3768_v4, 4 }
 0x162   : > { %v9062_v34 = vcombine.low %v3390_v36, %v3400_v17  ;;  %2503 = vrot.lane.b32.xlu1 %v8999_v22, %s10043_s16  ;;  %v3418_v45 = vor.u32 %v3417_v18, %v3413_v47  ;;  %v3771_v63 = vrot.slane %v3624_v9, 5  ;;  %v9079_v38 = vrot.slane %v3625_v8, 9  ;;  %v991_v10 = vld [vmem:[#allocation2 + $0xac] sm:$0xf]  ;;  %v992_v51 = vld [vmem:[#allocation2 + $0xb0] sm:$0x1]  ;;  %v1774_v20 = vpop.permute.xlu1 %1773 }
 0x163   : > { %v3408_v39 = vor.u32 %v3407_v31, %v3404_v56  ;;  %v3423_v46 = vrot.slane %v3421_v26, 5  ;;  %v3775_v57 = vrot.slane %v3626_v11, 5  ;;  %v3778_v43 = vrot.slane %v3627_v24, 5  ;;  %v3914_v33 = vld [vmem:[#allocation3 + $0x38] sm:$0xff]  ;;  %1813 = vst.msk [vmem:[#allocation3 + $0x48] sm:$0xff] %vm13383_vm10, %v1774_v20  ;;  %v2494_v61 = vpop.permute.xlu0 %2493  ;;  %v9883_v44 = vld [vmem:[#allocation2 + $0xa8] sm:$0xff]  }
 0x164   : > { %3545 = vrot.lane.b32.xlu0 %v9062_v34, %s10044_s17  ;;  %v3419_v53 = vrot.slane %v3418_v45, 4  ;;  %v3772_v54 = vsel %vm10162_vm11, %v3770_v32, %v3771_v63  ;;  %v1336_v21 = vshrl.u32 %v990_v29, 16  ;;  %v1339_v27 = vshll.u32 %v990_v29, 16  ;;  %v993_v59 = vld [vmem:[#allocation2 + $0xb4] sm:$0xf]  ;;  %9716 = vmatmul.mubr.msk.bf16.gmra.mrb[12].mxu0 %vm3950_vm5, %v3914_v33  ;;  %2534 = vst.msk [vmem:[#allocation3 + $0x40] sm:$0xff] %vm2525_vm13, %v2494_v61 }
 0x165   : > { %v3409_v35 = vrot.slane %v3408_v39, 4  ;;  %v9094_v5 = vcombine.low %v3769_v15, %v3772_v54  ;;  %v11223_v60 = vsel %vm10162_vm11, %v9079_v38, %v3775_v57  ;;  %v3777_v42 = vrot.slane %v3775_v57, 4  ;;  %v994_v4 = vld [vmem:[#allocation2 + $0xb8] sm:$0xf]  ;;  %v995_v52 = vld [vmem:[#allocation2 + $0xbc] sm:$0x1] }
 0x166   : > { %2824 = vrot.lane.b32.xlu1 %v9031_v49, %s10041_s14  ;;  %v3424_v7 = vsel %vm10191_vm15, %v3419_v53, %v3423_v46  ;;  %v1338_v58 = vrot.slane %v1336_v21, 4  ;;  %v1341_v30 = vrot.slane %v1339_v27, 5  ;;  %v1345_v28 = vshll.u32 %v991_v10, 16  ;;  %v1538_v49 = vld [vmem:[#allocation2 + $0xa8] sm:$0xe]  ;;  %v9884_v17 = vld [vmem:[#allocation2 + $0xb4] sm:$0xff]   ;;  %v1951_v34 = vpop.permute.xlu1 %1950 }
 0x167   : > { %v3414_v40 = vsel %vm10191_vm15, %v3409_v35, %v3413_v47  ;;  %v11236_v6 = vsel %vm10162_vm11, %v3777_v42, %v3778_v43  ;;  %v1349_v50 = vshrl.u32 %v991_v10, 16  ;;  %v1355_v3 = vshll.u32 %v992_v51, 16  ;;  %v1539_v9 = vld [vmem:[#allocation2 + $0xac] sm:$0xf]  ;;  %v1540_v12 = vld [vmem:[#allocation2 + $0xb0] sm:$0x1]  ;;  %v2815_v23 = vpop.permute.xlu0 %2814 }
 0x168   : > { %3866 = vrot.lane.b32.xlu0 %v9094_v5, %s10042_s15  ;;  %v9063_v36 = vcombine.low %v3414_v40, %v3424_v7  ;;  %v9095_v14 = vcombine.low %v11223_v60, %v11236_v6  ;;  %v1342_v37 = vor.u32 %v1341_v30, %v1338_v58  ;;  %v1347_v16 = vrot.slane %v1345_v28, 5  ;;  %v1541_v22 = vld [vmem:[#allocation2 + $0xb4] sm:$0xe]  ;;  %v1542_v56 = vld [vmem:[#allocation2 + $0xb8] sm:$0xf]  ;;  %1990 = vst.msk [vmem:[#allocation3 + $0x48] sm:$0xff] %vm13407_vm8, %v1951_v34 }
 0x169   : > { %vm13408_vm12 = vcmask 31744   ;;  %v1351_v55 = vrot.slane %v1349_v50, 4  ;;  %v1357_v19 = vrot.slane %v1355_v3, 5  ;;  %v1360_v8 = vshrl.u32 %v993_v59, 16  ;;  %v1543_v45 = vld [vmem:[#allocation2 + $0xbc] sm:$0x1] }
 0x16a   : > { %946 = vst.msk [vmem:[#allocation3 + $0x70] sm:$0xff] %vm13408_vm12, %v9883_v44  ;;  %v1363_v11 = vshll.u32 %v993_v59, 16  ;;  %3002 = vrot.lane.b32.xlu1 %v9872_v25, %s10040_s13  ;;  %v1343_v47 = vrot.slane %v1342_v37, 4  ;;  %v1369_v18 = vshll.u32 %v994_v4, 16  ;;  %v1373_v24 = vshrl.u32 %v994_v4, 16  ;;  %947 = vst.msk [vmem:[#allocation3 + $0x78] sm:$0xff] %vm13408_vm12, %v9884_v17 }
 0x16b   : > { %v1379_v62 = vshll.u32 %v995_v52, 16  ;;  %vm13409_vm10 = vcmask 195744   ;;  %v1352_v31 = vor.u32 %v1351_v55, %v1347_v16  ;;  %v1362_v26 = vrot.slane %v1360_v8, 4  ;;  %v282_v46 = vld [vmem:[#allocation2 + $0xc0] sm:$0x1]  ;;  %v2993_v51 = vpop.permute.xlu0 %2992 }
 0x16c   : > { %2855 = vst.msk [vmem:[#allocation3 + $0x40] sm:$0xff] %vm13409_vm10, %v2815_v23  ;;  %v1365_v15 = vrot.slane %v1363_v11, 5  ;;  %v8952_v29 = vrot.slane %v1538_v49, 9  ;;  %v1348_v32 = vsel %vm10191_vm15, %v1343_v47, %v1347_v16  ;;  %v1371_v63 = vrot.slane %v1369_v18, 5  ;;  %v365_v54 = vld [vmem:[%s10173_s9 + $0x78] sm:$0xf] }
 0x16d   : > { %v1375_v38 = vrot.slane %v1373_v24, 4  ;;  %v1381_v39 = vrot.slane %v1379_v62, 5  ;;  %v1353_v57 = vrot.slane %v1352_v31, 4  ;;  %v1695_v10 = vrot.slane %v1539_v9, 5  ;;  %v366_v25 = vld [vmem:[%s10173_s9 + $0x7c] sm:$0xf] }
 0x16e   : > { %v1366_v43 = vor.u32 %v1365_v15, %v1362_v26  ;;  %v1698_v53 = vrot.slane %v1540_v12, 5  ;;  %3547 = vrot.lane.b32.xlu1 %v9063_v36, %s10044_s17  ;;  %v8953_v27 = vrot.slane %v1541_v22, 9  ;;  %v1702_v20 = vrot.slane %v1542_v56, 5  ;;  %3033 = vst.msk [vmem:[#allocation3 + $0x40] sm:$0xff] %vm3024_vm2, %v2993_v51  ;;  %v2039_v59 = vld [vmem:[#allocation2 + $0xb4] sm:$0xf] }
 0x16f   : > { %v1376_v21 = vor.u32 %v1375_v38, %v1371_v63  ;;  %v1705_v33 = vrot.slane %v1543_v45, 5  ;;  %v1358_v35 = vsel %vm10191_vm15, %v1353_v57, %v1357_v19  ;;  %v1696_v60 = vsel %vm10162_vm11, %v8952_v29, %v1695_v10  ;;  %v2040_v61 = vld [vmem:[#allocation2 + $0xb8] sm:$0xf]  ;;  %v2041_v50 = vld [vmem:[#allocation2 + $0xbc] sm:$0x1]  ;;  %s9433_s9 = sshll.u32 %s10099_s22, 10 }
 0x170   : > { %v1367_v5 = vrot.slane %v1366_v43, 4  ;;  %v1697_v42 = vrot.slane %v1695_v10, 4  ;;  %v8936_v7 = vcombine.low %v1348_v32, %v1358_v35  ;;  %v1703_v30 = vsel %vm10162_vm11, %v8953_v27, %v1702_v20  ;;  %v332_v37 = vld [vmem:[#allocation2 + $0xc8] sm:$0x1]  ;;  %v2584_v55 = vld [vmem:[#allocation2 + $0xb4] sm:$0xe] }
 0x171   : > { %v1377_v58 = vrot.slane %v1376_v21, 4  ;;  %v1704_v28 = vrot.slane %v1702_v20, 4  ;;  %v283_v40 = vsel %vm10131_vm3, 0, %v282_v46  ;;  %v625_v6 = vshrl.u32 %v365_v54, 16  ;;  %v2585_v19 = vld [vmem:[#allocation2 + $0xb8] sm:$0xf] }
 0x172   : > { %v1372_v4 = vsel %vm10191_vm15, %v1367_v5, %v1371_v63  ;;  %v1699_v44 = vsel %vm10162_vm11, %v1697_v42, %v1698_v53  ;;  %3868 = vrot.lane.b32.xlu1 %v9095_v14, %s10042_s15  ;;  %1459 = vrot.lane.b32.xlu0 %v8936_v7, %s10038_s11  ;;  %284 = vst [vmem:[#allocation2 + $0xc0] sm:$0x1] %v283_v40  ;;  %v628_v36 = vshll.u32 %v365_v54, 16  ;;  %v633_v17 = vshrl.u32 %v366_v25, 16  ;;  %v2586_v34 = vld [vmem:[#allocation2 + $0xbc] sm:$0x1] }
 0x173   : > { %v1382_v3 = vsel %vm10191_vm15, %v1377_v58, %v1381_v39  ;;  %v8968_v52 = vcombine.low %v1696_v60, %v1699_v44  ;;  %v1706_v49 = vsel %vm10162_vm11, %v1704_v28, %v1705_v33  ;;  %v627_v12 = vrot.slane %v625_v6, 7  ;;  %v11269_v23 = vld [vmem:[#allocation2 + $0xcc] sm:$0xf]  ;;  %v9873_v47 = vld [vmem:[#allocation2 + $0xb4] sm:$0xff]   ;;  %v2496_v31 = vpop.permute.xlu1 %2495  ;;  %v3087_v5 = vld [vmem:[#allocation2 + $0xd0] sm:$0xf] }
 0x174   : > { %v8937_v16 = vcombine.low %v1372_v4, %v1382_v3  ;;  %v8969_v9 = vcombine.low %v1703_v30, %v1706_v49  ;;  %v636_v8 = vshll.u32 %v366_v25, 16  ;;  %v2382_v14 = vshrl.u32 %v2039_v59, 16  ;;  %2535 = vst.msk [vmem:[#allocation3 + $0x48] sm:$0xff] %vm2525_vm13, %v2496_v31  ;;  %s13328_s22 = scalar_lea.sflag [#allocation8], %s215_s30 }
 0x175   : > { %v2385_v11 = vshll.u32 %v2039_v59, 16  ;;  %v2391_v22 = vshll.u32 %v2040_v61, 16  ;;  %v630_v18 = vor.u32 %v628_v36, %v627_v12  ;;  %v631_v24 = vrot.slane %v627_v12, 4 }
 0x176   : > { %v635_v62 = vrot.slane %v633_v17, 7  ;;  %v2395_v56 = vshrl.u32 %v2040_v61, 16  ;;  %1461 = vrot.lane.b32.xlu1 %v8937_v16, %s10038_s11  ;;  %1783 = vrot.lane.b32.xlu0 %v8968_v52, %s10037_s10  ;;  %v2384_v26 = vrot.slane %v2382_v14, 4  ;;  %v2401_v45 = vshll.u32 %v2041_v50, 16  ;;  %v3538_v10 = vpop.permute.xlu0 %3537  ;;  %v11302_v52 = vld [vmem:[#allocation2 + $0xd4] sm:$0x1] }
 0x177   : > { %v2387_v15 = vrot.slane %v2385_v11, 5  ;;  %v2393_v29 = vrot.slane %v2391_v22, 5  ;;  %v333_v38 = vsel %vm10145_vm7, 0, %v332_v37  ;;  %v9016_v57 = vrot.slane %v2584_v55, 9  ;;  %v2817_v20 = vpop.permute.xlu1 %2816  ;;  %3578 = vst.msk [vmem:[#allocation3 + $0x40] sm:$0xff] %vm3569_vm6, %v3538_v10  ;;  %vm13410_vm7 = vmmov %vm13409_vm10  ;;  %s8837_s11 = sshll.u32 %s13255_s7, 4  ;;  %s13322_s11 = int_to_ptr.vmem [resolvable:$true] %s8837_s11 }
 0x178   : > { %v638_v32 = vor.u32 %v636_v8, %v635_v62  ;;  %v2397_v63 = vrot.slane %v2395_v56, 4  ;;  %v2403_v46 = vrot.slane %v2401_v45, 5  ;;  %334 = vst [vmem:[#allocation2 + $0xc8] sm:$0x1] %v333_v38  ;;  %v2738_v43 = vrot.slane %v2585_v19, 5  ;;  %2856 = vst.msk [vmem:[#allocation3 + $0x48] sm:$0xff] %vm13410_vm7, %v2817_v20 }
 0x179   : > { %v2388_v39 = vor.u32 %v2387_v15, %v2384_v26  ;;  %v796_v54 = vld [vmem:[#allocation2 + $0xc0] sm:$0xf]  ;;  %v2741_v21 = vrot.slane %v2586_v34, 5  ;;  %v3450_v27 = vshrl.u32 %v11269_v23, 16  ;;  %v640_v60 = vrot.slane %v635_v62, 4 }
 0x17a   : > { %v639_v53 = vsel %vm10201_vm1, %v631_v24, %v638_v32  ;;  %v2398_v51 = vor.u32 %v2397_v63, %v2393_v29  ;;  %1785 = vrot.lane.b32.xlu1 %v8969_v9, %s10037_s10  ;;  %1960 = vrot.lane.b32.xlu0 %v9873_v47, %s10039_s12  ;;  %v797_v2 = vsel %vm10183_vm14, %v630_v18, %v796_v54  ;;  %v2740_v25 = vrot.slane %v2738_v43, 4  ;;  %v3859_v59 = vpop.permute.xlu0 %3858 }
 0x17b   : > { %799 = vst.msk [vmem:[#allocation2 + $0xc4] sm:$0xf] %vm224_vm0, %v639_v53  ;;  %v2389_v33 = vrot.slane %v2388_v39, 4  ;;  %798 = vst [vmem:[#allocation2 + $0xc0] sm:$0xf] %v797_v2  ;;  %v2739_v41 = vsel %vm10162_vm11, %v9016_v57, %v2738_v43  ;;  %v2995_v58 = vpop.permute.xlu1 %2994  ;;  %v11295_v28 = vrot.slane %v3450_v27, 4 }
 0x17c   : > { %v2399_v35 = vrot.slane %v2398_v51, 4  ;;  %v2742_v7 = vsel %vm10162_vm11, %v2740_v25, %v2741_v21  ;;  %3899 = vst.msk [vmem:[#allocation3 + $0x40] sm:$0xff] %vm3890_vm4, %v3859_v59  ;;  %v3453_v4 = vshll.u32 %v11269_v23, 16  ;;  %v3459_v40 = vshll.u32 %v3087_v5, 16 }
 0x17d   : > { %v2394_v42 = vsel %vm10191_vm15, %v2389_v33, %v2393_v29  ;;  %3034 = vst.msk [vmem:[#allocation3 + $0x48] sm:$0xff] %vm3024_vm2, %v2995_v58  ;;  %v3463_v6 = vshrl.u32 %v3087_v5, 16  ;;  %v9032_v3 = vcombine.low %v2739_v41, %v2742_v7  ;;  %v3469_v47 = vshll.u32 %v11302_v52, 16 }
 0x17e   : > { %v2404_v61 = vsel %vm10191_vm15, %v2399_v35, %v2403_v46  ;;  %v3455_v1 = vrot.slane %v3453_v4, 5  ;;  %v11307_v26 = vrot.slane %v3459_v40, 5  ;;  %vm13411_vm0 = vcmask 97344   ;;  %v11323_v4 = vld [vmem:[#allocation2 + $0xd0] sm:$0xf] }
 0x17f   : > { %v9000_v30 = vcombine.low %v2394_v42, %v2404_v61  ;;  %v800_v44 = vld [vmem:[#allocation2 + $0xc8] sm:$0x1]  ;;  %v11309_v15 = vrot.slane %v3463_v6, 4  ;;  %vm13413_vm14 = vcmask 516096   ;;  %vm13416_vm12 = vsmask.f32 256 }
 0x180   : > { %v801_v50 = vsel %vm10131_vm3, %v640_v60, %v800_v44  ;;  %v3456_v43 = vor.u32 %v3455_v1, %v11295_v28  ;;  %vm13412_vm3 = vsmask.f32 7938  ;;  %vm13417_vm7 = vmmov %vm13413_vm14  ;;  %v4227_v1 = vld [vmem:[#allocation4 + $0x18] sm:$0x1] }
 0x181   : > { %2505 = vrot.lane.b32.xlu0 %v9000_v30, %s10043_s16  ;;  %802 = vst [vmem:[#allocation2 + $0xc8] sm:$0x1] %v801_v50  ;;  %v3466_v59 = vor.u32 %v11309_v15, %v11307_v26  ;;  %vm11331_vm10 = vmand %vm13413_vm14, %vm13412_vm3  ;;  %vm13420_vm3 = vcmask 97344  }
 0x182   : > { %v2043_v49 = vld [vmem:[#allocation2 + $0xc4] sm:$0xf]  ;;  %v2042_v16 = vld [vmem:[#allocation2 + $0xc0] sm:$0xf]  ;;  %vm13421_vm14 = vmmov %vm13407_vm8 }
 0x183   : > { %v2588_v36 = vld [vmem:[#allocation2 + $0xc4] sm:$0xf]  ;;  %v2415_v9 = vshll.u32 %v2043_v49, 16  ;;  %v2406_v12 = vshrl.u32 %v2042_v16, 16  ;;  %v2409_v17 = vshll.u32 %v2042_v16, 16  ;;  %v2419_v55 = vshrl.u32 %v2043_v49, 16  ;;  %v1452_v18 = vpop.permute.xlu0 %1451 }
 0x184   : > { %v9874_v37 = vld [vmem:[#allocation2 + $0xc0] sm:$0xff]   ;;  %v2745_v8 = vrot.slane %v2588_v36, 5  ;;  %v3915_v24 = vld [vmem:[#allocation3 + $0x40] sm:$0xff]  ;;  %1490 = vst.msk [vmem:[#allocation3 + $0x50] sm:$0xff] %vm1479_vm9, %v1452_v18 }
 0x185   : > { %v2587_v19 = vld [vmem:[#allocation2 + $0xc0] sm:$0xe]  ;;  %1962 = vrot.lane.b32.xlu1 %v9874_v37, %s10039_s12  ;;  %v2417_v14 = vrot.slane %v2415_v9, 5  ;;  %2826 = vrot.lane.b32.xlu0 %v9032_v3, %s10041_s14  ;;  %v2408_v11 = vrot.slane %v2406_v12, 4  ;;  %v2411_v22 = vrot.slane %v2409_v17, 5  ;;  %v2421_v34 = vrot.slane %v2419_v55, 4 }
 0x186   : > { %v9877_v23 = vld [vmem:[#allocation2 + $0xc0] sm:$0xff]   ;;  %v9017_v62 = vrot.slane %v2587_v19, 9  ;;  %v2747_v56 = vrot.slane %v2745_v8, 4  ;;  %9719 = vmatprep.mubr.msk.bf16.mxu0 %vm3950_vm5, %v3915_v24  ;;  %v3457_v12 = vrot.slane %v3456_v43, 4  ;;  %v3471_v17 = vrot.slane %v3469_v47, 5 }
 0x187   : > { %v3083_v31 = vld [vmem:[#allocation2 + $0xc0] sm:$0xf]  ;;  %v2412_v29 = vor.u32 %v2411_v22, %v2408_v11  ;;  %v2422_v45 = vor.u32 %v2421_v34, %v2417_v14  ;;  %v3084_v32 = vld [vmem:[#allocation2 + $0xc4] sm:$0xf]  ;;  %v3540_v27 = vpop.permute.xlu1 %3539  ;;  %v1776_v20 = vpop.permute.xlu0 %1775  ;;  %v3631_v19 = vld [vmem:[#allocation2 + $0xcc] sm:$0xe] }
 0x188   : > { %v3426_v63 = vshrl.u32 %v3083_v31, 16  ;;  %v3429_v38 = vshll.u32 %v3083_v31, 16  ;;  %v2044_v39 = vld [vmem:[#allocation2 + $0xc8] sm:$0x1]  ;;  %v3628_v21 = vld [vmem:[#allocation2 + $0xc0] sm:$0xe]  ;;  %v2746_v41 = vsel %vm10162_vm11, %v9017_v62, %v2745_v8 }
 0x189   : > { %v2589_v46 = vld [vmem:[#allocation2 + $0xc8] sm:$0x1]  ;;  %3004 = vrot.lane.b32.xlu0 %v9877_v23, %s10040_s13  ;;  %v2413_v10 = vrot.slane %v2412_v29, 4  ;;  %v2423_v53 = vrot.slane %v2422_v45, 4  ;;  %v2425_v54 = vshll.u32 %v2044_v39, 16  ;;  %v3435_v25 = vshll.u32 %v3084_v32, 16 }
 0x18a   : > { %v3085_v57 = vld [vmem:[#allocation2 + $0xc8] sm:$0x1]  ;;  %v2748_v51 = vrot.slane %v2589_v46, 5  ;;  %v3428_v2 = vrot.slane %v3426_v63, 4  ;;  %v3431_v33 = vrot.slane %v3429_v38, 5  ;;  %v3439_v35 = vshrl.u32 %v3084_v32, 16 }
 0x18b   : > { %3579 = vst.msk [vmem:[#allocation3 + $0x48] sm:$0xff] %vm3569_vm6, %v3540_v27  ;;  %v2418_v5 = vsel %vm10191_vm15, %v2413_v10, %v2417_v14  ;;  %v2427_v60 = vrot.slane %v2425_v54, 5  ;;  %v3445_v42 = vshll.u32 %v3085_v57, 16  ;;  %v3629_v61 = vld [vmem:[#allocation2 + $0xc4] sm:$0xf]  ;;  %v3437_v58 = vrot.slane %v3435_v25, 5  ;;  %v3861_v3 = vpop.permute.xlu1 %3860  ;;  %v1953_v52 = vpop.permute.xlu0 %1952 }
 0x18c   : > { %1814 = vst.msk [vmem:[#allocation3 + $0x50] sm:$0xff] %vm13411_vm0, %v1776_v20  ;;  %v3432_v7 = vor.u32 %v3431_v33, %v3428_v2  ;;  %v3441_v30 = vrot.slane %v3439_v35, 4  ;;  %v3630_v28 = vld [vmem:[#allocation2 + $0xc8] sm:$0x1]  ;;  %v2749_v40 = vsel %vm10162_vm11, %v2747_v56, %v2748_v51  ;;  %v9080_v50 = vrot.slane %v3628_v21, 9  ;;  %vm11340_vm0 = vmand %vm13417_vm7, %vm13416_vm12  ;;  %v9878_v46 = vld [vmem:[#allocation2 + $0xcc] sm:$0xff]  }
 0x18d   : > { %v2428_v44 = vsel %vm10191_vm15, %v2423_v53, %v2427_v60  ;;  %v3447_v6 = vrot.slane %v3445_v42, 5  ;;  %v3782_v9 = vrot.slane %v3629_v61, 5  ;;  %3900 = vst.msk [vmem:[#allocation3 + $0x48] sm:$0xff] %vm3890_vm4, %v3861_v3  ;;  %v3785_v55 = vrot.slane %v3630_v28, 5  ;;  %v4224_v47 = vld [vmem:[#allocation4 + $0xc] sm:$0x1]  ;;  %vm13424_vm7 = vmmov %vm13420_vm3 }
 0x18e   : > { %v9001_v36 = vcombine.low %v2418_v5, %v2428_v44  ;;  %v3433_v37 = vrot.slane %v3432_v7, 4  ;;  %v3442_v16 = vor.u32 %v3441_v30, %v3437_v58  ;;  %1991 = vst.msk [vmem:[#allocation3 + $0x50] sm:$0xff] %vm13407_vm8, %v1953_v52  ;;  %v3789_v8 = vrot.slane %v11323_v4, 5  ;;  %v4276_v18 = vld [vmem:[#allocation4 + $0x20] sm:$0x1] }
 0x18f   : > { %v9033_v11 = vcombine.low %v2746_v41, %v2749_v40  ;;  %v3784_v23 = vrot.slane %v3782_v9, 4  ;;  %v3467_v24 = vrot.slane %v3466_v59, 4  ;;  %v3633_v62 = vld [vmem:[#allocation2 + $0xd4] sm:$0x1]  ;;  %v1454_v56 = vpop.permute.xlu1 %1453  ;;  %v4228_v31 = vsel %vm11340_vm0, 0, %v4227_v1 }
 0x190   : > { %2507 = vrot.lane.b32.xlu1 %v9001_v36, %s10043_s16  ;;  %v3438_v22 = vsel %vm10191_vm15, %v3433_v37, %v3437_v58  ;;  %v3443_v34 = vrot.slane %v3442_v16, 4  ;;  %v4225_v15 = vsel %vm11340_vm0, 0, %v4224_v47  ;;  %v4277_v29 = vsel %vm11331_vm10, 0, %v4276_v18  ;;  %1491 = vst.msk [vmem:[#allocation3 + $0x58] sm:$0xff] %vm1479_vm9, %v1454_v56  ;;  %4229 = vst [vmem:[#allocation4 + $0x18] sm:$0x1] %v4228_v31 }
 0x191   : > { %v3783_v32 = vsel %vm10162_vm11, %v9080_v50, %v3782_v9  ;;  %v3786_v63 = vsel %vm10162_vm11, %v3784_v23, %v3785_v55  ;;  %4226 = vst [vmem:[#allocation4 + $0xc] sm:$0x1] %v4225_v15  ;;  %4278 = vst [vmem:[#allocation4 + $0x20] sm:$0x1] %v4277_v29  ;;  %v4273_v39 = vld [vmem:[#allocation4 + $0x14] sm:$0x1]  ;;  %v3462_v53 = vsel %vm10191_vm15, %v3457_v12, %v11307_v26 }
 0x192   : > { %v3448_v45 = vsel %vm10191_vm15, %v3443_v34, %v3447_v6  ;;  %v9081_v57 = vrot.slane %v3631_v19, 9  ;;  %v3792_v43 = vrot.slane %v3633_v62, 5  ;;  %v4274_v10 = vsel %vm11331_vm10, 0, %v4273_v39  ;;  %v4980_v60 = vld [vmem:[#allocation4] sm:$0xf]  ;;  %s10046_s16 = smov [#allocation7]  }
 0x193   : > { %v9064_v38 = vcombine.low %v3438_v22, %v3448_v45  ;;  %v3472_v54 = vsel %vm10191_vm15, %v3467_v24, %v3471_v17  ;;  %v9096_v51 = vcombine.low %v3783_v32, %v3786_v63  ;;  %v3791_v21 = vrot.slane %v3789_v8, 4  ;;  %v1778_v27 = vpop.permute.xlu1 %1777  ;;  %4275 = vst [vmem:[#allocation4 + $0x14] sm:$0x1] %v4274_v10  ;;  %v4981_v42 = vld [vmem:[#allocation4 + $0x4] sm:$0xf] }
 0x194   : > { %2828 = vrot.lane.b32.xlu1 %v9033_v11, %s10041_s14  ;;  %v3916_v20 = vld [vmem:[#allocation3 + $0x48] sm:$0xff]  ;;  %1815 = vst.msk [vmem:[#allocation3 + $0x58] sm:$0xff] %vm13420_vm3, %v1778_v27  ;;  %v9065_v33 = vcombine.low %v3462_v53, %v3472_v54  ;;  %v3790_v26 = vsel %vm10162_vm11, %v9081_v57, %v3789_v8  ;;  %vm13422_vm8 = vcmask 195744   ;;  %v5029_v41 = vshrl.u32 %v4980_v60, 16  ;;  %v4233_v4 = vld [vmem:[#allocation4 + $0x30] sm:$0x1]  ;;  %s13320_s14 = scalar_lea.hbm %s13375_s5, %s9433_s9 }
 0x195   : > { %3549 = vrot.lane.b32.xlu0 %v9064_v38, %s10044_s17  ;;  %9720 = vmatmul.mubr.msk.bf16.gmra.mrb[16].mxu0 %vm3950_vm5, %v3916_v20  ;;  %v2498_v2 = vpop.permute.xlu0 %2497  ;;  %v3793_v25 = vsel %vm10162_vm11, %v3791_v21, %v3792_v43  ;;  %v4982_v61 = vld [vmem:[#allocation4 + $0x8] sm:$0x1]  ;;  %v5032_v7 = vshll.u32 %v4980_v60, 16  ;;  %v5038_v58 = vshll.u32 %v4981_v42, 16  ;;  %v5042_v30 = vshrl.u32 %v4981_v42, 16  ;;  %vm13423_vm12 = vmmov %vm13422_vm8 }
 0x196   : > { %2536 = vst.msk [vmem:[#allocation3 + $0x50] sm:$0xff] %vm2525_vm13, %v2498_v2  ;;  %v9097_v59 = vcombine.low %v3790_v26, %v3793_v25  ;;  %v5048_v28 = vshll.u32 %v4982_v61, 16  ;;  %v5031_v40 = vrot.slane %v5029_v41, 4  ;;  %v4234_v50 = vsel %vm11340_vm0, 0, %v4233_v4  ;;  %v4230_v3 = vld [vmem:[#allocation4 + $0x24] sm:$0x1] }
 0x197   : > { %v5034_v6 = vrot.slane %v5032_v7, 5  ;;  %v5040_v52 = vrot.slane %v5038_v58, 5  ;;  %v5044_v36 = vrot.slane %v5042_v30, 4  ;;  %4235 = vst [vmem:[#allocation4 + $0x30] sm:$0x1] %v4234_v50  ;;  %v4231_v37 = vsel %vm11340_vm0, 0, %v4230_v3 }
 0x198   : > { %3006 = vrot.lane.b32.xlu1 %v9878_v46, %s10040_s13  ;;  %v4282_v16 = vld [vmem:[#allocation4 + $0x38] sm:$0x1]  ;;  %v5050_v12 = vrot.slane %v5048_v28, 5  ;;  %4232 = vst [vmem:[#allocation4 + $0x24] sm:$0x1] %v4231_v37  ;;  %v9891_v3 = vld [vmem:[%s13373_s3 + $0x40] sm:$0xff]  }
 0x199   : > { %3870 = vrot.lane.b32.xlu0 %v9096_v51, %s10042_s15  ;;  %v1955_v35 = vpop.permute.xlu1 %1954  ;;  %v2819_v5 = vpop.permute.xlu0 %2818  ;;  %v5035_v9 = vor.u32 %v5034_v6, %v5031_v40  ;;  %v4283_v17 = vsel %vm11331_vm10, 0, %v4282_v16  ;;  %v4279_v55 = vld [vmem:[#allocation4 + $0x2c] sm:$0x1]  ;;  %v4239_v19 = vld [vmem:[#allocation4 + $0x48] sm:$0x1]  ;;  %v5045_v8 = vor.u32 %v5044_v36, %v5040_v52  ;;  %9453 = vmatprep.subr.bf16.mxu1 %v9891_v3 }
 0x19a   : > { %1992 = vst.msk [vmem:[#allocation3 + $0x58] sm:$0xff] %vm13421_vm14, %v1955_v35  ;;  %4284 = vst [vmem:[#allocation4 + $0x38] sm:$0x1] %v4283_v17  ;;  %v4280_v1 = vsel %vm11331_vm10, 0, %v4279_v55  ;;  %v4240_v11 = vsel %vm11340_vm0, 0, %v4239_v19  ;;  %v9892_v37 = vld [vmem:[%s13373_s3] sm:$0xff]  }
 0x19b   : > { %2857 = vst.msk [vmem:[#allocation3 + $0x50] sm:$0xff] %vm13422_vm8, %v2819_v5  ;;  %v4236_v22 = vld [vmem:[#allocation4 + $0x3c] sm:$0x1]  ;;  %v4288_v34 = vld [vmem:[#allocation4 + $0x50] sm:$0x1]  ;;  %v5036_v23 = vrot.slane %v5035_v9, 4  ;;  %vm13425_vm8 = vmmov %vm13421_vm14  ;;  %9454 = vmatpush3.bf16.msra.mxu1 %v9892_v37 }
 0x19c   : > { %3551 = vrot.lane.b32.xlu1 %v9065_v33, %s10044_s17  ;;  %4281 = vst [vmem:[#allocation4 + $0x2c] sm:$0x1] %v4280_v1  ;;  %4241 = vst [vmem:[#allocation4 + $0x48] sm:$0x1] %v4240_v11  ;;  %v4237_v47 = vsel %vm11340_vm0, 0, %v4236_v22  ;;  %v4289_v18 = vsel %vm11331_vm10, 0, %v4288_v34 }
 0x19d   : > { %v2997_v44 = vpop.permute.xlu0 %2996  ;;  %v4285_v24 = vld [vmem:[#allocation4 + $0x44] sm:$0x1]  ;;  %v5046_v62 = vrot.slane %v5045_v8, 4  ;;  %4238 = vst [vmem:[#allocation4 + $0x3c] sm:$0x1] %v4237_v47  ;;  %v5041_v31 = vsel %vm10191_vm15, %v5036_v23, %v5040_v52  ;;  %v9895_v19 = vld [vmem:[%s13373_s3 + $0x8] sm:$0xff]  }
 0x19e   : > { %3035 = vst.msk [vmem:[#allocation3 + $0x50] sm:$0xff] %vm3024_vm2, %v2997_v44  ;;  %4290 = vst [vmem:[#allocation4 + $0x50] sm:$0x1] %v4289_v18  ;;  %v4286_v56 = vsel %vm11331_vm10, 0, %v4285_v24  ;;  %v4245_v54 = vld [vmem:[#allocation4 + $0x60] sm:$0x1] }
 0x19f   : > { %4287 = vst [vmem:[#allocation4 + $0x44] sm:$0x1] %v4286_v56  ;;  %v5051_v15 = vsel %vm10191_vm15, %v5046_v62, %v5050_v12  ;;  %v4246_v21 = vsel %vm11340_vm0, 0, %v4245_v54  ;;  %v4242_v25 = vld [vmem:[#allocation4 + $0x54] sm:$0x1]  ;;  %s9976_s17 = sshll.u32 %s10046_s16, 4  ;;  %s9977_s17 = int_to_ptr.vmem [resolvable:$false] %s9976_s17 }
 0x1a0   : > { %3872 = vrot.lane.b32.xlu1 %v9097_v59, %s10042_s15  ;;  %v9166_v29 = vcombine.low %v5041_v31, %v5051_v15  ;;  %4247 = vst [vmem:[#allocation4 + $0x60] sm:$0x1] %v4246_v21  ;;  %v4243_v35 = vsel %vm11340_vm0, 0, %v4242_v25  ;;  %v4294_v5 = vld [vmem:[#allocation4 + $0x68] sm:$0x1]  ;;  %v9894_v12 = vld [vmem:[%s13373_s3 + $0x48] sm:$0xff]   ;;  %p9979_p0 = scmp.lt.s32.totalorder %s13322_s11, %s9977_s17 }
 0x1a1   : > { %4244 = vst [vmem:[#allocation4 + $0x54] sm:$0x1] %v4243_v35  ;;  %v4295_v60 = vsel %vm11331_vm10, 0, %v4294_v5  ;;  %v11430_v59 = vld [vmem:[%s13372_s2] ss:$0 sm:$0xff]  ;;  %9455 = vmatprep.subr.bf16.mxu1 %v9894_v12  ;;  %s9972_s15 = scalar_lea.vmem %s13322_s11, 1024 }
 0x1a2   : > { %4296 = vst [vmem:[#allocation4 + $0x68] sm:$0x1] %v4295_v60  ;;  %v4291_v4 = vld [vmem:[#allocation4 + $0x5c] sm:$0x1]  ;;  %v4730_v56 = vld [vmem:[#allocation4 + $0x18] sm:$0xf]  ;;  %9456 = vmatpush3.bf16.msra.mxu1 %v9895_v19  ;;  %p9973_p11 = scmp.ne.s32.totalorder %s13322_s11, %s9972_s15 }
 0x1a3   : > { %v4292_v50 = vsel %vm11331_vm10, 0, %v4291_v4  ;;  %v4744_v19 = vld [vmem:[#allocation4 + $0x30] sm:$0xf]  ;;  %s9978_s23 = scalar_lea.vmem %s9977_s17, 2048 }
 0x1a4   : > { %5460 = vrot.lane.b32.xlu1 %v9166_v29, %s10045_s8  ;;  %4293 = vst [vmem:[#allocation4 + $0x5c] sm:$0x1] %v4292_v50  ;;  %p9974_p12 = pnand %p9973_p11, %p10116_p5  ;;  %p9980_p1 = scmp.lt.s32.totalorder %s9978_s23, %s9972_s15 }
 0x1a6   : > { %v2500_v45 = vpop.permute.xlu1 %2499  ;;  %p9975_p13 = pneg %p9974_p12  ;;  %p9981_p2 = por %p9980_p1, %p9979_p0 }
 0x1a7   : > { %2537 = vst.msk [vmem:[#allocation3 + $0x58] sm:$0xff] %vm2525_vm13, %v2500_v45 }
 0x1a8   : > { %p9982_p3 = pnand %p9981_p2, %p9975_p13 }
 0x1a9   : > { %v3542_v32 = vpop.permute.xlu0 %3541 }
 0x1aa   : > { %v2821_v63 = vpop.permute.xlu1 %2820  ;;  %3580 = vst.msk [vmem:[#allocation3 + $0x50] sm:$0xff] %vm3569_vm6, %v3542_v32 }
 0x1ab   : > { %2858 = vst.msk [vmem:[#allocation3 + $0x58] sm:$0xff] %vm13423_vm12, %v2821_v63  ;;  %v4723_v63 = vld [vmem:[#allocation4 + $0xc] sm:$0xf] }
 0x1ad   : > { %v3863_v38 = vpop.permute.xlu0 %3862 }
 0x1ae   : > { %v2999_v39 = vpop.permute.xlu1 %2998  ;;  %3901 = vst.msk [vmem:[#allocation3 + $0x50] sm:$0xff] %vm3890_vm4, %v3863_v38 }
 0x1af   : > { %3036 = vst.msk [vmem:[#allocation3 + $0x58] sm:$0xff] %vm3024_vm2, %v2999_v39 }
 0x1b2   : > { %v3544_v46 = vpop.permute.xlu1 %3543 }
 0x1b3   : > { %3581 = vst.msk [vmem:[#allocation3 + $0x58] sm:$0xff] %vm3569_vm6, %v3544_v46 }
 0x1b5   : > { %v3917_v57 = vld [vmem:[#allocation3 + $0x50] sm:$0xff] }
 0x1b6   : > { %v3865_v43 = vpop.permute.xlu1 %3864  ;;  %9723 = vmatprep.mubr.msk.bf16.mxu0 %vm3950_vm5, %v3917_v57 }
 0x1b7   : > { %3902 = vst.msk [vmem:[#allocation3 + $0x58] sm:$0xff] %vm3890_vm4, %v3865_v43  ;;  %v1456_v10 = vpop.permute.xlu0 %1455  ;;  %v4734_v43 = vld [vmem:[#allocation4 + $0x20] sm:$0x1] }
 0x1b8   : > { %1492 = vst.msk [vmem:[#allocation3 + $0x60] sm:$0xff] %vm1479_vm9, %v1456_v10 }
 0x1bb   : > { %v1458_v53 = vpop.permute.xlu1 %1457  ;;  %v1780_v51 = vpop.permute.xlu0 %1779 }
 0x1bc   : > { %1493 = vst.msk [vmem:[#allocation3 + $0x68] sm:$0xff] %vm1479_vm9, %v1458_v53 }
 0x1bd   : > { %1816 = vst.msk [vmem:[#allocation3 + $0x60] sm:$0xff] %vm13424_vm7, %v1780_v51  ;;  %vm13426_vm7 = vsmask.f32 7938 }
 0x1be   : > { %v3918_v20 = vld [vmem:[#allocation3 + $0x58] sm:$0xff] }
 0x1bf   : > { %v1782_v27 = vpop.permute.xlu1 %1781  ;;  %9724 = vmatmul.mubr.msk.bf16.gmra.mrb[20].mxu0 %vm3950_vm5, %v3918_v20  ;;  %v1957_v2 = vpop.permute.xlu0 %1956  ;;  %v4727_v20 = vld [vmem:[#allocation4 + $0x14] sm:$0x1] }
 0x1c0   : > { %1817 = vst.msk [vmem:[#allocation3 + $0x68] sm:$0xff] %vm13420_vm3, %v1782_v27  ;;  %vm13427_vm3 = vcmask 519168  }
 0x1c1   : > { %1993 = vst.msk [vmem:[#allocation3 + $0x60] sm:$0xff] %vm13421_vm14, %v1957_v2  ;;  %vm11455_vm14 = vmand %vm13427_vm3, %vm13426_vm7 }
 0x1c2   : > { %vm13432_vm7 = vmmov %vm13427_vm3 }
 0x1c5   : > { %v1959_v33 = vpop.permute.xlu1 %1958  ;;  %v9705_v61 = vpop.f32.mrb[0].mxu0 }
 0x1c6   : > { %v2502_v26 = vpop.permute.xlu0 %2501  ;;  %1994 = vst.msk [vmem:[#allocation3 + $0x68] sm:$0xff] %vm13425_vm8, %v1959_v33  ;;  %v4046_v7 = vadd.f32 %v9705_v61, %v11430_v59  ;;  %v4037_v58 = vpop.f32.mrb[1].mxu0  ;;  %vm13430_vm8 = vmmov %vm13423_vm12 }
 0x1c7   : > { %2538 = vst.msk [vmem:[#allocation3 + $0x60] sm:$0xff] %vm2525_vm13, %v2502_v26  ;;  %v4038_v30 = vadd.f32 %v11430_v59, %v4037_v58  ;;  %v9706_v28 = vpop.f32.mrb[2].mxu0 }
 0x1c8   : > { %v4166_v44 = vmax.f32 %v4046_v7, 0.0  ;;  %v4049_v40 = vadd.f32 %v9706_v28, %v11430_v59  ;;  %v4040_v6 = vpop.f32.mrb[3].mxu0 }
 0x1c9   : > { %v4164_v52 = vmax.f32 %v4038_v30, 0.0  ;;  %v4041_v36 = vadd.f32 %v11430_v59, %v4040_v6 }
 0x1ca   : > { %v2823_v42 = vpop.permute.xlu0 %2822  ;;  %v9403_v16 = vpack.c.bf16 %v4166_v44, %v4166_v44  ;;  %v4167_v9 = vmax.f32 %v4049_v40, 0.0 }
 0x1cb   : > { %2859 = vst.msk [vmem:[#allocation3 + $0x60] sm:$0xff] %vm13423_vm12, %v2823_v42  ;;  %v9401_v17 = vpack.c.bf16 %v4164_v52, %v4164_v52  ;;  %v4165_v55 = vmax.f32 %v4041_v36, 0.0  ;;  %vm13431_vm12 = vmmov %vm13427_vm3  ;;  %vm4963_vm3 = vcmask 523264  }
 0x1cc   : > { %v4419_v11 = vshrl.u32 %v9403_v16, 16  ;;  %v9404_v22 = vpack.c.bf16 %v4167_v9, %v4167_v9  ;;  %v4422_v18 = vshll.u32 %v9403_v16, 16 }
 0x1cd   : > { %v4402_v34 = vshrl.u32 %v9401_v17, 16  ;;  %v9402_v23 = vpack.c.bf16 %v4165_v55, %v4165_v55  ;;  %v4405_v15 = vshll.u32 %v9401_v17, 16 }
 0x1ce   : > { %v3001_v41 = vpop.permute.xlu0 %3000  ;;  %v4421_v47 = vrot.slane %v4419_v11, 7  ;;  %v4427_v24 = vshrl.u32 %v9404_v22, 16  ;;  %v4430_v39 = vshll.u32 %v9404_v22, 16 }
 0x1cf   : > { %3037 = vst.msk [vmem:[#allocation3 + $0x60] sm:$0xff] %vm3024_vm2, %v3001_v41  ;;  %v4404_v31 = vrot.slane %v4402_v34, 7  ;;  %v4410_v29 = vshrl.u32 %v9402_v23, 16  ;;  %v4413_v53 = vshll.u32 %v9402_v23, 16 }
 0x1d0   : > { %v4424_v32 = vor.u32 %v4422_v18, %v4421_v47  ;;  %v4429_v38 = vrot.slane %v4427_v24, 7  ;;  %v4425_v54 = vrot.slane %v4421_v47, 4  ;;  %v4737_v47 = vld [vmem:[#allocation4 + $0x24] sm:$0xf] }
 0x1d1   : > { %v4407_v57 = vor.u32 %v4405_v15, %v4404_v31  ;;  %v4412_v10 = vrot.slane %v4410_v29, 7  ;;  %v4408_v2 = vrot.slane %v4404_v31, 4 }
 0x1d2   : > { %v4731_v51 = vsel %vm11455_vm14, %v4424_v32, %v4730_v56  ;;  %v4432_v21 = vor.u32 %v4430_v39, %v4429_v38  ;;  %v4434_v27 = vrot.slane %v4429_v38, 4 }
 0x1d3   : > { %4732 = vst [vmem:[#allocation4 + $0x18] sm:$0xf] %v4731_v51  ;;  %v4724_v33 = vsel %vm11455_vm14, %v4407_v57, %v4723_v63  ;;  %v4415_v26 = vor.u32 %v4413_v53, %v4412_v10  ;;  %v4417_v25 = vrot.slane %v4412_v10, 4  ;;  %v4748_v10 = vld [vmem:[#allocation4 + $0x38] sm:$0x1] }
 0x1d4   : > { %v2504_v8 = vpop.permute.xlu1 %2503  ;;  %4725 = vst [vmem:[#allocation4 + $0xc] sm:$0xf] %v4724_v33  ;;  %v4433_v60 = vsel %vm10201_vm1, %v4425_v54, %v4432_v21  ;;  %v4735_v42 = vsel %vm11340_vm0, %v4434_v27, %v4734_v43 }
 0x1d5   : > { %2539 = vst.msk [vmem:[#allocation3 + $0x68] sm:$0xff] %vm2525_vm13, %v2504_v8  ;;  %4736 = vst [vmem:[#allocation4 + $0x20] sm:$0x1] %v4735_v42  ;;  %v4416_v7 = vsel %vm10201_vm1, %v4408_v2, %v4415_v26  ;;  %v4728_v58 = vsel %vm11340_vm0, %v4417_v25, %v4727_v20  ;;  %v4741_v2 = vld [vmem:[#allocation4 + $0x2c] sm:$0x1] }
 0x1d6   : > { %v3546_v1 = vpop.permute.xlu0 %3545  ;;  %4733 = vst.msk [vmem:[#allocation4 + $0x1c] sm:$0xf] %vm13431_vm12, %v4433_v60  ;;  %4729 = vst [vmem:[#allocation4 + $0x14] sm:$0x1] %v4728_v58 }
 0x1d7   : > { %3582 = vst.msk [vmem:[#allocation3 + $0x60] sm:$0xff] %vm3569_vm6, %v3546_v1 }
 0x1d8   : > { %v2825_v45 = vpop.permute.xlu1 %2824  ;;  %4726 = vst.msk [vmem:[#allocation4 + $0x10] sm:$0xf] %vm13432_vm7, %v4416_v7 }
 0x1d9   : > { %2860 = vst.msk [vmem:[#allocation3 + $0x68] sm:$0xff] %vm13430_vm8, %v2825_v45  ;;  %v9709_v35 = vpop.f32.mrb[4].mxu0  ;;  %vm13433_vm8 = vcmask 97344  }
 0x1da   : > { %v3867_v46 = vpop.permute.xlu0 %3866  ;;  %v4062_v61 = vadd.f32 %v9709_v35, %v11430_v59  ;;  %v4053_v41 = vpop.f32.mrb[5].mxu0  ;;  %vm13435_vm12 = vmmov %vm13433_vm8 }
 0x1db   : > { %3903 = vst.msk [vmem:[#allocation3 + $0x60] sm:$0xff] %vm3890_vm4, %v3867_v46  ;;  %v4054_v30 = vadd.f32 %v11430_v59, %v4053_v41  ;;  %v9710_v28 = vpop.f32.mrb[6].mxu0  ;;  %v4983_v18 = vld [vmem:[#allocation4 + $0xc] sm:$0xf]  ;;  %v4986_v41 = vld [vmem:[#allocation4 + $0x18] sm:$0xf] }
 0x1dc   : > { %v3003_v5 = vpop.permute.xlu1 %3002  ;;  %v4170_v4 = vmax.f32 %v4062_v61, 0.0  ;;  %v4065_v44 = vadd.f32 %v9710_v28, %v11430_v59  ;;  %v4056_v40 = vpop.f32.mrb[7].mxu0  ;;  %v5053_v53 = vshrl.u32 %v4983_v18, 16  ;;  %v5056_v33 = vshll.u32 %v4983_v18, 16 }
 0x1dd   : > { %3038 = vst.msk [vmem:[#allocation3 + $0x68] sm:$0xff] %vm3024_vm2, %v3003_v5  ;;  %v4168_v6 = vmax.f32 %v4054_v30, 0.0  ;;  %v4057_v50 = vadd.f32 %v11430_v59, %v4056_v40  ;;  %v9912_v54 = vld [vmem:[#allocation4 + $0x18] sm:$0xff]   ;;  %v4985_v30 = vld [vmem:[#allocation4 + $0x14] sm:$0x1] }
 0x1de   : > { %v9407_v52 = vpack.c.bf16 %v4170_v4, %v4170_v4  ;;  %v4171_v36 = vmax.f32 %v4065_v44, 0.0  ;;  %v9929_v25 = vld [vmem:[#allocation4 + $0x18] sm:$0xff]   ;;  %v5055_v61 = vrot.slane %v5053_v53, 4  ;;  %4966 = vst.msk [vmem:[#allocation5 + $0x50] sm:$0xff] %vm4963_vm3, %v9912_v54  ;;  %v5058_v28 = vrot.slane %v5056_v33, 5 }
 0x1df   : > { %v9405_v16 = vpack.c.bf16 %v4168_v6, %v4168_v6  ;;  %v4169_v9 = vmax.f32 %v4057_v50, 0.0  ;;  %v9885_v24 = vld [vmem:[#allocation4 + $0xc] sm:$0xff]   ;;  %v9886_v35 = vld [vmem:[#allocation4 + $0x18] sm:$0xff]   ;;  %6950 = vst.msk [vmem:[#allocation5 + $0x18] sm:$0xff] %vm4963_vm3, %v9929_v25 }
 0x1e0   : > { %v3548_v3 = vpop.permute.xlu1 %3547  ;;  %v4453_v12 = vshrl.u32 %v9407_v52, 16  ;;  %v9408_v17 = vpack.c.bf16 %v4171_v36, %v4171_v36  ;;  %v4456_v55 = vshll.u32 %v9407_v52, 16  ;;  %v4984_v38 = vld [vmem:[#allocation4 + $0x10] sm:$0xf]  ;;  %5925 = vrot.lane.b32.xlu0 %v9885_v24, %s10045_s8  ;;  %v4987_v4 = vld [vmem:[#allocation4 + $0x1c] sm:$0xf] }
 0x1e1   : > { %3583 = vst.msk [vmem:[#allocation3 + $0x68] sm:$0xff] %vm3569_vm6, %v3548_v3  ;;  %v4436_v8 = vshrl.u32 %v9405_v16, 16  ;;  %v9406_v1 = vpack.c.bf16 %v4169_v9, %v4169_v9  ;;  %v4439_v23 = vshll.u32 %v9405_v16, 16  ;;  %v9910_v39 = vld [vmem:[#allocation4 + $0xc] sm:$0xff]   ;;  %v5062_v26 = vshll.u32 %v4984_v38, 16 }
 0x1e2   : > { %v3919_v37 = vld [vmem:[#allocation3 + $0x60] sm:$0xff]  ;;  %v4455_v34 = vrot.slane %v4453_v12, 7  ;;  %v4461_v31 = vshrl.u32 %v9408_v17, 16  ;;  %v4464_v15 = vshll.u32 %v9408_v17, 16  ;;  %4965 = vst.msk [vmem:[#allocation5 + $0x28] sm:$0xff] %vm4963_vm3, %v9910_v39  ;;  %v5066_v50 = vshrl.u32 %v4984_v38, 16 }
 0x1e3   : > { %9727 = vmatprep.mubr.msk.bf16.mxu0 %vm3950_vm5, %v3919_v37  ;;  %v4438_v56 = vrot.slane %v4436_v8, 7  ;;  %v4444_v32 = vshrl.u32 %v9406_v1, 16  ;;  %v4447_v63 = vshll.u32 %v9406_v1, 16  ;;  %v5064_v6 = vrot.slane %v5062_v26, 5 }
 0x1e4   : > { %v3869_v11 = vpop.permute.xlu1 %3868  ;;  %v1460_v22 = vpop.permute.xlu0 %1459  ;;  %v4458_v29 = vor.u32 %v4456_v55, %v4455_v34  ;;  %v4459_v45 = vrot.slane %v4455_v34, 4  ;;  %v4463_v43 = vrot.slane %v4461_v31, 7  ;;  %5927 = vrot.lane.b32.xlu0 %v9886_v35, %s10045_s8  ;;  %v5059_v9 = vor.u32 %v5058_v28, %v5055_v61 }
 0x1e5   : > { %3904 = vst.msk [vmem:[#allocation3 + $0x68] sm:$0xff] %vm3890_vm4, %v3869_v11  ;;  %v4441_v46 = vor.u32 %v4439_v23, %v4438_v56  ;;  %v4442_v57 = vrot.slane %v4438_v56, 4  ;;  %v4446_v20 = vrot.slane %v4444_v32, 7  ;;  %v5077_v12 = vshrl.u32 %v4986_v41, 16 }
 0x1e6   : > { %1494 = vst.msk [vmem:[#allocation3 + $0x70] sm:$0xff] %vm1479_vm9, %v1460_v22  ;;  %v4745_v27 = vsel %vm11455_vm14, %v4458_v29, %v4744_v19  ;;  %v4466_v60 = vor.u32 %v4464_v15, %v4463_v43  ;;  %v4468_v42 = vrot.slane %v4463_v43, 4  ;;  %v5068_v17 = vrot.slane %v5066_v50, 4  ;;  %v4988_v19 = vld [vmem:[#allocation4 + $0x20] sm:$0x1] }
 0x1e7   : > { %4746 = vst [vmem:[#allocation4 + $0x30] sm:$0xf] %v4745_v27  ;;  %v4738_v5 = vsel %vm11455_vm14, %v4441_v46, %v4737_v47  ;;  %v4449_v7 = vor.u32 %v4447_v63, %v4446_v20  ;;  %v4451_v58 = vrot.slane %v4446_v20, 4  ;;  %v5072_v55 = vshll.u32 %v4985_v30, 16 }
 0x1e8   : > { %v1462_v51 = vpop.permute.xlu1 %1461  ;;  %v1784_v21 = vpop.permute.xlu0 %1783  ;;  %4739 = vst [vmem:[#allocation4 + $0x24] sm:$0xf] %v4738_v5  ;;  %v4467_v44 = vsel %vm10201_vm1, %v4459_v45, %v4466_v60  ;;  %v4749_v40 = vsel %vm11340_vm0, %v4468_v42, %v4748_v10  ;;  %v5080_v8 = vshll.u32 %v4986_v41, 16  ;;  %v5086_v1 = vshll.u32 %v4987_v4, 16 }
 0x1e9   : > { %1495 = vst.msk [vmem:[#allocation3 + $0x78] sm:$0xff] %vm1479_vm9, %v1462_v51  ;;  %vm13434_vm9 = vmmov %vm13432_vm7  ;;  %v4450_v37 = vsel %vm10201_vm1, %v4442_v57, %v4449_v7  ;;  %v4742_v16 = vsel %vm11340_vm0, %v4451_v58, %v4741_v2  ;;  %vm13436_vm7 = vcmask 130144   ;;  %v5079_v11 = vrot.slane %v5077_v12, 4  ;;  %v9896_v58 = vld [vmem:[%s13373_s3 + $0x50] sm:$0xff]  }
 0x1ea   : > { %1818 = vst.msk [vmem:[#allocation3 + $0x70] sm:$0xff] %vm13433_vm8, %v1784_v21  ;;  %4750 = vst [vmem:[#allocation4 + $0x38] sm:$0x1] %v4749_v40  ;;  %v5090_v22 = vshrl.u32 %v4987_v4, 16  ;;  %v5060_v34 = vrot.slane %v5059_v9, 4  ;;  %v5069_v23 = vor.u32 %v5068_v17, %v5064_v6  ;;  %v5082_v47 = vrot.slane %v5080_v8, 5  ;;  %9457 = vmatprep.subr.bf16.mxu1 %v9896_v58 }
 0x1eb   : > { %4747 = vst.msk [vmem:[#allocation4 + $0x34] sm:$0xf] %vm13434_vm9, %v4467_v44  ;;  %vm13437_vm8 = vmmov %vm13434_vm9  ;;  %v5088_v18 = vrot.slane %v5086_v1, 5  ;;  %v5096_v56 = vshll.u32 %v4988_v19, 16  ;;  %v5074_v15 = vrot.slane %v5072_v55, 5  ;;  %v9897_v12 = vld [vmem:[%s13373_s3 + $0x10] sm:$0xff]  }
 0x1ec   : > { %v1786_v3 = vpop.permute.xlu1 %1785  ;;  %v3920_v52 = vld [vmem:[#allocation3 + $0x68] sm:$0xff]  ;;  %v1961_v36 = vpop.permute.xlu0 %1960  ;;  %4740 = vst.msk [vmem:[#allocation4 + $0x28] sm:$0xf] %vm13437_vm8, %v4450_v37  ;;  %4743 = vst [vmem:[#allocation4 + $0x2c] sm:$0x1] %v4742_v16  ;;  %v5092_v24 = vrot.slane %v5090_v22, 4  ;;  %v5083_v29 = vor.u32 %v5082_v47, %v5079_v11  ;;  %v5065_v38 = vsel %vm10191_vm15, %v5060_v34, %v5064_v6  ;;  %9458 = vmatpush3.bf16.msra.mxu1 %v9897_v12 }
 0x1ed   : > { %1819 = vst.msk [vmem:[#allocation3 + $0x78] sm:$0xff] %vm13435_vm12, %v1786_v3  ;;  %9728 = vmatmul.mubr.msk.bf16.gmra.mrb[24].mxu0 %vm3950_vm5, %v3920_v52  ;;  %v5070_v31 = vrot.slane %v5069_v23, 4  ;;  %v5098_v53 = vrot.slane %v5096_v56, 5  ;;  %vm13438_vm9 = vmmov %vm13436_vm7  ;;  %vm13439_vm12 = vcmask 195744  }
 0x1ee   : > { %1995 = vst.msk [vmem:[#allocation3 + $0x70] sm:$0xff] %vm13436_vm7, %v1961_v36  ;;  %v4992_v45 = vld [vmem:[#allocation4 + $0x30] sm:$0xf]  ;;  %v5093_v63 = vor.u32 %v5092_v24, %v5088_v18  ;;  %v5084_v46 = vrot.slane %v5083_v29, 4 }
 0x1ef   : > { %v5075_v39 = vsel %vm10191_vm15, %v5070_v31, %v5074_v15  ;;  %v4989_v57 = vld [vmem:[#allocation4 + $0x24] sm:$0xf]  ;;  %v5125_v51 = vshrl.u32 %v4992_v45, 16  ;;  %v5128_v20 = vshll.u32 %v4992_v45, 16  ;;  %v6966_v31 = vld [vmem:[#allocation4 + $0x18] sm:$0xf] }
 0x1f0   : > { %v9167_v43 = vcombine.low %v5065_v38, %v5075_v39  ;;  %v5094_v10 = vrot.slane %v5093_v63, 4  ;;  %v5089_v21 = vsel %vm10191_vm15, %v5084_v46, %v5088_v18  ;;  %v5101_v35 = vshrl.u32 %v4989_v57, 16  ;;  %v9899_v63 = vld [vmem:[%s13373_s3 + $0x58] sm:$0xff]  }
 0x1f1   : > { %v5104_v5 = vshll.u32 %v4989_v57, 16  ;;  %v5127_v40 = vrot.slane %v5125_v51, 4  ;;  %v4994_v3 = vld [vmem:[#allocation4 + $0x38] sm:$0x1]  ;;  %v5130_v52 = vrot.slane %v5128_v20, 5  ;;  %v7015_v46 = vshrl.u32 %v6966_v31, 16  ;;  %9459 = vmatprep.subr.bf16.mxu1 %v9899_v63 }
 0x1f2   : > { %5462 = vrot.lane.b32.xlu1 %v9167_v43, %s10045_s8  ;;  %v5099_v26 = vsel %vm10191_vm15, %v5094_v10, %v5098_v53  ;;  %v4993_v7 = vld [vmem:[#allocation4 + $0x34] sm:$0xf]  ;;  %v5103_v28 = vrot.slane %v5101_v35, 4  ;;  %v5144_v11 = vshll.u32 %v4994_v3, 16  ;;  %v7018_v43 = vshll.u32 %v6966_v31, 16  ;;  %v9906_v31 = vld [vmem:[%s13373_s3 + $0x70] sm:$0xff]  }
 0x1f3   : > { %v2506_v32 = vpop.permute.xlu0 %2505  ;;  %v9887_v54 = vld [vmem:[#allocation4 + $0x24] sm:$0xff]   ;;  %v4991_v25 = vld [vmem:[#allocation4 + $0x2c] sm:$0x1]  ;;  %v9168_v61 = vcombine.low %v5089_v21, %v5099_v26  ;;  %v9888_v30 = vld [vmem:[#allocation4 + $0x30] sm:$0xff]   ;;  %v5106_v4 = vrot.slane %v5104_v5, 5  ;;  %v5134_v36 = vshll.u32 %v4993_v7, 16  ;;  %v5131_v55 = vor.u32 %v5130_v52, %v5127_v40 }
 0x1f4   : > { %2540 = vst.msk [vmem:[#allocation3 + $0x70] sm:$0xff] %vm2525_vm13, %v2506_v32  ;;  %v4990_v27 = vld [vmem:[#allocation4 + $0x28] sm:$0xf]  ;;  %5929 = vrot.lane.b32.xlu0 %v9887_v54, %s10045_s8  ;;  %v5120_v50 = vshll.u32 %v4991_v25, 16  ;;  %v5138_v9 = vshrl.u32 %v4993_v7, 16  ;;  %v9915_v47 = vld [vmem:[#allocation4 + $0x30] sm:$0xff]  }
 0x1f5   : > { %v5110_v60 = vshll.u32 %v4990_v27, 16  ;;  %v9914_v42 = vld [vmem:[#allocation4 + $0x24] sm:$0xff]   ;;  %v5114_v41 = vshrl.u32 %v4990_v27, 16  ;;  %v5107_v16 = vor.u32 %v5106_v4, %v5103_v28  ;;  %v5136_v19 = vrot.slane %v5134_v36, 5  ;;  %4968 = vst.msk [vmem:[#allocation5 + $0xa0] sm:$0xff] %vm4963_vm3, %v9915_v47  ;;  %v9903_v3 = vld [vmem:[%s13373_s3 + $0x68] sm:$0xff]  }
 0x1f6   : > { %4967 = vst.msk [vmem:[#allocation5 + $0x78] sm:$0xff] %vm4963_vm3, %v9914_v42  ;;  %5464 = vrot.lane.b32.xlu1 %v9168_v61, %s10045_s8  ;;  %v5140_v1 = vrot.slane %v5138_v9, 4  ;;  %v5122_v34 = vrot.slane %v5120_v50, 5  ;;  %v5132_v56 = vrot.slane %v5131_v55, 4  ;;  %v5146_v45 = vrot.slane %v5144_v11, 5  ;;  %v9900_v27 = vld [vmem:[%s13373_s3 + $0x18] sm:$0xff]  }
 0x1f7   : > { %v1963_v2 = vpop.permute.xlu1 %1962  ;;  %v2827_v33 = vpop.permute.xlu0 %2826  ;;  %v5112_v44 = vrot.slane %v5110_v60, 5  ;;  %v5116_v6 = vrot.slane %v5114_v41, 4  ;;  %v5108_v8 = vrot.slane %v5107_v16, 4  ;;  %v6967_v32 = vld [vmem:[#allocation4 + $0x1c] sm:$0xf]  ;;  %v11556_v5 = vrot.slane %v7015_v46, 4  ;;  %9460 = vmatpush3.bf16.msra.mxu1 %v9900_v27 }
 0x1f8   : > { %1996 = vst.msk [vmem:[#allocation3 + $0x78] sm:$0xff] %vm13438_vm9, %v1963_v2  ;;  %5931 = vrot.lane.b32.xlu0 %v9888_v30, %s10045_s8  ;;  %v5141_v23 = vor.u32 %v5140_v1, %v5136_v19  ;;  %v5137_v57 = vsel %vm10191_vm15, %v5132_v56, %v5136_v19  ;;  %v11545_v10 = vld [vmem:[#allocation4 + $0x24] sm:$0xf]  ;;  %v7024_v51 = vshll.u32 %v6967_v32, 16  ;;  %v7028_v21 = vshrl.u32 %v6967_v32, 16  ;;  %v9902_v4 = vld [vmem:[%s13373_s3 + $0x20] sm:$0xff]  }
 0x1f9   : > { %2861 = vst.msk [vmem:[#allocation3 + $0x70] sm:$0xff] %vm13439_vm12, %v2827_v33  ;;  %v5117_v17 = vor.u32 %v5116_v6, %v5112_v44  ;;  %v5113_v18 = vsel %vm10191_vm15, %v5108_v8, %v5112_v44  ;;  %v9901_v33 = vld [vmem:[%s13373_s3 + $0x60] sm:$0xff]   ;;  %v11558_v60 = vld [vmem:[#allocation4 + $0x10] sm:$0xf]  ;;  %v7039_v42 = vshrl.u32 %v11545_v10, 16  ;;  %v11563_v30 = vrot.slane %v7018_v43, 5 }
 0x1fa   : > { %v5142_v29 = vrot.slane %v5141_v23, 4  ;;  %v6970_v28 = vld [vmem:[#allocation4 + $0x28] sm:$0xf]  ;;  %v11570_v6 = vrot.slane %v7024_v51, 5  ;;  %v11572_v50 = vrot.slane %v7028_v21, 4  ;;  %9461 = vmatprep.subr.bf16.mxu1 %v9901_v33  ;;  %v9905_v52 = vld [vmem:[#allocation4] sm:$0xff]  }
 0x1fb   : > { %v3005_v37 = vpop.permute.xlu0 %3004  ;;  %v5118_v22 = vrot.slane %v5117_v17, 4  ;;  %v6599_v16 = vrot.slane %v11558_v60, 5  ;;  %v7042_v9 = vshll.u32 %v11545_v10, 16  ;;  %v7048_v19 = vshll.u32 %v6970_v28, 16  ;;  %4964 = vst.msk [vmem:[#allocation5] sm:$0xff] %vm4963_vm3, %v9905_v52  ;;  %9462 = vmatpush3.bf16.msra.mxu1 %v9902_v4  ;;  %v9935_v23 = vld [vmem:[#allocation4 + $0x24] sm:$0xff]  }
 0x1fc   : > { %3039 = vst.msk [vmem:[#allocation3 + $0x70] sm:$0xff] %vm3024_vm2, %v3005_v37  ;;  %v5147_v39 = vsel %vm10191_vm15, %v5142_v29, %v5146_v45  ;;  %v4758_v47 = vld [vmem:[#allocation4 + $0x48] sm:$0xf]  ;;  %v7021_v56 = vor.u32 %v11563_v30, %v11556_v5  ;;  %9463 = vmatprep.subr.bf16.mxu1 %v9903_v3  ;;  %v7031_v32 = vor.u32 %v11572_v50, %v11570_v6  ;;  %v9939_v63 = vld [vmem:[#allocation4 + $0x30] sm:$0xff]   ;;  %v9908_v5 = vld [vmem:[%s13373_s3 + $0x78] sm:$0xff]  }
 0x1fd   : > { %v5123_v24 = vsel %vm10191_vm15, %v5118_v22, %v5122_v34  ;;  %v9170_v54 = vcombine.low %v5137_v57, %v5147_v39  ;;  %v7052_v22 = vshrl.u32 %v6970_v28, 16  ;;  %v9904_v34 = vld [vmem:[%s13373_s3 + $0x28] sm:$0xff]   ;;  %6951 = vst.msk [vmem:[#allocation5 + $0x40] sm:$0xff] %vm4963_vm3, %v9935_v23  ;;  %v4751_v57 = vld [vmem:[#allocation4 + $0x3c] sm:$0xf]  ;;  %v11595_v10 = vrot.slane %v7042_v9, 5 }
 0x1fe   : > { %v9169_v15 = vcombine.low %v5113_v18, %v5123_v24  ;;  %v4762_v21 = vld [vmem:[#allocation4 + $0x50] sm:$0x1]  ;;  %v11598_v27 = vrot.slane %v7048_v19, 5  ;;  %6952 = vst.msk [vmem:[#allocation5 + $0x68] sm:$0xff] %vm4963_vm3, %v9939_v63  ;;  %v6503_v50 = vld [vmem:[#allocation4 + $0x14] sm:$0x1] }
 0x1ff   : > { %9464 = vmatpush3.bf16.msra.mxu1 %v9904_v34  ;;  %v6971_v3 = vld [vmem:[#allocation4 + $0x2c] sm:$0x1]  ;;  %v11613_v52 = vld [vmem:[#allocation4 + $0x1c] sm:$0xf]  ;;  %v9909_v19 = vld [vmem:[%s13373_s3 + $0x38] sm:$0xff]  }
 0x200   : > { %5466 = vrot.lane.b32.xlu1 %v9169_v15, %s10045_s8  ;;  %9465 = vmatprep.subr.bf16.mxu1 %v9906_v31  ;;  %v4248_v34 = vld [vmem:[#allocation4 + $0x6c] sm:$0x1]  ;;  %v4300_v23 = vld [vmem:[#allocation4 + $0x80] sm:$0x1]  ;;  %v6601_v31 = vrot.slane %v6599_v16, 4  ;;  %v7058_v63 = vshll.u32 %v6971_v3, 16 }
 0x202   : > { %v2508_v38 = vpop.permute.xlu1 %2507 }
 0x203   : > { %2541 = vst.msk [vmem:[#allocation3 + $0x78] sm:$0xff] %vm2525_vm13, %v2508_v38  ;;  %v9713_v53 = vpop.f32.mrb[8].mxu0  ;;  %vm13440_vm13 = vmmov %vm13439_vm12 }
 0x204   : > { %v4078_v20 = vadd.f32 %v9713_v53, %v11430_v59  ;;  %v4069_v2 = vpop.f32.mrb[9].mxu0  ;;  %5468 = vrot.lane.b32.xlu1 %v9170_v54, %s10045_s8 }
 0x205   : > { %v4070_v25 = vadd.f32 %v11430_v59, %v4069_v2  ;;  %v9714_v35 = vpop.f32.mrb[10].mxu0 }
 0x206   : > { %v2829_v26 = vpop.permute.xlu1 %2828  ;;  %v4174_v41 = vmax.f32 %v4078_v20, 0.0  ;;  %v4081_v7 = vadd.f32 %v9714_v35, %v11430_v59  ;;  %v4072_v58 = vpop.f32.mrb[11].mxu0  ;;  %v9907_v20 = vld [vmem:[%s13373_s3 + $0x30] sm:$0xff]   ;;  %v11604_v35 = vrot.slane %v7052_v22, 4 }
 0x207   : > { %2862 = vst.msk [vmem:[#allocation3 + $0x78] sm:$0xff] %vm13440_vm13, %v2829_v26  ;;  %v3550_v61 = vpop.permute.xlu0 %3549  ;;  %v4172_v44 = vmax.f32 %v4070_v25, 0.0  ;;  %v4073_v40 = vadd.f32 %v11430_v59, %v4072_v58  ;;  %v11579_v59 = vrot.slane %v7039_v42, 4  ;;  %v6968_v25 = vld [vmem:[#allocation4 + $0x20] sm:$0x1]  ;;  %9466 = vmatpush3.bf16.msra.mxu1 %v9907_v20 }
 0x208   : > { %3584 = vst.msk [vmem:[#allocation3 + $0x70] sm:$0xff] %vm3569_vm6, %v3550_v61  ;;  %v9411_v36 = vpack.c.bf16 %v4174_v41, %v4174_v41  ;;  %v4175_v37 = vmax.f32 %v4081_v7, 0.0  ;;  %v4755_v58 = vld [vmem:[#allocation4 + $0x44] sm:$0x1]  ;;  %9467 = vmatprep.subr.bf16.mxu1 %v9908_v5  ;;  %v11671_v5 = vld [vmem:[#allocation4 + $0x28] sm:$0xf] }
 0x209   : > { %v9409_v17 = vpack.c.bf16 %v4172_v44, %v4172_v44  ;;  %v4173_v55 = vmax.f32 %v4073_v40, 0.0  ;;  %v7045_v22 = vor.u32 %v11595_v10, %v11579_v59  ;;  %v6606_v59 = vrot.slane %v11613_v52, 5 }
 0x20a   : > { %v3007_v12 = vpop.permute.xlu1 %3006  ;;  %v4487_v1 = vshrl.u32 %v9411_v36, 16  ;;  %v9412_v11 = vpack.c.bf16 %v4175_v37, %v4175_v37  ;;  %v4490_v29 = vshll.u32 %v9411_v36, 16  ;;  %v4251_v36 = vld [vmem:[#allocation4 + $0x78] sm:$0x1] }
 0x20b   : > { %3040 = vst.msk [vmem:[#allocation3 + $0x78] sm:$0xff] %vm3024_vm2, %v3007_v12  ;;  %v3871_v8 = vpop.permute.xlu0 %3870  ;;  %v4470_v18 = vshrl.u32 %v9409_v17, 16  ;;  %v9410_v24 = vpack.c.bf16 %v4173_v55, %v4173_v55  ;;  %v4473_v46 = vshll.u32 %v9409_v17, 16  ;;  %v7034_v17 = vshll.u32 %v6968_v25, 16  ;;  %v11620_v55 = vld [vmem:[#allocation4 + $0x30] sm:$0xf]  ;;  %vm13441_vm2 = vmmov %vm13437_vm8  ;;  %9468 = vmatpush3.bf16.msra.mxu1 %v9909_v19 }
 0x20c   : > { %3905 = vst.msk [vmem:[#allocation3 + $0x70] sm:$0xff] %vm3890_vm4, %v3871_v8  ;;  %v4489_v15 = vrot.slane %v4487_v1, 7  ;;  %v4495_v45 = vshrl.u32 %v9412_v11, 16  ;;  %v4498_v51 = vshll.u32 %v9412_v11, 16  ;;  %v7022_v11 = vrot.slane %v7021_v56, 4  ;;  %vm13444_vm7 = vmmov %vm13441_vm2 }
 0x20d   : > { %v4472_v39 = vrot.slane %v4470_v18, 7  ;;  %v4478_v43 = vshrl.u32 %v9410_v24, 16  ;;  %v4481_v26 = vshll.u32 %v9410_v24, 16  ;;  %v7032_v18 = vrot.slane %v7031_v32, 4  ;;  %v6501_v24 = vld [vmem:[#allocation4 + $0xc] sm:$0xe]  ;;  %vm13445_vm8 = vmmov %vm13441_vm2 }
 0x20e   : > { %v3552_v38 = vpop.permute.xlu1 %3551  ;;  %v4492_v53 = vor.u32 %v4490_v29, %v4489_v15  ;;  %v4497_v54 = vrot.slane %v4495_v45, 7  ;;  %v4493_v42 = vrot.slane %v4489_v15, 4  ;;  %v7055_v15 = vor.u32 %v11604_v35, %v11598_v27  ;;  %vm13446_vm9 = vmmov %vm13441_vm2 }
 0x20f   : > { %3585 = vst.msk [vmem:[#allocation3 + $0x78] sm:$0xff] %vm3569_vm6, %v3552_v38  ;;  %v4475_v2 = vor.u32 %v4473_v46, %v4472_v39  ;;  %v4480_v33 = vrot.slane %v4478_v43, 7  ;;  %v4476_v28 = vrot.slane %v4472_v39, 4  ;;  %v4252_v56 = vsel %vm11340_vm0, 0, %v4251_v36  ;;  %v6504_v38 = vld [vmem:[#allocation4 + $0x18] sm:$0xe]  ;;  %vm13443_vm6 = vmmov %vm13441_vm2 }
 0x210   : > { %v4759_v61 = vsel %vm11455_vm14, %v4492_v53, %v4758_v47  ;;  %v4500_v41 = vor.u32 %v4498_v51, %v4497_v54  ;;  %v4502_v7 = vrot.slane %v4497_v54, 4  ;;  %v4297_v47 = vld [vmem:[#allocation4 + $0x74] sm:$0x1]  ;;  %v7036_v29 = vrot.slane %v7034_v17, 5  ;;  %4253 = vst [vmem:[#allocation4 + $0x78] sm:$0x1] %v4252_v56  ;;  %vm13448_vm12 = vmmov %vm13441_vm2 }
 0x211   : > { %4760 = vst [vmem:[#allocation4 + $0x48] sm:$0xf] %v4759_v61  ;;  %v4752_v4 = vsel %vm11455_vm14, %v4475_v2, %v4751_v57  ;;  %v4483_v44 = vor.u32 %v4481_v26, %v4480_v33  ;;  %v4485_v40 = vrot.slane %v4480_v33, 4  ;;  %v6602_v45 = vrot.slane %v6503_v50, 5  ;;  %v6506_v53 = vld [vmem:[#allocation4 + $0x20] sm:$0x1]  ;;  %vm13449_vm13 = vmmov %vm13441_vm2 }
 0x212   : > { %v3873_v30 = vpop.permute.xlu1 %3872  ;;  %4753 = vst [vmem:[#allocation4 + $0x3c] sm:$0xf] %v4752_v4  ;;  %v4501_v9 = vsel %vm10201_vm1, %v4493_v42, %v4500_v41  ;;  %v4763_v12 = vsel %vm11340_vm0, %v4502_v7, %v4762_v21  ;;  %v7063_v32 = vshrl.u32 %v11620_v55, 16  ;;  %v4249_v39 = vsel %vm11340_vm0, 0, %v4248_v34  ;;  %v6973_v2 = vld [vmem:[#allocation4 + $0x34] sm:$0xf] }
 0x213   : > { %3906 = vst.msk [vmem:[#allocation3 + $0x78] sm:$0xff] %vm3890_vm4, %v3873_v30  ;;  %v3921_v37 = vld [vmem:[#allocation3 + $0x70] sm:$0xff]  ;;  %4764 = vst [vmem:[#allocation4 + $0x50] sm:$0x1] %v4763_v12  ;;  %v4484_v8 = vsel %vm10201_vm1, %v4476_v28, %v4483_v44  ;;  %v4756_v1 = vsel %vm11340_vm0, %v4485_v40, %v4755_v58  ;;  %v4301_v46 = vsel %vm11331_vm10, 0, %v4300_v23  ;;  %v4298_v57 = vsel %vm11331_vm10, 0, %v4297_v47 }
 0x214   : > { %9731 = vmatprep.mubr.msk.bf16.mxu0 %vm3950_vm5, %v3921_v37  ;;  %4761 = vst.msk [vmem:[#allocation4 + $0x4c] sm:$0xf] %vm13441_vm2, %v4501_v9  ;;  %vm13442_vm4 = vmmov %vm13441_vm2  ;;  %v9246_v43 = vrot.slane %v6501_v24, 9  ;;  %v11648_v10 = vrot.slane %v7045_v22, 4  ;;  %v7037_v51 = vsel %vm10191_vm15, %v7032_v18, %v7036_v29  ;;  %v11654_v21 = vsel %vm10162_vm11, %v6601_v31, %v6602_v45  ;;  %v6974_v37 = vld [vmem:[#allocation4 + $0x38] sm:$0x1] }
 0x215   : > { %4754 = vst.msk [vmem:[#allocation4 + $0x40] sm:$0xf] %vm13442_vm4, %v4484_v8  ;;  %4757 = vst [vmem:[#allocation4 + $0x44] sm:$0x1] %v4756_v1  ;;  %v11656_v20 = vrot.slane %v7055_v15, 4  ;;  %v7027_v33 = vsel %vm10191_vm15, %v7022_v11, %v11570_v6  ;;  %v11668_v25 = vrot.slane %v7058_v63, 5 }
 0x216   : > { %4250 = vst [vmem:[#allocation4 + $0x6c] sm:$0x1] %v4249_v39  ;;  %4302 = vst [vmem:[#allocation4 + $0x80] sm:$0x1] %v4301_v46  ;;  %v11666_v26 = vsel %vm10162_vm11, %v9246_v43, %v6599_v16  ;;  %v7066_v35 = vshll.u32 %v11620_v55, 16  ;;  %v9247_v42 = vrot.slane %v6504_v38, 9  ;;  %v11675_v6 = vcombine.low %v7027_v33, %v7037_v51 }
 0x217   : > { %4299 = vst [vmem:[#allocation4 + $0x74] sm:$0x1] %v4298_v57  ;;  %v6608_v61 = vrot.slane %v6606_v59, 4  ;;  %v6609_v41 = vrot.slane %v6506_v53, 5  ;;  %v11673_v7 = vrot.slane %v7063_v32, 4  ;;  %v9262_v60 = vcombine.low %v11666_v26, %v11654_v21  ;;  %vm13450_vm4 = vmmov %vm13441_vm2 }
 0x218   : > { %v7051_v16 = vsel %vm10191_vm15, %v11648_v10, %v11598_v27  ;;  %v7072_v28 = vshll.u32 %v6973_v2, 16  ;;  %v4998_v4 = vld [vmem:[#allocation4 + $0x48] sm:$0xf]  ;;  %v7061_v52 = vsel %vm10191_vm15, %v11656_v20, %v11668_v25  ;;  %v11689_v36 = vsel %vm10162_vm11, %v9247_v42, %v6606_v59  ;;  %v6509_v1 = vld [vmem:[#allocation4 + $0x2c] sm:$0x1] }
 0x219   : > { %v4995_v30 = vld [vmem:[#allocation4 + $0x3c] sm:$0xf]  ;;  %v7068_v12 = vrot.slane %v7066_v35, 5  ;;  %v7076_v17 = vshrl.u32 %v6973_v2, 16  ;;  %v6613_v11 = vrot.slane %v11671_v5, 5  ;;  %v5173_v22 = vshrl.u32 %v4998_v4, 16 }
 0x21a   : > { %v3922_v54 = vld [vmem:[#allocation3 + $0x78] sm:$0xff]  ;;  %v5149_v50 = vshrl.u32 %v4995_v30, 16  ;;  %v5152_v3 = vshll.u32 %v4995_v30, 16  ;;  %v5176_v24 = vshll.u32 %v4998_v4, 16  ;;  %v11695_v15 = vsel %vm10162_vm11, %v6608_v61, %v6609_v41  ;;  %v6507_v20 = vld [vmem:[#allocation4 + $0x24] sm:$0xe] }
 0x21b   : > { %9732 = vmatmul.mubr.msk.bf16.gmra.mrb[28].mxu0 %vm3950_vm5, %v3922_v54  ;;  %v4999_v55 = vld [vmem:[#allocation4 + $0x4c] sm:$0xf]  ;;  %v11698_v38 = vrot.slane %v7072_v28, 5  ;;  %v7078_v59 = vrot.slane %v7076_v17, 4  ;;  %v7082_v32 = vshll.u32 %v6974_v37, 16  ;;  %v7069_v57 = vor.u32 %v7068_v12, %v11673_v7 }
 0x21c   : > { %v9889_v58 = vld [vmem:[#allocation4 + $0x3c] sm:$0xff]   ;;  %v4997_v40 = vld [vmem:[#allocation4 + $0x44] sm:$0x1]  ;;  %v5151_v19 = vrot.slane %v5149_v50, 4  ;;  %v5154_v8 = vrot.slane %v5152_v3, 5  ;;  %v9890_v34 = vld [vmem:[#allocation4 + $0x48] sm:$0xff]   ;;  %v11708_v28 = vcombine.low %v7051_v16, %v7061_v52  ;;  %v9263_v4 = vcombine.low %v11689_v36, %v11695_v15 }
 0x21d   : > { %v4996_v44 = vld [vmem:[#allocation4 + $0x40] sm:$0xf]  ;;  %5933 = vrot.lane.b32.xlu0 %v9889_v58, %s10045_s8  ;;  %v5168_v18 = vshll.u32 %v4997_v40, 16  ;;  %v5182_v56 = vshll.u32 %v4999_v55, 16  ;;  %v5186_v29 = vshrl.u32 %v4999_v55, 16  ;;  %v6615_v43 = vrot.slane %v6613_v11, 4 }
 0x21e   : > { %v5158_v9 = vshll.u32 %v4996_v44, 16  ;;  %v5162_v27 = vshrl.u32 %v4996_v44, 16  ;;  %v5155_v31 = vor.u32 %v5154_v8, %v5151_v19  ;;  %v9926_v45 = vld [vmem:[#allocation4 + $0x3c] sm:$0xff]   ;;  %v6616_v10 = vrot.slane %v6509_v1, 5  ;;  %v6977_v40 = vld [vmem:[#allocation4 + $0x44] sm:$0x1] }
 0x21f   : > { %v6975_v39 = vld [vmem:[#allocation4 + $0x3c] sm:$0xf]  ;;  %v6976_v53 = vld [vmem:[#allocation4 + $0x40] sm:$0xf]  ;;  %4969 = vst.msk [vmem:[#allocation5 + $0xc8] sm:$0xff] %vm4963_vm3, %v9926_v45  ;;  %v5170_v51 = vrot.slane %v5168_v18, 5  ;;  %v7079_v37 = vor.u32 %v7078_v59, %v11698_v38 }
 0x220   : > { %v5160_v23 = vrot.slane %v5158_v9, 5  ;;  %v5164_v47 = vrot.slane %v5162_v27, 4  ;;  %v5156_v46 = vrot.slane %v5155_v31, 4  ;;  %v5175_v2 = vrot.slane %v5173_v22, 4  ;;  %v11712_v50 = vld [vmem:[#allocation4 + $0x34] sm:$0xf] }
 0x221   : > { %5935 = vrot.lane.b32.xlu0 %v9890_v34, %s10045_s8  ;;  %v5178_v33 = vrot.slane %v5176_v24, 5  ;;  %v11702_v25 = vrot.slane %v5182_v56, 5  ;;  %v5188_v35 = vrot.slane %v5186_v29, 4  ;;  %v7087_v5 = vshrl.u32 %v6975_v39, 16  ;;  %v11723_v12 = vld [vmem:[#allocation4 + $0x30] sm:$0xe] }
 0x222   : > { %v5165_v63 = vor.u32 %v5164_v47, %v5160_v23  ;;  %v7090_v42 = vshll.u32 %v6975_v39, 16  ;;  %v5161_v61 = vsel %vm10191_vm15, %v5156_v46, %v5160_v23  ;;  %v7096_v7 = vshll.u32 %v6976_v53, 16  ;;  %v6978_v16 = vld [vmem:[#allocation4 + $0x48] sm:$0xf]  ;;  %v11726_v52 = vld [vmem:[#allocation4 + $0x50] sm:$0x1] }
 0x223   : > { %v7100_v58 = vshrl.u32 %v6976_v53, 16  ;;  %v9248_v44 = vrot.slane %v6507_v20, 9  ;;  %v11714_v3 = vrot.slane %v7069_v57, 4  ;;  %v11717_v9 = vrot.slane %v7082_v32, 5  ;;  %v6512_v23 = vld [vmem:[#allocation4 + $0x38] sm:$0x1] }
 0x224   : > { %v5166_v54 = vrot.slane %v5165_v63, 4  ;;  %v11721_v27 = vsel %vm10162_vm11, %v6615_v43, %v6616_v10  ;;  %v5179_v17 = vor.u32 %v5178_v33, %v5175_v2  ;;  %v5189_v55 = vor.u32 %v5188_v35, %v11702_v25  ;;  %v6979_v18 = vld [vmem:[#allocation4 + $0x4c] sm:$0xf]  ;;  %v5525_v45 = vld [vmem:[#allocation4] sm:$0xe] }
 0x225   : > { %v7089_v19 = vrot.slane %v7087_v5, 4  ;;  %v7092_v8 = vrot.slane %v7090_v42, 5  ;;  %v11729_v1 = vrot.slane %v7096_v7, 5  ;;  %v7102_v22 = vrot.slane %v7100_v58, 4  ;;  %v5526_v46 = vld [vmem:[#allocation4 + $0x4] sm:$0xf] }
 0x226   : > { %v5171_v41 = vsel %vm10191_vm15, %v5166_v54, %v5170_v51  ;;  %v7106_v34 = vshll.u32 %v6977_v40, 16  ;;  %v6620_v47 = vrot.slane %v11712_v50, 5  ;;  %v11734_v24 = vsel %vm10162_vm11, %v9248_v44, %v6613_v11  ;;  %v5527_v57 = vld [vmem:[#allocation4 + $0x8] sm:$0x1]  ;;  %v5461_v54 = vpop.permute.xlu1 %5460  ;;  %v5529_v51 = vld [vmem:[#allocation4 + $0x10] sm:$0xf] }
 0x227   : > { %v9171_v30 = vcombine.low %v5161_v61, %v5171_v41  ;;  %v9249_v31 = vrot.slane %v11723_v12, 9  ;;  %v7111_v56 = vshrl.u32 %v6978_v16, 16  ;;  %v7114_v29 = vshll.u32 %v6978_v16, 16  ;;  %v6980_v35 = vld [vmem:[#allocation4 + $0x50] sm:$0x1]  ;;  %v9940_v61 = vld [vmem:[#allocation4 + $0x48] sm:$0xff]  }
 0x228   : > { %v7075_v63 = vsel %vm10191_vm15, %v11714_v3, %v11698_v38  ;;  %v7080_v59 = vrot.slane %v7079_v37, 4  ;;  %v9264_v32 = vcombine.low %v11734_v24, %v11721_v27  ;;  %v5192_v39 = vshll.u32 %v11726_v52, 16  ;;  %v5530_v5 = vld [vmem:[#allocation4 + $0x14] sm:$0x1]  ;;  %v5528_v42 = vld [vmem:[#allocation4 + $0xc] sm:$0xe] }
 0x229   : > { %5470 = vrot.lane.b32.xlu1 %v9171_v30, %s10045_s8  ;;  %v11746_v11 = vrot.slane %v5179_v17, 4  ;;  %v7093_v43 = vor.u32 %v7092_v8, %v7089_v19  ;;  %v7120_v10 = vshll.u32 %v6979_v18, 16  ;;  %v7124_v53 = vshrl.u32 %v6979_v18, 16  ;;  %4970 = vst.msk [vmem:[#allocation5 + $0xf0] sm:$0xff] %vm4963_vm3, %v9940_v61  ;;  %v9941_v50 = vld [vmem:[#allocation4 + $0x3c] sm:$0xff]  }
 0x22a   : > { %v11748_v20 = vrot.slane %v5189_v55, 4  ;;  %v7103_v38 = vor.u32 %v7102_v22, %v11729_v1  ;;  %v11751_v2 = vrot.slane %v7106_v34, 5  ;;  %v6622_v33 = vrot.slane %v6620_v47, 4  ;;  %v4257_v8 = vld [vmem:[#allocation4 + $0x90] sm:$0x1]  ;;  %6953 = vst.msk [vmem:[#allocation5 + $0x90] sm:$0xff] %vm4963_vm3, %v9941_v50 }
 0x22b   : > { %v6623_v41 = vrot.slane %v6512_v23, 5  ;;  %v7116_v7 = vrot.slane %v7114_v29, 5  ;;  %vm5508_vm5 = vcmask 1048064   ;;  %v7085_v58 = vsel %vm10191_vm15, %v7080_v59, %v11717_v9  ;;  %v4254_v22 = vld [vmem:[#allocation4 + $0x84] sm:$0x1] }
 0x22c   : > { %v9182_v30 = vrot.slane %v5525_v45, 9  ;;  %v5623_v44 = vrot.slane %v5526_v46, 5  ;;  %v5626_v40 = vrot.slane %v5527_v57, 5  ;;  %5509 = vst.msk [vmem:[#allocation5] sm:$0xff] %vm5508_vm5, %v5461_v54  ;;  %v11762_v3 = vrot.slane %v7093_v43, 4 }
 0x22d   : > { %7446 = vrot.lane.b32.xlu1 %v11675_v6, %s10045_s8  ;;  %v7113_v6 = vrot.slane %v7111_v56, 4  ;;  %v11764_v37 = vrot.slane %v7120_v10, 5  ;;  %v7126_v12 = vrot.slane %v7124_v53, 4  ;;  %v5630_v16 = vrot.slane %v5529_v51, 5  ;;  %v4306_v23 = vld [vmem:[#allocation4 + $0x98] sm:$0x1] }
 0x22e   : > { %v11766_v9 = vrot.slane %v7103_v38, 4  ;;  %v11770_v17 = vsel %vm10162_vm11, %v6622_v33, %v6623_v41  ;;  %v5624_v55 = vsel %vm10162_vm11, %v9182_v30, %v5623_v44  ;;  %v5625_v19 = vrot.slane %v5623_v44, 4  ;;  %v4303_v59 = vld [vmem:[#allocation4 + $0x8c] sm:$0x1]  ;;  %v5531_v10 = vld [vmem:[#allocation4 + $0x18] sm:$0xe] }
 0x22f   : > { %v7130_v21 = vshll.u32 %v6980_v35, 16  ;;  %v5632_v26 = vrot.slane %v5630_v16, 4  ;;  %v9183_v34 = vrot.slane %v5528_v42, 9  ;;  %v9296_v18 = vcombine.low %v7075_v63, %v7085_v58  ;;  %v11798_v51 = vld [vmem:[#allocation4 + $0x40] sm:$0xf] }
 0x230   : > { %v11777_v56 = vsel %vm10162_vm11, %v9249_v31, %v6620_v47  ;;  %v7117_v29 = vor.u32 %v7116_v7, %v7113_v6  ;;  %v5627_v45 = vsel %vm10162_vm11, %v5625_v19, %v5626_v40  ;;  %v7127_v46 = vor.u32 %v7126_v12, %v11764_v37  ;;  %v5532_v47 = vld [vmem:[#allocation4 + $0x1c] sm:$0xf]  ;;  %v5533_v31 = vld [vmem:[#allocation4 + $0x20] sm:$0x1]  ;;  %v5534_v33 = vld [vmem:[#allocation4 + $0x24] sm:$0xe] }
 0x231   : > { %6757 = vrot.lane.b32.xlu1 %v9262_v60, %s10045_s8  ;;  %v5633_v60 = vrot.slane %v5530_v5, 5  ;;  %v9198_v57 = vcombine.low %v5624_v55, %v5627_v45  ;;  %v5631_v63 = vsel %vm10162_vm11, %v9183_v34, %v5630_v16  ;;  %v7099_v53 = vsel %vm10191_vm15, %v11762_v3, %v11729_v1  ;;  %v11812_v61 = vld [vmem:[%s13372_s2] ss:$0 sm:$0xff] }
 0x232   : > { %v9265_v54 = vcombine.low %v11777_v56, %v11770_v17  ;;  %v4258_v5 = vsel %vm11340_vm0, 0, %v4257_v8  ;;  %v4255_v1 = vsel %vm11340_vm0, 0, %v4254_v22  ;;  %v4307_v42 = vsel %vm11331_vm10, 0, %v4306_v23  ;;  %v5535_v44 = vld [vmem:[#allocation4 + $0x28] sm:$0xf] }
 0x233   : > { %v5634_v43 = vsel %vm10162_vm11, %v5632_v26, %v5633_v60  ;;  %5797 = vst.msk [vmem:[#allocation5 + $0x8] sm:$0xff] %vm4963_vm3, %v9198_v57  ;;  %v11815_v7 = vrot.slane %v7117_v29, 4  ;;  %v11817_v58 = vrot.slane %v7130_v21, 5  ;;  %4259 = vst [vmem:[#allocation4 + $0x90] sm:$0x1] %v4258_v5  ;;  %v5637_v30 = vrot.slane %v5532_v47, 5 }
 0x234   : > { %v9199_v38 = vcombine.low %v5631_v63, %v5634_v43  ;;  %4256 = vst [vmem:[#allocation4 + $0x84] sm:$0x1] %v4255_v1  ;;  %4308 = vst [vmem:[#allocation4 + $0x98] sm:$0x1] %v4307_v42  ;;  %v11825_v3 = vrot.slane %v7127_v46, 4  ;;  %v6627_v12 = vrot.slane %v11798_v51, 5 }
 0x235   : > { %7448 = vrot.lane.b32.xlu1 %v11708_v28, %s10045_s8  ;;  %v7109_v28 = vsel %vm10191_vm15, %v11766_v9, %v11751_v2  ;;  %v4304_v2 = vsel %vm11331_vm10, 0, %v4303_v59  ;;  %v9184_v16 = vrot.slane %v5531_v10, 9  ;;  %v5639_v8 = vrot.slane %v5637_v30, 4  ;;  %v5536_v60 = vld [vmem:[#allocation4 + $0x2c] sm:$0x1] }
 0x236   : > { %5798 = vst.msk [vmem:[#allocation5 + $0x30] sm:$0xff] %vm4963_vm3, %v9199_v38  ;;  %4305 = vst [vmem:[#allocation4 + $0x8c] sm:$0x1] %v4304_v2  ;;  %v5640_v22 = vrot.slane %v5533_v31, 5  ;;  %v9185_v34 = vrot.slane %v5534_v33, 9  ;;  %v5644_v23 = vrot.slane %v5535_v44, 5  ;;  %v9297_v46 = vcombine.low %v7099_v53, %v7109_v28 }
 0x237   : > { %v9717_v35 = vpop.f32.mrb[12].mxu0  ;;  %v5638_v15 = vsel %vm10162_vm11, %v9184_v16, %v5637_v30  ;;  %v9943_v43 = vld [vmem:[#allocation4 + $0x48] sm:$0xff]   ;;  %v5647_v31 = vrot.slane %v5536_v60, 5  ;;  %v4772_v33 = vld [vmem:[#allocation4 + $0x60] sm:$0xf] }
 0x238   : > { %v4094_v41 = vadd.f32 %v11812_v61, %v9717_v35  ;;  %v4085_v6 = vpop.f32.mrb[13].mxu0  ;;  %v5646_v47 = vrot.slane %v5644_v23, 4  ;;  %v5645_v1 = vsel %vm10162_vm11, %v9185_v34, %v5644_v23  ;;  %v5538_v42 = vld [vmem:[#allocation4 + $0x34] sm:$0xf]  ;;  %6954 = vst.msk [vmem:[#allocation5 + $0xb8] sm:$0xff] %vm4963_vm3, %v9943_v43 }
 0x239   : > { %v4086_v40 = vadd.f32 %v11812_v61, %v4085_v6  ;;  %v9718_v50 = vpop.f32.mrb[14].mxu0  ;;  %6759 = vrot.lane.b32.xlu1 %v9263_v4, %s10045_s8  ;;  %v5641_v4 = vsel %vm10162_vm11, %v5639_v8, %v5640_v22  ;;  %v4765_v28 = vld [vmem:[#allocation4 + $0x54] sm:$0xf]  ;;  %v4776_v44 = vld [vmem:[#allocation4 + $0x68] sm:$0x1] }
 0x23a   : > { %v4178_v9 = vmax.f32 %v4094_v41, 0.0  ;;  %v4097_v55 = vadd.f32 %v11812_v61, %v9718_v50  ;;  %v4088_v19 = vpop.f32.mrb[15].mxu0  ;;  %v9200_v57 = vcombine.low %v5638_v15, %v5641_v4  ;;  %v5648_v41 = vsel %vm10162_vm11, %v5646_v47, %v5647_v31  ;;  %v5537_v16 = vld [vmem:[#allocation4 + $0x30] sm:$0xe]  ;;  %v4769_v22 = vld [vmem:[#allocation4 + $0x5c] sm:$0x1] }
 0x23b   : > { %v4176_v21 = vmax.f32 %v4086_v40, 0.0  ;;  %v4089_v26 = vadd.f32 %v11812_v61, %v4088_v19  ;;  %v9201_v50 = vcombine.low %v5645_v1, %v5648_v41  ;;  %v11850_v15 = vld [vmem:[#allocation4 + $0x4c] sm:$0xf]  ;;  %v5541_v4 = vld [vmem:[#allocation4 + $0x40] sm:$0xf]  ;;  %v9186_v31 = vrot.slane %v5537_v16, 9 }
 0x23c   : > { %v9415_v29 = vpack.c.bf16 %v4178_v9, %v4178_v9  ;;  %v4179_v36 = vmax.f32 %v4097_v55, 0.0  ;;  %5799 = vst.msk [vmem:[#allocation5 + $0x58] sm:$0xff] %vm4963_vm3, %v9200_v57  ;;  %v5539_v9 = vld [vmem:[#allocation4 + $0x38] sm:$0x1]  ;;  %v6629_v1 = vrot.slane %v6627_v12, 4 }
 0x23d   : > { %v9413_v45 = vpack.c.bf16 %v4176_v21, %v4176_v21  ;;  %v4177_v59 = vmax.f32 %v4089_v26, 0.0  ;;  %7450 = vrot.lane.b32.xlu1 %v9296_v18, %s10045_s8  ;;  %v4263_v21 = vld [vmem:[#allocation4 + $0xa8] sm:$0x1]  ;;  %v5651_v26 = vrot.slane %v5538_v42, 5  ;;  %5800 = vst.msk [vmem:[#allocation5 + $0x80] sm:$0xff] %vm4963_vm3, %v9201_v50  ;;  %v5658_v42 = vrot.slane %v5541_v4, 5 }
 0x23e   : > { %v4521_v63 = vshrl.u32 %v9415_v29, 16  ;;  %v9416_v10 = vpack.c.bf16 %v4179_v36, %v4179_v36  ;;  %v4524_v38 = vshll.u32 %v9415_v29, 16  ;;  %v4264_v29 = vsel %vm11340_vm0, 0, %v4263_v21  ;;  %v11886_v16 = vld [vmem:[#allocation4 + $0x48] sm:$0xe] }
 0x23f   : > { %v4504_v35 = vshrl.u32 %v9413_v45, 16  ;;  %v9414_v5 = vpack.c.bf16 %v4177_v59, %v4177_v59  ;;  %v4507_v53 = vshll.u32 %v9413_v45, 16  ;;  %4265 = vst [vmem:[#allocation4 + $0xa8] sm:$0x1] %v4264_v29  ;;  %v5653_v43 = vrot.slane %v5651_v26, 4 }
 0x240   : > { %v4523_v18 = vrot.slane %v4521_v63, 7  ;;  %v4529_v2 = vshrl.u32 %v9416_v10, 16  ;;  %v4532_v30 = vshll.u32 %v9416_v10, 16  ;;  %v5540_v63 = vld [vmem:[#allocation4 + $0x3c] sm:$0xe] }
 0x241   : > { %v4506_v6 = vrot.slane %v4504_v35, 7  ;;  %v4512_v40 = vshrl.u32 %v9414_v5, 16  ;;  %6761 = vrot.lane.b32.xlu1 %v9264_v32, %s10045_s8  ;;  %v4515_v8 = vshll.u32 %v9414_v5, 16  ;;  %v6515_v5 = vld [vmem:[#allocation4 + $0x44] sm:$0x1] }
 0x242   : > { %v4526_v55 = vor.u32 %v4524_v38, %v4523_v18  ;;  %v4531_v19 = vrot.slane %v4529_v2, 7  ;;  %v4527_v60 = vrot.slane %v4523_v18, 4  ;;  %v5654_v38 = vrot.slane %v5539_v9, 5 }
 0x243   : > { %v4509_v34 = vor.u32 %v4507_v53, %v4506_v6  ;;  %v4514_v23 = vrot.slane %v4512_v40, 7  ;;  %v4510_v24 = vrot.slane %v4506_v6, 4  ;;  %v7133_v18 = vsel %vm10191_vm15, %v11825_v3, %v11817_v58  ;;  %v6513_v53 = vld [vmem:[#allocation4 + $0x3c] sm:$0xe] }
 0x244   : > { %v4773_v27 = vsel %vm11455_vm14, %v4526_v55, %v4772_v33  ;;  %v4534_v32 = vor.u32 %v4532_v30, %v4531_v19  ;;  %v4536_v36 = vrot.slane %v4531_v19, 4  ;;  %v5542_v33 = vld [vmem:[#allocation4 + $0x44] sm:$0x1]  ;;  %v5652_v2 = vsel %vm10162_vm11, %v9186_v31, %v5651_v26  ;;  %v6518_v19 = vld [vmem:[#allocation4 + $0x50] sm:$0x1] }
 0x245   : > { %4774 = vst [vmem:[#allocation4 + $0x60] sm:$0xf] %v4773_v27  ;;  %v4766_v45 = vsel %vm11455_vm14, %v4509_v34, %v4765_v28  ;;  %v4517_v59 = vor.u32 %v4515_v8, %v4514_v23  ;;  %v4519_v57 = vrot.slane %v4514_v23, 4  ;;  %7452 = vrot.lane.b32.xlu1 %v9297_v46, %s10045_s8  ;;  %v6634_v28 = vrot.slane %v11850_v15, 5  ;;  %v4260_v15 = vld [vmem:[#allocation4 + $0x9c] sm:$0x1] }
 0x246   : > { %4767 = vst [vmem:[#allocation4 + $0x54] sm:$0xf] %v4766_v45  ;;  %v4535_v10 = vsel %vm10201_vm1, %v4527_v60, %v4534_v32  ;;  %v4777_v47 = vsel %vm11340_vm0, %v4536_v36, %v4776_v44  ;;  %v5655_v41 = vsel %vm10162_vm11, %v5653_v43, %v5654_v38  ;;  %v9187_v30 = vrot.slane %v5540_v63, 9 }
 0x247   : > { %4775 = vst.msk [vmem:[#allocation4 + $0x64] sm:$0xf] %vm13443_vm6, %v4535_v10  ;;  %4778 = vst [vmem:[#allocation4 + $0x68] sm:$0x1] %v4777_v47  ;;  %v4518_v35 = vsel %vm10201_vm1, %v4510_v24, %v4517_v59  ;;  %v4770_v46 = vsel %vm11340_vm0, %v4519_v57, %v4769_v22  ;;  %v9202_v6 = vcombine.low %v5652_v2, %v5655_v41  ;;  %v5660_v44 = vrot.slane %v5658_v42, 4 }
 0x248   : > { %4768 = vst.msk [vmem:[#allocation4 + $0x58] sm:$0xf] %vm13444_vm7, %v4518_v35  ;;  %4771 = vst [vmem:[#allocation4 + $0x5c] sm:$0x1] %v4770_v46  ;;  %v5661_v40 = vrot.slane %v5542_v33, 5  ;;  %v5194_v58 = vrot.slane %v5192_v39, 5  ;;  %v7123_v3 = vsel %vm10191_vm15, %v11815_v7, %v11764_v37  ;;  %v5659_v17 = vsel %vm10162_vm11, %v9187_v30, %v5658_v42 }
 0x249   : > { %6763 = vrot.lane.b32.xlu1 %v9265_v54, %s10045_s8  ;;  %v6630_v50 = vrot.slane %v6515_v5, 5  ;;  %v9298_v9 = vcombine.low %v7123_v3, %v7133_v18  ;;  %v9250_v55 = vrot.slane %v6513_v53, 9  ;;  %5801 = vst.msk [vmem:[#allocation5 + $0xa8] sm:$0xff] %vm4963_vm3, %v9202_v6  ;;  %v11893_v39 = vld [vmem:[#allocation4 + $0xc] sm:$0xf]  ;;  %v6636_v37 = vrot.slane %v6634_v28, 4 }
 0x24a   : > { %v5662_v52 = vsel %vm10162_vm11, %v5660_v44, %v5661_v40  ;;  %v11899_v7 = vld [vmem:[#allocation4 + $0x10] sm:$0xf]  ;;  %v5185_v8 = vsel %vm10191_vm15, %v11746_v11, %v11702_v25  ;;  %v5195_v22 = vsel %vm10191_vm15, %v11748_v20, %v5194_v58  ;;  %v9251_v23 = vrot.slane %v11886_v16, 9 }
 0x24b   : > { %v6631_v56 = vsel %vm10162_vm11, %v6629_v1, %v6630_v50  ;;  %v9203_v54 = vcombine.low %v5659_v17, %v5662_v52  ;;  %v6628_v26 = vsel %vm10162_vm11, %v9250_v55, %v6627_v12  ;;  %v6637_v29 = vrot.slane %v6518_v19, 5 }
 0x24c   : > { %v6038_v25 = vshrl.u32 %v11893_v39, 16  ;;  %v9266_v20 = vcombine.low %v6628_v26, %v6631_v56  ;;  %v6041_v24 = vshll.u32 %v11893_v39, 16  ;;  %v6047_v32 = vshll.u32 %v11899_v7, 16  ;;  %v6984_v57 = vld [vmem:[#allocation4 + $0x60] sm:$0xf]  ;;  %v7798_v39 = vld [vmem:[#allocation5] sm:$0xff] }
 0x24d   : > { %v5001_v21 = vld [vmem:[#allocation4 + $0x54] sm:$0xf]  ;;  %7454 = vrot.lane.b32.xlu1 %v9298_v9, %s10045_s8  ;;  %5802 = vst.msk [vmem:[#allocation5 + $0xd0] sm:$0xff] %vm4963_vm3, %v9203_v54  ;;  %v9172_v51 = vcombine.low %v5185_v8, %v5195_v22  ;;  %v11920_v59 = vsel %vm10162_vm11, %v6636_v37, %v6637_v29  ;;  %v6051_v2 = vshrl.u32 %v11899_v7, 16  ;;  %v7159_v3 = vshrl.u32 %v6984_v57, 16 }
 0x24e   : > { %v6981_v60 = vld [vmem:[#allocation4 + $0x54] sm:$0xf]  ;;  %v5197_v34 = vshrl.u32 %v5001_v21, 16  ;;  %v5200_v27 = vshll.u32 %v5001_v21, 16  ;;  %v6985_v53 = vld [vmem:[#allocation4 + $0x64] sm:$0xf] }
 0x24f   : > { %v9893_v11 = vld [vmem:[#allocation4 + $0x54] sm:$0xff]   ;;  %v5003_v4 = vld [vmem:[#allocation4 + $0x5c] sm:$0x1]  ;;  %v7135_v45 = vshrl.u32 %v6981_v60, 16  ;;  %v7138_v35 = vshll.u32 %v6981_v60, 16  ;;  %v7162_v50 = vshll.u32 %v6984_v57, 16 }
 0x250   : > { %v5002_v36 = vld [vmem:[#allocation4 + $0x58] sm:$0xf]  ;;  %v5199_v12 = vrot.slane %v5197_v34, 4  ;;  %5937 = vrot.lane.b32.xlu0 %v9893_v11, %s10045_s8  ;;  %v5202_v43 = vrot.slane %v5200_v27, 5  ;;  %v5216_v47 = vshll.u32 %v5003_v4, 16  ;;  %v7168_v52 = vshll.u32 %v6985_v53, 16 }
 0x251   : > { %v5206_v63 = vshll.u32 %v5002_v36, 16  ;;  %v5210_v10 = vshrl.u32 %v5002_v36, 16  ;;  %6765 = vrot.lane.b32.xlu1 %v9266_v20, %s10045_s8  ;;  %v6982_v31 = vld [vmem:[#allocation4 + $0x58] sm:$0xf]  ;;  %v6983_v38 = vld [vmem:[#allocation4 + $0x5c] sm:$0x1] }
 0x252   : > { %v7137_v33 = vrot.slane %v7135_v45, 4  ;;  %v7144_v46 = vshll.u32 %v6982_v31, 16  ;;  %v7148_v5 = vshrl.u32 %v6982_v31, 16  ;;  %v5203_v1 = vor.u32 %v5202_v43, %v5199_v12  ;;  %v6986_v17 = vld [vmem:[#allocation4 + $0x68] sm:$0x1]  ;;  %v9898_v56 = vld [vmem:[#allocation4 + $0x60] sm:$0xff]   ;;  %v5926_v26 = vpop.permute.xlu0 %5925 }
 0x253   : > { %v5208_v42 = vrot.slane %v5206_v63, 5  ;;  %v5212_v18 = vrot.slane %v5210_v10, 4  ;;  %v7140_v41 = vrot.slane %v7138_v35, 5  ;;  %v7154_v44 = vshll.u32 %v6983_v38, 16  ;;  %v9918_v21 = vld [vmem:[%s13373_s3 + $0xc0] sm:$0xff]   ;;  %5973 = vst.msk [vmem:[#allocation5 + $0x8] sm:$0xff] %vm5508_vm5, %v5926_v26 }
 0x254   : > { %v7146_v6 = vrot.slane %v7144_v46, 5  ;;  %v7150_v30 = vrot.slane %v7148_v5, 4  ;;  %5472 = vrot.lane.b32.xlu0 %v9172_v51, %s10045_s8  ;;  %v5204_v40 = vrot.slane %v5203_v1, 4  ;;  %v5218_v9 = vrot.slane %v5216_v47, 5  ;;  %v11937_v36 = vld [vmem:[#allocation4 + $0x58] sm:$0xf]  ;;  %9565 = vmatprep.subr.bf16.mxu0 %v9918_v21 }
 0x255   : > { %v5213_v58 = vor.u32 %v5212_v18, %v5208_v42  ;;  %v7141_v55 = vor.u32 %v7140_v41, %v7137_v33  ;;  %v7156_v54 = vrot.slane %v7154_v44, 5  ;;  %v7161_v8 = vrot.slane %v7159_v3, 4  ;;  %v11939_v4 = vld [vmem:[#allocation4 + $0x14] sm:$0x1]  ;;  %v9919_v10 = vld [vmem:[%s13373_s3 + $0x80] sm:$0xff]  }
 0x256   : > { %v7151_v19 = vor.u32 %v7150_v30, %v7146_v6  ;;  %v7164_v22 = vrot.slane %v7162_v50, 5  ;;  %v11929_v29 = vrot.slane %v7168_v52, 5  ;;  %v7172_v11 = vshrl.u32 %v6985_v53, 16  ;;  %v11950_v47 = vld [vmem:[#allocation4 + $0x18] sm:$0xf]  ;;  %v5928_v46 = vpop.permute.xlu0 %5927  ;;  %9566 = vmatpush3.bf16.msra.mxu0 %v9919_v10  ;;  %v9927_v10 = vld [vmem:[%s13373_s3 + $0xe0] sm:$0xff]  }
 0x257   : > { %v5214_v37 = vrot.slane %v5213_v58, 4  ;;  %v7142_v60 = vrot.slane %v7141_v55, 4  ;;  %v5209_v27 = vsel %vm10191_vm15, %v5204_v40, %v5208_v42  ;;  %v11941_v12 = vrot.slane %v6038_v25, 4  ;;  %v9920_v25 = vld [vmem:[%s13373_s3 + $0xc8] sm:$0xff]   ;;  %5974 = vst.msk [vmem:[#allocation5 + $0x30] sm:$0xff] %vm5508_vm5, %v5928_v46  ;;  %v9922_v40 = vld [vmem:[%s13373_s3 + $0xd0] sm:$0xff]  }
 0x258   : > { %v7152_v34 = vrot.slane %v7151_v19, 4  ;;  %5939 = vrot.lane.b32.xlu0 %v9898_v56, %s10045_s8  ;;  %v7165_v51 = vor.u32 %v7164_v22, %v7161_v8  ;;  %v7174_v43 = vrot.slane %v7172_v11, 4  ;;  %v7178_v63 = vshll.u32 %v6986_v17, 16  ;;  %v9921_v42 = vld [vmem:[%s13373_s3 + $0x88] sm:$0xff]   ;;  %v6521_v44 = vld [vmem:[#allocation4 + $0x5c] sm:$0x1]  ;;  %9567 = vmatprep.subr.bf16.mxu0 %v9920_v25 }
 0x259   : > { %v5219_v20 = vsel %vm10191_vm15, %v5214_v37, %v5218_v9  ;;  %v7147_v45 = vsel %vm10191_vm15, %v7142_v60, %v7146_v6  ;;  %v6043_v33 = vrot.slane %v6041_v24, 5  ;;  %v11959_v35 = vrot.slane %v6047_v32, 5  ;;  %v11970_v24 = vld [vmem:[#allocation4 + $0x54] sm:$0xe]  ;;  %v11972_v32 = vld [vmem:[#allocation4 + $0x60] sm:$0xf] }
 0x25a   : > { %v7157_v57 = vsel %vm10191_vm15, %v7152_v34, %v7156_v54  ;;  %v9173_v31 = vcombine.low %v5209_v27, %v5219_v20  ;;  %v7175_v5 = vor.u32 %v7174_v43, %v11929_v29  ;;  %v6641_v1 = vrot.slane %v11937_v36, 5  ;;  %v11986_v50 = vld [vmem:[#allocation4 + $0x64] sm:$0xf]  ;;  %v4312_v9 = vld [vmem:[#allocation4 + $0xb0] sm:$0x1]  ;;  %9568 = vmatpush3.bf16.msra.mxu0 %v9921_v42  ;;  %v9942_v21 = vld [vmem:[#allocation4 + $0x54] sm:$0xff]  }
 0x25b   : > { %v9299_v38 = vcombine.low %v7147_v45, %v7157_v57  ;;  %v6053_v18 = vrot.slane %v6051_v2, 4  ;;  %v6057_v53 = vshll.u32 %v11939_v4, 16  ;;  %v7166_v7 = vrot.slane %v7165_v51, 4  ;;  %v7799_v55 = vld [vmem:[#allocation5 + $0x8] sm:$0xff]  ;;  %v12004_v22 = vld [vmem:[#allocation4 + $0x1c] sm:$0xf]  ;;  %9569 = vmatprep.subr.bf16.mxu0 %v9922_v40 }
 0x25c   : > { %5474 = vrot.lane.b32.xlu0 %v9173_v31, %s10045_s8  ;;  %v6062_v41 = vshrl.u32 %v11950_v47, 16  ;;  %v6635_v2 = vsel %vm10162_vm11, %v9251_v23, %v6634_v28  ;;  %v7176_v6 = vrot.slane %v7175_v5, 4  ;;  %v7180_v30 = vrot.slane %v7178_v63, 5  ;;  %v4309_v17 = vld [vmem:[#allocation4 + $0xa4] sm:$0x1]  ;;  %8253 = vmatprep.mubr.bf16.mxu1 %v7799_v55  ;;  %v9945_v27 = vld [vmem:[#allocation4 + $0x54] sm:$0xff]  }
 0x25d   : > { %7456 = vrot.lane.b32.xlu1 %v9299_v38, %s10045_s8  ;;  %v6065_v58 = vshll.u32 %v11950_v47, 16  ;;  %v9267_v3 = vcombine.low %v6635_v2, %v11920_v59  ;;  %v6044_v16 = vor.u32 %v6043_v33, %v11941_v12  ;;  %v9252_v23 = vrot.slane %v11970_v24, 9  ;;  %v9923_v59 = vld [vmem:[%s13373_s3 + $0x90] sm:$0xff]   ;;  %8254 = vmatmul.mubr.bf16.vlgmr.msra.gmra.mrb[0].mxu1 %v7798_v39  ;;  %v9925_v4 = vld [vmem:[%s13373_s3 + $0x98] sm:$0xff]   ;;  %v12020_v45 = vld [vmem:[#allocation4 + $0x4c] sm:$0xf] }
 0x25e   : > { %v7181_v28 = vsel %vm10191_vm15, %v7176_v6, %v7180_v30  ;;  %v6643_v19 = vrot.slane %v6641_v1, 4  ;;  %v6054_v52 = vor.u32 %v6053_v18, %v11959_v35  ;;  %v7171_v56 = vsel %vm10191_vm15, %v7166_v7, %v11929_v29  ;;  %v9924_v29 = vld [vmem:[%s13373_s3 + $0xd8] sm:$0xff]   ;;  %4971 = vst.msk [vmem:[#allocation5 + $0x118] sm:$0xff] %vm4963_vm3, %v9942_v21  ;;  %v7804_v43 = vld [vmem:[#allocation5 + $0x30] sm:$0xff]  ;;  %9570 = vmatpush3.bf16.msra.mxu0 %v9923_v59 }
 0x25f   : > { %v6644_v37 = vrot.slane %v6521_v44, 5  ;;  %v5221_v54 = vshrl.u32 %v11972_v32, 16  ;;  %v5224_v8 = vshll.u32 %v11972_v32, 16  ;;  %v5230_v26 = vshll.u32 %v11986_v50, 16  ;;  %v9948_v57 = vld [vmem:[#allocation4 + $0x60] sm:$0xff]   ;;  %6955 = vst.msk [vmem:[#allocation5 + $0xe0] sm:$0xff] %vm4963_vm3, %v9945_v27  ;;  %8261 = vmatprep.mubr.bf16.mxu1 %v7804_v43  ;;  %9571 = vmatprep.subr.bf16.mxu0 %v9924_v29 }
 0x260   : > { %v5234_v60 = vshrl.u32 %v11986_v50, 16  ;;  %v4261_v34 = vsel %vm11340_vm0, 0, %v4260_v15  ;;  %v4313_v11 = vsel %vm11331_vm10, 0, %v4312_v9  ;;  %v9300_v20 = vcombine.low %v7171_v56, %v7181_v28  ;;  %v12028_v38 = vld [vmem:[#allocation4 + $0x20] sm:$0x1]  ;;  %6956 = vst.msk [vmem:[#allocation5 + $0x108] sm:$0xff] %vm4963_vm3, %v9948_v57 }
 0x261   : > { %6767 = vrot.lane.b32.xlu1 %v9267_v3, %s10045_s8  ;;  %4262 = vst [vmem:[#allocation4 + $0x9c] sm:$0x1] %v4261_v34  ;;  %4314 = vst [vmem:[#allocation4 + $0xb0] sm:$0x1] %v4313_v11  ;;  %v4310_v51 = vsel %vm11331_vm10, 0, %v4309_v17  ;;  %v6045_v12 = vrot.slane %v6044_v16, 4  ;;  %v6645_v63 = vsel %vm10162_vm11, %v6643_v19, %v6644_v37  ;;  %v6642_v46 = vsel %vm10162_vm11, %v9252_v23, %v6641_v1 }
 0x262   : > { %4311 = vst [vmem:[#allocation4 + $0xa4] sm:$0x1] %v4310_v51  ;;  %v6055_v47 = vrot.slane %v6054_v52, 4  ;;  %v6059_v31 = vrot.slane %v6057_v53, 5  ;;  %v6064_v25 = vrot.slane %v6062_v41, 4  ;;  %v6067_v33 = vrot.slane %v6065_v58, 5  ;;  %9572 = vmatpush3.bf16.msra.mxu0 %v9925_v4 }
 0x263   : > { %v6050_v5 = vsel %vm10191_vm15, %v6045_v12, %v11959_v35  ;;  %v6071_v18 = vshll.u32 %v12004_v22, 16  ;;  %v9949_v53 = vld [vmem:[#allocation4 + $0x60] sm:$0xff]   ;;  %v9268_v7 = vcombine.low %v6642_v46, %v6645_v63  ;;  %v6075_v36 = vshrl.u32 %v12004_v22, 16  ;;  %v5543_v2 = vld [vmem:[#allocation4 + $0x48] sm:$0xe]  ;;  %9573 = vmatprep.subr.bf16.mxu0 %v9927_v10  ;;  %v9930_v9 = vld [vmem:[%s13373_s3 + $0xe8] sm:$0xff]  }
 0x264   : > { %v6060_v42 = vsel %vm10191_vm15, %v6055_v47, %v6059_v31  ;;  %v5463_v39 = vpop.permute.xlu1 %5462  ;;  %v6068_v41 = vor.u32 %v6067_v33, %v6064_v25  ;;  %v5545_v1 = vld [vmem:[#allocation4 + $0x50] sm:$0x1]  ;;  %v12045_v30 = vrot.slane %v5221_v54, 4  ;;  %v9928_v35 = vld [vmem:[%s13373_s3 + $0xa0] sm:$0xff]   ;;  %v5665_v40 = vrot.slane %v12020_v45, 5  ;;  %4972 = vst.msk [vmem:[#allocation5 + $0x140] sm:$0xff] %vm4963_vm3, %v9949_v53 }
 0x265   : > { %7458 = vrot.lane.b32.xlu1 %v9300_v20, %s10045_s8  ;;  %v9230_v32 = vcombine.low %v6050_v5, %v6060_v42  ;;  %5510 = vst.msk [vmem:[#allocation5 + $0x28] sm:$0xff] %vm5508_vm5, %v5463_v39  ;;  %v6073_v44 = vrot.slane %v6071_v18, 5  ;;  %v12055_v15 = vrot.slane %v5224_v8, 5  ;;  %v6077_v16 = vrot.slane %v6075_v36, 4  ;;  %v9932_v50 = vld [vmem:[%s13373_s3 + $0xa8] sm:$0xff]   ;;  %v9933_v20 = vld [vmem:[%s13373_s3 + $0xf0] sm:$0xff]  }
 0x266   : > { %v5930_v24 = vpop.permute.xlu0 %5929  ;;  %v6081_v55 = vshll.u32 %v12028_v38, 16  ;;  %v12065_v19 = vrot.slane %v5230_v26, 5  ;;  %v12069_v17 = vrot.slane %v5234_v60, 4  ;;  %v6069_v59 = vrot.slane %v6068_v41, 4  ;;  %9574 = vmatpush3.bf16.msra.mxu0 %v9928_v35  ;;  %v12081_v4 = vld [vmem:[#allocation4 + $0x24] sm:$0xf] }
 0x267   : > { %5975 = vst.msk [vmem:[#allocation5 + $0x58] sm:$0xff] %vm5508_vm5, %v5930_v24  ;;  %v6078_v8 = vor.u32 %v6077_v16, %v6073_v44  ;;  %v9188_v22 = vrot.slane %v5543_v2, 9  ;;  %v5667_v26 = vrot.slane %v5665_v40, 4  ;;  %v5668_v60 = vrot.slane %v5545_v1, 5  ;;  %9575 = vmatprep.subr.bf16.mxu0 %v9930_v9  ;;  %v4269_v5 = vld [vmem:[#allocation4 + $0xc0] sm:$0x1] }
 0x268   : > { %v9721_v6 = vpop.f32.mrb[16].mxu0  ;;  %6485 = vst.msk [vmem:[#allocation5 + $0x10] sm:$0xff] %vm4963_vm3, %v9230_v32  ;;  %v5465_v54 = vpop.permute.xlu1 %5464  ;;  %v6083_v51 = vrot.slane %v6081_v55, 5  ;;  %v6074_v57 = vsel %vm10191_vm15, %v6069_v59, %v6073_v44  ;;  %v6086_v18 = vshrl.u32 %v12081_v4, 16  ;;  %v4270_v32 = vsel %vm11340_vm0, 0, %v4269_v5 }
 0x269   : > { %v4110_v58 = vadd.f32 %v11812_v61, %v9721_v6  ;;  %v4101_v3 = vpop.f32.mrb[17].mxu0  ;;  %6769 = vrot.lane.b32.xlu1 %v9268_v7, %s10045_s8  ;;  %5511 = vst.msk [vmem:[#allocation5 + $0x50] sm:$0xff] %vm5508_vm5, %v5465_v54  ;;  %v5666_v43 = vsel %vm10162_vm11, %v9188_v22, %v5665_v40  ;;  %v5669_v25 = vsel %vm10162_vm11, %v5667_v26, %v5668_v60  ;;  %v4786_v7 = vld [vmem:[#allocation4 + $0x78] sm:$0xf]  ;;  %v4779_v2 = vld [vmem:[#allocation4 + $0x6c] sm:$0xf] }
 0x26a   : > { %v4102_v28 = vadd.f32 %v11812_v61, %v4101_v3  ;;  %v9722_v23 = vpop.f32.mrb[18].mxu0  ;;  %v5932_v11 = vpop.permute.xlu0 %5931  ;;  %9576 = vmatpush3.bf16.msra.mxu0 %v9932_v50  ;;  %4271 = vst [vmem:[#allocation4 + $0xc0] sm:$0x1] %v4270_v32  ;;  %v9204_v6 = vcombine.low %v5666_v43, %v5669_v25  ;;  %v6089_v9 = vshll.u32 %v12081_v4, 16  ;;  %v5237_v59 = vor.u32 %v12069_v17, %v12065_v19 }
 0x26b   : > { %v4182_v52 = vmax.f32 %v4110_v58, 0.0  ;;  %v4113_v56 = vadd.f32 %v11812_v61, %v9722_v23  ;;  %v4104_v37 = vpop.f32.mrb[19].mxu0  ;;  %5976 = vst.msk [vmem:[#allocation5 + $0x80] sm:$0xff] %vm5508_vm5, %v5932_v11  ;;  %9577 = vmatprep.subr.bf16.mxu0 %v9933_v20  ;;  %v4790_v58 = vld [vmem:[#allocation4 + $0x80] sm:$0x1] }
 0x26c   : > { %v4180_v21 = vmax.f32 %v4102_v28, 0.0  ;;  %v4105_v34 = vadd.f32 %v11812_v61, %v4104_v37  ;;  %v6079_v61 = vrot.slane %v6078_v8, 4  ;;  %v7803_v47 = vld [vmem:[#allocation5 + $0x28] sm:$0xff]  ;;  %v4783_v23 = vld [vmem:[#allocation4 + $0x74] sm:$0x1]  ;;  %5803 = vst.msk [vmem:[#allocation5 + $0xf8] sm:$0xff] %vm4963_vm3, %v9204_v6 }
 0x26d   : > { %v9419_v29 = vpack.c.bf16 %v4182_v52, %v4182_v52  ;;  %v4183_v27 = vmax.f32 %v4113_v56, 0.0  ;;  %8262 = vmatmul.mubr.bf16.gmra.mrb[4].mxu1 %v7803_v47  ;;  %v12100_v52 = vld [vmem:[#allocation4 + $0x28] sm:$0xf]  ;;  %v5546_v47 = vld [vmem:[#allocation4 + $0x54] sm:$0xe] }
 0x26e   : > { %v9417_v12 = vpack.c.bf16 %v4180_v21, %v4180_v21  ;;  %v4181_v45 = vmax.f32 %v4105_v34, 0.0  ;;  %v7809_v31 = vld [vmem:[#allocation5 + $0x58] sm:$0xff]  ;;  %v6084_v38 = vsel %vm10191_vm15, %v6079_v61, %v6083_v51  ;;  %v12102_v56 = vld [vmem:[#allocation4 + $0x28] sm:$0xf]  ;;  %v12106_v34 = vld [vmem:[#allocation4 + $0x64] sm:$0xf] }
 0x26f   : > { %v4555_v63 = vshrl.u32 %v9419_v29, 16  ;;  %v9420_v10 = vpack.c.bf16 %v4183_v27, %v4183_v27  ;;  %v9231_v42 = vcombine.low %v6074_v57, %v6084_v38  ;;  %v4558_v39 = vshll.u32 %v9419_v29, 16  ;;  %8269 = vmatprep.mubr.bf16.mxu1 %v7809_v31  ;;  %v5006_v21 = vld [vmem:[#allocation4 + $0x68] sm:$0x1]  ;;  %v5547_v29 = vld [vmem:[#allocation4 + $0x58] sm:$0xf] }
 0x270   : > { %v4538_v33 = vshrl.u32 %v9417_v12, 16  ;;  %v9418_v46 = vpack.c.bf16 %v4181_v45, %v4181_v45  ;;  %v4541_v36 = vshll.u32 %v9417_v12, 16  ;;  %v12114_v61 = vld [vmem:[#allocation4 + $0x60] sm:$0xe]  ;;  %v7808_v51 = vld [vmem:[#allocation5 + $0x50] sm:$0xff]  ;;  %v6088_v12 = vrot.slane %v6086_v18, 4 }
 0x271   : > { %v4557_v53 = vrot.slane %v4555_v63, 7  ;;  %v4563_v24 = vshrl.u32 %v9420_v10, 16  ;;  %6486 = vst.msk [vmem:[#allocation5 + $0x38] sm:$0xff] %vm4963_vm3, %v9231_v42  ;;  %v4566_v40 = vshll.u32 %v9420_v10, 16  ;;  %v6091_v45 = vrot.slane %v6089_v9, 5  ;;  %v9934_v18 = vld [vmem:[%s13373_s3 + $0xb0] sm:$0xff]  }
 0x272   : > { %v4540_v41 = vrot.slane %v4538_v33, 7  ;;  %v4546_v1 = vshrl.u32 %v9418_v46, 16  ;;  %v5467_v3 = vpop.permute.xlu1 %5466  ;;  %v4549_v28 = vshll.u32 %v9418_v46, 16  ;;  %v7814_v60 = vld [vmem:[#allocation5 + $0x80] sm:$0xff]  ;;  %v5227_v63 = vor.u32 %v12055_v15, %v12045_v30  ;;  %v6524_v38 = vld [vmem:[#allocation4 + $0x68] sm:$0x1]  ;;  %9578 = vmatpush3.bf16.msra.mxu0 %v9934_v18 }
 0x273   : > { %v4560_v35 = vor.u32 %v4558_v39, %v4557_v53  ;;  %v4565_v44 = vrot.slane %v4563_v24, 7  ;;  %5512 = vst.msk [vmem:[#allocation5 + $0x78] sm:$0xff] %vm5508_vm5, %v5467_v3  ;;  %v4561_v37 = vrot.slane %v4557_v53, 4  ;;  %v5240_v10 = vshll.u32 %v5006_v21, 16  ;;  %v5548_v31 = vld [vmem:[#allocation4 + $0x5c] sm:$0x1] }
 0x274   : > { %v4543_v16 = vor.u32 %v4541_v36, %v4540_v41  ;;  %v4548_v55 = vrot.slane %v4546_v1, 7  ;;  %v4544_v11 = vrot.slane %v4540_v41, 4  ;;  %v6648_v25 = vrot.slane %v12106_v34, 5  ;;  %v12129_v15 = vld [vmem:[#allocation4 + $0x2c] sm:$0x1] }
 0x275   : > { %v4787_v54 = vsel %vm11455_vm14, %v4560_v35, %v4786_v7  ;;  %v4568_v8 = vor.u32 %v4566_v40, %v4565_v44  ;;  %v4570_v22 = vrot.slane %v4565_v44, 4  ;;  %8270 = vmatmul.mubr.bf16.gmra.mrb[8].mxu1 %v7808_v51  ;;  %v6095_v33 = vshll.u32 %v12100_v52, 16  ;;  %v4266_v53 = vld [vmem:[#allocation4 + $0xb4] sm:$0x1]  ;;  %v12136_v6 = vld [vmem:[#allocation4 + $0x30] sm:$0xf] }
 0x276   : > { %4788 = vst [vmem:[#allocation4 + $0x78] sm:$0xf] %v4787_v54  ;;  %v4780_v17 = vsel %vm11455_vm14, %v4543_v16, %v4779_v2  ;;  %v4551_v50 = vor.u32 %v4549_v28, %v4548_v55  ;;  %v4553_v26 = vrot.slane %v4548_v55, 4  ;;  %v5469_v4 = vpop.permute.xlu1 %5468  ;;  %8277 = vmatprep.mubr.bf16.mxu1 %v7814_v60  ;;  %v5672_v46 = vrot.slane %v5547_v29, 5 }
 0x277   : > { %4781 = vst [vmem:[#allocation4 + $0x6c] sm:$0xf] %v4780_v17  ;;  %v4569_v27 = vsel %vm10201_vm1, %v4561_v37, %v4568_v8  ;;  %v4791_v20 = vsel %vm11340_vm0, %v4570_v22, %v4790_v58  ;;  %5513 = vst.msk [vmem:[#allocation5 + $0xa0] sm:$0xff] %vm5508_vm5, %v5469_v4  ;;  %v7615_v5 = vrot.slane %v12102_v56, 5  ;;  %v5238_v42 = vrot.slane %v5237_v59, 4 }
 0x278   : > { %4789 = vst.msk [vmem:[#allocation4 + $0x7c] sm:$0xf] %vm13445_vm8, %v4569_v27  ;;  %4792 = vst [vmem:[#allocation4 + $0x80] sm:$0x1] %v4791_v20  ;;  %v4552_v57 = vsel %vm10201_vm1, %v4544_v11, %v4551_v50  ;;  %v4784_v43 = vsel %vm11340_vm0, %v4553_v26, %v4783_v23  ;;  %v9253_v30 = vrot.slane %v12114_v61, 9  ;;  %v6092_v39 = vor.u32 %v6091_v45, %v6088_v12 }
 0x279   : > { %4782 = vst.msk [vmem:[#allocation4 + $0x70] sm:$0xf] %vm13446_vm9, %v4552_v57  ;;  %4785 = vst [vmem:[#allocation4 + $0x74] sm:$0x1] %v4784_v43  ;;  %v9189_v7 = vrot.slane %v5546_v47, 9  ;;  %v5674_v24 = vrot.slane %v5672_v46, 4 }
 0x27a   : > { %v5675_v32 = vrot.slane %v5548_v31, 5  ;;  %v5228_v41 = vrot.slane %v5227_v63, 4  ;;  %v5242_v36 = vrot.slane %v5240_v10, 5  ;;  %v6651_v2 = vrot.slane %v6524_v38, 5  ;;  %v7813_v44 = vld [vmem:[#allocation5 + $0x78] sm:$0xff] }
 0x27b   : > { %v4267_v1 = vsel %vm11340_vm0, 0, %v4266_v53  ;;  %v6650_v35 = vrot.slane %v6648_v25, 4  ;;  %v12140_v40 = vrot.slane %v6095_v33, 5  ;;  %v5673_v58 = vsel %vm10162_vm11, %v9189_v7, %v5672_v46  ;;  %v12152_v8 = vld [vmem:[#allocation4 + $0x34] sm:$0xf] }
 0x27c   : > { %4268 = vst [vmem:[#allocation4 + $0xb4] sm:$0x1] %v4267_v1  ;;  %v5676_v3 = vsel %vm10162_vm11, %v5674_v24, %v5675_v32  ;;  %v5243_v9 = vsel %vm10191_vm15, %v5238_v42, %v5242_v36  ;;  %v12148_v59 = vrot.slane %v6092_v39, 4  ;;  %v6099_v37 = vshrl.u32 %v12100_v52, 16 }
 0x27d   : > { %v9205_v28 = vcombine.low %v5673_v58, %v5676_v3  ;;  %v6105_v54 = vshll.u32 %v12129_v15, 16  ;;  %v5233_v21 = vsel %vm10191_vm15, %v5228_v41, %v12065_v19  ;;  %8278 = vmatmul.mubr.bf16.gmra.mrb[12].mxu1 %v7813_v44  ;;  %v6110_v17 = vshrl.u32 %v12136_v6, 16  ;;  %v6990_v4 = vld [vmem:[#allocation4 + $0x78] sm:$0xf] }
 0x27e   : > { %v6987_v16 = vld [vmem:[#allocation4 + $0x6c] sm:$0xf]  ;;  %v6113_v50 = vshll.u32 %v12136_v6, 16  ;;  %v9174_v26 = vcombine.low %v5233_v21, %v5243_v9  ;;  %v12162_v51 = vsel %vm10162_vm11, %v6650_v35, %v6651_v2  ;;  %v6119_v53 = vshll.u32 %v12152_v8, 16  ;;  %v9936_v35 = vld [vmem:[%s13373_s3 + $0xf8] sm:$0xff]  }
 0x27f   : > { %v5007_v55 = vld [vmem:[#allocation4 + $0x6c] sm:$0xf]  ;;  %v7183_v23 = vshrl.u32 %v6987_v16, 16  ;;  %v7186_v11 = vshll.u32 %v6987_v16, 16  ;;  %5804 = vst.msk [vmem:[#allocation5 + $0x120] sm:$0xff] %vm4963_vm3, %v9205_v28  ;;  %v7207_v2 = vshrl.u32 %v6990_v4, 16  ;;  %9579 = vmatprep.subr.bf16.mxu0 %v9936_v35  ;;  %v6649_v15 = vsel %vm10162_vm11, %v9253_v30, %v6648_v25 }
 0x280   : > { %v9911_v22 = vld [vmem:[#allocation4 + $0x6c] sm:$0xff]   ;;  %v6989_v29 = vld [vmem:[#allocation4 + $0x74] sm:$0x1]  ;;  %v5245_v20 = vshrl.u32 %v5007_v55, 16  ;;  %v5248_v47 = vshll.u32 %v5007_v55, 16  ;;  %v7210_v1 = vshll.u32 %v6990_v4, 16  ;;  %v6098_v30 = vsel %vm10191_vm15, %v12148_v59, %v12140_v40 }
 0x281   : > { %v6988_v60 = vld [vmem:[#allocation4 + $0x70] sm:$0xf]  ;;  %v7185_v27 = vrot.slane %v7183_v23, 4  ;;  %5941 = vrot.lane.b32.xlu0 %v9911_v22, %s10045_s8  ;;  %v7188_v19 = vrot.slane %v7186_v11, 5  ;;  %v7202_v57 = vshll.u32 %v6989_v29, 16  ;;  %v9913_v55 = vld [vmem:[#allocation4 + $0x78] sm:$0xff]  }
 0x282   : > { %v7192_v12 = vshll.u32 %v6988_v60, 16  ;;  %v7196_v45 = vshrl.u32 %v6988_v60, 16  ;;  %v5008_v43 = vld [vmem:[#allocation4 + $0x70] sm:$0xf]  ;;  %v5009_v63 = vld [vmem:[#allocation4 + $0x74] sm:$0x1] }
 0x283   : > { %v5247_v10 = vrot.slane %v5245_v20, 4  ;;  %v5254_v31 = vshll.u32 %v5008_v43, 16  ;;  %v5258_v38 = vshrl.u32 %v5008_v43, 16  ;;  %v7189_v33 = vor.u32 %v7188_v19, %v7185_v27  ;;  %v6991_v18 = vld [vmem:[#allocation4 + $0x7c] sm:$0xf]  ;;  %v9938_v11 = vld [vmem:[%s13373_s3 + $0xb8] sm:$0xff]  }
 0x284   : > { %v7194_v46 = vrot.slane %v7192_v12, 5  ;;  %v7198_v42 = vrot.slane %v7196_v45, 4  ;;  %v5250_v39 = vrot.slane %v5248_v47, 5  ;;  %v5264_v32 = vshll.u32 %v5009_v63, 16  ;;  %v6992_v9 = vld [vmem:[#allocation4 + $0x80] sm:$0x1]  ;;  %9580 = vmatpush3.bf16.msra.mxu0 %v9938_v11 }
 0x285   : > { %v5256_v7 = vrot.slane %v5254_v31, 5  ;;  %v5260_v24 = vrot.slane %v5258_v38, 4  ;;  %5476 = vrot.lane.b32.xlu0 %v9174_v26, %s10045_s8  ;;  %v7190_v41 = vrot.slane %v7189_v33, 4  ;;  %v7204_v44 = vrot.slane %v7202_v57, 5  ;;  %v12173_v20 = vld [vmem:[#allocation4 + $0x70] sm:$0xf] }
 0x286   : > { %v7199_v36 = vor.u32 %v7198_v42, %v7194_v46  ;;  %v5251_v58 = vor.u32 %v5250_v39, %v5247_v10  ;;  %v7216_v16 = vshll.u32 %v6991_v18, 16  ;;  %v5266_v23 = vrot.slane %v5264_v32, 5  ;;  %v9950_v47 = vld [vmem:[#allocation4 + $0x6c] sm:$0xff]   ;;  %v5011_v6 = vld [vmem:[#allocation4 + $0x7c] sm:$0xf] }
 0x287   : > { %v5261_v3 = vor.u32 %v5260_v24, %v5256_v7  ;;  %v7209_v22 = vrot.slane %v7207_v2, 4  ;;  %v7212_v21 = vrot.slane %v7210_v1, 5  ;;  %v7220_v27 = vshrl.u32 %v6991_v18, 16  ;;  %v9951_v42 = vld [vmem:[#allocation4 + $0x6c] sm:$0xff]   ;;  %6957 = vst.msk [vmem:[#allocation5 + $0x130] sm:$0xff] %vm4963_vm3, %v9950_v47 }
 0x288   : > { %v7200_v28 = vrot.slane %v7199_v36, 4  ;;  %v5252_v26 = vrot.slane %v5251_v58, 4  ;;  %v7218_v29 = vrot.slane %v7216_v16, 5  ;;  %v7195_v4 = vsel %vm10191_vm15, %v7190_v41, %v7194_v46  ;;  %v5010_v24 = vld [vmem:[#allocation4 + $0x78] sm:$0xf]  ;;  %4973 = vst.msk [vmem:[#allocation5 + $0x168] sm:$0xff] %vm4963_vm3, %v9951_v42 }
 0x289   : > { %v5262_v60 = vrot.slane %v5261_v3, 4  ;;  %5943 = vrot.lane.b32.xlu0 %v9913_v55, %s10045_s8  ;;  %v7213_v12 = vor.u32 %v7212_v21, %v7209_v22  ;;  %v7226_v45 = vshll.u32 %v6992_v9, 16  ;;  %v7222_v10 = vrot.slane %v7220_v27, 4  ;;  %v6527_v1 = vld [vmem:[#allocation4 + $0x74] sm:$0x1] }
 0x28a   : > { %v7205_v19 = vsel %vm10191_vm15, %v7200_v28, %v7204_v44  ;;  %v5257_v43 = vsel %vm10191_vm15, %v5252_v26, %v5256_v7  ;;  %v6655_v38 = vrot.slane %v12173_v20, 5  ;;  %v12187_v33 = vrot.slane %v6099_v37, 4  ;;  %v9952_v37 = vld [vmem:[#allocation4 + $0x78] sm:$0xff]   ;;  %v12236_v28 = vld [vmem:[%s13372_s2] ss:$0 sm:$0xff] }
 0x28b   : > { %v9301_v57 = vcombine.low %v7195_v4, %v7205_v19  ;;  %v5267_v63 = vsel %vm10191_vm15, %v5262_v60, %v5266_v23  ;;  %v12191_v46 = vrot.slane %v6105_v54, 5  ;;  %v7223_v18 = vor.u32 %v7222_v10, %v7218_v29  ;;  %6958 = vst.msk [vmem:[#allocation5 + $0x158] sm:$0xff] %vm4963_vm3, %v9952_v37  ;;  %v4315_v25 = vld [vmem:[#allocation4 + $0xbc] sm:$0x1] }
 0x28c   : > { %v9175_v31 = vcombine.low %v5257_v43, %v5267_v63  ;;  %v12196_v39 = vrot.slane %v6110_v17, 4  ;;  %v12200_v7 = vrot.slane %v6113_v50, 5  ;;  %v6123_v52 = vshrl.u32 %v12152_v8, 16  ;;  %v6525_v17 = vld [vmem:[#allocation4 + $0x6c] sm:$0xe] }
 0x28d   : > { %7460 = vrot.lane.b32.xlu1 %v9301_v57, %s10045_s8  ;;  %v7214_v54 = vrot.slane %v7213_v12, 4  ;;  %v4318_v50 = vld [vmem:[#allocation4 + $0xc8] sm:$0x1]  ;;  %v12211_v32 = vrot.slane %v6119_v53, 5  ;;  %v9269_v41 = vcombine.low %v6649_v15, %v12162_v51  ;;  %v7224_v36 = vrot.slane %v7223_v18, 4  ;;  %v9954_v53 = vld [vmem:[#allocation4 + $0x78] sm:$0xff]  }
 0x28e   : > { %5478 = vrot.lane.b32.xlu0 %v9175_v31, %s10045_s8  ;;  %v7228_v2 = vrot.slane %v7226_v45, 5  ;;  %v6657_v34 = vrot.slane %v6655_v38, 4  ;;  %v5278_v35 = vshll.u32 %v5011_v6, 16  ;;  %v5282_v44 = vshrl.u32 %v5011_v6, 16  ;;  %4974 = vst.msk [vmem:[#allocation5 + $0x190] sm:$0xff] %vm4963_vm3, %v9954_v53 }
 0x28f   : > { %v5934_v61 = vpop.permute.xlu0 %5933  ;;  %v6102_v58 = vor.u32 %v12187_v33, %v12140_v40  ;;  %v7219_v9 = vsel %vm10191_vm15, %v7214_v54, %v7218_v29  ;;  %v9254_v16 = vrot.slane %v6525_v17, 9  ;;  %v6658_v55 = vrot.slane %v6527_v1, 5  ;;  %v12261_v33 = vld [vmem:[%s13373_s3 + $0x100] sm:$0xff]  }
 0x290   : > { %v7229_v51 = vsel %vm10191_vm15, %v7224_v36, %v7228_v2  ;;  %5977 = vst.msk [vmem:[#allocation5 + $0xa8] sm:$0xff] %vm5508_vm5, %v5934_v61  ;;  %v6116_v59 = vor.u32 %v12200_v7, %v12196_v39  ;;  %v5269_v21 = vshrl.u32 %v5010_v24, 16  ;;  %v4319_v11 = vsel %vm11331_vm10, 0, %v4318_v50  ;;  %9775 = vmatprep.subr.bf16.mxu1 %v12261_v33  ;;  %9735 = vmatprep.subr.bf16.mxu0 %v12261_v33  ;;  %v7818_v50 = vld [vmem:[#allocation5 + $0xa0] sm:$0xff]  ;;  %v4800_v2 = vld [vmem:[#allocation4 + $0x90] sm:$0xf] }
 0x291   : > { %6771 = vrot.lane.b32.xlu1 %v9269_v41, %s10045_s8  ;;  %v9302_v40 = vcombine.low %v7219_v9, %v7229_v51  ;;  %v6659_v29 = vsel %vm10162_vm11, %v6657_v34, %v6658_v55  ;;  %v5272_v27 = vshll.u32 %v5010_v24, 16  ;;  %4320 = vst [vmem:[#allocation4 + $0xc8] sm:$0x1] %v4319_v11  ;;  %v4316_v19 = vsel %vm11331_vm10, 0, %v4315_v25  ;;  %v6000_v51 = vld [vmem:[#allocation4 + $0x38] sm:$0x1]  ;;  %9779 = vmatpush3.bf16.msra.mxu1 %v12261_v33  ;;  %vm13447_vm10 = vmmov %vm13441_vm2 }
 0x292   : > { %v9725_v3 = vpop.f32.mrb[20].mxu0  ;;  %v12248_v43 = vrot.slane %v5278_v35, 5  ;;  %v12250_v63 = vrot.slane %v5282_v44, 4  ;;  %4317 = vst [vmem:[#allocation4 + $0xbc] sm:$0x1] %v4316_v19  ;;  %v6656_v49 = vsel %vm10162_vm11, %v9254_v16, %v6655_v38  ;;  %v6103_v31 = vrot.slane %v6102_v58, 4 }
 0x293   : > { %v4126_v23 = vadd.f32 %v12236_v28, %v9725_v3  ;;  %v4117_v22 = vpop.f32.mrb[21].mxu0  ;;  %v5936_v4 = vpop.permute.xlu0 %5935  ;;  %v9270_v39 = vcombine.low %v6656_v49, %v6659_v29  ;;  %v12263_v7 = vrot.slane %v5269_v21, 4  ;;  %v12265_v54 = vrot.slane %v5272_v27, 5  ;;  %v4804_v21 = vld [vmem:[#allocation4 + $0x98] sm:$0x1] }
 0x294   : > { %v4118_v26 = vadd.f32 %v12236_v28, %v4117_v22  ;;  %v9726_v60 = vpop.f32.mrb[22].mxu0  ;;  %5978 = vst.msk [vmem:[#allocation5 + $0xd0] sm:$0xff] %vm5508_vm5, %v5936_v4  ;;  %v6108_v20 = vsel %vm10191_vm15, %v6103_v31, %v12191_v46  ;;  %v5285_v6 = vor.u32 %v12250_v63, %v12248_v43  ;;  %v6117_v35 = vrot.slane %v6116_v59, 4  ;;  %v4793_v22 = vld [vmem:[#allocation4 + $0x84] sm:$0xf] }
 0x295   : > { %v4186_v12 = vmax.f32 %v4126_v23, 0.0  ;;  %v4129_v45 = vadd.f32 %v12236_v28, %v9726_v60  ;;  %v4120_v57 = vpop.f32.mrb[23].mxu0  ;;  %7462 = vrot.lane.b32.xlu1 %v9302_v40, %s10045_s8  ;;  %v9232_v41 = vcombine.low %v6098_v30, %v6108_v20  ;;  %v6125_v44 = vrot.slane %v6123_v52, 4  ;;  %v4797_v19 = vld [vmem:[#allocation4 + $0x8c] sm:$0x1] }
 0x296   : > { %v4184_v10 = vmax.f32 %v4118_v26, 0.0  ;;  %v4121_v47 = vadd.f32 %v12236_v28, %v4120_v57  ;;  %v5012_v26 = vld [vmem:[#allocation4 + $0x80] sm:$0x1]  ;;  %v6129_v60 = vshll.u32 %v6000_v51, 16  ;;  %v6529_v49 = vld [vmem:[#allocation4 + $0x7c] sm:$0xf] }
 0x297   : > { %v9423_v42 = vpack.c.bf16 %v4186_v12, %v4186_v12  ;;  %v4187_v18 = vmax.f32 %v4129_v45, 0.0  ;;  %v7819_v17 = vld [vmem:[#allocation5 + $0xa8] sm:$0xff]  ;;  %6487 = vst.msk [vmem:[#allocation5 + $0x60] sm:$0xff] %vm4963_vm3, %v9232_v41  ;;  %v6126_v59 = vor.u32 %v6125_v44, %v12211_v32  ;;  %v6662_v41 = vrot.slane %v6529_v49, 5 }
 0x298   : > { %v9421_v37 = vpack.c.bf16 %v4184_v10, %v4184_v10  ;;  %v4185_v15 = vmax.f32 %v4121_v47, 0.0  ;;  %8285 = vmatprep.mubr.bf16.mxu1 %v7819_v17  ;;  %v6131_v31 = vrot.slane %v6129_v60, 5  ;;  %v12294_v17 = vld [vmem:[#allocation4 + $0x2c] sm:$0x1] }
 0x299   : > { %v4589_v38 = vshrl.u32 %v9423_v42, 16  ;;  %v9424_v24 = vpack.c.bf16 %v4187_v18, %v4187_v18  ;;  %6773 = vrot.lane.b32.xlu1 %v9270_v39, %s10045_s8  ;;  %v4592_v36 = vshll.u32 %v9423_v42, 16  ;;  %8286 = vmatmul.mubr.bf16.gmra.mrb[16].mxu1 %v7818_v50  ;;  %v6127_v45 = vrot.slane %v6126_v59, 4  ;;  %v12286_v42 = vld [vmem:[#allocation4 + $0x24] sm:$0xe] }
 0x29a   : > { %v4572_v1 = vshrl.u32 %v9421_v37, 16  ;;  %v4575_v34 = vshll.u32 %v9421_v37, 16  ;;  %v9422_v61 = vpack.c.bf16 %v4185_v15, %v4185_v15  ;;  %v5275_v37 = vor.u32 %v12265_v54, %v12263_v7  ;;  %v6001_v7 = vld [vmem:[#allocation4 + $0x3c] sm:$0xf]  ;;  %v6528_v54 = vld [vmem:[#allocation4 + $0x78] sm:$0xe] }
 0x29b   : > { %v4591_v46 = vrot.slane %v4589_v38, 7  ;;  %v4597_v25 = vshrl.u32 %v9424_v24, 16  ;;  %v5471_v53 = vpop.permute.xlu1 %5470  ;;  %v4600_v30 = vshll.u32 %v9424_v24, 16  ;;  %v7824_v16 = vld [vmem:[#allocation5 + $0xd0] sm:$0xff]  ;;  %v5288_v15 = vshll.u32 %v5012_v26, 16 }
 0x29c   : > { %v4574_v58 = vrot.slane %v4572_v1, 7  ;;  %v4580_v3 = vshrl.u32 %v9422_v61, 16  ;;  %v4583_v9 = vshll.u32 %v9422_v61, 16  ;;  %5514 = vst.msk [vmem:[#allocation5 + $0xc8] sm:$0xff] %vm5508_vm5, %v5471_v53  ;;  %8293 = vmatprep.mubr.bf16.mxu1 %v7824_v16  ;;  %v6122_v24 = vsel %vm10191_vm15, %v6117_v35, %v12211_v32 }
 0x29d   : > { %v4594_v55 = vor.u32 %v4592_v36, %v4591_v46  ;;  %v4595_v23 = vrot.slane %v4591_v46, 4  ;;  %v4599_v40 = vrot.slane %v4597_v25, 7  ;;  %v6132_v50 = vsel %vm10191_vm15, %v6127_v45, %v6131_v31  ;;  %v6530_v46 = vld [vmem:[#allocation4 + $0x80] sm:$0x1] }
 0x29e   : > { %v4577_v11 = vor.u32 %v4575_v34, %v4574_v58  ;;  %v4578_v8 = vrot.slane %v4574_v58, 4  ;;  %v4582_v52 = vrot.slane %v4580_v3, 7  ;;  %v9233_v1 = vcombine.low %v6122_v24, %v6132_v50  ;;  %v12307_v34 = vld [vmem:[#allocation4 + $0x40] sm:$0xf]  ;;  %v12320_v3 = vld [vmem:[#allocation4 + $0x44] sm:$0x1] }
 0x29f   : > { %v4801_v29 = vsel %vm11455_vm14, %v4594_v55, %v4800_v2  ;;  %v4602_v27 = vor.u32 %v4600_v30, %v4599_v40  ;;  %v4604_v4 = vrot.slane %v4599_v40, 4  ;;  %v7447_v12 = vpop.permute.xlu1 %7446  ;;  %v9311_v61 = vrot.slane %v12286_v42, 9  ;;  %v12323_v55 = vld [vmem:[#allocation4 + $0x48] sm:$0xf] }
 0x2a0   : > { %4802 = vst [vmem:[#allocation4 + $0x90] sm:$0xf] %v4801_v29  ;;  %v4794_v57 = vsel %vm11455_vm14, %v4577_v11, %v4793_v22  ;;  %v4585_v10 = vor.u32 %v4583_v9, %v4582_v52  ;;  %v4587_v47 = vrot.slane %v4582_v52, 4  ;;  %7494 = vst.msk [vmem:[#allocation5 + $0x18] sm:$0xff] %vm5508_vm5, %v7447_v12  ;;  %v5286_v32 = vrot.slane %v5285_v6, 4 }
 0x2a1   : > { %4795 = vst [vmem:[#allocation4 + $0x84] sm:$0xf] %v4794_v57  ;;  %v4603_v18 = vsel %vm10201_vm1, %v4595_v23, %v4602_v27  ;;  %v4805_v39 = vsel %vm11340_vm0, %v4604_v4, %v4804_v21  ;;  %v12316_v25 = vrot.slane %v7615_v5, 4  ;;  %6488 = vst.msk [vmem:[#allocation5 + $0x88] sm:$0xff] %vm4963_vm3, %v9233_v1  ;;  %v6134_v51 = vshrl.u32 %v6001_v7, 16 }
 0x2a2   : > { %4803 = vst.msk [vmem:[#allocation4 + $0x94] sm:$0xf] %vm13447_vm10, %v4603_v18  ;;  %4806 = vst [vmem:[#allocation4 + $0x98] sm:$0x1] %v4805_v39  ;;  %v4586_v20 = vsel %vm10201_vm1, %v4578_v8, %v4585_v10  ;;  %v4798_v38 = vsel %vm11340_vm0, %v4587_v47, %v4797_v19  ;;  %v6137_v35 = vshll.u32 %v6001_v7, 16  ;;  %v5276_v44 = vrot.slane %v5275_v37, 4 }
 0x2a3   : > { %4796 = vst.msk [vmem:[#allocation4 + $0x88] sm:$0xf] %vm13448_vm12, %v4586_v20  ;;  %4799 = vst [vmem:[#allocation4 + $0x8c] sm:$0x1] %v4798_v38  ;;  %v6758_v36 = vpop.permute.xlu1 %6757  ;;  %v7823_v2 = vld [vmem:[#allocation5 + $0xc8] sm:$0xff]  ;;  %v5290_v58 = vrot.slane %v5288_v15, 5 }
 0x2a4   : > { %6805 = vst.msk [vmem:[#allocation5 + $0x10] sm:$0xff] %vm5508_vm5, %v6758_v36  ;;  %8294 = vmatmul.mubr.bf16.gmra.mrb[20].mxu1 %v7823_v2  ;;  %v9255_v30 = vrot.slane %v6528_v54, 9  ;;  %v6143_v63 = vshll.u32 %v12307_v34, 16  ;;  %v6664_v6 = vrot.slane %v6662_v41, 4  ;;  %v6665_v9 = vrot.slane %v6530_v46, 5 }
 0x2a5   : > { %v5291_v23 = vsel %vm10191_vm15, %v5286_v32, %v5290_v58  ;;  %v12332_v11 = vrot.slane %v6134_v51, 4  ;;  %v12334_v8 = vrot.slane %v6137_v35, 5  ;;  %v6147_v52 = vshrl.u32 %v12307_v34, 16  ;;  %v12350_v1 = vld [vmem:[#allocation4 + $0x4c] sm:$0xf] }
 0x2a6   : > { %v12329_v21 = vsel %vm10162_vm11, %v9255_v30, %v6662_v41  ;;  %v5281_v60 = vsel %vm10191_vm15, %v5276_v44, %v12248_v43  ;;  %v12340_v27 = vrot.slane %v6143_v63, 5  ;;  %v6153_v4 = vshll.u32 %v12320_v3, 16 }
 0x2a7   : > { %v7449_v16 = vpop.permute.xlu1 %7448  ;;  %v9176_v19 = vcombine.low %v5281_v60, %v5291_v23  ;;  %v12345_v47 = vsel %vm10162_vm11, %v6664_v6, %v6665_v9  ;;  %v6158_v37 = vshrl.u32 %v12323_v55, 16  ;;  %v7801_v2 = vld [vmem:[#allocation5 + $0x18] sm:$0xff]  ;;  %v6149_v6 = vrot.slane %v6147_v52, 4 }
 0x2a8   : > { %v6993_v22 = vld [vmem:[#allocation4 + $0x84] sm:$0xf]  ;;  %7495 = vst.msk [vmem:[#allocation5 + $0x40] sm:$0xff] %vm5508_vm5, %v7449_v16  ;;  %8414 = vmatprep.mubr.bf16.mxu0 %v7801_v2  ;;  %v6161_v9 = vshll.u32 %v12323_v55, 16 }
 0x2a9   : > { %v5013_v40 = vld [vmem:[#allocation4 + $0x84] sm:$0xf]  ;;  %v7231_v59 = vshrl.u32 %v6993_v22, 16  ;;  %v7234_v29 = vshll.u32 %v6993_v22, 16 }
 0x2aa   : > { %v9916_v26 = vld [vmem:[#allocation4 + $0x84] sm:$0xff]   ;;  %v6995_v45 = vld [vmem:[#allocation4 + $0x8c] sm:$0x1]  ;;  %v5293_v10 = vshrl.u32 %v5013_v40, 16  ;;  %v5296_v38 = vshll.u32 %v5013_v40, 16 }
 0x2ab   : > { %v6994_v12 = vld [vmem:[#allocation4 + $0x88] sm:$0xf]  ;;  %v7233_v57 = vrot.slane %v7231_v59, 4  ;;  %v6760_v49 = vpop.permute.xlu1 %6759  ;;  %5945 = vrot.lane.b32.xlu0 %v9916_v26, %s10045_s8  ;;  %v7236_v31 = vrot.slane %v7234_v29, 5  ;;  %v5015_v15 = vld [vmem:[#allocation4 + $0x8c] sm:$0x1]  ;;  %v6140_v59 = vor.u32 %v12334_v8, %v12332_v11 }
 0x2ac   : > { %v7240_v18 = vshll.u32 %v6994_v12, 16  ;;  %v7244_v43 = vshrl.u32 %v6994_v12, 16  ;;  %v5014_v39 = vld [vmem:[#allocation4 + $0x88] sm:$0xf]  ;;  %6806 = vst.msk [vmem:[#allocation5 + $0x38] sm:$0xff] %vm5508_vm5, %v6760_v49  ;;  %v5295_v20 = vrot.slane %v5293_v10, 4 }
 0x2ad   : > { %v5302_v24 = vshll.u32 %v5014_v39, 16  ;;  %v5306_v50 = vshrl.u32 %v5014_v39, 16  ;;  %v7237_v7 = vor.u32 %v7236_v31, %v7233_v57  ;;  %v7250_v36 = vshll.u32 %v6995_v45, 16  ;;  %v12352_v35 = vld [vmem:[#allocation4 + $0x88] sm:$0xf]  ;;  %v9917_v26 = vld [vmem:[#allocation4 + $0x90] sm:$0xff]  }
 0x2ae   : > { %v7242_v54 = vrot.slane %v7240_v18, 5  ;;  %v7246_v41 = vrot.slane %v7244_v43, 4  ;;  %v5298_v34 = vrot.slane %v5296_v38, 5  ;;  %v5312_v51 = vshll.u32 %v5015_v15, 16  ;;  %v7800_v63 = vld [vmem:[#allocation5 + $0x10] sm:$0xff] }
 0x2af   : > { %v5304_v32 = vrot.slane %v5302_v24, 5  ;;  %v5308_v46 = vrot.slane %v5306_v50, 4  ;;  %v7451_v44 = vpop.permute.xlu1 %7450  ;;  %5480 = vrot.lane.b32.xlu0 %v9176_v19, %s10045_s8  ;;  %v7238_v58 = vrot.slane %v7237_v7, 4  ;;  %v6669_v22 = vrot.slane %v12352_v35, 5  ;;  %v12358_v40 = vld [vmem:[#allocation4 + $0x94] sm:$0xf]  ;;  %8415 = vmatmul.mubr.bf16.vlgmr.msra.gmra.mrb[32].mxu0 %v7800_v63 }
 0x2b0   : > { %v7247_v30 = vor.u32 %v7246_v41, %v7242_v54  ;;  %7496 = vst.msk [vmem:[#allocation5 + $0x68] sm:$0xff] %vm5508_vm5, %v7451_v44  ;;  %v5299_v16 = vor.u32 %v5298_v34, %v5295_v20  ;;  %v7252_v29 = vrot.slane %v7250_v36, 5  ;;  %v12362_v19 = vrot.slane %v6158_v37, 4  ;;  %9736 = vmatpush3.bf16.msra.mxu0 %v12261_v33  ;;  %v7806_v10 = vld [vmem:[#allocation5 + $0x40] sm:$0xff]  ;;  %v6531_v31 = vld [vmem:[#allocation4 + $0x84] sm:$0xe] }
 0x2b1   : > { %v5309_v23 = vor.u32 %v5308_v46, %v5304_v32  ;;  %v6167_v12 = vshll.u32 %v12350_v1, 16  ;;  %v5314_v45 = vrot.slane %v5312_v51, 5  ;;  %v6676_v57 = vrot.slane %v12358_v40, 5  ;;  %v6533_v18 = vld [vmem:[#allocation4 + $0x8c] sm:$0x1]  ;;  %8422 = vmatprep.mubr.bf16.mxu0 %v7806_v10  ;;  %v9953_v50 = vld [vmem:[%s13373_s3 + $0x108] sm:$0xff]  }
 0x2b2   : > { %v7248_v60 = vrot.slane %v7247_v30, 4  ;;  %v5300_v55 = vrot.slane %v5299_v16, 4  ;;  %v7243_v11 = vsel %vm10191_vm15, %v7238_v58, %v7242_v54  ;;  %v6150_v33 = vor.u32 %v6149_v6, %v12340_v27  ;;  %v12380_v38 = vld [vmem:[#allocation4 + $0x90] sm:$0xe]  ;;  %v12382_v24 = vld [vmem:[#allocation4 + $0x50] sm:$0x1]  ;;  %9776 = vmatprep.subr.bf16.mxu1 %v9953_v50  ;;  %9737 = vmatprep.subr.bf16.mxu0 %v9953_v50 }
 0x2b3   : > { %v5310_v52 = vrot.slane %v5309_v23, 4  ;;  %v6762_v49 = vpop.permute.xlu1 %6761  ;;  %5947 = vrot.lane.b32.xlu0 %v9917_v26, %s10045_s8  ;;  %v12374_v43 = vrot.slane %v6161_v9, 5  ;;  %v6671_v20 = vrot.slane %v6669_v22, 4  ;;  %v9271_v54 = vcombine.low %v12329_v21, %v12345_v47  ;;  %v6536_v41 = vld [vmem:[#allocation4 + $0x98] sm:$0x1]  ;;  %v7805_v2 = vld [vmem:[#allocation5 + $0x38] sm:$0xff]  ;;  %9780 = vmatpush3.bf16.msra.mxu1 %v9953_v50 }
 0x2b4   : > { %v7253_v8 = vsel %vm10191_vm15, %v7248_v60, %v7252_v29  ;;  %6807 = vst.msk [vmem:[#allocation5 + $0x60] sm:$0xff] %vm5508_vm5, %v6762_v49  ;;  %v5305_v37 = vsel %vm10191_vm15, %v5300_v55, %v5304_v32  ;;  %v12389_v36 = vld [vmem:[#allocation4 + $0x90] sm:$0xf]  ;;  %v6171_v34 = vshrl.u32 %v12350_v1, 16  ;;  %v12392_v32 = vld [vmem:[#allocation4 + $0x3c] sm:$0xe]  ;;  %9738 = vmatpush3.bf16.msra.mxu0 %v9953_v50 }
 0x2b5   : > { %v9303_v39 = vcombine.low %v7243_v11, %v7253_v8  ;;  %v5315_v15 = vsel %vm10191_vm15, %v5310_v52, %v5314_v45  ;;  %v12394_v46 = vld [vmem:[#allocation4 + $0x40] sm:$0xf]  ;;  %v9256_v51 = vrot.slane %v6531_v31, 9  ;;  %v6672_v35 = vrot.slane %v6533_v18, 5  ;;  %v9955_v47 = vld [vmem:[#allocation4 + $0x84] sm:$0xff]  }
 0x2b6   : > { %v9177_v7 = vcombine.low %v5305_v37, %v5315_v15  ;;  %v6678_v44 = vrot.slane %v6676_v57, 4  ;;  %v6155_v21 = vrot.slane %v6153_v4, 5  ;;  %v12402_v63 = vld [vmem:[#allocation4 + $0x94] sm:$0xf]  ;;  %v6141_v6 = vrot.slane %v6140_v59, 4  ;;  %v9956_v26 = vld [vmem:[#allocation4 + $0x84] sm:$0xff]  }
 0x2b7   : > { %7464 = vrot.lane.b32.xlu1 %v9303_v39, %s10045_s8  ;;  %v7453_v58 = vpop.permute.xlu1 %7452  ;;  %v7811_v30 = vld [vmem:[#allocation5 + $0x68] sm:$0xff]  ;;  %v6151_v9 = vrot.slane %v6150_v33, 4  ;;  %v6164_v16 = vor.u32 %v12374_v43, %v12362_v19  ;;  %v6177_v23 = vshll.u32 %v12382_v24, 16  ;;  %v6670_v3 = vsel %vm10162_vm11, %v9256_v51, %v6669_v22  ;;  %v12413_v55 = vld [vmem:[#allocation4 + $0x98] sm:$0x1]  ;;  %8423 = vmatmul.mubr.bf16.gmra.mrb[36].mxu0 %v7805_v2  ;;  %6959 = vst.msk [vmem:[#allocation5 + $0x180] sm:$0xff] %vm4963_vm3, %v9955_v47 }
 0x2b8   : > { %5482 = vrot.lane.b32.xlu0 %v9177_v7, %s10045_s8  ;;  %7497 = vst.msk [vmem:[#allocation5 + $0x90] sm:$0xff] %vm5508_vm5, %v7453_v58  ;;  %v6673_v4 = vsel %vm10162_vm11, %v6671_v20, %v6672_v35  ;;  %v9257_v60 = vrot.slane %v12380_v38, 9  ;;  %v6679_v29 = vrot.slane %v6536_v41, 5  ;;  %v9957_v59 = vld [vmem:[%s13373_s3 + $0x110] sm:$0xff]   ;;  %v5317_v19 = vshrl.u32 %v12389_v36, 16  ;;  %8430 = vmatprep.mubr.bf16.mxu0 %v7811_v30  ;;  %v9958_v43 = vld [vmem:[#allocation4 + $0x90] sm:$0xff]  }
 0x2b9   : > { %v6146_v22 = vsel %vm10191_vm15, %v6141_v6, %v12340_v27  ;;  %v6156_v52 = vsel %vm10191_vm15, %v6151_v9, %v6155_v21  ;;  %v6169_v45 = vrot.slane %v6167_v12, 5  ;;  %v12427_v10 = vld [vmem:[#allocation4 + $0x90] sm:$0xf]  ;;  %4975 = vst.msk [vmem:[#allocation5 + $0x1b8] sm:$0xff] %vm4963_vm3, %v9956_v26  ;;  %v5320_v11 = vshll.u32 %v12389_v36, 16  ;;  %9777 = vmatprep.subr.bf16.mxu1 %v9957_v59  ;;  %9739 = vmatprep.subr.bf16.mxu0 %v9957_v59 }
 0x2ba   : > { %v6680_v49 = vsel %vm10162_vm11, %v6678_v44, %v6679_v29  ;;  %v9234_v27 = vcombine.low %v6146_v22, %v6156_v52  ;;  %v6173_v31 = vrot.slane %v6171_v34, 4  ;;  %v9313_v18 = vrot.slane %v12392_v32, 9  ;;  %9781 = vmatpush3.bf16.msra.mxu1 %v9957_v59  ;;  %v6997_v38 = vld [vmem:[#allocation4 + $0x94] sm:$0xf]  ;;  %4976 = vst.msk [vmem:[#allocation5 + $0x1e0] sm:$0xff] %vm4963_vm3, %v9958_v43  ;;  %9740 = vmatpush3.bf16.msra.mxu0 %v9957_v59 }
 0x2bb   : > { %6775 = vrot.lane.b32.xlu1 %v9271_v54, %s10045_s8  ;;  %v6764_v8 = vpop.permute.xlu1 %6763  ;;  %v7629_v1 = vrot.slane %v12394_v46, 5  ;;  %v9272_v12 = vcombine.low %v6670_v3, %v6673_v4  ;;  %v5326_v33 = vshll.u32 %v12402_v63, 16  ;;  %v6677_v39 = vsel %vm10162_vm11, %v9257_v60, %v6676_v57  ;;  %v9963_v24 = vld [vmem:[#allocation4 + $0x90] sm:$0xff]   ;;  %v7810_v41 = vld [vmem:[#allocation5 + $0x60] sm:$0xff]  ;;  %v5550_v6 = vld [vmem:[#allocation4 + $0x64] sm:$0xf] }
 0x2bc   : > { %6808 = vst.msk [vmem:[#allocation5 + $0x88] sm:$0xff] %vm5508_vm5, %v6764_v8  ;;  %v5330_v37 = vshrl.u32 %v12402_v63, 16  ;;  %v6165_v15 = vrot.slane %v6164_v16, 4  ;;  %v6174_v20 = vor.u32 %v6173_v31, %v6169_v45  ;;  %v9273_v50 = vcombine.low %v6677_v39, %v6680_v49  ;;  %v5549_v22 = vld [vmem:[#allocation4 + $0x60] sm:$0xe] }
 0x2bd   : > { %6489 = vst.msk [vmem:[#allocation5 + $0xb0] sm:$0xff] %vm4963_vm3, %v9234_v27  ;;  %v12444_v7 = vrot.slane %v5317_v19, 4  ;;  %v5336_v54 = vshll.u32 %v12413_v55, 16  ;;  %v7255_v36 = vshrl.u32 %v12427_v10, 16  ;;  %v12450_v57 = vrot.slane %v5320_v11, 5  ;;  %6960 = vst.msk [vmem:[#allocation5 + $0x1a8] sm:$0xff] %vm4963_vm3, %v9963_v24 }
 0x2be   : > { %v6175_v51 = vrot.slane %v6174_v20, 4  ;;  %v6179_v35 = vrot.slane %v6177_v23, 5  ;;  %v7258_v44 = vshll.u32 %v12427_v10, 16  ;;  %v12455_v21 = vrot.slane %v5326_v33, 5  ;;  %v5551_v8 = vld [vmem:[#allocation4 + $0x68] sm:$0x1] }
 0x2bf   : > { %6777 = vrot.lane.b32.xlu1 %v9272_v12, %s10045_s8  ;;  %v7455_v2 = vpop.permute.xlu1 %7454  ;;  %v7816_v34 = vld [vmem:[#allocation5 + $0x90] sm:$0xff]  ;;  %v7264_v47 = vshll.u32 %v6997_v38, 16  ;;  %v7268_v63 = vshrl.u32 %v6997_v38, 16  ;;  %v12459_v26 = vrot.slane %v5330_v37, 4  ;;  %8431 = vmatmul.mubr.bf16.gmra.mrb[40].mxu0 %v7810_v41  ;;  %v6170_v23 = vsel %vm10191_vm15, %v6165_v15, %v6169_v45 }
 0x2c0   : > { %v9729_v40 = vpop.f32.mrb[24].mxu0  ;;  %7498 = vst.msk [vmem:[#allocation5 + $0xb8] sm:$0xff] %vm5508_vm5, %v7455_v2  ;;  %v6180_v3 = vsel %vm10191_vm15, %v6175_v51, %v6179_v35  ;;  %8438 = vmatprep.mubr.bf16.mxu0 %v7816_v34  ;;  %v12466_v19 = vrot.slane %v7255_v36, 4  ;;  %v12470_v45 = vrot.slane %v7258_v44, 5  ;;  %v5679_v27 = vrot.slane %v5550_v6, 5 }
 0x2c1   : > { %v4142_v58 = vadd.f32 %v12236_v28, %v9729_v40  ;;  %v4133_v30 = vpop.f32.mrb[25].mxu0  ;;  %v9235_v59 = vcombine.low %v6170_v23, %v6180_v3  ;;  %v12475_v33 = vrot.slane %v7264_v47, 5  ;;  %v12477_v43 = vrot.slane %v7268_v63, 4  ;;  %v6007_v63 = vld [vmem:[#allocation4 + $0x54] sm:$0xf] }
 0x2c2   : > { %v4134_v9 = vadd.f32 %v12236_v28, %v4133_v30  ;;  %v9730_v16 = vpop.f32.mrb[26].mxu0  ;;  %v5938_v49 = vpop.permute.xlu0 %5937  ;;  %v5333_v37 = vor.u32 %v12459_v26, %v12455_v21  ;;  %v9190_v15 = vrot.slane %v5549_v22, 9  ;;  %v5682_v41 = vrot.slane %v5551_v8, 5  ;;  %v4814_v6 = vld [vmem:[#allocation4 + $0xa8] sm:$0xf] }
 0x2c3   : > { %v4190_v4 = vmax.f32 %v4142_v58, 0.0  ;;  %v4145_v60 = vadd.f32 %v12236_v28, %v9730_v16  ;;  %v4136_v29 = vpop.f32.mrb[27].mxu0  ;;  %6779 = vrot.lane.b32.xlu1 %v9273_v50, %s10045_s8  ;;  %v6766_v11 = vpop.permute.xlu1 %6765  ;;  %5979 = vst.msk [vmem:[#allocation5 + $0xf8] sm:$0xff] %vm5508_vm5, %v5938_v49  ;;  %v7815_v24 = vld [vmem:[#allocation5 + $0x88] sm:$0xff]  ;;  %v5681_v50 = vrot.slane %v5679_v27, 4  ;;  %v7271_v26 = vor.u32 %v12477_v43, %v12475_v33 }
 0x2c4   : > { %v4188_v52 = vmax.f32 %v4134_v9, 0.0  ;;  %v4137_v10 = vadd.f32 %v12236_v28, %v4136_v29  ;;  %6809 = vst.msk [vmem:[#allocation5 + $0xb0] sm:$0xff] %vm5508_vm5, %v6766_v11  ;;  %v5680_v35 = vsel %vm10162_vm11, %v9190_v15, %v5679_v27  ;;  %v4807_v29 = vld [vmem:[#allocation4 + $0x9c] sm:$0xf]  ;;  %v4818_v49 = vld [vmem:[#allocation4 + $0xb0] sm:$0x1] }
 0x2c5   : > { %v9427_v31 = vpack.c.bf16 %v4190_v4, %v4190_v4  ;;  %v4191_v12 = vmax.f32 %v4145_v60, 0.0  ;;  %6490 = vst.msk [vmem:[#allocation5 + $0xd8] sm:$0xff] %vm4963_vm3, %v9235_v59  ;;  %v5683_v3 = vsel %vm10162_vm11, %v5681_v50, %v5682_v41  ;;  %v4811_v15 = vld [vmem:[#allocation4 + $0xa4] sm:$0x1]  ;;  %v13452_v46 = vrot.slane %v12294_v17, 5 }
 0x2c6   : > { %v9425_v28 = vpack.c.bf16 %v4188_v52, %v4188_v52  ;;  %v4189_v39 = vmax.f32 %v4137_v10, 0.0  ;;  %v5473_v34 = vpop.permute.xlu0 %5472  ;;  %v9206_v22 = vcombine.low %v5680_v35, %v5683_v3  ;;  %v5323_v35 = vor.u32 %v12450_v57, %v12444_v7  ;;  %v5554_v3 = vld [vmem:[#allocation4 + $0x74] sm:$0x1] }
 0x2c7   : > { %v4623_v20 = vshrl.u32 %v9427_v31, 16  ;;  %v9428_v38 = vpack.c.bf16 %v4191_v12, %v4191_v12  ;;  %v4626_v36 = vshll.u32 %v9427_v31, 16  ;;  %v7821_v51 = vld [vmem:[#allocation5 + $0xb8] sm:$0xff]  ;;  %5515 = vst.msk [vmem:[#allocation5 + $0xf0] sm:$0xff] %vm5508_vm5, %v5473_v34  ;;  %8439 = vmatmul.mubr.bf16.gmra.mrb[44].mxu0 %v7815_v24  ;;  %v6182_v31 = vshrl.u32 %v6007_v63, 16 }
 0x2c8   : > { %v4606_v40 = vshrl.u32 %v9425_v28, 16  ;;  %v9426_v2 = vpack.c.bf16 %v4189_v39, %v4189_v39  ;;  %v4609_v58 = vshll.u32 %v9425_v28, 16  ;;  %8446 = vmatprep.mubr.bf16.mxu0 %v7821_v51  ;;  %5805 = vst.msk [vmem:[#allocation5 + $0x148] sm:$0xff] %vm4963_vm3, %v9206_v22  ;;  %v12490_v24 = vld [vmem:[#allocation4 + $0x44] sm:$0x1]  ;;  %v7619_v32 = vsel %vm10162_vm11, %v12316_v25, %v13452_v46 }
 0x2c9   : > { %v4625_v44 = vrot.slane %v4623_v20, 7  ;;  %v4631_v30 = vshrl.u32 %v9428_v38, 16  ;;  %v4634_v47 = vshll.u32 %v9428_v38, 16  ;;  %v6998_v20 = vld [vmem:[#allocation4 + $0x98] sm:$0x1]  ;;  %v6185_v38 = vshll.u32 %v6007_v63, 16 }
 0x2ca   : > { %v4608_v9 = vrot.slane %v4606_v40, 7  ;;  %v4614_v16 = vshrl.u32 %v9426_v2, 16  ;;  %v4617_v23 = vshll.u32 %v9426_v2, 16  ;;  %v5940_v8 = vpop.permute.xlu0 %5939  ;;  %v7829_v27 = vld [vmem:[#allocation5 + $0xf8] sm:$0xff]  ;;  %v6184_v40 = vrot.slane %v6182_v31, 4 }
 0x2cb   : > { %v4628_v4 = vor.u32 %v4626_v36, %v4625_v44  ;;  %v4629_v60 = vrot.slane %v4625_v44, 4  ;;  %v4633_v59 = vrot.slane %v4631_v30, 7  ;;  %5980 = vst.msk [vmem:[#allocation5 + $0x120] sm:$0xff] %vm5508_vm5, %v5940_v8  ;;  %8301 = vmatprep.mubr.bf16.mxu1 %v7829_v27  ;;  %v5553_v2 = vld [vmem:[#allocation4 + $0x70] sm:$0xf]  ;;  %v7820_v44 = vld [vmem:[#allocation5 + $0xb0] sm:$0xff] }
 0x2cc   : > { %v4611_v52 = vor.u32 %v4609_v58, %v4608_v9  ;;  %v4612_v10 = vrot.slane %v4608_v9, 4  ;;  %v4616_v11 = vrot.slane %v4614_v16, 7  ;;  %v6008_v58 = vld [vmem:[#allocation4 + $0x58] sm:$0xf]  ;;  %v6187_v30 = vrot.slane %v6185_v38, 5 }
 0x2cd   : > { %v4815_v12 = vsel %vm11455_vm14, %v4628_v4, %v4814_v6  ;;  %v4636_v28 = vor.u32 %v4634_v47, %v4633_v59  ;;  %v4638_v39 = vrot.slane %v4633_v59, 4  ;;  %v5552_v47 = vld [vmem:[#allocation4 + $0x6c] sm:$0xe]  ;;  %v5334_v9 = vrot.slane %v5333_v37, 4  ;;  %v6009_v37 = vld [vmem:[#allocation4 + $0x5c] sm:$0x1] }
 0x2ce   : > { %4816 = vst [vmem:[#allocation4 + $0xa8] sm:$0xf] %v4815_v12  ;;  %v4808_v50 = vsel %vm11455_vm14, %v4611_v52, %v4807_v29  ;;  %v4619_v41 = vor.u32 %v4617_v23, %v4616_v11  ;;  %v4621_v36 = vrot.slane %v4616_v11, 4  ;;  %v5475_v16 = vpop.permute.xlu0 %5474  ;;  %v7828_v23 = vld [vmem:[#allocation5 + $0xf0] sm:$0xff]  ;;  %v7274_v57 = vshll.u32 %v6998_v20, 16 }
 0x2cf   : > { %4809 = vst [vmem:[#allocation4 + $0x9c] sm:$0xf] %v4808_v50  ;;  %v4637_v34 = vsel %vm10201_vm1, %v4629_v60, %v4636_v28  ;;  %v4819_v51 = vsel %vm11340_vm0, %v4638_v39, %v4818_v49  ;;  %v7457_v7 = vpop.permute.xlu1 %7456  ;;  %v7632_v4 = vrot.slane %v12490_v24, 5  ;;  %5516 = vst.msk [vmem:[#allocation5 + $0x118] sm:$0xff] %vm5508_vm5, %v5475_v16  ;;  %8302 = vmatmul.mubr.bf16.gmra.mrb[24].mxu1 %v7828_v23  ;;  %v5686_v29 = vrot.slane %v5553_v2, 5 }
 0x2d0   : > { %4817 = vst.msk [vmem:[#allocation4 + $0xac] sm:$0xf] %vm13449_vm13, %v4637_v34  ;;  %4820 = vst [vmem:[#allocation4 + $0xb0] sm:$0x1] %v4819_v51  ;;  %v4620_v63 = vsel %vm10201_vm1, %v4612_v10, %v4619_v41  ;;  %v4812_v6 = vsel %vm11340_vm0, %v4621_v36, %v4811_v15  ;;  %v7261_v60 = vor.u32 %v12470_v45, %v12466_v19  ;;  %v5338_v59 = vrot.slane %v5336_v54, 5 }
 0x2d1   : > { %4810 = vst.msk [vmem:[#allocation4 + $0xa0] sm:$0xf] %vm13441_vm2, %v4620_v63  ;;  %4813 = vst [vmem:[#allocation4 + $0xa4] sm:$0x1] %v4812_v6  ;;  %8447 = vmatmul.mubr.bf16.gmra.mrb[48].mxu0 %v7820_v44  ;;  %v6188_v22 = vor.u32 %v6187_v30, %v6184_v40  ;;  %v6191_v52 = vshll.u32 %v6008_v58, 16  ;;  %v6195_v10 = vshrl.u32 %v6008_v58, 16 }
 0x2d2   : > { %7499 = vst.msk [vmem:[#allocation5 + $0xe0] sm:$0xff] %vm5508_vm5, %v7457_v7  ;;  %v12520_v49 = vrot.slane %v7629_v1, 4  ;;  %v9191_v11 = vrot.slane %v5552_v47, 9  ;;  %v5688_v8 = vrot.slane %v5686_v29, 4  ;;  %v5689_v27 = vrot.slane %v5554_v3, 5  ;;  %v7834_v43 = vld [vmem:[#allocation5 + $0x120] sm:$0xff] }
 0x2d3   : > { %v5324_v19 = vrot.slane %v5323_v35, 4  ;;  %v5339_v45 = vsel %vm10191_vm15, %v5334_v9, %v5338_v59  ;;  %v6768_v31 = vpop.permute.xlu1 %6767  ;;  %v12524_v12 = vrot.slane %v7274_v57, 5  ;;  %v6201_v55 = vshll.u32 %v6009_v37, 16  ;;  %8309 = vmatprep.mubr.bf16.mxu1 %v7834_v43  ;;  %v12535_v20 = vld [vmem:[#allocation4 + $0x60] sm:$0xf] }
 0x2d4   : > { %6810 = vst.msk [vmem:[#allocation5 + $0xd8] sm:$0xff] %vm5508_vm5, %v6768_v31  ;;  %v12527_v54 = vrot.slane %v7261_v60, 4  ;;  %v12529_v28 = vrot.slane %v7271_v26, 4  ;;  %v5687_v39 = vsel %vm10162_vm11, %v9191_v11, %v5686_v29  ;;  %v5690_v15 = vsel %vm10162_vm11, %v5688_v8, %v5689_v27 }
 0x2d5   : > { %v12537_v38 = vrot.slane %v6188_v22, 4  ;;  %v12539_v50 = vrot.slane %v6191_v52, 5  ;;  %v12541_v41 = vrot.slane %v6195_v10, 4  ;;  %v9207_v36 = vcombine.low %v5687_v39, %v5690_v15  ;;  %v5022_v2 = vld [vmem:[#allocation4 + $0xa8] sm:$0xf] }
 0x2d6   : > { %v6537_v40 = vld [vmem:[#allocation4 + $0x9c] sm:$0xe]  ;;  %v5329_v51 = vsel %vm10191_vm15, %v5324_v19, %v12455_v21  ;;  %v12546_v44 = vrot.slane %v6201_v55, 5  ;;  %v6206_v58 = vshrl.u32 %v12535_v20, 16  ;;  %v6209_v30 = vshll.u32 %v12535_v20, 16  ;;  %v7833_v29 = vld [vmem:[#allocation5 + $0x118] sm:$0xff] }
 0x2d7   : > { %v7459_v35 = vpop.permute.xlu1 %7458  ;;  %5806 = vst.msk [vmem:[#allocation5 + $0x170] sm:$0xff] %vm4963_vm3, %v9207_v36  ;;  %v9178_v47 = vcombine.low %v5329_v51, %v5339_v45  ;;  %v6540_v9 = vld [vmem:[#allocation4 + $0xa8] sm:$0xe]  ;;  %v6541_v16 = vld [vmem:[#allocation4 + $0xac] sm:$0xf]  ;;  %v9258_v23 = vrot.slane %v6537_v40, 9  ;;  %v6194_v22 = vsel %vm10191_vm15, %v12537_v38, %v12539_v50  ;;  %v6198_v52 = vor.u32 %v12541_v41, %v12539_v50  ;;  %8310 = vmatmul.mubr.bf16.gmra.mrb[28].mxu1 %v7833_v29 }
 0x2d8   : > { %v9931_v34 = vld [vmem:[#allocation4 + $0x9c] sm:$0xff]   ;;  %v6539_v6 = vld [vmem:[#allocation4 + $0xa4] sm:$0x1]  ;;  %7500 = vst.msk [vmem:[#allocation5 + $0x108] sm:$0xff] %vm5508_vm5, %v7459_v35  ;;  %v6542_v7 = vld [vmem:[#allocation4 + $0xb0] sm:$0x1] }
 0x2d9   : > { %v6538_v63 = vld [vmem:[#allocation4 + $0xa0] sm:$0xf]  ;;  %5949 = vrot.lane.b32.xlu0 %v9931_v34, %s10045_s8  ;;  %v6690_v57 = vrot.slane %v6541_v16, 5  ;;  %v5365_v3 = vshrl.u32 %v5022_v2, 16  ;;  %v6686_v60 = vrot.slane %v6539_v6, 5  ;;  %v6693_v8 = vrot.slane %v6542_v7, 5 }
 0x2da   : > { %v6683_v21 = vrot.slane %v6538_v63, 5  ;;  %v5019_v26 = vld [vmem:[#allocation4 + $0x9c] sm:$0xf]  ;;  %v5020_v37 = vld [vmem:[#allocation4 + $0xa0] sm:$0xf]  ;;  %v5368_v19 = vshll.u32 %v5022_v2, 16 }
 0x2db   : > { %v6692_v11 = vrot.slane %v6690_v57, 4  ;;  %v5021_v27 = vld [vmem:[#allocation4 + $0xa4] sm:$0x1]  ;;  %v5341_v45 = vshrl.u32 %v5019_v26, 16  ;;  %v5344_v43 = vshll.u32 %v5019_v26, 16  ;;  %v5350_v31 = vshll.u32 %v5020_v37, 16 }
 0x2dc   : > { %v6685_v10 = vrot.slane %v6683_v21, 4  ;;  %v5354_v55 = vshrl.u32 %v5020_v37, 16  ;;  %v6684_v39 = vsel %vm10162_vm11, %v9258_v23, %v6683_v21  ;;  %v9259_v36 = vrot.slane %v6540_v9, 9  ;;  %v5023_v40 = vld [vmem:[#allocation4 + $0xac] sm:$0xf]  ;;  %v7826_v34 = vld [vmem:[#allocation5 + $0xe0] sm:$0xff] }
 0x2dd   : > { %5484 = vrot.lane.b32.xlu0 %v9178_v47, %s10045_s8  ;;  %v6694_v41 = vsel %vm10162_vm11, %v6692_v11, %v6693_v8  ;;  %v7825_v2 = vld [vmem:[#allocation5 + $0xd8] sm:$0xff]  ;;  %v5343_v35 = vrot.slane %v5341_v45, 4  ;;  %v5346_v63 = vrot.slane %v5344_v43, 5  ;;  %v5360_v6 = vshll.u32 %v5021_v27, 16  ;;  %8454 = vmatprep.mubr.bf16.mxu0 %v7826_v34  ;;  %v6999_v16 = vld [vmem:[#allocation4 + $0x9c] sm:$0xf] }
 0x2de   : > { %v6687_v15 = vsel %vm10162_vm11, %v6685_v10, %v6686_v60  ;;  %v9937_v47 = vld [vmem:[#allocation4 + $0xa8] sm:$0xff]   ;;  %v5352_v7 = vrot.slane %v5350_v31, 5  ;;  %v5356_v26 = vrot.slane %v5354_v55, 4  ;;  %v5367_v23 = vrot.slane %v5365_v3, 4  ;;  %8455 = vmatmul.mubr.bf16.gmra.mrb[52].mxu0 %v7825_v2  ;;  %v9959_v11 = vld [vmem:[#allocation4 + $0x9c] sm:$0xff]  }
 0x2df   : > { %v9274_v51 = vcombine.low %v6684_v39, %v6687_v15  ;;  %v5370_v21 = vrot.slane %v5368_v19, 5  ;;  %v7831_v60 = vld [vmem:[#allocation5 + $0x108] sm:$0xff]  ;;  %v6691_v9 = vsel %vm10162_vm11, %v9259_v36, %v6690_v57  ;;  %v5347_v37 = vor.u32 %v5346_v63, %v5343_v35  ;;  %v9961_v19 = vld [vmem:[#allocation4 + $0xa8] sm:$0xff]   ;;  %4977 = vst.msk [vmem:[#allocation5 + $0x208] sm:$0xff] %vm4963_vm3, %v9959_v11  ;;  %v5024_v35 = vld [vmem:[#allocation4 + $0xb0] sm:$0x1] }
 0x2e0   : > { %v5374_v29 = vshll.u32 %v5023_v40, 16  ;;  %v5378_v10 = vshrl.u32 %v5023_v40, 16  ;;  %8462 = vmatprep.mubr.bf16.mxu0 %v7831_v60  ;;  %v9275_v8 = vcombine.low %v6691_v9, %v6694_v41  ;;  %v5357_v27 = vor.u32 %v5356_v26, %v5352_v7  ;;  %v12574_v3 = vld [vmem:[#allocation4 + $0x64] sm:$0xf]  ;;  %v7000_v57 = vld [vmem:[#allocation4 + $0xa0] sm:$0xf] }
 0x2e1   : > { %6781 = vrot.lane.b32.xlu1 %v9274_v51, %s10045_s8  ;;  %5951 = vrot.lane.b32.xlu0 %v9937_v47, %s10045_s8  ;;  %v6199_v45 = vrot.slane %v6198_v52, 4  ;;  %v7279_v43 = vshrl.u32 %v6999_v16, 16  ;;  %v5348_v31 = vrot.slane %v5347_v37, 4  ;;  %v5362_v55 = vrot.slane %v5360_v6, 5  ;;  %v7002_v52 = vld [vmem:[#allocation4 + $0xa8] sm:$0xf]  ;;  %v6770_v6 = vpop.permute.xlu1 %6769 }
 0x2e2   : > { %v12576_v39 = vrot.slane %v5374_v29, 5  ;;  %v5380_v15 = vrot.slane %v5378_v10, 4  ;;  %v5358_v36 = vrot.slane %v5357_v27, 4  ;;  %v5371_v40 = vor.u32 %v5370_v21, %v5367_v23  ;;  %v9960_v2 = vld [vmem:[%s13373_s3 + $0x118] sm:$0xff]   ;;  %4978 = vst.msk [vmem:[#allocation5 + $0x230] sm:$0xff] %vm4963_vm3, %v9961_v19 }
 0x2e3   : > { %v6204_v41 = vsel %vm10191_vm15, %v6199_v45, %v12546_v44  ;;  %v7282_v34 = vshll.u32 %v6999_v16, 16  ;;  %v5353_v51 = vsel %vm10191_vm15, %v5348_v31, %v5352_v7  ;;  %v7281_v16 = vrot.slane %v7279_v43, 4  ;;  %v7003_v60 = vld [vmem:[#allocation4 + $0xac] sm:$0xf]  ;;  %9778 = vmatprep.subr.bf16.mxu1 %v9960_v2  ;;  %v9964_v7 = vld [vmem:[#allocation4 + $0x9c] sm:$0xff]   ;;  %9741 = vmatprep.subr.bf16.mxu0 %v9960_v2 }
 0x2e4   : > { %v5381_v63 = vor.u32 %v5380_v15, %v12576_v39  ;;  %v9236_v44 = vcombine.low %v6194_v22, %v6204_v41  ;;  %v5363_v47 = vsel %vm10191_vm15, %v5358_v36, %v5362_v55  ;;  %v7288_v23 = vshll.u32 %v7000_v57, 16  ;;  %v7001_v37 = vld [vmem:[#allocation4 + $0xa4] sm:$0x1]  ;;  %9782 = vmatpush3.bf16.msra.mxu1 %v9960_v2  ;;  %9742 = vmatpush3.bf16.msra.mxu0 %v9960_v2 }
 0x2e5   : > { %6783 = vrot.lane.b32.xlu1 %v9275_v8, %s10045_s8  ;;  %v7284_v26 = vrot.slane %v7282_v34, 5  ;;  %v7292_v21 = vshrl.u32 %v7000_v57, 16  ;;  %v9179_v9 = vcombine.low %v5353_v51, %v5363_v47  ;;  %v7303_v29 = vshrl.u32 %v7002_v52, 16  ;;  %v7004_v8 = vld [vmem:[#allocation4 + $0xb0] sm:$0x1]  ;;  %6961 = vst.msk [vmem:[#allocation5 + $0x1d0] sm:$0xff] %vm4963_vm3, %v9964_v7 }
 0x2e6   : > { %6491 = vst.msk [vmem:[#allocation5 + $0x100] sm:$0xff] %vm4963_vm3, %v9236_v44  ;;  %v6208_v38 = vrot.slane %v6206_v58, 4  ;;  %v6215_v50 = vshll.u32 %v12574_v3, 16  ;;  %v5384_v22 = vshll.u32 %v5024_v35, 16  ;;  %v12602_v10 = vrot.slane %v7288_v23, 5 }
 0x2e7   : > { %6811 = vst.msk [vmem:[#allocation5 + $0x100] sm:$0xff] %vm5508_vm5, %v6770_v6  ;;  %v7294_v11 = vrot.slane %v7292_v21, 4  ;;  %v7306_v27 = vshll.u32 %v7002_v52, 16  ;;  %5486 = vrot.lane.b32.xlu0 %v9179_v9, %s10045_s8  ;;  %v12606_v45 = vrot.slane %v5371_v40, 4  ;;  %v12608_v43 = vrot.slane %v5381_v63, 4 }
 0x2e8   : > { %v7312_v58 = vshll.u32 %v7003_v60, 16  ;;  %v6219_v19 = vshrl.u32 %v12574_v3, 16  ;;  %v7285_v31 = vor.u32 %v7284_v26, %v7281_v16  ;;  %v7298_v15 = vshll.u32 %v7001_v37, 16  ;;  %v6012_v52 = vld [vmem:[#allocation4 + $0x68] sm:$0x1] }
 0x2e9   : > { %v7295_v55 = vor.u32 %v7294_v11, %v12602_v10  ;;  %v7305_v57 = vrot.slane %v7303_v29, 4  ;;  %v7308_v36 = vrot.slane %v7306_v27, 5  ;;  %v7316_v41 = vshrl.u32 %v7003_v60, 16  ;;  %v6013_v63 = vld [vmem:[#allocation4 + $0x6c] sm:$0xf] }
 0x2ea   : > { %v7322_v34 = vshll.u32 %v7004_v8, 16  ;;  %v6211_v2 = vrot.slane %v6209_v30, 5  ;;  %v12614_v51 = vrot.slane %v5384_v22, 5  ;;  %v6217_v35 = vrot.slane %v6215_v50, 5  ;;  %v9971_v60 = vld [vmem:[%s13372_s2] ss:$0 sm:$0xff] }
 0x2eb   : > { %v12620_v3 = vrot.slane %v7295_v55, 4  ;;  %v12622_v44 = vrot.slane %v7312_v58, 5  ;;  %v7318_v6 = vrot.slane %v7316_v41, 4  ;;  %v6221_v47 = vrot.slane %v6219_v19, 4  ;;  %v5555_v30 = vld [vmem:[#allocation4 + $0x78] sm:$0xe] }
 0x2ec   : > { %v6212_v16 = vor.u32 %v6211_v2, %v6208_v38  ;;  %v12632_v23 = vrot.slane %v7298_v15, 5  ;;  %v6225_v21 = vshll.u32 %v6012_v52, 16  ;;  %v12637_v37 = vrot.slane %v7285_v31, 4 }
 0x2ed   : > { %v7309_v29 = vor.u32 %v7308_v36, %v7305_v57  ;;  %v12639_v38 = vrot.slane %v7322_v34, 5  ;;  %v6222_v58 = vor.u32 %v6221_v47, %v6217_v35  ;;  %v7319_v31 = vor.u32 %v7318_v6, %v12622_v44 }
 0x2ee   : > { %v9733_v26 = vpop.f32.mrb[28].mxu0  ;;  %v7830_v50 = vld [vmem:[#allocation5 + $0x100] sm:$0xff]  ;;  %v6213_v27 = vrot.slane %v6212_v16, 4  ;;  %v6230_v41 = vshrl.u32 %v6013_v63, 16  ;;  %v6227_v52 = vrot.slane %v6225_v21, 5  ;;  %v6233_v59 = vshll.u32 %v6013_v63, 16 }
 0x2ef   : > { %v4158_v7 = vadd.f32 %v9971_v60, %v9733_v26  ;;  %v4149_v9 = vpop.f32.mrb[29].mxu0  ;;  %8463 = vmatmul.mubr.bf16.gmra.mrb[56].mxu0 %v7830_v50  ;;  %v6223_v34 = vrot.slane %v6222_v58, 4  ;;  %v9192_v0 = vrot.slane %v5555_v30, 9  ;;  %v13453_v56 = vsel %vm10191_vm15, %v12608_v43, %v12614_v51 }
 0x2f0   : > { %v4150_v22 = vadd.f32 %v9971_v60, %v4149_v9  ;;  %v9734_v11 = vpop.f32.mrb[30].mxu0  ;;  %v12646_v9 = vrot.slane %v7309_v29, 4  ;;  %v6218_v16 = vsel %vm10191_vm15, %v6213_v27, %v6217_v35  ;;  %v12653_v29 = vrot.slane %v7319_v31, 4  ;;  %v4828_v27 = vld [vmem:[#allocation4 + $0xc0] sm:$0xf] }
 0x2f1   : > { %v4194_v19 = vmax.f32 %v4158_v7, 0.0  ;;  %v4161_v55 = vadd.f32 %v9971_v60, %v9734_v11  ;;  %v4152_v15 = vpop.f32.mrb[31].mxu0  ;;  %v6228_v47 = vsel %vm10191_vm15, %v6223_v34, %v6227_v52  ;;  %v6014_v7 = vld [vmem:[#allocation4 + $0x70] sm:$0xf]  ;;  %v6232_v11 = vrot.slane %v6230_v41, 4 }
 0x2f2   : > { %v4192_v57 = vmax.f32 %v4150_v22, 0.0  ;;  %v4153_v36 = vadd.f32 %v9971_v60, %v4152_v15  ;;  %v9237_v60 = vcombine.low %v6218_v16, %v6228_v47  ;;  %v6235_v63 = vrot.slane %v6233_v59, 5  ;;  %v4821_v41 = vld [vmem:[#allocation4 + $0xb4] sm:$0xf] }
 0x2f3   : > { %v9431_v2 = vpack.c.bf16 %v4194_v19, %v4194_v19  ;;  %v4195_v26 = vmax.f32 %v4161_v55, 0.0  ;;  %v5942_v22 = vpop.permute.xlu0 %5941  ;;  %v6239_v35 = vshll.u32 %v6014_v7, 16 }
 0x2f4   : > { %v9429_v40 = vpack.c.bf16 %v4192_v57, %v4192_v57  ;;  %v4193_v8 = vmax.f32 %v4153_v36, 0.0  ;;  %5981 = vst.msk [vmem:[#allocation5 + $0x148] sm:$0xff] %vm5508_vm5, %v5942_v22  ;;  %v6015_v22 = vld [vmem:[#allocation4 + $0x74] sm:$0x1]  ;;  %v6236_v31 = vor.u32 %v6235_v63, %v6232_v11 }
 0x2f5   : > { %v4657_v6 = vshrl.u32 %v9431_v2, 16  ;;  %v9432_v50 = vpack.c.bf16 %v4195_v26, %v4195_v26  ;;  %v4660_v55 = vshll.u32 %v9431_v2, 16  ;;  %6492 = vst.msk [vmem:[#allocation5 + $0x128] sm:$0xff] %vm4963_vm3, %v9237_v60  ;;  %v12657_v60 = vrot.slane %v6239_v35, 5 }
 0x2f6   : > { %v4640_v21 = vshrl.u32 %v9429_v40, 16  ;;  %v9430_v58 = vpack.c.bf16 %v4193_v8, %v4193_v8  ;;  %v4643_v36 = vshll.u32 %v9429_v40, 16 }
 0x2f7   : > { %v4659_v19 = vrot.slane %v4657_v6, 7  ;;  %v4665_v15 = vshrl.u32 %v9432_v50, 16  ;;  %v4668_v34 = vshll.u32 %v9432_v50, 16  ;;  %v5477_v47 = vpop.permute.xlu0 %5476  ;;  %v4832_v6 = vld [vmem:[#allocation4 + $0xc8] sm:$0x1] }
 0x2f8   : > { %v4642_v57 = vrot.slane %v4640_v21, 7  ;;  %v4648_v52 = vshrl.u32 %v9430_v58, 16  ;;  %v4651_v8 = vshll.u32 %v9430_v58, 16  ;;  %5517 = vst.msk [vmem:[#allocation5 + $0x140] sm:$0xff] %vm5508_vm5, %v5477_v47  ;;  %v5556_v58 = vld [vmem:[#allocation4 + $0x7c] sm:$0xf] }
 0x2f9   : > { %v4662_v26 = vor.u32 %v4660_v55, %v4659_v19  ;;  %v4667_v16 = vrot.slane %v4665_v15, 7  ;;  %v4663_v20 = vrot.slane %v4659_v19, 4  ;;  %v4825_v55 = vld [vmem:[#allocation4 + $0xbc] sm:$0x1]  ;;  %v6243_v15 = vshrl.u32 %v6014_v7, 16 }
 0x2fa   : > { %v4645_v59 = vor.u32 %v4643_v36, %v4642_v57  ;;  %v4650_v2 = vrot.slane %v4648_v52, 7  ;;  %v4646_v53 = vrot.slane %v4642_v57, 4  ;;  %v5557_v36 = vld [vmem:[#allocation4 + $0x80] sm:$0x1]  ;;  %v7011_v52 = vld [vmem:[#allocation4 + $0xcc] sm:$0xf] }
 0x2fb   : > { %v4829_v40 = vsel %vm11455_vm14, %v4662_v26, %v4828_v27  ;;  %v4670_v50 = vor.u32 %v4668_v34, %v4667_v16  ;;  %v4672_v21 = vrot.slane %v4667_v16, 4  ;;  %v5944_v34 = vpop.permute.xlu0 %5943  ;;  %v7839_v26 = vld [vmem:[#allocation5 + $0x148] sm:$0xff]  ;;  %v6245_v7 = vrot.slane %v6243_v15, 4  ;;  %v12667_v47 = vld [vmem:[#allocation4 + $0xd0] sm:$0xf] }
 0x2fc   : > { %4830 = vst [vmem:[#allocation4 + $0xc0] sm:$0xf] %v4829_v40  ;;  %v4822_v11 = vsel %vm11455_vm14, %v4645_v59, %v4821_v41  ;;  %v4653_v63 = vor.u32 %v4651_v8, %v4650_v2  ;;  %v4655_v19 = vrot.slane %v4650_v2, 4  ;;  %v6249_v16 = vshll.u32 %v6015_v22, 16  ;;  %5982 = vst.msk [vmem:[#allocation5 + $0x170] sm:$0xff] %vm5508_vm5, %v5944_v34  ;;  %8317 = vmatprep.mubr.bf16.mxu1 %v7839_v26 }
 0x2fd   : > { %4823 = vst [vmem:[#allocation4 + $0xb4] sm:$0xf] %v4822_v11  ;;  %v4671_v35 = vsel %vm10201_vm1, %v4663_v20, %v4670_v50  ;;  %v4833_v27 = vsel %vm11340_vm0, %v4672_v21, %v4832_v6  ;;  %v7325_v20 = vsel %vm10191_vm15, %v12653_v29, %v12639_v38  ;;  %v5693_v41 = vrot.slane %v5556_v58, 5  ;;  %vm13451_vm14 = vmmov %vm13441_vm2 }
 0x2fe   : > { %4831 = vst.msk [vmem:[#allocation4 + $0xc4] sm:$0xf] %vm13450_vm4, %v4671_v35  ;;  %4834 = vst [vmem:[#allocation4 + $0xc8] sm:$0x1] %v4833_v27  ;;  %v4654_v62 = vsel %vm10201_vm1, %v4646_v53, %v4653_v63  ;;  %v4826_v57 = vsel %vm11340_vm0, %v4655_v19, %v4825_v55  ;;  %v6237_v8 = vrot.slane %v6236_v31, 4  ;;  %v6246_v22 = vor.u32 %v6245_v7, %v12657_v60 }
 0x2ff   : > { %4824 = vst.msk [vmem:[#allocation4 + $0xb8] sm:$0xf] %vm13451_vm14, %v4654_v62  ;;  %4827 = vst [vmem:[#allocation4 + $0xbc] sm:$0x1] %v4826_v57  ;;  %v12681_v53 = vld [vmem:[#allocation4 + $0xd4] sm:$0x1]  ;;  %v7461_v59 = vpop.permute.xlu1 %7460  ;;  %v5694_v31 = vsel %vm10162_vm11, %v9192_v0, %v5693_v41 }
 0x300   : > { %v7375_v14 = vshrl.u32 %v7011_v52, 16  ;;  %v5695_v6 = vrot.slane %v5693_v41, 4  ;;  %v5696_v2 = vrot.slane %v5557_v36, 5  ;;  %v7378_v40 = vshll.u32 %v7011_v52, 16  ;;  %7501 = vst.msk [vmem:[#allocation5 + $0x130] sm:$0xff] %vm5508_vm5, %v7461_v59  ;;  %v5479_v21 = vpop.permute.xlu0 %5478  ;;  %v7838_v55 = vld [vmem:[#allocation5 + $0x140] sm:$0xff] }
 0x301   : > { %v7384_v50 = vshll.u32 %v12667_v47, 16  ;;  %v6247_v15 = vrot.slane %v6246_v22, 4  ;;  %v6251_v58 = vrot.slane %v6249_v16, 5  ;;  %5518 = vst.msk [vmem:[#allocation5 + $0x168] sm:$0xff] %vm5508_vm5, %v5479_v21  ;;  %8318 = vmatmul.mubr.bf16.gmra.mrb[32].mxu1 %v7838_v55  ;;  %v7388_v19 = vshrl.u32 %v12667_v47, 16 }
 0x302   : > { %v12687_v11 = vrot.slane %v7375_v14, 4  ;;  %v5697_v30 = vsel %vm10162_vm11, %v5695_v6, %v5696_v2  ;;  %v12692_v63 = vrot.slane %v7378_v40, 5  ;;  %v7394_v36 = vshll.u32 %v12681_v53, 16  ;;  %v12696_v52 = vld [vmem:[#allocation4 + $0x84] sm:$0xe] }
 0x303   : > { %v6546_v35 = vld [vmem:[#allocation4 + $0xc0] sm:$0xe]  ;;  %v6242_v34 = vsel %vm10191_vm15, %v6237_v8, %v12657_v60  ;;  %v6252_v26 = vsel %vm10191_vm15, %v6247_v15, %v6251_v58  ;;  %v9208_v7 = vcombine.low %v5694_v31, %v5697_v30  ;;  %v7633_v16 = vsel %vm10162_vm11, %v12520_v49, %v7632_v4  ;;  %v6772_v57 = vpop.permute.xlu1 %6771  ;;  %v7844_v55 = vld [vmem:[#allocation5 + $0x170] sm:$0xff] }
 0x304   : > { %v12698_v27 = vld [vmem:[#allocation4 + $0xc0] sm:$0xf]  ;;  %v6543_v62 = vld [vmem:[#allocation4 + $0xb4] sm:$0xe]  ;;  %v9238_v22 = vcombine.low %v6242_v34, %v6252_v26  ;;  %v12711_v0 = vrot.slane %v7384_v50, 5  ;;  %v7630_v60 = vsel %vm10162_vm11, %v9313_v18, %v7629_v1  ;;  %6812 = vst.msk [vmem:[#allocation5 + $0x128] sm:$0xff] %vm5508_vm5, %v6772_v57  ;;  %v7616_v49 = vsel %vm10162_vm11, %v9311_v61, %v7615_v5  ;;  %8325 = vmatprep.mubr.bf16.mxu1 %v7844_v55 }
 0x305   : > { %v7351_v41 = vshrl.u32 %v12698_v27, 16  ;;  %5807 = vst.msk [vmem:[#allocation5 + $0x198] sm:$0xff] %vm4963_vm3, %v9208_v7  ;;  %v9193_v24 = vrot.slane %v12696_v52, 9  ;;  %v9329_v4 = vcombine.low %v7630_v60, %v7633_v16  ;;  %v9260_v1 = vrot.slane %v6543_v62, 9  ;;  %v6547_v25 = vld [vmem:[#allocation4 + $0xc4] sm:$0xf] }
 0x306   : > { %v9944_v18 = vld [vmem:[#allocation4 + $0xb4] sm:$0xff]   ;;  %v9261_v8 = vrot.slane %v6546_v35, 9  ;;  %6493 = vst.msk [vmem:[#allocation5 + $0x150] sm:$0xff] %vm4963_vm3, %v9238_v22  ;;  %v9327_v59 = vcombine.low %v7616_v49, %v7619_v32  ;;  %v13454_v5 = vsel %vm10191_vm15, %v12606_v45, %v12576_v39  ;;  %v6545_v61 = vld [vmem:[#allocation4 + $0xbc] sm:$0x1]  ;;  %v13455_v6 = vsel %vm10191_vm15, %v12529_v28, %v12524_v12  ;;  %v9946_v26 = vld [vmem:[#allocation4 + $0xc0] sm:$0xff]  }
 0x307   : > { %v12733_v14 = vrot.slane %v7351_v41, 4  ;;  %v9180_v42 = vcombine.low %v13454_v5, %v13453_v56  ;;  %v6544_v17 = vld [vmem:[#allocation4 + $0xb8] sm:$0xf]  ;;  %v13456_v2 = vsel %vm10191_vm15, %v12527_v54, %v12475_v33  ;;  %v7291_v39 = vsel %vm10191_vm15, %v12637_v37, %v12602_v10  ;;  %7785 = vst.msk [vmem:[#allocation5 + $0x98] sm:$0xff] %vm4963_vm3, %v9329_v4  ;;  %5953 = vrot.lane.b32.xlu0 %v9944_v18, %s10045_s8  ;;  %v6548_v51 = vld [vmem:[#allocation4 + $0xc8] sm:$0x1]  ;;  %v7463_v40 = vpop.permute.xlu1 %7462 }
 0x308   : > { %v12756_v43 = vcombine.low %v13456_v2, %v13455_v6  ;;  %v7315_v45 = vsel %vm10191_vm15, %v12646_v9, %v12622_v44  ;;  %v6697_v12 = vrot.slane %v6544_v17, 5  ;;  %v6700_v28 = vrot.slane %v6545_v61, 5  ;;  %7783 = vst.msk [vmem:[#allocation5 + $0x48] sm:$0xff] %vm4963_vm3, %v9327_v59  ;;  %v5025_v10 = vld [vmem:[#allocation4 + $0xb4] sm:$0xf]  ;;  %v7836_v18 = vld [vmem:[#allocation5 + $0x130] sm:$0xff] }
 0x309   : > { %v6704_v33 = vrot.slane %v6547_v25, 5  ;;  %v7354_v54 = vshll.u32 %v12698_v27, 16  ;;  %v6707_v50 = vrot.slane %v6548_v51, 5  ;;  %v5026_v37 = vld [vmem:[#allocation4 + $0xb8] sm:$0xf]  ;;  %v13457_v44 = vsel %vm10191_vm15, %v12620_v3, %v12632_v23  ;;  %7502 = vst.msk [vmem:[#allocation5 + $0x158] sm:$0xff] %vm5508_vm5, %v7463_v40  ;;  %8470 = vmatprep.mubr.bf16.mxu0 %v7836_v18 }
 0x30a   : > { %v12775_v9 = vcombine.low %v7291_v39, %v13457_v44  ;;  %v12782_v21 = vcombine.low %v7315_v45, %v7325_v20  ;;  %v7381_v15 = vor.u32 %v12692_v63, %v12687_v11  ;;  %v6698_v58 = vsel %vm10162_vm11, %v9260_v1, %v6697_v12  ;;  %v5027_v30 = vld [vmem:[#allocation4 + $0xbc] sm:$0x1]  ;;  %v7005_v35 = vld [vmem:[#allocation4 + $0xb4] sm:$0xf]  ;;  %v7006_v62 = vld [vmem:[#allocation4 + $0xb8] sm:$0xf] }
 0x30b   : > { %v6699_v31 = vrot.slane %v6697_v12, 4  ;;  %v6705_v3 = vsel %vm10162_vm11, %v9261_v8, %v6704_v33  ;;  %v6706_v23 = vrot.slane %v6704_v33, 4  ;;  %v5389_v38 = vshrl.u32 %v5025_v10, 16  ;;  %5488 = vrot.lane.b32.xlu0 %v9180_v42, %s10045_s8  ;;  %v7007_v57 = vld [vmem:[#allocation4 + $0xbc] sm:$0x1]  ;;  %v6774_v22 = vpop.permute.xlu1 %6773  ;;  %v7843_v1 = vld [vmem:[#allocation5 + $0x168] sm:$0xff] }
 0x30c   : > { %v5392_v29 = vshll.u32 %v5025_v10, 16  ;;  %v5398_v20 = vshll.u32 %v5026_v37, 16  ;;  %v5402_v27 = vshrl.u32 %v5026_v37, 16  ;;  %v5408_v16 = vshll.u32 %v5027_v30, 16  ;;  %v7009_v32 = vld [vmem:[#allocation4 + $0xc4] sm:$0xf]  ;;  %8326 = vmatmul.mubr.bf16.gmra.mrb[36].mxu1 %v7843_v1 }
 0x30d   : > { %v6701_v34 = vsel %vm10162_vm11, %v6699_v31, %v6700_v28  ;;  %v6708_v7 = vsel %vm10162_vm11, %v6706_v23, %v6707_v50  ;;  %v7327_v41 = vshrl.u32 %v7005_v35, 16  ;;  %v5391_v49 = vrot.slane %v5389_v38, 4  ;;  %6813 = vst.msk [vmem:[#allocation5 + $0x150] sm:$0xff] %vm5508_vm5, %v6774_v22  ;;  %v7835_v42 = vld [vmem:[#allocation5 + $0x128] sm:$0xff]  ;;  %v9962_v17 = vld [vmem:[#allocation4 + $0xb4] sm:$0xff]  }
 0x30e   : > { %v9276_v60 = vcombine.low %v6698_v58, %v6701_v34  ;;  %v9277_v4 = vcombine.low %v6705_v3, %v6708_v7  ;;  %v5394_v46 = vrot.slane %v5392_v29, 5  ;;  %v5400_v8 = vrot.slane %v5398_v20, 5  ;;  %8471 = vmatmul.mubr.bf16.gmra.mrb[60].mxu0 %v7835_v42  ;;  %4979 = vst.msk [vmem:[#allocation5 + $0x258] sm:$0xff] %vm4963_vm3, %v9962_v17  ;;  %v7010_v37 = vld [vmem:[#allocation4 + $0xc8] sm:$0x1]  ;;  %v9966_v18 = vld [vmem:[#allocation4 + $0xb4] sm:$0xff]  }
 0x30f   : > { %v5404_v59 = vrot.slane %v5402_v27, 4  ;;  %v5410_v56 = vrot.slane %v5408_v16, 5  ;;  %v7329_v5 = vrot.slane %v7327_v41, 4  ;;  %v7330_v25 = vshll.u32 %v7005_v35, 16  ;;  %5955 = vrot.lane.b32.xlu0 %v9946_v26, %s10045_s8  ;;  %v9965_v35 = vld [vmem:[#allocation4 + $0xa8] sm:$0xff]   ;;  %6963 = vst.msk [vmem:[#allocation5 + $0x220] sm:$0xff] %vm4963_vm3, %v9966_v18 }
 0x310   : > { %6785 = vrot.lane.b32.xlu1 %v9276_v60, %s10045_s8  ;;  %v5395_v61 = vor.u32 %v5394_v46, %v5391_v49  ;;  %v7336_v6 = vshll.u32 %v7006_v62, 16  ;;  %v7340_v2 = vshrl.u32 %v7006_v62, 16  ;;  %v7346_v45 = vshll.u32 %v7007_v57, 16  ;;  %v7841_v51 = vld [vmem:[#allocation5 + $0x158] sm:$0xff]  ;;  %v5559_v34 = vld [vmem:[#allocation4 + $0x88] sm:$0xf] }
 0x311   : > { %v5405_v39 = vor.u32 %v5404_v59, %v5400_v8  ;;  %v7356_v12 = vrot.slane %v7354_v54, 5  ;;  %v7360_v28 = vshll.u32 %v7009_v32, 16  ;;  %v7332_v40 = vrot.slane %v7330_v25, 5  ;;  %8478 = vmatprep.mubr.bf16.mxu0 %v7841_v51  ;;  %v6016_v26 = vld [vmem:[#allocation4 + $0x78] sm:$0xf]  ;;  %6962 = vst.msk [vmem:[#allocation5 + $0x1f8] sm:$0xff] %vm4963_vm3, %v9965_v35 }
 0x312   : > { %v5396_v33 = vrot.slane %v5395_v61, 4  ;;  %v7338_v50 = vrot.slane %v7336_v6, 5  ;;  %v7342_v10 = vrot.slane %v7340_v2, 4  ;;  %v7348_v55 = vrot.slane %v7346_v45, 5  ;;  %v5560_v41 = vld [vmem:[#allocation4 + $0x8c] sm:$0x1] }
 0x313   : > { %v5406_v44 = vrot.slane %v5405_v39, 4  ;;  %v7357_v58 = vor.u32 %v7356_v12, %v12733_v14  ;;  %v7362_v31 = vrot.slane %v7360_v28, 5  ;;  %v7333_v3 = vor.u32 %v7332_v40, %v7329_v5  ;;  %v6017_v63 = vld [vmem:[#allocation4 + $0x7c] sm:$0xf]  ;;  %v6018_v59 = vld [vmem:[#allocation4 + $0x80] sm:$0x1] }
 0x314   : > { %6787 = vrot.lane.b32.xlu1 %v9277_v4, %s10045_s8  ;;  %v5401_v54 = vsel %vm10191_vm15, %v5396_v33, %v5400_v8  ;;  %v7343_v23 = vor.u32 %v7342_v10, %v7338_v50  ;;  %v7364_v30 = vshrl.u32 %v7009_v32, 16  ;;  %v7370_v20 = vshll.u32 %v7010_v37, 16  ;;  %v7840_v27 = vld [vmem:[#allocation5 + $0x150] sm:$0xff]  ;;  %v6019_v6 = vld [vmem:[#allocation4 + $0x84] sm:$0xf] }
 0x315   : > { %v5411_v38 = vsel %vm10191_vm15, %v5406_v44, %v5410_v56  ;;  %v7358_v29 = vrot.slane %v7357_v58, 4  ;;  %v7382_v14 = vrot.slane %v7381_v15, 4  ;;  %v7334_v16 = vrot.slane %v7333_v3, 4  ;;  %v6020_v12 = vld [vmem:[#allocation4 + $0x88] sm:$0xf]  ;;  %v9967_v28 = vld [vmem:[#allocation4 + $0xc0] sm:$0xff]  }
 0x316   : > { %v9181_v7 = vcombine.low %v5401_v54, %v5411_v38  ;;  %v7344_v62 = vrot.slane %v7343_v23, 4  ;;  %v7366_v57 = vrot.slane %v7364_v30, 4  ;;  %v7372_v60 = vrot.slane %v7370_v20, 5  ;;  %8479 = vmatmul.mubr.bf16.gmra.mrb[64].mxu0 %v7840_v27  ;;  %v6021_v40 = vld [vmem:[#allocation4 + $0x8c] sm:$0x1]  ;;  %6964 = vst.msk [vmem:[#allocation5 + $0x248] sm:$0xff] %vm4963_vm3, %v9967_v28 }
 0x317   : > { %v7363_v22 = vsel %vm10191_vm15, %v7358_v29, %v7362_v31  ;;  %v7387_v4 = vsel %vm10191_vm15, %v7382_v14, %v12711_v0  ;;  %v7390_v11 = vrot.slane %v7388_v19, 4  ;;  %v7339_v15 = vsel %vm10191_vm15, %v7334_v16, %v7338_v50  ;;  %v6022_v54 = vld [vmem:[#allocation4 + $0x90] sm:$0xf]  ;;  %v6023_v29 = vld [vmem:[#allocation4 + $0x94] sm:$0xf] }
 0x318   : > { %5490 = vrot.lane.b32.xlu0 %v9181_v7, %s10045_s8  ;;  %v7349_v49 = vsel %vm10191_vm15, %v7344_v62, %v7348_v55  ;;  %v7367_v46 = vor.u32 %v7366_v57, %v7362_v31  ;;  %v7396_v32 = vrot.slane %v7394_v36, 5  ;;  %v5700_v19 = vrot.slane %v5559_v34, 5  ;;  %v5563_v18 = vld [vmem:[#allocation4 + $0x98] sm:$0x1] }
 0x319   : > { %v12824_v1 = vcombine.low %v7339_v15, %v7349_v49  ;;  %v7391_v47 = vor.u32 %v7390_v11, %v12711_v0  ;;  %v5703_v8 = vrot.slane %v5560_v41, 5  ;;  %v6254_v5 = vshrl.u32 %v6016_v26, 16  ;;  %v5562_v11 = vld [vmem:[#allocation4 + $0x94] sm:$0xf] }
 0x31a   : > { %v7368_v56 = vrot.slane %v7367_v46, 4  ;;  %v6257_v42 = vshll.u32 %v6016_v26, 16  ;;  %v6263_v17 = vshll.u32 %v6017_v63, 16  ;;  %v5701_v53 = vsel %vm10162_vm11, %v9193_v24, %v5700_v19 }
 0x31b   : > { %v7392_v61 = vrot.slane %v7391_v47, 4  ;;  %v5702_v36 = vrot.slane %v5700_v19, 4  ;;  %v6267_v25 = vshrl.u32 %v6017_v63, 16  ;;  %v6256_v2 = vrot.slane %v6254_v5, 4 }
 0x31c   : > { %7466 = vrot.lane.b32.xlu0 %v12756_v43, %s10045_s8  ;;  %v7373_v0 = vsel %vm10191_vm15, %v7368_v56, %v7372_v60  ;;  %v6259_v39 = vrot.slane %v6257_v42, 5  ;;  %v6265_v45 = vrot.slane %v6263_v17, 5  ;;  %v6273_v37 = vshll.u32 %v6018_v59, 16 }
 0x31d   : > { %v12836_v51 = vcombine.low %v7363_v22, %v7373_v0  ;;  %v7397_v52 = vsel %vm10191_vm15, %v7392_v61, %v7396_v32  ;;  %v5704_v24 = vsel %vm10162_vm11, %v5702_v36, %v5703_v8  ;;  %v6269_v33 = vrot.slane %v6267_v25, 4  ;;  %v5946_v3 = vpop.permute.xlu0 %5945  ;;  %v6025_v61 = vld [vmem:[#allocation4 + $0x9c] sm:$0xf] }
 0x31e   : > { %v12842_v50 = vcombine.low %v7387_v4, %v7397_v52  ;;  %v9209_v43 = vcombine.low %v5701_v53, %v5704_v24  ;;  %v6260_v10 = vor.u32 %v6259_v39, %v6256_v2  ;;  %v6278_v55 = vshrl.u32 %v6019_v6, 16  ;;  %5983 = vst.msk [vmem:[#allocation5 + $0x198] sm:$0xff] %vm5508_vm5, %v5946_v3  ;;  %v5561_v4 = vld [vmem:[#allocation4 + $0x90] sm:$0xe]  ;;  %v6027_v52 = vld [vmem:[#allocation4 + $0xa4] sm:$0x1] }
 0x31f   : > { %v6270_v44 = vor.u32 %v6269_v33, %v6265_v45  ;;  %v6281_v58 = vshll.u32 %v6019_v6, 16  ;;  %v6287_v31 = vshll.u32 %v6020_v12, 16  ;;  %v6275_v30 = vrot.slane %v6273_v37, 5  ;;  %v6026_v6 = vld [vmem:[#allocation4 + $0xa0] sm:$0xf] }
 0x320   : > { %7468 = vrot.lane.b32.xlu0 %v12775_v9, %s10045_s8  ;;  %5808 = vst.msk [vmem:[#allocation5 + $0x1c0] sm:$0xff] %vm4963_vm3, %v9209_v43  ;;  %v6261_v23 = vrot.slane %v6260_v10, 4  ;;  %v6291_v35 = vshrl.u32 %v6020_v12, 16  ;;  %v6297_v38 = vshll.u32 %v6021_v40, 16  ;;  %v6280_v27 = vrot.slane %v6278_v55, 4 }
 0x321   : > { %v6271_v20 = vrot.slane %v6270_v44, 4  ;;  %v6283_v14 = vrot.slane %v6281_v58, 5  ;;  %v6289_v34 = vrot.slane %v6287_v31, 5  ;;  %v6024_v9 = vld [vmem:[#allocation4 + $0x98] sm:$0x1]  ;;  %v6302_v62 = vshrl.u32 %v6022_v54, 16  ;;  %v5481_v63 = vpop.permute.xlu0 %5480 }
 0x322   : > { %v6266_v26 = vsel %vm10191_vm15, %v6261_v23, %v6265_v45  ;;  %v6293_v7 = vrot.slane %v6291_v35, 4  ;;  %v6299_v16 = vrot.slane %v6297_v38, 5  ;;  %v6305_v22 = vshll.u32 %v6022_v54, 16  ;;  %5519 = vst.msk [vmem:[#allocation5 + $0x190] sm:$0xff] %vm5508_vm5, %v5481_v63  ;;  %v5564_v10 = vld [vmem:[#allocation4 + $0x9c] sm:$0xe] }
 0x323   : > { %v6276_v57 = vsel %vm10191_vm15, %v6271_v20, %v6275_v30  ;;  %v6284_v41 = vor.u32 %v6283_v14, %v6280_v27  ;;  %v6311_v60 = vshll.u32 %v6023_v29, 16  ;;  %v6304_v46 = vrot.slane %v6302_v62, 4  ;;  %v5565_v58 = vld [vmem:[#allocation4 + $0xa0] sm:$0xf]  ;;  %v5566_v35 = vld [vmem:[#allocation4 + $0xa4] sm:$0x1] }
 0x324   : > { %7470 = vrot.lane.b32.xlu0 %v12782_v21, %s10045_s8  ;;  %v9239_v15 = vcombine.low %v6266_v26, %v6276_v57  ;;  %v6294_v49 = vor.u32 %v6293_v7, %v6289_v34  ;;  %v6315_v32 = vshrl.u32 %v6023_v29, 16  ;;  %v6307_v19 = vrot.slane %v6305_v22, 5  ;;  %v6028_v38 = vld [vmem:[#allocation4 + $0xa8] sm:$0xf] }
 0x325   : > { %v6285_v47 = vrot.slane %v6284_v41, 4  ;;  %v6313_v8 = vrot.slane %v6311_v60, 5  ;;  %v6321_v59 = vshll.u32 %v6024_v9, 16  ;;  %v9194_v42 = vrot.slane %v5561_v4, 9  ;;  %v5948_v0 = vpop.permute.xlu0 %5947  ;;  %v7849_v2 = vld [vmem:[#allocation5 + $0x198] sm:$0xff] }
 0x326   : > { %6494 = vst.msk [vmem:[#allocation5 + $0x178] sm:$0xff] %vm4963_vm3, %v9239_v15  ;;  %v6295_v56 = vrot.slane %v6294_v49, 4  ;;  %v6317_v5 = vrot.slane %v6315_v32, 4  ;;  %v5707_v17 = vrot.slane %v5562_v11, 5  ;;  %v6308_v53 = vor.u32 %v6307_v19, %v6304_v46  ;;  %8333 = vmatprep.mubr.bf16.mxu1 %v7849_v2  ;;  %v6030_v60 = vld [vmem:[#allocation4 + $0xb0] sm:$0x1] }
 0x327   : > { %v6290_v21 = vsel %vm10191_vm15, %v6285_v47, %v6289_v34  ;;  %v6323_v36 = vrot.slane %v6321_v59, 5  ;;  %v5710_v25 = vrot.slane %v5563_v18, 5  ;;  %5984 = vst.msk [vmem:[#allocation5 + $0x1c0] sm:$0xff] %vm5508_vm5, %v5948_v0  ;;  %v6326_v40 = vshrl.u32 %v6025_v61, 16  ;;  %v5567_v32 = vld [vmem:[#allocation4 + $0xa8] sm:$0xe] }
 0x328   : > { %7472 = vrot.lane.b32.xlu0 %v12824_v1, %s10045_s8  ;;  %v6300_v39 = vsel %vm10191_vm15, %v6295_v56, %v6299_v16  ;;  %v6318_v45 = vor.u32 %v6317_v5, %v6313_v8  ;;  %v5708_v12 = vsel %vm10162_vm11, %v9194_v42, %v5707_v17  ;;  %v5709_v28 = vrot.slane %v5707_v17, 4 }
 0x329   : > { %v9240_v24 = vcombine.low %v6290_v21, %v6300_v39  ;;  %v6309_v33 = vrot.slane %v6308_v53, 4  ;;  %v6329_v43 = vshll.u32 %v6025_v61, 16  ;;  %v6335_v44 = vshll.u32 %v6026_v6, 16  ;;  %v7465_v31 = vpop.permute.xlu1 %7464  ;;  %v7848_v20 = vld [vmem:[#allocation5 + $0x190] sm:$0xff]  ;;  %v6031_v21 = vld [vmem:[#allocation4 + $0xb4] sm:$0xf] }
 0x32a   : > { %v6319_v1 = vrot.slane %v6318_v45, 4  ;;  %v5711_v37 = vsel %vm10162_vm11, %v5709_v28, %v5710_v25  ;;  %v6339_v55 = vshrl.u32 %v6026_v6, 16  ;;  %v6328_v23 = vrot.slane %v6326_v40, 4  ;;  %7503 = vst.msk [vmem:[#allocation5 + $0x180] sm:$0xff] %vm5508_vm5, %v7465_v31  ;;  %v5483_v29 = vpop.permute.xlu0 %5482  ;;  %8334 = vmatmul.mubr.bf16.gmra.mrb[40].mxu1 %v7848_v20  ;;  %v5568_v61 = vld [vmem:[#allocation4 + $0xac] sm:$0xf] }
 0x32b   : > { %6495 = vst.msk [vmem:[#allocation5 + $0x1a0] sm:$0xff] %vm4963_vm3, %v9240_v24  ;;  %v6314_v54 = vsel %vm10191_vm15, %v6309_v33, %v6313_v8  ;;  %v9210_v3 = vcombine.low %v5708_v12, %v5711_v37  ;;  %v6331_v30 = vrot.slane %v6329_v43, 5  ;;  %v6337_v14 = vrot.slane %v6335_v44, 5  ;;  %v6032_v6 = vld [vmem:[#allocation4 + $0xb8] sm:$0xf]  ;;  %v9968_v31 = vld [vmem:[#allocation4 + $0xcc] sm:$0xff]  }
 0x32c   : > { %7474 = vrot.lane.b32.xlu0 %v12836_v51, %s10045_s8  ;;  %v6324_v27 = vsel %vm10191_vm15, %v6319_v1, %v6323_v36  ;;  %v6341_v34 = vrot.slane %v6339_v55, 4  ;;  %v6345_v26 = vshll.u32 %v6027_v52, 16  ;;  %5520 = vst.msk [vmem:[#allocation5 + $0x1b8] sm:$0xff] %vm5508_vm5, %v5483_v29  ;;  %v9195_v9 = vrot.slane %v5564_v10, 9  ;;  %v6029_v51 = vld [vmem:[#allocation4 + $0xac] sm:$0xf] }
 0x32d   : > { %v9241_v7 = vcombine.low %v6314_v54, %v6324_v27  ;;  %5809 = vst.msk [vmem:[#allocation5 + $0x1e8] sm:$0xff] %vm4963_vm3, %v9210_v3  ;;  %v6332_v16 = vor.u32 %v6331_v30, %v6328_v23  ;;  %v5714_v62 = vrot.slane %v5565_v58, 5  ;;  %v5717_v22 = vrot.slane %v5566_v35, 5  ;;  %v6776_v11 = vpop.permute.xlu1 %6775  ;;  %v5569_v28 = vld [vmem:[#allocation4 + $0xb0] sm:$0x1]  ;;  %6965 = vst.msk [vmem:[#allocation5 + $0x270] sm:$0xff] %vm4963_vm3, %v9968_v31 }
 0x32e   : > { %v6342_v57 = vor.u32 %v6341_v34, %v6337_v14  ;;  %v6347_v41 = vrot.slane %v6345_v26, 5  ;;  %v6350_v4 = vshrl.u32 %v6028_v38, 16  ;;  %v6353_v46 = vshll.u32 %v6028_v38, 16  ;;  %6814 = vst.msk [vmem:[#allocation5 + $0x178] sm:$0xff] %vm5508_vm5, %v6776_v11  ;;  %v7854_v18 = vld [vmem:[#allocation5 + $0x1c0] sm:$0xff] }
 0x32f   : > { %6496 = vst.msk [vmem:[#allocation5 + $0x1c8] sm:$0xff] %vm4963_vm3, %v9241_v7  ;;  %v6333_v63 = vrot.slane %v6332_v16, 4  ;;  %v5715_v15 = vsel %vm10162_vm11, %v9195_v9, %v5714_v62  ;;  %v5716_v49 = vrot.slane %v5714_v62, 4  ;;  %v6359_v8 = vshll.u32 %v6029_v51, 16  ;;  %8341 = vmatprep.mubr.bf16.mxu1 %v7854_v18  ;;  %v6033_v43 = vld [vmem:[#allocation4 + $0xbc] sm:$0x1] }
 0x330   : > { %7476 = vrot.lane.b32.xlu0 %v12842_v50, %s10045_s8  ;;  %v6343_v47 = vrot.slane %v6342_v57, 4  ;;  %v6352_v19 = vrot.slane %v6350_v4, 4  ;;  %v6363_v59 = vshrl.u32 %v6029_v51, 16  ;;  %v6355_v42 = vrot.slane %v6353_v46, 5  ;;  %v5570_v58 = vld [vmem:[#allocation4 + $0xb4] sm:$0xe] }
 0x331   : > { %v6338_v56 = vsel %vm10191_vm15, %v6333_v63, %v6337_v14  ;;  %v5718_v5 = vsel %vm10162_vm11, %v5716_v49, %v5717_v22  ;;  %v6369_v17 = vshll.u32 %v6030_v60, 16  ;;  %v6361_v36 = vrot.slane %v6359_v8, 5  ;;  %v6778_v0 = vpop.permute.xlu1 %6777  ;;  %v7846_v2 = vld [vmem:[#allocation5 + $0x180] sm:$0xff]  ;;  %v9469_v27 = vpop.f32.mrb[0].mxu1  ;;  %v6034_v57 = vld [vmem:[#allocation4 + $0xc0] sm:$0xf] }
 0x332   : > { %v6348_v50 = vsel %vm10191_vm15, %v6343_v47, %v6347_v41  ;;  %v9211_v53 = vcombine.low %v5715_v15, %v5718_v5  ;;  %v6365_v25 = vrot.slane %v6363_v59, 4  ;;  %v6356_v45 = vor.u32 %v6355_v42, %v6352_v19  ;;  %6815 = vst.msk [vmem:[#allocation5 + $0x1a0] sm:$0xff] %vm5508_vm5, %v6778_v0  ;;  %8486 = vmatprep.mubr.bf16.mxu0 %v7846_v2  ;;  %v5571_v35 = vld [vmem:[#allocation4 + $0xb8] sm:$0xf]  ;;  %v9470_v62 = vpop.f32.mrb[1].mxu1 }
 0x333   : > { %v9242_v39 = vcombine.low %v6338_v56, %v6348_v50  ;;  %v6371_v12 = vrot.slane %v6369_v17, 5  ;;  %v7853_v52 = vld [vmem:[#allocation5 + $0x1b8] sm:$0xff]  ;;  %v9196_v33 = vrot.slane %v5567_v32, 9  ;;  %v5721_v40 = vrot.slane %v5568_v61, 5  ;;  %v9472_v4 = vpop.f32.mrb[2].mxu1 }
 0x334   : > { %5810 = vst.msk [vmem:[#allocation5 + $0x210] sm:$0xff] %vm4963_vm3, %v9211_v53  ;;  %v6366_v24 = vor.u32 %v6365_v25, %v6361_v36  ;;  %v6374_v10 = vshrl.u32 %v6031_v21, 16  ;;  %8342 = vmatmul.mubr.bf16.gmra.mrb[44].mxu1 %v7853_v52  ;;  %v6357_v1 = vrot.slane %v6356_v45, 4  ;;  %v6377_v37 = vshll.u32 %v6031_v21, 16  ;;  %v5572_v63 = vld [vmem:[#allocation4 + $0xbc] sm:$0x1] }
 0x335   : > { %6497 = vst.msk [vmem:[#allocation5 + $0x1f0] sm:$0xff] %vm4963_vm3, %v9242_v39  ;;  %v6383_v44 = vshll.u32 %v6032_v6, 16  ;;  %v6387_v55 = vshrl.u32 %v6032_v6, 16  ;;  %v5723_v3 = vrot.slane %v5721_v40, 4  ;;  %v5724_v23 = vrot.slane %v5569_v28, 5  ;;  %v6780_v38 = vpop.permute.xlu1 %6779  ;;  %v7845_v29 = vld [vmem:[#allocation5 + $0x178] sm:$0xff] }
 0x336   : > { %v6367_v54 = vrot.slane %v6366_v24, 4  ;;  %v6376_v30 = vrot.slane %v6374_v10, 4  ;;  %v5722_v20 = vsel %vm10162_vm11, %v9196_v33, %v5721_v40  ;;  %v6379_v14 = vrot.slane %v6377_v37, 5  ;;  %6816 = vst.msk [vmem:[#allocation5 + $0x1c8] sm:$0xff] %vm5508_vm5, %v6780_v38  ;;  %8487 = vmatmul.mubr.bf16.gmra.mrb[68].mxu0 %v7845_v29  ;;  %v9473_v15 = vpop.f32.mrb[3].mxu1 }
 0x337   : > { %v6385_v34 = vrot.slane %v6383_v44, 5  ;;  %v6389_v26 = vrot.slane %v6387_v55, 4  ;;  %v6362_v7 = vsel %vm10191_vm15, %v6357_v1, %v6361_v36  ;;  %v5725_v9 = vsel %vm10162_vm11, %v5723_v3, %v5724_v23  ;;  %v6035_v18 = vld [vmem:[#allocation4 + $0xc4] sm:$0xf]  ;;  %v6036_v17 = vld [vmem:[#allocation4 + $0xc8] sm:$0x1] }
 0x338   : > { %v6372_v16 = vsel %vm10191_vm15, %v6367_v54, %v6371_v12  ;;  %v6393_v51 = vshll.u32 %v6033_v43, 16  ;;  %v9212_v22 = vcombine.low %v5722_v20, %v5725_v9  ;;  %v12903_v60 = vadd.f32 %v9470_v62, %v9469_v27  ;;  %v7517_v21 = vld [vmem:[#allocation4 + $0x34] sm:$0xf]  ;;  %v7523_v50 = vld [vmem:[#allocation4 + $0x4c] sm:$0xf] }
 0x339   : > { %v9243_v41 = vcombine.low %v6362_v7, %v6372_v16  ;;  %v6380_v11 = vor.u32 %v6379_v14, %v6376_v30  ;;  %v6390_v49 = vor.u32 %v6389_v26, %v6385_v34  ;;  %v9197_v46 = vrot.slane %v5570_v58, 9  ;;  %v7516_v12 = vld [vmem:[#allocation4 + $0x30] sm:$0xe]  ;;  %v7518_v28 = vld [vmem:[#allocation4 + $0x38] sm:$0x1] }
 0x33a   : > { %v5728_v32 = vrot.slane %v5571_v35, 5  ;;  %5811 = vst.msk [vmem:[#allocation5 + $0x238] sm:$0xff] %vm4963_vm3, %v9212_v22  ;;  %v12907_v47 = vadd.f32 %v9473_v15, %v9472_v4  ;;  %v6395_v8 = vrot.slane %v6393_v51, 5  ;;  %v6398_v59 = vshrl.u32 %v6034_v57, 16  ;;  %v7522_v43 = vld [vmem:[#allocation4 + $0x48] sm:$0xe] }
 0x33b   : > { %6498 = vst.msk [vmem:[#allocation5 + $0x218] sm:$0xff] %vm4963_vm3, %v9243_v41  ;;  %v6381_v19 = vrot.slane %v6380_v11, 4  ;;  %v6391_v56 = vrot.slane %v6390_v49, 4  ;;  %v5731_v42 = vrot.slane %v5572_v63, 5  ;;  %v6401_v61 = vshll.u32 %v6034_v57, 16 }
 0x33c   : > { %v5730_v5 = vrot.slane %v5728_v32, 4  ;;  %v5729_v36 = vsel %vm10162_vm11, %v9197_v46, %v5728_v32  ;;  %v6400_v25 = vrot.slane %v6398_v59, 4  ;;  %v6407_v6 = vshll.u32 %v6035_v18, 16  ;;  %v7524_v44 = vld [vmem:[#allocation4 + $0x50] sm:$0x1] }
 0x33d   : > { %v6386_v53 = vsel %vm10191_vm15, %v6381_v19, %v6385_v34  ;;  %v6396_v0 = vsel %vm10191_vm15, %v6391_v56, %v6395_v8  ;;  %v6403_v39 = vrot.slane %v6401_v61, 5  ;;  %v6411_v45 = vshrl.u32 %v6035_v18, 16  ;;  %v7526_v55 = vld [vmem:[#allocation4 + $0x58] sm:$0xf]  ;;  %v7525_v38 = vld [vmem:[#allocation4 + $0x54] sm:$0xe] }
 0x33e   : > { %v5732_v2 = vsel %vm10162_vm11, %v5730_v5, %v5731_v42  ;;  %v9244_v52 = vcombine.low %v6386_v53, %v6396_v0  ;;  %v6409_v33 = vrot.slane %v6407_v6, 5  ;;  %v6417_v40 = vshll.u32 %v6036_v17, 16  ;;  %v7527_v34 = vld [vmem:[#allocation4 + $0x5c] sm:$0x1]  ;;  %v7529_v26 = vld [vmem:[#allocation4 + $0x64] sm:$0xf] }
 0x33f   : > { %v9213_v24 = vcombine.low %v5729_v36, %v5732_v2  ;;  %v6404_v10 = vor.u32 %v6403_v39, %v6400_v25  ;;  %v6413_v1 = vrot.slane %v6411_v45, 4  ;;  %v7622_v37 = vrot.slane %v7517_v21, 5  ;;  %v7532_v51 = vld [vmem:[#allocation4 + $0x70] sm:$0xf]  ;;  %v7528_v63 = vld [vmem:[#allocation4 + $0x60] sm:$0xe] }
 0x340   : > { %6499 = vst.msk [vmem:[#allocation5 + $0x240] sm:$0xff] %vm4963_vm3, %v9244_v52  ;;  %v9312_v58 = vrot.slane %v7516_v12, 9  ;;  %v7625_v31 = vrot.slane %v7518_v28, 5  ;;  %v7636_v54 = vrot.slane %v7523_v50, 5  ;;  %v9314_v35 = vrot.slane %v7522_v43, 9  ;;  %v9475_v57 = vpop.f32.mrb[4].mxu1 }
 0x341   : > { %5812 = vst.msk [vmem:[#allocation5 + $0x260] sm:$0xff] %vm4963_vm3, %v9213_v24  ;;  %v6405_v3 = vrot.slane %v6404_v10, 4  ;;  %v6414_v23 = vor.u32 %v6413_v1, %v6409_v33  ;;  %v7624_v30 = vrot.slane %v7622_v37, 4  ;;  %v6419_v29 = vrot.slane %v6417_v40, 5  ;;  %v9476_v15 = vpop.f32.mrb[5].mxu1 }
 0x342   : > { %v7623_v20 = vsel %vm10162_vm11, %v9312_v58, %v7622_v37  ;;  %v7638_v27 = vrot.slane %v7636_v54, 4  ;;  %v7639_v14 = vrot.slane %v7524_v44, 5  ;;  %v7637_v9 = vsel %vm10162_vm11, %v9314_v35, %v7636_v54  ;;  %v7531_v19 = vld [vmem:[#allocation4 + $0x6c] sm:$0xe]  ;;  %v9478_v59 = vpop.f32.mrb[6].mxu1 }
 0x343   : > { %v6415_v7 = vrot.slane %v6414_v23, 4  ;;  %v7626_v16 = vsel %vm10162_vm11, %v7624_v30, %v7625_v31  ;;  %v7643_v62 = vrot.slane %v7526_v55, 5  ;;  %v6410_v41 = vsel %vm10191_vm15, %v6405_v3, %v6409_v33  ;;  %v7530_v5 = vld [vmem:[#allocation4 + $0x68] sm:$0x1]  ;;  %v7533_v17 = vld [vmem:[#allocation4 + $0x74] sm:$0x1] }
 0x344   : > { %v9328_v22 = vcombine.low %v7623_v20, %v7626_v16  ;;  %v7640_v4 = vsel %vm10162_vm11, %v7638_v27, %v7639_v14  ;;  %v9315_v11 = vrot.slane %v7525_v38, 9  ;;  %v7646_v18 = vrot.slane %v7527_v34, 5  ;;  %v7535_v61 = vld [vmem:[#allocation4 + $0x7c] sm:$0xf]  ;;  %v9479_v21 = vpop.f32.mrb[7].mxu1 }
 0x345   : > { %v6420_v49 = vsel %vm10191_vm15, %v6415_v7, %v6419_v29  ;;  %v9330_v46 = vcombine.low %v7637_v9, %v7640_v4  ;;  %v7645_v32 = vrot.slane %v7643_v62, 4  ;;  %v12931_v8 = vadd.f32 %v9476_v15, %v9475_v57  ;;  %v7534_v36 = vld [vmem:[#allocation4 + $0x78] sm:$0xe]  ;;  %v7538_v25 = vld [vmem:[#allocation4 + $0x88] sm:$0xf] }
 0x346   : > { %v9245_v56 = vcombine.low %v6410_v41, %v6420_v49  ;;  %7784 = vst.msk [vmem:[#allocation5 + $0x70] sm:$0xff] %vm4963_vm3, %v9328_v22  ;;  %v7650_v42 = vrot.slane %v7529_v26, 5  ;;  %v7644_v48 = vsel %vm10162_vm11, %v9315_v11, %v7643_v62  ;;  %v7657_v53 = vrot.slane %v7532_v51, 5  ;;  %v7536_v45 = vld [vmem:[#allocation4 + $0x80] sm:$0x1] }
 0x347   : > { %7786 = vst.msk [vmem:[#allocation5 + $0xc0] sm:$0xff] %vm4963_vm3, %v9330_v46  ;;  %v7647_v50 = vsel %vm10162_vm11, %v7645_v32, %v7646_v18  ;;  %v12940_v6 = vadd.f32 %v9479_v21, %v9478_v59  ;;  %v9316_v2 = vrot.slane %v7528_v63, 9  ;;  %v9317_v39 = vrot.slane %v7531_v19, 9  ;;  %v7537_v33 = vld [vmem:[#allocation4 + $0x84] sm:$0xe] }
 0x348   : > { %6500 = vst.msk [vmem:[#allocation5 + $0x268] sm:$0xff] %vm4963_vm3, %v9245_v56  ;;  %v9331_v0 = vcombine.low %v7644_v48, %v7647_v50  ;;  %v7652_v12 = vrot.slane %v7650_v42, 4  ;;  %v7653_v28 = vrot.slane %v7530_v5, 5  ;;  %v7659_v52 = vrot.slane %v7657_v53, 4  ;;  %v7541_v40 = vld [vmem:[#allocation4 + $0x94] sm:$0xf] }
 0x349   : > { %v7660_v24 = vrot.slane %v7533_v17, 5  ;;  %v7651_v43 = vsel %vm10162_vm11, %v9316_v2, %v7650_v42  ;;  %v7658_v10 = vsel %vm10162_vm11, %v9317_v39, %v7657_v53  ;;  %v9318_v1 = vrot.slane %v7534_v36, 9  ;;  %v7539_v44 = vld [vmem:[#allocation4 + $0x8c] sm:$0x1]  ;;  %v7540_v3 = vld [vmem:[#allocation4 + $0x90] sm:$0xe] }
 0x34a   : > { %7787 = vst.msk [vmem:[#allocation5 + $0xe8] sm:$0xff] %vm4963_vm3, %v9331_v0  ;;  %v7664_v37 = vrot.slane %v7535_v61, 5  ;;  %v7654_v55 = vsel %vm10162_vm11, %v7652_v12, %v7653_v28  ;;  %v7667_v31 = vrot.slane %v7536_v45, 5  ;;  %v7671_v54 = vrot.slane %v7538_v25, 5  ;;  %v12951_v23 = vld [vmem:[#allocation4 + $0xac] sm:$0xf] }
 0x34b   : > { %v7661_v58 = vsel %vm10162_vm11, %v7659_v52, %v7660_v24  ;;  %v5950_v30 = vpop.permute.xlu0 %5949  ;;  %v9481_v35 = vpop.f32.mrb[8].mxu1  ;;  %v9332_v38 = vcombine.low %v7651_v43, %v7654_v55  ;;  %v9319_v27 = vrot.slane %v7537_v33, 9  ;;  %v7542_v14 = vld [vmem:[#allocation4 + $0x98] sm:$0x1]  ;;  %v7544_v34 = vld [vmem:[#allocation4 + $0xa0] sm:$0xf] }
 0x34c   : > { %v9333_v29 = vcombine.low %v7658_v10, %v7661_v58  ;;  %v7666_v20 = vrot.slane %v7664_v37, 4  ;;  %5985 = vst.msk [vmem:[#allocation5 + $0x1e8] sm:$0xff] %vm5508_vm5, %v5950_v30  ;;  %v9482_v26 = vpop.f32.mrb[9].mxu1  ;;  %v7665_v7 = vsel %vm10162_vm11, %v9318_v1, %v7664_v37  ;;  %v7673_v16 = vrot.slane %v7671_v54, 4  ;;  %v7543_v11 = vld [vmem:[#allocation4 + $0x9c] sm:$0xe] }
 0x34d   : > { %v7674_v9 = vrot.slane %v7539_v44, 5  ;;  %v7678_v62 = vrot.slane %v7541_v40, 5  ;;  %v12956_v51 = vadd.f32 %v9482_v26, %v9481_v35  ;;  %v9484_v57 = vpop.f32.mrb[10].mxu1  ;;  %7788 = vst.msk [vmem:[#allocation5 + $0x110] sm:$0xff] %vm4963_vm3, %v9332_v38  ;;  %v7672_v22 = vsel %vm10162_vm11, %v9319_v27, %v7671_v54  ;;  %v7545_v63 = vld [vmem:[#allocation4 + $0xa4] sm:$0x1] }
 0x34e   : > { %7789 = vst.msk [vmem:[#allocation5 + $0x138] sm:$0xff] %vm4963_vm3, %v9333_v29  ;;  %v7668_v41 = vsel %vm10162_vm11, %v7666_v20, %v7667_v31  ;;  %v9320_v4 = vrot.slane %v7540_v3, 9  ;;  %v9485_v15 = vpop.f32.mrb[11].mxu1  ;;  %v7681_v18 = vrot.slane %v7542_v14, 5  ;;  %v7546_v19 = vld [vmem:[#allocation4 + $0xa8] sm:$0xe] }
 0x34f   : > { %v9334_v49 = vcombine.low %v7665_v7, %v7668_v41  ;;  %v7675_v46 = vsel %vm10162_vm11, %v7673_v16, %v7674_v9  ;;  %v7680_v32 = vrot.slane %v7678_v62, 4  ;;  %v7511_v59 = vld [vmem:[#allocation4 + $0x1c] sm:$0xf]  ;;  %v5485_v56 = vpop.permute.xlu0 %5484  ;;  %v12966_v5 = vadd.f32 %v9485_v15, %v9484_v57  ;;  %v7548_v61 = vld [vmem:[#allocation4 + $0xb0] sm:$0x1] }
 0x350   : > { %v9335_v42 = vcombine.low %v7672_v22, %v7675_v46  ;;  %v7685_v17 = vrot.slane %v7544_v34, 5  ;;  %5521 = vst.msk [vmem:[#allocation5 + $0x1e0] sm:$0xff] %vm5508_vm5, %v5485_v56  ;;  %v7679_v21 = vsel %vm10162_vm11, %v9320_v4, %v7678_v62  ;;  %v9321_v50 = vrot.slane %v7543_v11, 9  ;;  %v7510_v36 = vld [vmem:[#allocation4 + $0x18] sm:$0xe]  ;;  %v9487_v44 = vpop.f32.mrb[12].mxu1 }
 0x351   : > { %7790 = vst.msk [vmem:[#allocation5 + $0x160] sm:$0xff] %vm4963_vm3, %v9334_v49  ;;  %v7682_v48 = vsel %vm10162_vm11, %v7680_v32, %v7681_v18  ;;  %v7692_v53 = vrot.slane %v12951_v23, 5  ;;  %v7512_v25 = vld [vmem:[#allocation4 + $0x20] sm:$0x1]  ;;  %v12975_v0 = vld [vmem:[#allocation4 + $0xc4] sm:$0xf] }
 0x352   : > { %v7550_v2 = vld [vmem:[#allocation4 + $0xb8] sm:$0xf]  ;;  %7791 = vst.msk [vmem:[#allocation5 + $0x188] sm:$0xff] %vm4963_vm3, %v9335_v42  ;;  %v9336_v39 = vcombine.low %v7679_v21, %v7682_v48  ;;  %v7687_v45 = vrot.slane %v7685_v17, 4  ;;  %v7688_v12 = vrot.slane %v7545_v63, 5  ;;  %v9322_v28 = vrot.slane %v7546_v19, 9 }
 0x353   : > { %v6782_v52 = vpop.permute.xlu1 %6781  ;;  %v7686_v24 = vsel %vm10162_vm11, %v9321_v50, %v7685_v17  ;;  %v7694_v33 = vrot.slane %v7692_v53, 4  ;;  %v7695_v40 = vrot.slane %v7548_v61, 5  ;;  %v7549_v43 = vld [vmem:[#allocation4 + $0xb4] sm:$0xe]  ;;  %v7551_v10 = vld [vmem:[#allocation4 + $0xbc] sm:$0x1]  ;;  %v5952_v1 = vpop.permute.xlu0 %5951 }
 0x354   : > { %6817 = vst.msk [vmem:[#allocation5 + $0x1f0] sm:$0xff] %vm5508_vm5, %v6782_v52  ;;  %v7859_v37 = vld [vmem:[#allocation5 + $0x1e8] sm:$0xff]  ;;  %v7689_v55 = vsel %vm10162_vm11, %v7687_v45, %v7688_v12  ;;  %v7693_v58 = vsel %vm10162_vm11, %v9322_v28, %v7692_v53  ;;  %v9310_v31 = vrot.slane %v7510_v36, 9  ;;  %v7608_v54 = vrot.slane %v7511_v59, 5  ;;  %5986 = vst.msk [vmem:[#allocation5 + $0x210] sm:$0xff] %vm5508_vm5, %v5952_v1  ;;  %v9488_v23 = vpop.f32.mrb[13].mxu1 }
 0x355   : > { %7792 = vst.msk [vmem:[#allocation5 + $0x1b0] sm:$0xff] %vm4963_vm3, %v9336_v39  ;;  %v7552_v3 = vld [vmem:[#allocation4 + $0xc0] sm:$0xe]  ;;  %8349 = vmatprep.mubr.bf16.mxu1 %v7859_v37  ;;  %v9337_v30 = vcombine.low %v7686_v24, %v7689_v55  ;;  %v7696_v35 = vsel %vm10162_vm11, %v7694_v33, %v7695_v40  ;;  %v7611_v38 = vrot.slane %v7512_v25, 5  ;;  %v7699_v29 = vrot.slane %v7550_v2, 5  ;;  %v9490_v14 = vpop.f32.mrb[14].mxu1 }
 0x356   : > { %v7554_v20 = vld [vmem:[#allocation4 + $0xc8] sm:$0x1]  ;;  %v12989_v27 = vadd.f32 %v9488_v23, %v9487_v44  ;;  %v9338_v34 = vcombine.low %v7693_v58, %v7696_v35  ;;  %v7610_v26 = vrot.slane %v7608_v54, 4  ;;  %v9323_v7 = vrot.slane %v7549_v43, 9  ;;  %v7555_v16 = vld [vmem:[#allocation4 + $0xcc] sm:$0xe] }
 0x357   : > { %v6784_v9 = vpop.permute.xlu1 %6783  ;;  %v9491_v62 = vpop.f32.mrb[15].mxu1  ;;  %7793 = vst.msk [vmem:[#allocation5 + $0x1d8] sm:$0xff] %vm4963_vm3, %v9337_v30  ;;  %v7609_v57 = vsel %vm10162_vm11, %v9310_v31, %v7608_v54  ;;  %v7701_v41 = vrot.slane %v7699_v29, 4  ;;  %v7702_v22 = vrot.slane %v7551_v10, 5  ;;  %v7706_v4 = vrot.slane %v12975_v0, 5  ;;  %v7858_v63 = vld [vmem:[#allocation5 + $0x1e0] sm:$0xff] }
 0x358   : > { %v7556_v11 = vld [vmem:[#allocation4 + $0xd0] sm:$0xf]  ;;  %6818 = vst.msk [vmem:[#allocation5 + $0x218] sm:$0xff] %vm5508_vm5, %v6784_v9  ;;  %v12996_v15 = vadd.f32 %v9491_v62, %v9490_v14  ;;  %v7612_v49 = vsel %vm10162_vm11, %v7610_v26, %v7611_v38  ;;  %v7700_v46 = vsel %vm10162_vm11, %v9323_v7, %v7699_v29  ;;  %v9324_v32 = vrot.slane %v7552_v3, 9  ;;  %v7557_v18 = vld [vmem:[#allocation4 + $0xd4] sm:$0x1]  ;;  %8350 = vmatmul.mubr.bf16.gmra.mrb[48].mxu1 %v7858_v63 }
 0x359   : > { %7794 = vst.msk [vmem:[#allocation5 + $0x200] sm:$0xff] %vm4963_vm3, %v9338_v34  ;;  %v9326_v19 = vcombine.low %v7609_v57, %v7612_v49  ;;  %v7703_v59 = vsel %vm10162_vm11, %v7701_v41, %v7702_v22  ;;  %v7708_v56 = vrot.slane %v7706_v4, 4  ;;  %v7709_v42 = vrot.slane %v7554_v20, 5  ;;  %v5487_v48 = vpop.permute.xlu0 %5486 }
 0x35a   : > { %v9339_v17 = vcombine.low %v7700_v46, %v7703_v59  ;;  %v9325_v61 = vrot.slane %v7555_v16, 9  ;;  %v7713_v21 = vrot.slane %v7556_v11, 5  ;;  %v7707_v50 = vsel %vm10162_vm11, %v9324_v32, %v7706_v4  ;;  %5522 = vst.msk [vmem:[#allocation5 + $0x208] sm:$0xff] %vm5508_vm5, %v5487_v48  ;;  %v7812_v32 = vld [vmem:[#allocation5 + $0x70] sm:$0xff] }
 0x35b   : > { %7782 = vst.msk [vmem:[#allocation5 + $0x20] sm:$0xff] %vm4963_vm3, %v9326_v19  ;;  %v7710_v53 = vsel %vm10162_vm11, %v7708_v56, %v7709_v42  ;;  %v7716_v36 = vrot.slane %v7557_v18, 5  ;;  %v7864_v25 = vld [vmem:[#allocation5 + $0x210] sm:$0xff]  ;;  %v7850_v56 = vld [vmem:[#allocation5 + $0x1a0] sm:$0xff] }
 0x35c   : > { %7795 = vst.msk [vmem:[#allocation5 + $0x228] sm:$0xff] %vm4963_vm3, %v9339_v17  ;;  %v9340_v0 = vcombine.low %v7707_v50, %v7710_v53  ;;  %v7714_v2 = vsel %vm10162_vm11, %v9325_v61, %v7713_v21  ;;  %v7715_v39 = vrot.slane %v7713_v21, 4  ;;  %8357 = vmatprep.mubr.bf16.mxu1 %v7864_v25  ;;  %v7817_v53 = vld [vmem:[#allocation5 + $0x98] sm:$0xff]  ;;  %v7822_v25 = vld [vmem:[#allocation5 + $0xc0] sm:$0xff] }
 0x35e   : > { %7796 = vst.msk [vmem:[#allocation5 + $0x250] sm:$0xff] %vm4963_vm3, %v9340_v0  ;;  %v7717_v45 = vsel %vm10162_vm11, %v7715_v39, %v7716_v36  ;;  %v7855_v39 = vld [vmem:[#allocation5 + $0x1c8] sm:$0xff] }
 0x35f   : > { %v9341_v12 = vcombine.low %v7714_v2, %v7717_v45 }
 0x361   : > { %7797 = vst.msk [vmem:[#allocation5 + $0x278] sm:$0xff] %vm4963_vm3, %v9341_v12  ;;  %v7863_v28 = vld [vmem:[#allocation5 + $0x208] sm:$0xff] }
 0x362   : > { %8358 = vmatmul.mubr.bf16.gmra.mrb[52].mxu1 %v7863_v28 }
 0x36c   : > { %v9493_v52 = vpop.f32.mrb[16].mxu1 }
 0x36d   : > { %v9494_v24 = vpop.f32.mrb[17].mxu1 }
 0x36e   : > { %v13018_v33 = vadd.f32 %v9494_v24, %v9493_v52  ;;  %v9496_v40 = vpop.f32.mrb[18].mxu1 }
 0x36f   : > { %v9497_v43 = vpop.f32.mrb[19].mxu1 }
 0x370   : > { %v13020_v10 = vadd.f32 %v9497_v43, %v9496_v40  ;;  %v7827_v40 = vld [vmem:[#allocation5 + $0xe8] sm:$0xff] }
 0x377   : > { %v9499_v1 = vpop.f32.mrb[20].mxu1 }
 0x378   : > { %v9500_v37 = vpop.f32.mrb[21].mxu1 }
 0x379   : > { %v5954_v44 = vpop.permute.xlu0 %5953  ;;  %v13022_v55 = vadd.f32 %v9500_v37, %v9499_v1  ;;  %v9502_v13 = vpop.f32.mrb[22].mxu1  ;;  %v7832_v37 = vld [vmem:[#allocation5 + $0x110] sm:$0xff] }
 0x37a   : > { %5987 = vst.msk [vmem:[#allocation5 + $0x238] sm:$0xff] %vm5508_vm5, %v5954_v44  ;;  %v9503_v58 = vpop.f32.mrb[23].mxu1 }
 0x37b   : > { %v13025_v31 = vadd.f32 %v9503_v58, %v9502_v13 }
 0x37d   : > { %v5489_v54 = vpop.permute.xlu0 %5488 }
 0x37e   : > { %5523 = vst.msk [vmem:[#allocation5 + $0x230] sm:$0xff] %vm5508_vm5, %v5489_v54  ;;  %v7860_v54 = vld [vmem:[#allocation5 + $0x1f0] sm:$0xff] }
 0x381   : > { %v5956_v23 = vpop.permute.xlu0 %5955  ;;  %v7869_v30 = vld [vmem:[#allocation5 + $0x238] sm:$0xff] }
 0x382   : > { %v6786_v3 = vpop.permute.xlu1 %6785  ;;  %5988 = vst.msk [vmem:[#allocation5 + $0x260] sm:$0xff] %vm5508_vm5, %v5956_v23  ;;  %8365 = vmatprep.mubr.bf16.mxu1 %v7869_v30  ;;  %v9581_v38 = vpop.f32.mrb[32].mxu0 }
 0x383   : > { %6819 = vst.msk [vmem:[#allocation5 + $0x240] sm:$0xff] %vm5508_vm5, %v6786_v3  ;;  %v9582_v20 = vpop.f32.mrb[33].mxu0 }
 0x384   : > { %v13031_v14 = vadd.f32 %v9582_v20, %v9581_v38  ;;  %v9584_v34 = vpop.f32.mrb[34].mxu0 }
 0x385   : > { %v7868_v29 = vld [vmem:[#allocation5 + $0x230] sm:$0xff]  ;;  %v9585_v26 = vpop.f32.mrb[35].mxu0 }
 0x386   : > { %v6788_v35 = vpop.permute.xlu1 %6787  ;;  %8366 = vmatmul.mubr.bf16.gmra.mrb[56].mxu1 %v7868_v29  ;;  %v13033_v16 = vadd.f32 %v9585_v26, %v9584_v34 }
 0x387   : > { %6820 = vst.msk [vmem:[#allocation5 + $0x268] sm:$0xff] %vm5508_vm5, %v6788_v35 }
 0x389   : > { %v7874_v9 = vld [vmem:[#allocation5 + $0x260] sm:$0xff] }
 0x38a   : > { %v5491_v7 = vpop.permute.xlu0 %5490  ;;  %8373 = vmatprep.mubr.bf16.mxu1 %v7874_v9  ;;  %v9587_v57 = vpop.f32.mrb[36].mxu0 }
 0x38b   : > { %5524 = vst.msk [vmem:[#allocation5 + $0x258] sm:$0xff] %vm5508_vm5, %v5491_v7  ;;  %v9588_v41 = vpop.f32.mrb[37].mxu0  ;;  %v7837_v7 = vld [vmem:[#allocation5 + $0x138] sm:$0xff] }
 0x38c   : > { %v13037_v22 = vadd.f32 %v9588_v41, %v9587_v57  ;;  %v9590_v4 = vpop.f32.mrb[38].mxu0  ;;  %v7865_v57 = vld [vmem:[#allocation5 + $0x218] sm:$0xff] }
 0x38d   : > { %v9591_v11 = vpop.f32.mrb[39].mxu0 }
 0x38e   : > { %v7467_v62 = vpop.permute.xlu0 %7466  ;;  %v13039_v46 = vadd.f32 %v9591_v11, %v9590_v4 }
 0x38f   : > { %7504 = vst.msk [vmem:[#allocation5 + $0x1a8] sm:$0xff] %vm5508_vm5, %v7467_v62  ;;  %v7842_v62 = vld [vmem:[#allocation5 + $0x160] sm:$0xff] }
 0x392   : > { %v7469_v63 = vpop.permute.xlu0 %7468  ;;  %v7873_v49 = vld [vmem:[#allocation5 + $0x258] sm:$0xff]  ;;  %v9593_v59 = vpop.f32.mrb[40].mxu0 }
 0x393   : > { %7505 = vst.msk [vmem:[#allocation5 + $0x1d0] sm:$0xff] %vm5508_vm5, %v7469_v63  ;;  %8374 = vmatmul.mubr.bf16.gmra.mrb[60].mxu1 %v7873_v49  ;;  %v9594_v42 = vpop.f32.mrb[41].mxu0  ;;  %v7847_v63 = vld [vmem:[#allocation5 + $0x188] sm:$0xff] }
 0x394   : > { %9747 = vmatprep.mubr.msk.bf16.mxu1 %vm4963_vm3, %v7812_v32  ;;  %v13044_v17 = vadd.f32 %v9594_v42, %v9593_v59  ;;  %v9596_v61 = vpop.f32.mrb[42].mxu0 }
 0x395   : > { %v9597_v21 = vpop.f32.mrb[43].mxu0 }
 0x396   : > { %v7471_v18 = vpop.permute.xlu0 %7470  ;;  %v7851_v19 = vld [vmem:[#allocation5 + $0x1a8] sm:$0xff]  ;;  %v13046_v36 = vadd.f32 %v9597_v21, %v9596_v61 }
 0x397   : > { %7506 = vst.msk [vmem:[#allocation5 + $0x1f8] sm:$0xff] %vm5508_vm5, %v7471_v18  ;;  %8494 = vmatprep.mubr.bf16.mxu0 %v7851_v19  ;;  %v7852_v18 = vld [vmem:[#allocation5 + $0x1b0] sm:$0xff] }
 0x398   : > { %8495 = vmatmul.mubr.bf16.gmra.mrb[72].mxu0 %v7850_v56 }
 0x39a   : > { %v7473_v48 = vpop.permute.xlu0 %7472  ;;  %v7856_v50 = vld [vmem:[#allocation5 + $0x1d0] sm:$0xff]  ;;  %v9599_v2 = vpop.f32.mrb[44].mxu0 }
 0x39b   : > { %7507 = vst.msk [vmem:[#allocation5 + $0x220] sm:$0xff] %vm5508_vm5, %v7473_v48  ;;  %8502 = vmatprep.mubr.bf16.mxu0 %v7856_v50  ;;  %9748 = vmatmul.mubr.msk.bf16.vlgmr.msra.gmra.mrb[64].mxu1 %vm4963_vm3, %v7817_v53  ;;  %v9600_v45 = vpop.f32.mrb[45].mxu0  ;;  %v7870_v50 = vld [vmem:[#allocation5 + $0x240] sm:$0xff] }
 0x39c   : > { %9751 = vmatprep.mubr.msk.bf16.mxu1 %vm4963_vm3, %v7822_v25  ;;  %v13052_v28 = vadd.f32 %v9600_v45, %v9599_v2  ;;  %v9602_v52 = vpop.f32.mrb[46].mxu0  ;;  %v7862_v2 = vld [vmem:[#allocation5 + $0x200] sm:$0xff] }
 0x39d   : > { %v9603_v24 = vpop.f32.mrb[47].mxu0  ;;  %v7802_v45 = vld [vmem:[#allocation5 + $0x20] sm:$0xff] }
 0x39e   : > { %v7475_v0 = vpop.permute.xlu0 %7474  ;;  %v7861_v12 = vld [vmem:[#allocation5 + $0x1f8] sm:$0xff]  ;;  %v13054_v1 = vadd.f32 %v9603_v24, %v9602_v52  ;;  %v7872_v52 = vld [vmem:[#allocation5 + $0x250] sm:$0xff] }
 0x39f   : > { %7508 = vst.msk [vmem:[#allocation5 + $0x248] sm:$0xff] %vm5508_vm5, %v7475_v0  ;;  %v7857_v0 = vld [vmem:[#allocation5 + $0x1d8] sm:$0xff] }
 0x3a0   : > { %8503 = vmatmul.mubr.bf16.gmra.mrb[76].mxu0 %v7855_v39  ;;  %v7875_v39 = vld [vmem:[#allocation5 + $0x268] sm:$0xff] }
 0x3a1   : > { %8510 = vmatprep.mubr.bf16.mxu0 %v7861_v12  ;;  %v7867_v12 = vld [vmem:[#allocation5 + $0x228] sm:$0xff] }
 0x3a2   : > { %v7477_v43 = vpop.permute.xlu0 %7476  ;;  %v9505_v44 = vpop.f32.mrb[24].mxu1  ;;  %v7866_v35 = vld [vmem:[#allocation5 + $0x220] sm:$0xff] }
 0x3a3   : > { %9752 = vmatmul.mubr.msk.bf16.gmra.mrb[68].mxu1 %vm4963_vm3, %v7827_v40  ;;  %7509 = vst.msk [vmem:[#allocation5 + $0x270] sm:$0xff] %vm5508_vm5, %v7477_v43  ;;  %v9506_v13 = vpop.f32.mrb[25].mxu1 }
 0x3a4   : > { %9755 = vmatprep.mubr.msk.bf16.mxu1 %vm4963_vm3, %v7832_v37  ;;  %v9605_v58 = vpop.f32.mrb[48].mxu0  ;;  %v13059_v3 = vadd.f32 %v9506_v13, %v9505_v44  ;;  %v9508_v23 = vpop.f32.mrb[26].mxu1  ;;  %v7807_v44 = vld [vmem:[#allocation5 + $0x48] sm:$0xff] }
 0x3a5   : > { %v9606_v30 = vpop.f32.mrb[49].mxu0  ;;  %v9509_v38 = vpop.f32.mrb[27].mxu1 }
 0x3a6   : > { %v13061_v29 = vadd.f32 %v9606_v30, %v9605_v58  ;;  %v9608_v20 = vpop.f32.mrb[50].mxu0  ;;  %v13063_v34 = vadd.f32 %v9509_v38, %v9508_v23  ;;  %v7871_v41 = vld [vmem:[#allocation5 + $0x248] sm:$0xff]  ;;  %v7877_v58 = vld [vmem:[#allocation5 + $0x278] sm:$0xff] }
 0x3a7   : > { %v9609_v26 = vpop.f32.mrb[51].mxu0 }
 0x3a8   : > { %8511 = vmatmul.mubr.bf16.gmra.mrb[80].mxu0 %v7860_v54  ;;  %v13065_v9 = vadd.f32 %v9609_v26, %v9608_v20 }
 0x3a9   : > { %8518 = vmatprep.mubr.bf16.mxu0 %v7866_v35 }
 0x3aa   : > { %v9511_v4 = vpop.f32.mrb[28].mxu1  ;;  %v7876_v61 = vld [vmem:[#allocation5 + $0x270] sm:$0xff] }
 0x3ab   : > { %9756 = vmatmul.mubr.msk.bf16.gmra.mrb[72].mxu1 %vm4963_vm3, %v7837_v7  ;;  %v9512_v11 = vpop.f32.mrb[29].mxu1 }
 0x3ac   : > { %9759 = vmatprep.mubr.msk.bf16.mxu1 %vm4963_vm3, %v7842_v62  ;;  %v13069_v49 = vadd.f32 %v9512_v11, %v9511_v4  ;;  %v9514_v32 = vpop.f32.mrb[30].mxu1 }
 0x3ad   : > { %v9515_v19 = vpop.f32.mrb[31].mxu1 }
 0x3ae   : > { %v13073_v59 = vadd.f32 %v9515_v19, %v9514_v32 }
 0x3b0   : > { %8519 = vmatmul.mubr.bf16.gmra.mrb[84].mxu0 %v7865_v57 }
 0x3b1   : > { %8526 = vmatprep.mubr.bf16.mxu0 %v7871_v41  ;;  %v9611_v56 = vpop.f32.mrb[52].mxu0 }
 0x3b2   : > { %v9612_v42 = vpop.f32.mrb[53].mxu0 }
 0x3b3   : > { %9760 = vmatmul.mubr.msk.bf16.gmra.mrb[76].mxu1 %vm4963_vm3, %v7847_v63  ;;  %v13075_v21 = vadd.f32 %v9612_v42, %v9611_v56  ;;  %v9614_v48 = vpop.f32.mrb[54].mxu0 }
 0x3b4   : > { %9763 = vmatprep.mubr.msk.bf16.mxu1 %vm4963_vm3, %v7852_v18  ;;  %v9615_v53 = vpop.f32.mrb[55].mxu0 }
 0x3b5   : > { %v13077_v25 = vadd.f32 %v9615_v53, %v9614_v48  ;;  %v13095_v48 = vld [vmem:[%s13374_s4] ss:$0 sm:$0xff] }
 0x3b6   : > { %v8280_v53 = vadd.f32 %v12989_v27, %v13095_v48 }
 0x3b8   : > { %8527 = vmatmul.mubr.bf16.gmra.mrb[88].mxu0 %v7870_v50 }
 0x3b9   : > { %8534 = vmatprep.mubr.bf16.mxu0 %v7876_v61 }
 0x3bb   : > { %9764 = vmatmul.mubr.msk.bf16.gmra.mrb[80].mxu1 %vm4963_vm3, %v7857_v0 }
 0x3bc   : > { %9767 = vmatprep.mubr.msk.bf16.mxu1 %vm4963_vm3, %v7862_v2 }
 0x3c0   : > { %8535 = vmatmul.mubr.bf16.gmra.mrb[92].mxu0 %v7875_v39 }
 0x3c1   : > { %9743 = vmatprep.mubr.msk.bf16.mxu0 %vm4963_vm3, %v7802_v45  ;;  %v8272_v45 = vadd.f32 %v12956_v51, %v13095_v48  ;;  %v8288_v51 = vadd.f32 %v13018_v33, %v13095_v48 }
 0x3c2   : > { %v9617_v24 = vpop.f32.mrb[56].mxu0 }
 0x3c3   : > { %9768 = vmatmul.mubr.msk.bf16.gmra.mrb[84].mxu1 %vm4963_vm3, %v7867_v12  ;;  %v9618_v40 = vpop.f32.mrb[57].mxu0 }
 0x3c4   : > { %9771 = vmatprep.mubr.msk.bf16.mxu1 %vm4963_vm3, %v7872_v52  ;;  %v13084_v43 = vadd.f32 %v9618_v40, %v9617_v24  ;;  %v9620_v37 = vpop.f32.mrb[58].mxu0  ;;  %v13102_v52 = vadd.f32 %v13052_v28, %v8280_v53  ;;  %v13105_v24 = vadd.f32 %v13044_v17, %v8272_v45  ;;  %v8275_v40 = vadd.f32 %v12966_v5, %v13095_v48 }
 0x3c5   : > { %v9621_v13 = vpop.f32.mrb[59].mxu0  ;;  %v8296_v28 = vadd.f32 %v13022_v55, %v13095_v48  ;;  %v8299_v17 = vadd.f32 %v13025_v31, %v13095_v48  ;;  %v8291_v5 = vadd.f32 %v13020_v10, %v13095_v48  ;;  %v8304_v10 = vadd.f32 %v13059_v3, %v13095_v48 }
 0x3c6   : > { %v9622_v54 = vadd.f32 %v9621_v13, %v9620_v37  ;;  %v8283_v37 = vadd.f32 %v12996_v15, %v13095_v48  ;;  %v8256_v45 = vadd.f32 %v12903_v60, %v13095_v48 }
 0x3c7   : > { %v13134_v33 = vadd.f32 %v13077_v25, %v8299_v17  ;;  %v13137_v31 = vadd.f32 %v13065_v9, %v8291_v5  ;;  %v8307_v25 = vadd.f32 %v13063_v34, %v13095_v48 }
 0x3c8   : > { %9744 = vmatmul.mubr.msk.bf16.vlgmr.msra.gmra.mrb[96].mxu0 %vm4963_vm3, %v7807_v44  ;;  %v13112_v27 = vadd.f32 %v13054_v1, %v8283_v37  ;;  %v13115_v44 = vadd.f32 %v13046_v36, %v8275_v40  ;;  %v13128_v36 = vadd.f32 %v13075_v21, %v8296_v28  ;;  %v8315_v21 = vadd.f32 %v13073_v59, %v13095_v48 }
 0x3cb   : > { %9772 = vmatmul.mubr.msk.bf16.gmra.mrb[88].mxu1 %vm4963_vm3, %v7877_v58 }
 0x3d4   : > { %v9517_v23 = vpop.f32.mrb[32].mxu1 }
 0x3d5   : > { %v9518_v30 = vpop.f32.mrb[33].mxu1 }
 0x3d6   : > { %v13088_v35 = vadd.f32 %v9518_v30, %v9517_v23  ;;  %v9520_v38 = vpop.f32.mrb[34].mxu1  ;;  %v13131_v23 = vadd.f32 %v13061_v29, %v8288_v51 }
 0x3d7   : > { %v9521_v20 = vpop.f32.mrb[35].mxu1 }
 0x3d8   : > { %v13090_v26 = vadd.f32 %v9521_v20, %v9520_v38  ;;  %v8312_v38 = vadd.f32 %v13069_v49, %v13095_v48 }
 0x3df   : > { %v9523_v7 = vpop.f32.mrb[36].mxu1 }
 0x3e0   : > { %v9524_v62 = vpop.f32.mrb[37].mxu1 }
 0x3e1   : > { %v9623_v57 = vpop.f32.mrb[60].mxu0  ;;  %v9525_v41 = vadd.f32 %v9524_v62, %v9523_v7  ;;  %v9526_v4 = vpop.f32.mrb[38].mxu1 }
 0x3e2   : > { %v9624_v11 = vpop.f32.mrb[61].mxu0  ;;  %v9527_v32 = vpop.f32.mrb[39].mxu1 }
 0x3e3   : > { %v9625_v63 = vadd.f32 %v9624_v11, %v9623_v57  ;;  %v9626_v18 = vpop.f32.mrb[62].mxu0  ;;  %v9528_v19 = vadd.f32 %v9527_v32, %v9526_v4  ;;  %v13154_v57 = vadd.f32 %v13084_v43, %v8304_v10  ;;  %v13158_v11 = vadd.f32 %v9622_v54, %v8307_v25 }
 0x3e4   : > { %v9627_v56 = vpop.f32.mrb[63].mxu0  ;;  %v8323_v43 = vadd.f32 %v13090_v26, %v13095_v48  ;;  %v8264_v26 = vadd.f32 %v12931_v8, %v13095_v48 }
 0x3e5   : > { %v9628_v42 = vadd.f32 %v9627_v56, %v9626_v18  ;;  %v13151_v62 = vadd.f32 %v9625_v63, %v8312_v38  ;;  %v8320_v63 = vadd.f32 %v13088_v35, %v13095_v48  ;;  %v8259_v35 = vadd.f32 %v12907_v47, %v13095_v48 }
 0x3e7   : > { %v13156_v3 = vadd.f32 %v9628_v42, %v8315_v21  ;;  %v8328_v42 = vadd.f32 %v9525_v41, %v13095_v48  ;;  %v8267_v41 = vadd.f32 %v12940_v6, %v13095_v48  ;;  %v13194_v60 = vadd.f32 %v13033_v16, %v8259_v35 }
 0x3e9   : > { %v9629_v61 = vpop.f32.mrb[64].mxu0 }
 0x3ea   : > { %v9630_v50 = vpop.f32.mrb[65].mxu0 }
 0x3eb   : > { %v9631_v0 = vadd.f32 %v9630_v50, %v9629_v61  ;;  %v9632_v2 = vpop.f32.mrb[66].mxu0  ;;  %v8331_v50 = vadd.f32 %v9528_v19, %v13095_v48  ;;  %v13185_v19 = vadd.f32 %v13037_v22, %v8264_v26 }
 0x3ec   : > { %v9633_v39 = vpop.f32.mrb[67].mxu0 }
 0x3ed   : > { %v9634_v12 = vadd.f32 %v9633_v39, %v9632_v2  ;;  %v13170_v54 = vadd.f32 %v9631_v0, %v8320_v63  ;;  %v13188_v0 = vadd.f32 %v13031_v14, %v8256_v45 }
 0x3ef   : > { %v13174_v39 = vadd.f32 %v9634_v12, %v8323_v43  ;;  %v13191_v12 = vadd.f32 %v13039_v46, %v8267_v41 }
 0x3fd   : > { %v9529_v13 = vpop.f32.mrb[40].mxu1 }
 0x3fe   : > { %v9530_v15 = vpop.f32.mrb[41].mxu1 }
 0x3ff   : > { %v13125_v58 = vadd.f32 %v9530_v15, %v9529_v13  ;;  %v9532_v1 = vpop.f32.mrb[42].mxu1 }
 0x400   : > { %v9533_v55 = vpop.f32.mrb[43].mxu1 }
 0x401   : > { %v13139_v30 = vadd.f32 %v9533_v55, %v9532_v1 }
 0x403   : > { %v8339_v63 = vadd.f32 %v13139_v30, %v13095_v48 }
 0x407   : > { %v9535_v29 = vpop.f32.mrb[44].mxu1 }
 0x408   : > { %v9536_v20 = vpop.f32.mrb[45].mxu1 }
 0x409   : > { %v13149_v7 = vadd.f32 %v9536_v20, %v9535_v29  ;;  %v9538_v9 = vpop.f32.mrb[46].mxu1  ;;  %v9635_v4 = vpop.f32.mrb[68].mxu0 }
 0x40a   : > { %v9539_v49 = vpop.f32.mrb[47].mxu1  ;;  %v9636_v59 = vpop.f32.mrb[69].mxu0 }
 0x40b   : > { %v13160_v32 = vadd.f32 %v9539_v49, %v9538_v9  ;;  %v9637_v18 = vadd.f32 %v9636_v59, %v9635_v4  ;;  %v9638_v34 = vpop.f32.mrb[70].mxu0  ;;  %v8336_v59 = vadd.f32 %v13125_v58, %v13095_v48 }
 0x40c   : > { %v9639_v56 = vpop.f32.mrb[71].mxu0 }
 0x40d   : > { %v9640_v61 = vadd.f32 %v9639_v56, %v9638_v34  ;;  %v13168_v53 = vadd.f32 %v9637_v18, %v8328_v42 }
 0x40f   : > { %v13172_v2 = vadd.f32 %v9640_v61, %v8331_v50 }
 0x42b   : > { %v9541_v40 = vpop.f32.mrb[48].mxu1 }
 0x42c   : > { %v9542_v47 = vpop.f32.mrb[49].mxu1 }
 0x42d   : > { %v13196_v37 = vadd.f32 %v9542_v47, %v9541_v40  ;;  %v9544_v8 = vpop.f32.mrb[50].mxu1 }
 0x42e   : > { %v9545_v51 = vpop.f32.mrb[51].mxu1 }
 0x42f   : > { %v13198_v28 = vadd.f32 %v9545_v51, %v9544_v8 }
 0x435   : > { %v9547_v6 = vpop.f32.mrb[52].mxu1 }
 0x436   : > { %v9548_v22 = vpop.f32.mrb[53].mxu1 }
 0x437   : > { %v13200_v17 = vadd.f32 %v9548_v22, %v9547_v6  ;;  %v9550_v14 = vpop.f32.mrb[54].mxu1 }
 0x438   : > { %v9551_v13 = vpop.f32.mrb[55].mxu1 }
 0x439   : > { %v13202_v5 = vadd.f32 %v9551_v13, %v9550_v14  ;;  %v8344_v13 = vadd.f32 %v13149_v7, %v13095_v48 }
 0x459   : > { %v9553_v46 = vpop.f32.mrb[56].mxu1 }
 0x45a   : > { %v9554_v15 = vpop.f32.mrb[57].mxu1 }
 0x45b   : > { %v13204_v16 = vadd.f32 %v9554_v15, %v9553_v46  ;;  %v9556_v1 = vpop.f32.mrb[58].mxu1 }
 0x45c   : > { %v9557_v55 = vpop.f32.mrb[59].mxu1 }
 0x45d   : > { %v13206_v10 = vadd.f32 %v9557_v55, %v9556_v1  ;;  %v8347_v55 = vadd.f32 %v13160_v32, %v13095_v48 }
 0x466   : > { %v9559_v38 = vpop.f32.mrb[60].mxu1 }
 0x467   : > { %v9560_v21 = vpop.f32.mrb[61].mxu1 }
 0x468   : > { %v13208_v29 = vadd.f32 %v9560_v21, %v9559_v38  ;;  %v9562_v25 = vpop.f32.mrb[62].mxu1 }
 0x469   : > { %v9563_v20 = vpop.f32.mrb[63].mxu1 }
 0x46a   : > { %v13210_v9 = vadd.f32 %v9563_v20, %v9562_v25 }
 0x46b   : > { %v9641_v4 = vpop.f32.mrb[72].mxu0 }
 0x46c   : > { %v9642_v49 = vpop.f32.mrb[73].mxu0 }
 0x46d   : > { %v9643_v18 = vadd.f32 %v9642_v49, %v9641_v4  ;;  %v9644_v34 = vpop.f32.mrb[74].mxu0 }
 0x46e   : > { %v9645_v56 = vpop.f32.mrb[75].mxu0  ;;  %v9749_v61 = vpop.f32.mrb[64].mxu1 }
 0x46f   : > { %v9646_v43 = vadd.f32 %v9645_v56, %v9644_v34  ;;  %v8602_v42 = vadd.f32 %v9749_v61, %v13102_v52  ;;  %v8593_v50 = vpop.f32.mrb[65].mxu1  ;;  %v13217_v45 = vadd.f32 %v9643_v18, %v8336_v59 }
 0x470   : > { %v8594_v35 = vadd.f32 %v8593_v50, %v13105_v24  ;;  %v9750_v26 = vpop.f32.mrb[66].mxu1 }
 0x471   : > { %v8710_v41 = vmax.f32 %v8602_v42, 0.0  ;;  %v8605_v40 = vadd.f32 %v9750_v26, %v13112_v27  ;;  %v8596_v58 = vpop.f32.mrb[67].mxu1  ;;  %v13221_v47 = vadd.f32 %v9646_v43, %v8339_v63 }
 0x472   : > { %v8708_v8 = vmax.f32 %v8594_v35, 0.0  ;;  %v8597_v51 = vadd.f32 %v8596_v58, %v13115_v44 }
 0x473   : > { %v8711_v6 = vmax.f32 %v8605_v40, 0.0  ;;  %v9647_v30 = vpop.f32.mrb[76].mxu0 }
 0x474   : > { %v8738_v22 = vadd.f32 %v8710_v41, %v8708_v8  ;;  %v8709_v14 = vmax.f32 %v8597_v51, 0.0  ;;  %v9648_v52 = vpop.f32.mrb[77].mxu0 }
 0x475   : > { %v9649_v46 = vadd.f32 %v9648_v52, %v9647_v30  ;;  %v9650_v24 = vpop.f32.mrb[78].mxu0 }
 0x476   : > { %8754 = vst.msk [vmem:[#allocation6 + $0x10] sm:$0xff] %vm4963_vm3, %v8738_v22  ;;  %v8739_v15 = vadd.f32 %v8711_v6, %v8709_v14  ;;  %v9651_v27 = vpop.f32.mrb[79].mxu0  ;;  %v9753_v1 = vpop.f32.mrb[68].mxu1 }
 0x477   : > { %v9652_v44 = vadd.f32 %v9651_v27, %v9650_v24  ;;  %v8618_v38 = vadd.f32 %v9753_v1, %v13128_v36  ;;  %v8609_v21 = vpop.f32.mrb[69].mxu1  ;;  %v13230_v25 = vadd.f32 %v9649_v46, %v8344_v13 }
 0x478   : > { %8755 = vst.msk [vmem:[#allocation6 + $0x18] sm:$0xff] %vm4963_vm3, %v8739_v15  ;;  %v8610_v7 = vadd.f32 %v8609_v21, %v13131_v23  ;;  %v9754_v20 = vpop.f32.mrb[70].mxu1  ;;  %v8352_v23 = vadd.f32 %v13196_v37, %v13095_v48 }
 0x479   : > { %v8714_v4 = vmax.f32 %v8618_v38, 0.0  ;;  %v8621_v49 = vadd.f32 %v9754_v20, %v13134_v33  ;;  %v8612_v59 = vpop.f32.mrb[71].mxu1  ;;  %v13235_v18 = vadd.f32 %v9652_v44, %v8347_v55  ;;  %v8363_v20 = vadd.f32 %v13202_v5, %v13095_v48 }
 0x47a   : > { %v8712_v32 = vmax.f32 %v8610_v7, 0.0  ;;  %v8613_v34 = vadd.f32 %v8612_v59, %v13137_v31  ;;  %v8355_v31 = vadd.f32 %v13198_v28, %v13095_v48 }
 0x47b   : > { %v8715_v56 = vmax.f32 %v8621_v49, 0.0  ;;  %v9653_v36 = vpop.f32.mrb[80].mxu0 }
 0x47c   : > { %v8740_v61 = vadd.f32 %v8714_v4, %v8712_v32  ;;  %v8713_v63 = vmax.f32 %v8613_v34, 0.0  ;;  %v9654_v43 = vpop.f32.mrb[81].mxu0 }
 0x47d   : > { %v9655_v42 = vadd.f32 %v9654_v43, %v9653_v36  ;;  %v9656_v50 = vpop.f32.mrb[82].mxu0 }
 0x47e   : > { %8756 = vst.msk [vmem:[#allocation6 + $0x20] sm:$0xff] %vm4963_vm3, %v8740_v61  ;;  %v8741_v33 = vadd.f32 %v8715_v56, %v8713_v63  ;;  %v9657_v35 = vpop.f32.mrb[83].mxu0  ;;  %v9757_v26 = vpop.f32.mrb[72].mxu1 }
 0x47f   : > { %v8770_v41 = vld [vmem:[#allocation6 + $0x10] ss:$2 sm:$0xff]  ;;  %v8786_v40 = vld [vmem:[#allocation6 + $0x11] ss:$2 sm:$0xff]  ;;  %v9658_v58 = vadd.f32 %v9657_v35, %v9656_v50  ;;  %v8634_v8 = vadd.f32 %v9757_v26, %v13151_v62  ;;  %v8625_v51 = vpop.f32.mrb[73].mxu1  ;;  %v13247_v6 = vadd.f32 %v9655_v42, %v8352_v23 }
 0x480   : > { %v8800_v37 = vadd.f32 %v8786_v40, %v8770_v41  ;;  %8757 = vst.msk [vmem:[#allocation6 + $0x28] sm:$0xff] %vm4963_vm3, %v8741_v33  ;;  %v8626_v30 = vadd.f32 %v8625_v51, %v13154_v57  ;;  %v9758_v22 = vpop.f32.mrb[74].mxu1  ;;  %v8360_v57 = vadd.f32 %v13200_v17, %v13095_v48 }
 0x481   : > { %v8718_v14 = vmax.f32 %v8634_v8, 0.0  ;;  %v8637_v52 = vadd.f32 %v9758_v22, %v13156_v3  ;;  %v8628_v13 = vpop.f32.mrb[75].mxu1  ;;  %v13252_v46 = vadd.f32 %v9658_v58, %v8355_v31 }
 0x482   : > { %v8808_v28 = vmul.f32 0.25, %v8800_v37  ;;  %v8716_v24 = vmax.f32 %v8626_v30, 0.0  ;;  %v8629_v15 = vadd.f32 %v8628_v13, %v13158_v11 }
 0x483   : > { %v8719_v62 = vmax.f32 %v8637_v52, 0.0  ;;  %v9659_v27 = vpop.f32.mrb[84].mxu0 }
 0x484   : > { %v8742_v1 = vadd.f32 %v8718_v14, %v8716_v24  ;;  %v8717_v55 = vmax.f32 %v8629_v15, 0.0  ;;  %v9660_v44 = vpop.f32.mrb[85].mxu0  ;;  %8816 = vst.msk [vmem:[%s13255_s7 + $0x8] sm:$0xff] %vm4963_vm3, %v8808_v28 }
 0x485   : > { %v9661_v3 = vadd.f32 %v9660_v44, %v9659_v27  ;;  %v9662_v38 = vpop.f32.mrb[86].mxu0 }
 0x486   : > { %8758 = vst.msk [vmem:[#allocation6 + $0x30] sm:$0xff] %vm4963_vm3, %v8742_v1  ;;  %v8743_v21 = vadd.f32 %v8719_v62, %v8717_v55  ;;  %v9663_v7 = vpop.f32.mrb[87].mxu0  ;;  %v9761_v11 = vpop.f32.mrb[76].mxu1 }
 0x487   : > { %v8772_v4 = vld [vmem:[#allocation6 + $0x20] ss:$2 sm:$0xff]  ;;  %v8788_v49 = vld [vmem:[#allocation6 + $0x21] ss:$2 sm:$0xff]  ;;  %v9664_v59 = vadd.f32 %v9663_v7, %v9662_v38  ;;  %v8650_v32 = vadd.f32 %v9761_v11, %v13168_v53  ;;  %v8641_v34 = vpop.f32.mrb[77].mxu1  ;;  %v8521_v56 = vadd.f32 %v9661_v3, %v8360_v57 }
 0x488   : > { %v8801_v36 = vadd.f32 %v8788_v49, %v8772_v4  ;;  %8759 = vst.msk [vmem:[#allocation6 + $0x38] sm:$0xff] %vm4963_vm3, %v8743_v21  ;;  %v8642_v17 = vadd.f32 %v8641_v34, %v13170_v54  ;;  %v9762_v61 = vpop.f32.mrb[78].mxu1  ;;  %v8368_v54 = vadd.f32 %v13204_v16, %v13095_v48 }
 0x489   : > { %v8722_v63 = vmax.f32 %v8650_v32, 0.0  ;;  %v8653_v43 = vadd.f32 %v9762_v61, %v13172_v2  ;;  %v8644_v23 = vpop.f32.mrb[79].mxu1  ;;  %v8524_v42 = vadd.f32 %v9664_v59, %v8363_v20 }
 0x48a   : > { %v8809_v5 = vmul.f32 0.25, %v8801_v36  ;;  %v8720_v50 = vmax.f32 %v8642_v17, 0.0  ;;  %v8645_v33 = vadd.f32 %v8644_v23, %v13174_v39  ;;  %v8371_v39 = vadd.f32 %v13206_v10, %v13095_v48 }
 0x48b   : > { %v8723_v35 = vmax.f32 %v8653_v43, 0.0  ;;  %v9665_v53 = vpop.f32.mrb[88].mxu0 }
 0x48c   : > { %v8744_v26 = vadd.f32 %v8722_v63, %v8720_v50  ;;  %v8721_v31 = vmax.f32 %v8645_v33, 0.0  ;;  %v9666_v41 = vpop.f32.mrb[89].mxu0  ;;  %8817 = vst.msk [vmem:[%s13255_s7 + $0x10] sm:$0xff] %vm4963_vm3, %v8809_v5 }
 0x48d   : > { %v9667_v40 = vadd.f32 %v9666_v41, %v9665_v53  ;;  %v9668_v58 = vpop.f32.mrb[90].mxu0 }
 0x48e   : > { %8760 = vst.msk [vmem:[#allocation6 + $0x40] sm:$0xff] %vm4963_vm3, %v8744_v26  ;;  %v8745_v2 = vadd.f32 %v8723_v35, %v8721_v31  ;;  %v9669_v8 = vpop.f32.mrb[91].mxu0  ;;  %v9765_v51 = vpop.f32.mrb[80].mxu1 }
 0x48f   : > { %v8774_v37 = vld [vmem:[#allocation6 + $0x30] ss:$2 sm:$0xff]  ;;  %v8790_v30 = vld [vmem:[#allocation6 + $0x31] ss:$2 sm:$0xff]  ;;  %v9670_v22 = vadd.f32 %v9669_v8, %v9668_v58  ;;  %v8666_v14 = vadd.f32 %v9765_v51, %v13230_v25  ;;  %v8657_v52 = vpop.f32.mrb[81].mxu1  ;;  %v13277_v13 = vadd.f32 %v9667_v40, %v8368_v54 }
 0x490   : > { %v8802_v28 = vadd.f32 %v8790_v30, %v8774_v37  ;;  %8761 = vst.msk [vmem:[#allocation6 + $0x48] sm:$0xff] %vm4963_vm3, %v8745_v2  ;;  %v8658_v16 = vadd.f32 %v8657_v52, %v13217_v45  ;;  %v9766_v24 = vpop.f32.mrb[82].mxu1  ;;  %v8376_v45 = vadd.f32 %v13208_v29, %v13095_v48 }
 0x491   : > { %v8726_v15 = vmax.f32 %v8666_v14, 0.0  ;;  %v8669_v62 = vadd.f32 %v9766_v24, %v13235_v18  ;;  %v8660_v27 = vpop.f32.mrb[83].mxu1  ;;  %v13282_v10 = vadd.f32 %v9670_v22, %v8371_v39 }
 0x492   : > { %v8810_v1 = vmul.f32 0.25, %v8802_v28  ;;  %v8724_v55 = vmax.f32 %v8658_v16, 0.0  ;;  %v8661_v25 = vadd.f32 %v8660_v27, %v13221_v47  ;;  %v8379_v47 = vadd.f32 %v13210_v9, %v13095_v48 }
 0x493   : > { %v8727_v44 = vmax.f32 %v8669_v62, 0.0  ;;  %v9671_v57 = vpop.f32.mrb[92].mxu0 }
 0x494   : > { %v8746_v3 = vadd.f32 %v8726_v15, %v8724_v55  ;;  %v8725_v38 = vmax.f32 %v8661_v25, 0.0  ;;  %v9672_v21 = vpop.f32.mrb[93].mxu0  ;;  %8818 = vst.msk [vmem:[%s13255_s7 + $0x18] sm:$0xff] %vm4963_vm3, %v8810_v1 }
 0x495   : > { %v9673_v7 = vadd.f32 %v9672_v21, %v9671_v57  ;;  %v9674_v11 = vpop.f32.mrb[94].mxu0 }
 0x496   : > { %8762 = vst.msk [vmem:[#allocation6 + $0x50] sm:$0xff] %vm4963_vm3, %v8746_v3  ;;  %v8747_v18 = vadd.f32 %v8727_v44, %v8725_v38  ;;  %v9675_v20 = vpop.f32.mrb[95].mxu0  ;;  %v9769_v4 = vpop.f32.mrb[84].mxu1 }
 0x497   : > { %v8776_v49 = vld [vmem:[#allocation6 + $0x40] ss:$2 sm:$0xff]  ;;  %v8792_v59 = vld [vmem:[#allocation6 + $0x41] ss:$2 sm:$0xff]  ;;  %v9676_v32 = vadd.f32 %v9675_v20, %v9674_v11  ;;  %v8682_v34 = vadd.f32 %v9769_v4, %v8521_v56  ;;  %v8673_v36 = vpop.f32.mrb[85].mxu1  ;;  %v8537_v17 = vadd.f32 %v9673_v7, %v8376_v45 }
 0x498   : > { %v8803_v61 = vadd.f32 %v8792_v59, %v8776_v49  ;;  %8763 = vst.msk [vmem:[#allocation6 + $0x58] sm:$0xff] %vm4963_vm3, %v8747_v18  ;;  %v8674_v29 = vadd.f32 %v8673_v36, %v13247_v6  ;;  %v9770_v63 = vpop.f32.mrb[86].mxu1 }
 0x499   : > { %v8730_v43 = vmax.f32 %v8682_v34, 0.0  ;;  %v8685_v23 = vadd.f32 %v9770_v63, %v8524_v42  ;;  %v8676_v5 = vpop.f32.mrb[87].mxu1  ;;  %v8540_v50 = vadd.f32 %v9676_v32, %v8379_v47 }
 0x49a   : > { %v8811_v33 = vmul.f32 0.25, %v8803_v61  ;;  %v8728_v35 = vmax.f32 %v8674_v29, 0.0  ;;  %v8677_v48 = vadd.f32 %v8676_v5, %v13252_v46 }
 0x49b   : > { %v8731_v9 = vmax.f32 %v8685_v23, 0.0  ;;  %v9745_v53 = vpop.f32.mrb[96].mxu0 }
 0x49c   : > { %v8748_v56 = vadd.f32 %v8730_v43, %v8728_v35  ;;  %v8729_v26 = vmax.f32 %v8677_v48, 0.0  ;;  %v8586_v31 = vadd.f32 %v9745_v53, %v13185_v19  ;;  %v8577_v41 = vpop.f32.mrb[97].mxu0  ;;  %8819 = vst.msk [vmem:[%s13255_s7 + $0x20] sm:$0xff] %vm4963_vm3, %v8811_v33 }
 0x49d   : > { %v8578_v6 = vadd.f32 %v8577_v41, %v13188_v0  ;;  %v9746_v54 = vpop.f32.mrb[98].mxu0 }
 0x49e   : > { %8764 = vst.msk [vmem:[#allocation6 + $0x60] sm:$0xff] %vm4963_vm3, %v8748_v56  ;;  %v8749_v42 = vadd.f32 %v8731_v9, %v8729_v26  ;;  %v8706_v40 = vmax.f32 %v8586_v31, 0.0  ;;  %v8589_v58 = vadd.f32 %v9746_v54, %v13191_v12  ;;  %v8580_v2 = vpop.f32.mrb[99].mxu0  ;;  %v9773_v46 = vpop.f32.mrb[88].mxu1 }
 0x49f   : > { %v8778_v8 = vld [vmem:[#allocation6 + $0x50] ss:$2 sm:$0xff]  ;;  %v8794_v51 = vld [vmem:[#allocation6 + $0x51] ss:$2 sm:$0xff]  ;;  %v8704_v39 = vmax.f32 %v8578_v6, 0.0  ;;  %v8581_v37 = vadd.f32 %v8580_v2, %v13194_v60  ;;  %v8698_v19 = vadd.f32 %v9773_v46, %v8537_v17  ;;  %v8689_v30 = vpop.f32.mrb[89].mxu1 }
 0x4a0   : > { %v8804_v22 = vadd.f32 %v8794_v51, %v8778_v8  ;;  %8765 = vst.msk [vmem:[#allocation6 + $0x68] sm:$0xff] %vm4963_vm3, %v8749_v42  ;;  %v8707_v0 = vmax.f32 %v8589_v58, 0.0  ;;  %v8690_v14 = vadd.f32 %v8689_v30, %v13277_v13  ;;  %v9774_v52 = vpop.f32.mrb[90].mxu1 }
 0x4a1   : > { %v8736_v28 = vadd.f32 %v8706_v40, %v8704_v39  ;;  %v8705_v16 = vmax.f32 %v8581_v37, 0.0  ;;  %v8734_v12 = vmax.f32 %v8698_v19, 0.0  ;;  %v8701_v24 = vadd.f32 %v9774_v52, %v8540_v50  ;;  %v8692_v15 = vpop.f32.mrb[91].mxu1 }
 0x4a2   : > { %v8812_v62 = vmul.f32 0.25, %v8804_v22  ;;  %v8732_v27 = vmax.f32 %v8690_v14, 0.0  ;;  %v8693_v1 = vadd.f32 %v8692_v15, %v13282_v10 }
 0x4a3   : > { %8752 = vst.msk [vmem:[#allocation6] sm:$0xff] %vm4963_vm3, %v8736_v28  ;;  %v8737_v60 = vadd.f32 %v8707_v0, %v8705_v16  ;;  %v8735_v55 = vmax.f32 %v8701_v24, 0.0 }
 0x4a4   : > { %v8750_v25 = vadd.f32 %v8734_v12, %v8732_v27  ;;  %v8733_v44 = vmax.f32 %v8693_v1, 0.0  ;;  %8820 = vst.msk [vmem:[%s13255_s7 + $0x28] sm:$0xff] %vm4963_vm3, %v8812_v62 }
 0x4a5   : > { %8753 = vst.msk [vmem:[#allocation6 + $0x8] sm:$0xff] %vm4963_vm3, %v8737_v60 }
 0x4a6   : > { %8766 = vst.msk [vmem:[#allocation6 + $0x70] sm:$0xff] %vm4963_vm3, %v8750_v25  ;;  %v8751_v13 = vadd.f32 %v8735_v55, %v8733_v44 }
 0x4a7   : > { %v8780_v57 = vld [vmem:[#allocation6 + $0x60] ss:$2 sm:$0xff]  ;;  %v8796_v3 = vld [vmem:[#allocation6 + $0x61] ss:$2 sm:$0xff] }
 0x4a8   : > { %v8805_v10 = vadd.f32 %v8796_v3, %v8780_v57  ;;  %8767 = vst.msk [vmem:[#allocation6 + $0x78] sm:$0xff] %vm4963_vm3, %v8751_v13 }
 0x4aa   : > { %v8813_v38 = vmul.f32 0.25, %v8805_v10 }
 0x4ac   : > { %v8768_v21 = vld [vmem:[#allocation6] ss:$2 sm:$0xff]  ;;  %v8784_v45 = vld [vmem:[#allocation6 + $0x1] ss:$2 sm:$0xff]  ;;  %8821 = vst.msk [vmem:[%s13255_s7 + $0x30] sm:$0xff] %vm4963_vm3, %v8813_v38 }
 0x4ad   : > { %v8799_v7 = vadd.f32 %v8784_v45, %v8768_v21 }
 0x4af   : > { %v8807_v11 = vmul.f32 0.25, %v8799_v7  ;;  %v8782_v18 = vld [vmem:[#allocation6 + $0x70] ss:$2 sm:$0xff]  ;;  %v8798_v20 = vld [vmem:[#allocation6 + $0x71] ss:$2 sm:$0xff] }
 0x4b0   : > { %v8806_v4 = vadd.f32 %v8798_v20, %v8782_v18 }
 0x4b1   : > { %8815 = vst.msk [vmem:[%s13255_s7] sm:$0xff] %vm4963_vm3, %v8807_v11 }
 0x4b2   : > { %v8814_v47 = vmul.f32 0.25, %v8806_v4 }
 0x4b4   : > { %8822 = vst.msk [vmem:[%s13255_s7 + $0x38] sm:$0xff] %vm4963_vm3, %v8814_v47 }
 0x4b5   : > { %9985 = shalt.err (!%p9982_p3)
}
 0x4b6   : > { %s9986_s25 = scalar_lea.hbm %s13320_s14, 1024  ;;  %s9990_s30 = scalar_lea.hbm %s13375_s5, 2048 }
 0x4b7   : > { %p9987_p4 = scmp.ne.s32.totalorder %s13320_s14, %s9986_s25  ;;  %p9991_p9 = scmp.lt.u32.totalorder %s13320_s14, %s13375_s5 }
 0x4b8   : > { %p9992_p10 = scmp.lt.u32.totalorder %s9990_s30, %s9986_s25  ;;  %p9994_p12 = scmp.lt.u32.totalorder %s9986_s25, %s13320_s14 }
 0x4b9   : > { %p9988_p7 = pnand %p9987_p4, %p10116_p5 }
 0x4ba   : > { %p9993_p11 = por %p9992_p10, %p9991_p9 }
 0x4bb   : > { %p9989_p8 = pneg %p9988_p7 }
 0x4bc   : > { %p9995_p13 = por %p9994_p12, %p9993_p11 }
 0x4be   : > { %p9996_p0 = pnand %p9995_p13, %p9989_p8 }
 0x4c0   : > { %9999 = shalt.err (!%p9996_p0)
}
 0x4c1   : > { %s10047_s9 = smov 128  }
 0x4c2   : > { %9784 = dma.vmem_to_hbm [thread:$0]  (%p10116_p5), %s13322_s11, 1024, %s13320_s14, %s13328_s22, %s10047_s9, %s10047_s9, %s10037_s10  }
 0x4c3 PF: > { %p9790_p1 = scmp.ge.s32.totalorder %s10034_s21, 2  ;;  %s8852_s12 = sand.u32 1, %s10022_s18  }
 0x4c4   : > { %s8853_s13 = scalar_lea.sflag [#allocation8], %s8852_s12 }
 0x4c5   : > { %p9787_p2 = pnand %p9790_p1, %p10120_p6 }
 0x4c7   : > { %10017 = dma.done.wait (!%p9787_p2), %s8853_s13, 1024  }
 0x4c8   : > { %10019 = vsyncadd (!%p9787_p2), %s8853_s13, 4294966272  ;;  %p15_p3 = scmp.ge.s32.totalorder %s10103_s24, 4   ;;  %s13458_s18 = smov %s10026_s19 }
 0x4c9   : > { %s13459_s19 = smov %s10030_s20  ;;  %s13460_s20 = smov %s10114_s27 }
 0x4ca   : > { %s13461_s21 = smov %s10103_s24  ;;  %17 = sbr.rel (!%p15_p3) target bundleno = 3 (0x3), region = 96 }
 0x4d1   :  { %8858 = vsyncpa [#allocation8], 1 }
 0x4d2   :  { %8860 = vsyncpa [#allocation8 + $0x1], 1 }

</bundles_post_ra>
